<compile_context>
chip_gen: v7x
topology: tpu7x:2x2x1
jax: 0.10.0
libtpu: 0.0.40
codegen_flags: <defaults>
</compile_context>

<pallas_src>
import jax
import jax.numpy as jnp
from jax.experimental import pallas as pl
from jax.experimental.pallas import tpu as pltpu

FC_PAD = 1536        # 1521 (=9*13*13) and 1500 padded up to a multiple of 128
FC4_OUT_PAD = 128    # fc4 output 10 padded to one full lane group


# ------------------------------ Pallas kernels ------------------------------ #
def _conv_gemm_kernel(w_ref, p_ref, b_ref, o_ref):
    # w: [Cout, K], p: [K, S], b: [Cout, 1]  ->  o = relu(w @ p + b): [Cout, S]
    y = jnp.dot(
        w_ref[...].astype(jnp.bfloat16),
        p_ref[...].astype(jnp.bfloat16),
        preferred_element_type=jnp.float32,
    )
    o_ref[...] = jnp.maximum(y + b_ref[...], 0.0)


def _fc_chain_kernel(x_ref, w_ref, b_ref, w4_ref, b4_ref, o_ref, act_ref):
    # Fused fc1..fc4.  grid=(3,): step l streams the [1536,1536] bf16 weight of
    # hidden layer l; the activation stays resident in VMEM (act_ref, bf16).
    # The last step additionally applies the small resident fc4 weight.
    l = pl.program_id(0)

    @pl.when(l == 0)
    def _():
        act_ref[...] = x_ref[...].astype(act_ref.dtype)

    # Hidden layer l: act <- relu(act @ W_l + b_l), carried bf16.
    y = jnp.dot(act_ref[...], w_ref[...], preferred_element_type=jnp.float32)
    y = y + b_ref[...]
    act_ref[...] = jnp.maximum(y, 0.0).astype(act_ref.dtype)

    # Final step: fc4 (no ReLU), lane-dense 128-wide padded output.
    @pl.when(l == pl.num_programs(0) - 1)
    def _():
        o_ref[...] = (
            jnp.dot(act_ref[...], w4_ref[...], preferred_element_type=jnp.float32)
            + b4_ref[...]
        )


# ------------------------------ Pallas wrappers ----------------------------- #
def conv_gemm_bias_relu(w2, patches, b):
    """Single-block fused GEMM+bias+ReLU (conv GEMMs are tiny: K<=180, Cout<=9)."""
    cout, _ = w2.shape
    _, s = patches.shape
    return pl.pallas_call(
        _conv_gemm_kernel,
        out_shape=jax.ShapeDtypeStruct((cout, s), jnp.float32),
        in_specs=[
            pl.BlockSpec(memory_space=pltpu.MemorySpace.VMEM),
            pl.BlockSpec(memory_space=pltpu.MemorySpace.VMEM),
            pl.BlockSpec(memory_space=pltpu.MemorySpace.VMEM),
        ],
        out_specs=pl.BlockSpec(memory_space=pltpu.MemorySpace.VMEM),
    )(w2, patches, b.reshape(cout, 1))


def fc_chain(x, w_stack, b_stack, w4, b4):
    """Fused fc1..fc4.

    x:        [M, 1536] f32 (padded flattened conv output)
    w_stack:  [3, 1536, 1536] bf16 (fc1..fc3, zero-padded, [in, out] layout)
    b_stack:  [3, 1, 1536] f32
    w4:       [1536, 128] bf16 (fc4, zero-padded)
    b4:       [1, 128] f32
    returns   [M, 128] f32 logits (columns 10..127 are zero)
    """
    m, k = x.shape
    n_layers, k2, n = w_stack.shape
    assert k == k2 == n, (k, k2, n)
    k4, n_out = w4.shape
    assert k4 == k, (k4, k)

    return pl.pallas_call(
        _fc_chain_kernel,
        out_shape=jax.ShapeDtypeStruct((m, n_out), jnp.float32),
        grid_spec=pltpu.PrefetchScalarGridSpec(
            num_scalar_prefetch=0,
            grid=(n_layers,),
            in_specs=[
                pl.BlockSpec((m, k), lambda l: (0, 0)),           # activation in, resident
                pl.BlockSpec((None, k, n), lambda l: (l, 0, 0)),  # layer weight, streamed
                pl.BlockSpec((None, 1, n), lambda l: (l, 0, 0)),  # layer bias
                pl.BlockSpec((k, n_out), lambda l: (0, 0)),       # fc4 weight, resident
                pl.BlockSpec((1, n_out), lambda l: (0, 0)),       # fc4 bias, resident
            ],
            out_specs=pl.BlockSpec((m, n_out), lambda l: (0, 0)),
            scratch_shapes=[pltpu.VMEM((m, k), jnp.bfloat16)],    # resident activation
        ),
        compiler_params=pltpu.CompilerParams(
            dimension_semantics=("arbitrary",),                   # layer chain is serial
        ),
    )(x, w_stack, b_stack, w4, b4)


# ------------------------------- conv as GEMM ------------------------------- #
def _im2col_cnhw(x, kh, kw):
    """x: [C, N, H, W] -> patches [C*kh*kw, N*Ho*Wo]; row order (c, i, j) matches
    PyTorch's w.reshape(Cout, Cin*kh*kw)."""
    c, n, h, w = x.shape
    ho, wo = h - kh + 1, w - kw + 1
    cols = [x[:, :, i:i + ho, j:j + wo] for i in range(kh) for j in range(kw)]
    p = jnp.stack(cols, axis=1)                       # [C, kh*kw, N, Ho, Wo]
    return p.reshape(c * kh * kw, n * ho * wo), (n, ho, wo)


def conv2d_bias_relu(x, w, b):
    """x: [Cin, N, H, W] (channel-major); w: [Cout, Cin, KH, KW] torch layout."""
    cout, cin, kh, kw = w.shape
    patches, (n, ho, wo) = _im2col_cnhw(x, kh, kw)
    w2 = w.reshape(cout, cin * kh * kw)               # [Cout, K]
    y = conv_gemm_bias_relu(w2, patches, b)           # [Cout, N*Ho*Wo], lane-dense
    return y.reshape(cout, n, ho, wo)                 # stays channel-major [C,N,H,W]


# -------------------------------- parameters -------------------------------- #
def init_params(key):
    # NOTE: He-normal weights / small uniform biases (not PyTorch's exact default
    # kaiming-uniform); in practice trained weights would be loaded here.
    ks = jax.random.split(key, 14)

    def w_init(k, shape, fan_in):
        return jax.random.normal(k, shape, jnp.float32) * (2.0 / fan_in) ** 0.5

    def b_init(k, shape, fan_in):
        bound = 1.0 / (fan_in ** 0.5)
        return jax.random.uniform(k, shape, jnp.float32, -bound, bound)

    def pad2(a, rows, cols):
        return jnp.pad(a, ((0, rows - a.shape[0]), (0, cols - a.shape[1])))

    def pad1(a, n):
        return jnp.pad(a, (0, n - a.shape[0]))

    # fc weights stored as [in, out] (torch stores [out, in]).
    fc1_w = w_init(ks[6], (1521, 1500), 1521)
    fc2_w = w_init(ks[8], (1500, 1500), 1500)
    fc3_w = w_init(ks[10], (1500, 1500), 1500)
    fc4_w = w_init(ks[12], (1500, 10), 1500)
    fc1_b = b_init(ks[7], (1500,), 1521)
    fc2_b = b_init(ks[9], (1500,), 1500)
    fc3_b = b_init(ks[11], (1500,), 1500)
    fc4_b = b_init(ks[13], (10,), 1500)

    params = {
        # conv weights in PyTorch layout [Cout, Cin, KH, KW], f32 (tiny)
        "conv1_w": w_init(ks[0], (3, 1, 6, 6), 1 * 36),
        "conv1_b": b_init(ks[1], (3,), 1 * 36),
        "conv2_w": w_init(ks[2], (5, 3, 6, 6), 3 * 36),
        "conv2_b": b_init(ks[3], (5,), 3 * 36),
        "conv3_w": w_init(ks[4], (9, 5, 6, 6), 5 * 36),
        "conv3_b": b_init(ks[5], (9,), 5 * 36),
        # fused FC chain: stacked, zero-padded to (8,128)-aligned 1536, bf16 weights
        "fc_w_stack": jnp.stack([
            pad2(fc1_w, FC_PAD, FC_PAD),
            pad2(fc2_w, FC_PAD, FC_PAD),
            pad2(fc3_w, FC_PAD, FC_PAD),
        ]).astype(jnp.bfloat16),                                   # [3,1536,1536]
        "fc_b_stack": jnp.stack([
            pad1(fc1_b, FC_PAD),
            pad1(fc2_b, FC_PAD),
            pad1(fc3_b, FC_PAD),
        ])[:, None, :],                                            # [3,1,1536] f32
        "fc4_w": pad2(fc4_w, FC_PAD, FC4_OUT_PAD).astype(jnp.bfloat16),  # [1536,128]
        "fc4_b": pad1(fc4_b, FC4_OUT_PAD)[None, :],                      # [1,128]
    }
    return params


# --------------------------------- forward ---------------------------------- #
@jax.jit
def net_forward(params, x):
    # x: [N, 1, 28, 28] NCHW (PyTorch convention)
    a = jnp.transpose(x, (1, 0, 2, 3))                               # [1, N, 28, 28]
    a = conv2d_bias_relu(a, params["conv1_w"], params["conv1_b"])    # [3, N, 23, 23]
    a = conv2d_bias_relu(a, params["conv2_w"], params["conv2_b"])    # [5, N, 18, 18]
    a = conv2d_bias_relu(a, params["conv3_w"], params["conv3_b"])    # [9, N, 13, 13]
    n = a.shape[1]
    # torch's x.view(-1, 9*13*13) flattens NCHW -> tiny transpose back to NCHW
    h = jnp.transpose(a, (1, 0, 2, 3)).reshape(n, 9 * 13 * 13)       # [N, 1521]
    h = jnp.pad(h, ((0, 0), (0, FC_PAD - 9 * 13 * 13)))              # [N, 1536]
    logits_pad = fc_chain(h, params["fc_w_stack"], params["fc_b_stack"],
                          params["fc4_w"], params["fc4_b"])          # [N, 128]
    return logits_pad[:, :10]


# ----------------------- pure-JAX reference (same math) --------------------- #
def reference_forward(params, x):
    def conv(a, w, b):
        y = jax.lax.conv_general_dilated(
            a.astype(jnp.bfloat16), w.astype(jnp.bfloat16),
            window_strides=(1, 1), padding="VALID",
            dimension_numbers=("NCHW", "OIHW", "NCHW"),
            preferred_element_type=jnp.float32)
        return jnp.maximum(y + b[None, :, None, None], 0.0)

    a = conv(x, params["conv1_w"], params["conv1_b"])
    a = conv(a, params["conv2_w"], params["conv2_b"])
    a = conv(a, params["conv3_w"], params["conv3_b"])
    n = a.shape[0]
    h = a.reshape(n, 9 * 13 * 13)
    h = jnp.pad(h, ((0, 0), (0, FC_PAD - 9 * 13 * 13)))
    for l in range(3):
        h = jnp.dot(h.astype(jnp.bfloat16), params["fc_w_stack"][l],
                    preferred_element_type=jnp.float32) + params["fc_b_stack"][l, 0]
        h = jnp.maximum(h, 0.0)
    y = jnp.dot(h.astype(jnp.bfloat16), params["fc4_w"],
                preferred_element_type=jnp.float32) + params["fc4_b"][0]
    return y[:, :10]


if __name__ == "__main__":
    key = jax.random.PRNGKey(0)
    pkey, xkey = jax.random.split(key)
    params = init_params(pkey)
    # 28x28 input is required by the module (flatten size 9*13*13 after 3 convs)
    x = jax.random.normal(xkey, (2, 1, 28, 28), jnp.float32)

    out = net_forward(params, x)
    jax.block_until_ready(out)
    assert out.shape == (2, 10), out.shape

    ref = reference_forward(params, x)
    max_err = float(jnp.max(jnp.abs(out - ref)))
    assert bool(jnp.allclose(out, ref, rtol=2e-2, atol=2e-2)), max_err

    print("KERNEL_OK")
</pallas_src>

<mosaic_0001>
module attributes {stable_mosaic.version = 11 : i64} {
  func.func @_conv_gemm_kernel(%arg0: memref<3x36xf32, #tpu.memory_space<vmem>>, %arg1: memref<36x1058xf32, #tpu.memory_space<vmem>>, %arg2: memref<3x1xf32, #tpu.memory_space<vmem>>, %arg3: memref<3x1058xf32, #tpu.memory_space<vmem>>) attributes {dimension_semantics = [], scalar_prefetch = 0 : i64, scratch_operands = 0 : i64, tpu.core_type = #tpu.core_type<tc>} {
    %c0 = arith.constant 0 : index
    %c0_0 = arith.constant 0 : index
    %0 = vector.load %arg0[%c0, %c0_0] : memref<3x36xf32, #tpu.memory_space<vmem>>, vector<3x36xf32>
    %1 = arith.truncf %0 : vector<3x36xf32> to vector<3x36xbf16>
    %c0_1 = arith.constant 0 : index
    %c0_2 = arith.constant 0 : index
    %2 = vector.load %arg1[%c0_1, %c0_2] : memref<36x1058xf32, #tpu.memory_space<vmem>>, vector<36x1058xf32>
    %3 = arith.truncf %2 : vector<36x1058xf32> to vector<36x1058xbf16>
    %cst = arith.constant dense<0.000000e+00> : vector<3x1058xf32>
    %4 = tpu.matmul %1, %3, %cst {dimension_numbers = #tpu.dot_dimension_numbers<[1], [0], [0], [1], [0, 0, 1, 1], [], []>} : vector<3x36xbf16>, vector<36x1058xbf16>, vector<3x1058xf32> -> vector<3x1058xf32>
    %c0_3 = arith.constant 0 : index
    %c0_4 = arith.constant 0 : index
    %5 = vector.load %arg2[%c0_3, %c0_4] : memref<3x1xf32, #tpu.memory_space<vmem>>, vector<3x1xf32>
    %6 = vector.broadcast %5 : vector<3x1xf32> to vector<3x1058xf32>
    %7 = arith.addf %4, %6 : vector<3x1058xf32>
    %cst_5 = arith.constant 0.000000e+00 : f32
    %8 = vector.broadcast %cst_5 : f32 to vector<3x1058xf32>
    %9 = arith.maximumf %7, %8 : vector<3x1058xf32>
    %c0_6 = arith.constant 0 : index
    %c0_7 = arith.constant 0 : index
    %10 = vector.load %arg3[%c0_6, %c0_7] : memref<3x1058xf32, #tpu.memory_space<vmem>>, vector<3x1058xf32>
    tpu.vector_store %arg3[%c0_6, %c0_7], %9 {strides = array<i32>} : memref<3x1058xf32, #tpu.memory_space<vmem>>, vector<3x1058xf32>,
    return
  }
}

module attributes {stable_mosaic.version = 11 : i64} {
  func.func @_conv_gemm_kernel(%arg0: memref<5x108xf32, #tpu.memory_space<vmem>>, %arg1: memref<108x648xf32, #tpu.memory_space<vmem>>, %arg2: memref<5x1xf32, #tpu.memory_space<vmem>>, %arg3: memref<5x648xf32, #tpu.memory_space<vmem>>) attributes {dimension_semantics = [], scalar_prefetch = 0 : i64, scratch_operands = 0 : i64, tpu.core_type = #tpu.core_type<tc>} {
    %c0 = arith.constant 0 : index
    %c0_0 = arith.constant 0 : index
    %0 = vector.load %arg0[%c0, %c0_0] : memref<5x108xf32, #tpu.memory_space<vmem>>, vector<5x108xf32>
    %1 = arith.truncf %0 : vector<5x108xf32> to vector<5x108xbf16>
    %c0_1 = arith.constant 0 : index
    %c0_2 = arith.constant 0 : index
    %2 = vector.load %arg1[%c0_1, %c0_2] : memref<108x648xf32, #tpu.memory_space<vmem>>, vector<108x648xf32>
    %3 = arith.truncf %2 : vector<108x648xf32> to vector<108x648xbf16>
    %cst = arith.constant dense<0.000000e+00> : vector<5x648xf32>
    %4 = tpu.matmul %1, %3, %cst {dimension_numbers = #tpu.dot_dimension_numbers<[1], [0], [0], [1], [0, 0, 1, 1], [], []>} : vector<5x108xbf16>, vector<108x648xbf16>, vector<5x648xf32> -> vector<5x648xf32>
    %c0_3 = arith.constant 0 : index
    %c0_4 = arith.constant 0 : index
    %5 = vector.load %arg2[%c0_3, %c0_4] : memref<5x1xf32, #tpu.memory_space<vmem>>, vector<5x1xf32>
    %6 = vector.broadcast %5 : vector<5x1xf32> to vector<5x648xf32>
    %7 = arith.addf %4, %6 : vector<5x648xf32>
    %cst_5 = arith.constant 0.000000e+00 : f32
    %8 = vector.broadcast %cst_5 : f32 to vector<5x648xf32>
    %9 = arith.maximumf %7, %8 : vector<5x648xf32>
    %c0_6 = arith.constant 0 : index
    %c0_7 = arith.constant 0 : index
    %10 = vector.load %arg3[%c0_6, %c0_7] : memref<5x648xf32, #tpu.memory_space<vmem>>, vector<5x648xf32>
    tpu.vector_store %arg3[%c0_6, %c0_7], %9 {strides = array<i32>} : memref<5x648xf32, #tpu.memory_space<vmem>>, vector<5x648xf32>,
    return
  }
}

module attributes {stable_mosaic.version = 11 : i64} {
  func.func @_conv_gemm_kernel(%arg0: memref<9x180xf32, #tpu.memory_space<vmem>>, %arg1: memref<180x338xf32, #tpu.memory_space<vmem>>, %arg2: memref<9x1xf32, #tpu.memory_space<vmem>>, %arg3: memref<9x338xf32, #tpu.memory_space<vmem>>) attributes {dimension_semantics = [], scalar_prefetch = 0 : i64, scratch_operands = 0 : i64, tpu.core_type = #tpu.core_type<tc>} {
    %c0 = arith.constant 0 : index
    %c0_0 = arith.constant 0 : index
    %0 = vector.load %arg0[%c0, %c0_0] : memref<9x180xf32, #tpu.memory_space<vmem>>, vector<9x180xf32>
    %1 = arith.truncf %0 : vector<9x180xf32> to vector<9x180xbf16>
    %c0_1 = arith.constant 0 : index
    %c0_2 = arith.constant 0 : index
    %2 = vector.load %arg1[%c0_1, %c0_2] : memref<180x338xf32, #tpu.memory_space<vmem>>, vector<180x338xf32>
    %3 = arith.truncf %2 : vector<180x338xf32> to vector<180x338xbf16>
    %cst = arith.constant dense<0.000000e+00> : vector<9x338xf32>
    %4 = tpu.matmul %1, %3, %cst {dimension_numbers = #tpu.dot_dimension_numbers<[1], [0], [0], [1], [0, 0, 1, 1], [], []>} : vector<9x180xbf16>, vector<180x338xbf16>, vector<9x338xf32> -> vector<9x338xf32>
    %c0_3 = arith.constant 0 : index
    %c0_4 = arith.constant 0 : index
    %5 = vector.load %arg2[%c0_3, %c0_4] : memref<9x1xf32, #tpu.memory_space<vmem>>, vector<9x1xf32>
    %6 = vector.broadcast %5 : vector<9x1xf32> to vector<9x338xf32>
    %7 = arith.addf %4, %6 : vector<9x338xf32>
    %cst_5 = arith.constant 0.000000e+00 : f32
    %8 = vector.broadcast %cst_5 : f32 to vector<9x338xf32>
    %9 = arith.maximumf %7, %8 : vector<9x338xf32>
    %c0_6 = arith.constant 0 : index
    %c0_7 = arith.constant 0 : index
    %10 = vector.load %arg3[%c0_6, %c0_7] : memref<9x338xf32, #tpu.memory_space<vmem>>, vector<9x338xf32>
    tpu.vector_store %arg3[%c0_6, %c0_7], %9 {strides = array<i32>} : memref<9x338xf32, #tpu.memory_space<vmem>>, vector<9x338xf32>,
    return
  }
}

module attributes {stable_mosaic.version = 11 : i64} {
  func.func @_fc_chain_kernel(%arg0: i32, %arg1: memref<2x1536xf32, #tpu.memory_space<vmem>>, %arg2: memref<1x1536x1536xbf16, #tpu.memory_space<vmem>>, %arg3: memref<1x1x1536xf32, #tpu.memory_space<vmem>>, %arg4: memref<1536x128xbf16, #tpu.memory_space<vmem>>, %arg5: memref<1x128xf32, #tpu.memory_space<vmem>>, %arg6: memref<2x128xf32, #tpu.memory_space<vmem>>, %arg7: memref<2x1536xbf16, #tpu.memory_space<vmem>>) attributes {dimension_semantics = [#tpu.dimension_semantics<arbitrary>], iteration_bounds = array<i64: 3>, scalar_prefetch = 0 : i64, scratch_operands = 1 : i64, tpu.core_type = #tpu.core_type<tc>, window_params = [{pipeline_mode = #tpu.pipeline_mode<synchronous>, transform_indices = @transform_0, window_bounds = array<i64: 2, 1536>}, {transform_indices = @transform_1, window_bounds = array<i64: 1, 1536, 1536>}, {transform_indices = @transform_2, window_bounds = array<i64: 1, 1, 1536>}, {pipeline_mode = #tpu.pipeline_mode<synchronous>, transform_indices = @transform_3, window_bounds = array<i64: 1536, 128>}, {pipeline_mode = #tpu.pipeline_mode<synchronous>, transform_indices = @transform_4, window_bounds = array<i64: 1, 128>}, {pipeline_mode = #tpu.pipeline_mode<synchronous>, transform_indices = @transform_5, window_bounds = array<i64: 2, 128>}]} {
    %c0_i32 = arith.constant 0 : i32
    %0 = arith.cmpi eq, %arg0, %c0_i32 : i32
    %1 = arith.extui %0 : i1 to i32
    %c0_i32_0 = arith.constant 0 : i32
    %2 = arith.cmpi ne, %1, %c0_i32_0 : i32
    scf.if %2 {
      %c0_12 = arith.constant 0 : index
      %c0_13 = arith.constant 0 : index
      %18 = vector.load %arg1[%c0_12, %c0_13] : memref<2x1536xf32, #tpu.memory_space<vmem>>, vector<2x1536xf32>
      %19 = arith.truncf %18 : vector<2x1536xf32> to vector<2x1536xbf16>
      %c0_14 = arith.constant 0 : index
      %c0_15 = arith.constant 0 : index
      %20 = vector.load %arg7[%c0_14, %c0_15] : memref<2x1536xbf16, #tpu.memory_space<vmem>>, vector<2x1536xbf16>
      tpu.vector_store %arg7[%c0_14, %c0_15], %19 {strides = array<i32>} : memref<2x1536xbf16, #tpu.memory_space<vmem>>, vector<2x1536xbf16>,
    } else {
    }
    %c0 = arith.constant 0 : index
    %c0_1 = arith.constant 0 : index
    %3 = vector.load %arg7[%c0, %c0_1] : memref<2x1536xbf16, #tpu.memory_space<vmem>>, vector<2x1536xbf16>
    %c0_2 = arith.constant 0 : index
    %c0_3 = arith.constant 0 : index
    %c0_4 = arith.constant 0 : index
    %4 = vector.load %arg2[%c0_2, %c0_3, %c0_4] : memref<1x1536x1536xbf16, #tpu.memory_space<vmem>>, vector<1x1536x1536xbf16>
    %5 = vector.shape_cast %4 : vector<1x1536x1536xbf16> to vector<1536x1536xbf16>
    %cst = arith.constant dense<0.000000e+00> : vector<2x1536xf32>
    %6 = tpu.matmul %3, %5, %cst {dimension_numbers = #tpu.dot_dimension_numbers<[1], [0], [0], [1], [0, 0, 1, 1], [], []>} : vector<2x1536xbf16>, vector<1536x1536xbf16>, vector<2x1536xf32> -> vector<2x1536xf32>
    %c0_5 = arith.constant 0 : index
    %c0_6 = arith.constant 0 : index
    %c0_7 = arith.constant 0 : index
    %7 = vector.load %arg3[%c0_5, %c0_6, %c0_7] : memref<1x1x1536xf32, #tpu.memory_space<vmem>>, vector<1x1x1536xf32>
    %8 = vector.shape_cast %7 : vector<1x1x1536xf32> to vector<1x1536xf32>
    %9 = vector.broadcast %8 : vector<1x1536xf32> to vector<2x1536xf32>
    %10 = arith.addf %6, %9 : vector<2x1536xf32>
    %cst_8 = arith.constant 0.000000e+00 : f32
    %11 = vector.broadcast %cst_8 : f32 to vector<2x1536xf32>
    %12 = arith.maximumf %10, %11 : vector<2x1536xf32>
    %13 = arith.truncf %12 : vector<2x1536xf32> to vector<2x1536xbf16>
    %c0_9 = arith.constant 0 : index
    %c0_10 = arith.constant 0 : index
    %14 = vector.load %arg7[%c0_9, %c0_10] : memref<2x1536xbf16, #tpu.memory_space<vmem>>, vector<2x1536xbf16>
    tpu.vector_store %arg7[%c0_9, %c0_10], %13 {strides = array<i32>} : memref<2x1536xbf16, #tpu.memory_space<vmem>>, vector<2x1536xbf16>,
    %c2_i32 = arith.constant 2 : i32
    %15 = arith.cmpi eq, %arg0, %c2_i32 : i32
    %16 = arith.extui %15 : i1 to i32
    %c0_i32_11 = arith.constant 0 : i32
    %17 = arith.cmpi ne, %16, %c0_i32_11 : i32
    scf.if %17 {
      %c0_12 = arith.constant 0 : index
      %c0_13 = arith.constant 0 : index
      %18 = vector.load %arg7[%c0_12, %c0_13] : memref<2x1536xbf16, #tpu.memory_space<vmem>>, vector<2x1536xbf16>
      %c0_14 = arith.constant 0 : index
      %c0_15 = arith.constant 0 : index
      %19 = vector.load %arg4[%c0_14, %c0_15] : memref<1536x128xbf16, #tpu.memory_space<vmem>>, vector<1536x128xbf16>
      %cst_16 = arith.constant dense<0.000000e+00> : vector<2x128xf32>
      %20 = tpu.matmul %18, %19, %cst_16 {dimension_numbers = #tpu.dot_dimension_numbers<[1], [0], [0], [1], [0, 0, 1, 1], [], []>} : vector<2x1536xbf16>, vector<1536x128xbf16>, vector<2x128xf32> -> vector<2x128xf32>
      %c0_17 = arith.constant 0 : index
      %c0_18 = arith.constant 0 : index
      %21 = vector.load %arg5[%c0_17, %c0_18] : memref<1x128xf32, #tpu.memory_space<vmem>>, vector<1x128xf32>
      %22 = vector.broadcast %21 : vector<1x128xf32> to vector<2x128xf32>
      %23 = arith.addf %20, %22 : vector<2x128xf32>
      %c0_19 = arith.constant 0 : index
      %c0_20 = arith.constant 0 : index
      %24 = vector.load %arg6[%c0_19, %c0_20] : memref<2x128xf32, #tpu.memory_space<vmem>>, vector<2x128xf32>
      tpu.vector_store %arg6[%c0_19, %c0_20], %23 {strides = array<i32>} : memref<2x128xf32, #tpu.memory_space<vmem>>, vector<2x128xf32>,
    } else {
    }
    return
  }
  func.func @transform_0(%arg0: i32) -> (i32, i32) {
    %c0_i32 = arith.constant 0 : i32
    %c0_i32_0 = arith.constant 0 : i32
    %c0_i32_1 = arith.constant 0 : i32
    return %c0_i32, %c0_i32_0 : i32, i32
  }
  func.func @transform_1(%arg0: i32) -> (i32, i32, i32) {
    %c0_i32 = arith.constant 0 : i32
    %c0_i32_0 = arith.constant 0 : i32
    %c0_i32_1 = arith.constant 0 : i32
    return %arg0, %c0_i32, %c0_i32_0 : i32, i32, i32
  }
  func.func @transform_2(%arg0: i32) -> (i32, i32, i32) {
    %c0_i32 = arith.constant 0 : i32
    %c0_i32_0 = arith.constant 0 : i32
    %c0_i32_1 = arith.constant 0 : i32
    return %arg0, %c0_i32, %c0_i32_0 : i32, i32, i32
  }
  func.func @transform_3(%arg0: i32) -> (i32, i32) {
    %c0_i32 = arith.constant 0 : i32
    %c0_i32_0 = arith.constant 0 : i32
    %c0_i32_1 = arith.constant 0 : i32
    return %c0_i32, %c0_i32_0 : i32, i32
  }
  func.func @transform_4(%arg0: i32) -> (i32, i32) {
    %c0_i32 = arith.constant 0 : i32
    %c0_i32_0 = arith.constant 0 : i32
    %c0_i32_1 = arith.constant 0 : i32
    return %c0_i32, %c0_i32_0 : i32, i32
  }
  func.func @transform_5(%arg0: i32) -> (i32, i32) {
    %c0_i32 = arith.constant 0 : i32
    %c0_i32_0 = arith.constant 0 : i32
    %c0_i32_1 = arith.constant 0 : i32
    return %c0_i32, %c0_i32_0 : i32, i32
  }
}

</mosaic_0001>

<bundles_post_ra>
// kernel: net_forward.4
= control target key start
LH: loop header
LB: loop body
LE: loop exit
PB: predicated region body
PF: predicated region fallthrough
CT: control target
= control target key end

     0   :  { %v393_v3 = vmov 0   ;;  %vm99_vm0 = vcmask 1041408   ;;  %vm95_vm1 = vcmask 293888   ;;  %vm395_vm2 = vmmov 0   ;;  %s598_s1 = inlined_call_operand.vmem [shape: f32[36,1058], index: 1, kind: input, shape index: {}]   ;;  %s599_s0 = inlined_call_operand.vmem [shape: f32[3,36], index: 0, kind: input, shape index: {}]   ;;  %s600_s2 = inlined_call_operand.vmem [shape: f32[3,1], index: 2, kind: input, shape index: {}]   ;;  %s601_s3 = inlined_call_operand.vmem [shape: f32[3,1058], index: 3, kind: output, shape index: {}]  }
   0x1   :  { %v18_v0 = vld [vmem:[%s598_s1 + $0x8] sm:$0xff]  ;;  %v27_v1 = vld [vmem:[%s598_s1 + $0x50] sm:$0xff]  ;;  %v17_v2 = vld [vmem:[%s598_s1] sm:$0xff]  ;;  %159 = vmatprep.mubr.bf16.mxu0 %v393_v3  ;;  %200 = vmatprep.mubr.bf16.mxu1 %v393_v3  ;;  %vm360_vm3 = vcmask 272384  }
   0x2   :  { %v63_v4 = vpack.c.bf16 %v27_v1, %v18_v0  ;;  %v26_v5 = vld [vmem:[%s598_s1 + $0x48] sm:$0xff]  ;;  %v36_v6 = vld [vmem:[%s598_s1 + $0x98] sm:$0xff]  ;;  %v45_v7 = vld [vmem:[%s598_s1 + $0xe0] sm:$0xff]  ;;  %392 = vset.pattern.permute.xlu0 %v393_v3 }
   0x3   :  { %v62_v8 = vpack.c.bf16 %v26_v5, %v17_v2  ;;  %v72_v9 = vpack.c.bf16 %v45_v7, %v36_v6  ;;  %v35_v10 = vld [vmem:[%s598_s1 + $0x90] sm:$0xff]  ;;  %v44_v11 = vld [vmem:[%s598_s1 + $0xd8] sm:$0xff]  ;;  %v29_v13 = vld [vmem:[%s598_s1 + $0x60] sm:$0xff] }
   0x4   :  { %v20_v12 = vld [vmem:[%s598_s1 + $0x18] sm:$0xff]  ;;  %127 = vmatprep.subr.bf16.mxu0 %v63_v4  ;;  %v19_v14 = vld [vmem:[%s598_s1 + $0x10] sm:$0xff]  ;;  %v71_v16 = vpack.c.bf16 %v44_v11, %v35_v10  ;;  %v54_v19 = vld [vmem:[%s598_s1 + $0x128] sm:$0xf]  ;;  %v394_v11 = vmov 0.0  }
   0x5   :  { %v28_v15 = vld [vmem:[%s598_s1 + $0x58] sm:$0xff]  ;;  %128 = vmatpush1.bf16.msra.mxu0 %v62_v8  ;;  %v65_v17 = vpack.c.bf16 %v29_v13, %v20_v12  ;;  %v53_v20 = vld [vmem:[%s598_s1 + $0x120] sm:$0xf]  ;;  %v38_v21 = vld [vmem:[%s598_s1 + $0xa8] sm:$0xff]  ;;  %v81_v22 = vpack.c.bf16 %v54_v19, %v54_v19 }
   0x6   :  { %v64_v18 = vpack.c.bf16 %v28_v15, %v19_v14  ;;  %129 = vmatprep.subr.bf16.mxu0 %v72_v9  ;;  %v80_v23 = vpack.c.bf16 %v53_v20, %v53_v20  ;;  %v47_v24 = vld [vmem:[%s598_s1 + $0xf0] sm:$0xff]  ;;  %v37_v25 = vld [vmem:[%s598_s1 + $0xa0] sm:$0xff]  ;;  %v46_v26 = vld [vmem:[%s598_s1 + $0xe8] sm:$0xff] }
   0x7   :  { %168 = vmatprep.subr.bf16.mxu1 %v65_v17  ;;  %v74_v27 = vpack.c.bf16 %v47_v24, %v38_v21  ;;  %v22_v28 = vld [vmem:[%s598_s1 + $0x28] sm:$0xff]  ;;  %v31_v29 = vld [vmem:[%s598_s1 + $0x70] sm:$0xff]  ;;  %v73_v30 = vpack.c.bf16 %v46_v26, %v37_v25  ;;  %v56_v31 = vld [vmem:[%s598_s1 + $0x138] sm:$0xf] }
   0x8   :  { %169 = vmatpush1.bf16.msra.mxu1 %v64_v18  ;;  %v15_v32 = vld [vmem:[%s599_s0] sm:$0x7]  ;;  %v83_v33 = vpack.c.bf16 %v56_v31, %v56_v31  ;;  %v55_v34 = vld [vmem:[%s598_s1 + $0x130] sm:$0xf]  ;;  %v101_v35 = vsel %vm99_vm0, %v80_v23, 0  ;;  %v67_v36 = vpack.c.bf16 %v31_v29, %v22_v28  ;;  %v30_v38 = vld [vmem:[%s598_s1 + $0x68] sm:$0xff] }
   0x9   :  { %130 = vmatpush1.bf16.msra.mxu0 %v71_v16  ;;  %170 = vmatprep.subr.bf16.mxu1 %v74_v27  ;;  %v21_v37 = vld [vmem:[%s598_s1 + $0x20] sm:$0xff]  ;;  %v82_v39 = vpack.c.bf16 %v55_v34, %v55_v34  ;;  %v24_v40 = vld [vmem:[%s598_s1 + $0x38] sm:$0xff]  ;;  %v508_v44 = vpack.c.bf16 %v15_v32, %v15_v32  ;;  %v39_v47 = vld [vmem:[%s598_s1 + $0xb0] sm:$0xff] }
   0xa   :  { %366 = vmatprep.subr.msk.bf16.mxu0 %vm99_vm0, %v81_v22  ;;  %v40_v41 = vld [vmem:[%s598_s1 + $0xb8] sm:$0xff]  ;;  %v49_v42 = vld [vmem:[%s598_s1 + $0x100] sm:$0xff]  ;;  %v66_v45 = vpack.c.bf16 %v30_v38, %v21_v37  ;;  %v23_v49 = vld [vmem:[%s598_s1 + $0x30] sm:$0xff] }
   0xb   :  { %v33_v43 = vld [vmem:[%s598_s1 + $0x80] sm:$0xff]  ;;  %v107_v46 = vsel %vm99_vm0, %v82_v39, 0  ;;  %v32_v50 = vld [vmem:[%s598_s1 + $0x78] sm:$0xff]  ;;  %v76_v51 = vpack.c.bf16 %v49_v42, %v40_v41  ;;  %v42_v53 = vld [vmem:[%s598_s1 + $0xc8] sm:$0xff] }
   0xc   :  { %171 = vmatpush1.bf16.msra.mxu1 %v73_v30  ;;  %v69_v48 = vpack.c.bf16 %v33_v43, %v24_v40  ;;  %v48_v52 = vld [vmem:[%s598_s1 + $0xf8] sm:$0xff]  ;;  %v51_v54 = vld [vmem:[%s598_s1 + $0x110] sm:$0xff]  ;;  %v58_v55 = vld [vmem:[%s598_s1 + $0x148] sm:$0xf]  ;;  %v68_v57 = vpack.c.bf16 %v32_v50, %v23_v49 }
   0xd   :  { %132 = vmatpush1.bf16.msra.mxu0 %v101_v35  ;;  %368 = vmatprep.subr.msk.bf16.mxu1 %vm99_vm0, %v83_v33  ;;  %v57_v56 = vld [vmem:[%s598_s1 + $0x140] sm:$0xf]  ;;  %v75_v59 = vpack.c.bf16 %v48_v52, %v39_v47  ;;  %v78_v60 = vpack.c.bf16 %v51_v54, %v42_v53  ;;  %v50_v62 = vld [vmem:[%s598_s1 + $0x108] sm:$0xff]  ;;  %v85_v63 = vpack.c.bf16 %v58_v55, %v58_v55  ;;  %v60_v1 = vld [vmem:[%s598_s1 + $0x158] sm:$0xf] }
   0xe   :  { %209 = vmatprep.subr.bf16.mxu0 %v67_v36  ;;  %v89_v58 = vld [vmem:[%s600_s2] sm:$0x7]  ;;  %v84_v0 = vpack.c.bf16 %v57_v56, %v57_v56  ;;  %v59_v2 = vld [vmem:[%s598_s1 + $0x150] sm:$0xf]  ;;  %v87_v5 = vpack.c.bf16 %v60_v1, %v60_v1  ;;  %v34_v9 = vld [vmem:[%s598_s1 + $0x88] sm:$0xff] }
   0xf   :  { %v41_v61 = vld [vmem:[%s598_s1 + $0xc0] sm:$0xff]  ;;  %92 = vperm.xlu0 %392, %v89_v58   ;;  %v86_v6 = vpack.c.bf16 %v59_v2, %v59_v2  ;;  %v43_v12 = vld [vmem:[%s598_s1 + $0xd0] sm:$0xff]  ;;  %v52_v13 = vld [vmem:[%s598_s1 + $0x118] sm:$0xff] }
  0x10   :  { %367 = vmatmul.mubr.msk.bf16.vlgmr.msra.gmra.mrb[0].mxu0 %vm95_vm1, %v508_v44  ;;  %173 = vmatpush1.bf16.msra.mxu1 %v107_v46  ;;  %v77_v4 = vpack.c.bf16 %v50_v62, %v41_v61  ;;  %v113_v7 = vsel %vm99_vm0, %v84_v0, 0  ;;  %v25_v8 = vld [vmem:[%s598_s1 + $0x40] sm:$0xff]  ;;  %v79_v15 = vpack.c.bf16 %v52_v13, %v43_v12 }
  0x11   :  { %210 = vmatpush1.bf16.msra.mxu0 %v66_v45  ;;  %250 = vmatprep.subr.bf16.mxu1 %v69_v48  ;;  %v70_v10 = vpack.c.bf16 %v34_v9, %v25_v8  ;;  %v61_v14 = vld [vmem:[%s598_s1 + $0x160] sm:$0xf] }
  0x12   :  { %211 = vmatprep.subr.bf16.mxu0 %v76_v51  ;;  %241 = vmatprep.mubr.bf16.mxu0 %v393_v3  ;;  %v88_v16 = vpack.c.bf16 %v61_v14, %v61_v14 }
  0x13   :  { %369 = vmatmul.mubr.msk.bf16.vlgmr.msra.gmra.mrb[0].mxu1 %vm95_vm1, %v508_v44 }
  0x14   :  { %251 = vmatpush1.bf16.msra.mxu1 %v68_v57  ;;  %282 = vmatprep.mubr.bf16.mxu1 %v393_v3  ;;  %v119_v3 = vsel %vm99_vm0, %v86_v6, 0  ;;  %v125_v17 = vsel %vm99_vm0, %v88_v16, 0 }
  0x15   :  { %212 = vmatpush1.bf16.msra.mxu0 %v75_v59  ;;  %252 = vmatprep.subr.bf16.mxu1 %v78_v60 }
  0x16   :  { %370 = vmatprep.subr.msk.bf16.mxu0 %vm99_vm0, %v85_v63 }
  0x18   :  { %253 = vmatpush1.bf16.msra.mxu1 %v77_v4 }
  0x19   :  { %214 = vmatpush1.bf16.msra.mxu0 %v113_v7  ;;  %372 = vmatprep.subr.msk.bf16.mxu1 %vm99_vm0, %v87_v5 }
  0x1a   :  { %379 = vmatprep.subr.bf16.mxu0 %v394_v11 }
  0x1c   :  { %371 = vmatmul.mubr.msk.bf16.vlgmr.msra.gmra.mrb[4].mxu0 %vm95_vm1, %v508_v44  ;;  %255 = vmatpush1.bf16.msra.mxu1 %v119_v3 }
  0x1d   :  { %380 = vmatpush3.bf16.msra.mxu0 %v70_v10  ;;  %385 = vmatprep.mubr.msk.bf16.mxu0 %vm395_vm2, %v394_v11 }
  0x1e   :  { %381 = vmatprep.subr.bf16.mxu0 %v394_v11 }
  0x1f   :  { %373 = vmatmul.mubr.msk.bf16.vlgmr.msra.gmra.mrb[4].mxu1 %vm95_vm1, %v508_v44 }
  0x21   :  { %382 = vmatpush3.bf16.msra.mxu0 %v79_v15 }
  0x22   :  { %383 = vmatprep.subr.bf16.mxu0 %v394_v11 }
  0x25   :  { %384 = vmatpush3.bf16.msra.mxu0 %v125_v17 }
  0x28   :  { %386 = vmatmul.mubr.msk.bf16.vlgmr.msra.gmra.mrb[8].mxu0 %vm95_vm1, %v508_v44 }
  0x8e   :  { %v93_v18 = vpop.permute.xlu0 %92 }
  0xe3   :  { %v161_v19 = vpop.f32.mrb[0].mxu0 }
  0xe4   :  { %v162_v20 = vadd.f32 %v161_v19, %v93_v18  ;;  %v163_v21 = vpop.f32.mrb[1].mxu0 }
  0xe5   :  { %v164_v22 = vadd.f32 %v163_v21, %v93_v18  ;;  %v165_v23 = vpop.f32.mrb[2].mxu0 }
  0xe6   :  { %v331_v24 = vmax.f32 %v162_v20, 0.0  ;;  %v166_v25 = vpop.f32.mrb[3].mxu0  ;;  %v202_v26 = vpop.f32.mrb[0].mxu1 }
  0xe7   :  { %v332_v27 = vmax.f32 %v164_v22, 0.0  ;;  %v203_v28 = vadd.f32 %v202_v26, %v93_v18  ;;  %v204_v29 = vpop.f32.mrb[1].mxu1 }
  0xe8   :  { %v205_v30 = vadd.f32 %v204_v29, %v93_v18  ;;  %v206_v31 = vpop.f32.mrb[2].mxu1 }
  0xe9   :  { %v348_v32 = vcombine.low %v331_v24, %v332_v27  ;;  %v333_v33 = vmax.f32 %v203_v28, 0.0  ;;  %v207_v34 = vpop.f32.mrb[3].mxu1 }
  0xea   :  { %v334_v35 = vmax.f32 %v205_v30, 0.0 }
  0xeb   :  { %356 = vst [vmem:[%s601_s3] sm:$0x77] %v348_v32 }
  0xec   :  { %v349_v36 = vcombine.low %v333_v33, %v334_v35 }
  0xee   :  { %357 = vst [vmem:[%s601_s3 + $0x8] sm:$0x77] %v349_v36 }
  0xef   :  { %v243_v37 = vpop.f32.mrb[4].mxu0 }
  0xf0   :  { %v244_v38 = vadd.f32 %v243_v37, %v93_v18  ;;  %v245_v39 = vpop.f32.mrb[5].mxu0 }
  0xf1   :  { %v246_v40 = vadd.f32 %v245_v39, %v93_v18  ;;  %v247_v41 = vpop.f32.mrb[6].mxu0 }
  0xf2   :  { %v335_v42 = vmax.f32 %v244_v38, 0.0  ;;  %v248_v43 = vpop.f32.mrb[7].mxu0  ;;  %v284_v44 = vpop.f32.mrb[4].mxu1 }
  0xf3   :  { %v336_v45 = vmax.f32 %v246_v40, 0.0  ;;  %v285_v46 = vadd.f32 %v284_v44, %v93_v18  ;;  %v286_v47 = vpop.f32.mrb[5].mxu1 }
  0xf4   :  { %v287_v48 = vadd.f32 %v286_v47, %v93_v18  ;;  %v288_v49 = vpop.f32.mrb[6].mxu1 }
  0xf5   :  { %v350_v50 = vcombine.low %v335_v42, %v336_v45  ;;  %v337_v51 = vmax.f32 %v285_v46, 0.0  ;;  %v289_v52 = vpop.f32.mrb[7].mxu1 }
  0xf6   :  { %v338_v53 = vmax.f32 %v287_v48, 0.0 }
  0xf7   :  { %358 = vst [vmem:[%s601_s3 + $0x10] sm:$0x77] %v350_v50 }
  0xf8   :  { %v351_v54 = vcombine.low %v337_v51, %v338_v53 }
  0xfa   :  { %359 = vst [vmem:[%s601_s3 + $0x18] sm:$0x77] %v351_v54 }
  0xfb   :  { %v325_v55 = vpop.f32.mrb[8].mxu0 }
  0xfc   :  { %v326_v56 = vadd.f32 %v325_v55, %v93_v18  ;;  %v387_v57 = vpop.f32.mrb[9].mxu0 }
  0xfd   :  { %v328_v58 = vpop.f32.mrb[10].mxu0 }
  0xfe   :  { %v339_v59 = vmax.f32 %v326_v56, 0.0  ;;  %v388_v60 = vpop.f32.mrb[11].mxu0 }
 0x100   :  { %361 = vst.msk [vmem:[%s601_s3 + $0x20] sm:$0x7] %vm360_vm3, %v339_v59 }

// kernel: net_forward.5
= control target key start
LH: loop header
LB: loop body
LE: loop exit
PB: predicated region body
PF: predicated region fallthrough
CT: control target
= control target key end

     0   :  { %v320_v3 = vmov 0   ;;  %vm153_vm0 = vcmask 1045504   ;;  %vm149_vm1 = vcmask 883712   ;;  %vm306_vm2 = vcmask 61440   ;;  %s635_s1 = inlined_call_operand.vmem [shape: f32[108,648], index: 1, kind: input, shape index: {}]   ;;  %s636_s0 = inlined_call_operand.vmem [shape: f32[5,108], index: 0, kind: input, shape index: {}]   ;;  %s637_s2 = inlined_call_operand.vmem [shape: f32[5,1], index: 2, kind: input, shape index: {}]   ;;  %s638_s3 = inlined_call_operand.vmem [shape: f32[5,648], index: 3, kind: output, shape index: {}]  }
   0x1   :  { %v18_v0 = vld [vmem:[%s635_s1 + $0x8] sm:$0xff]  ;;  %v24_v1 = vld [vmem:[%s635_s1 + $0x38] sm:$0xff]  ;;  %v17_v2 = vld [vmem:[%s635_s1] sm:$0xff]  ;;  %204 = vmatprep.mubr.bf16.mxu0 %v320_v3  ;;  %245 = vmatprep.mubr.bf16.mxu1 %v320_v3 }
   0x2   :  { %v102_v4 = vpack.c.bf16 %v24_v1, %v18_v0  ;;  %v23_v5 = vld [vmem:[%s635_s1 + $0x30] sm:$0xff]  ;;  %v30_v6 = vld [vmem:[%s635_s1 + $0x68] sm:$0xff]  ;;  %v36_v7 = vld [vmem:[%s635_s1 + $0x98] sm:$0xff]  ;;  %319 = vset.pattern.permute.xlu0 %v320_v3 }
   0x3   :  { %v101_v8 = vpack.c.bf16 %v23_v5, %v17_v2  ;;  %v108_v9 = vpack.c.bf16 %v36_v7, %v30_v6  ;;  %v29_v10 = vld [vmem:[%s635_s1 + $0x60] sm:$0xff]  ;;  %v35_v11 = vld [vmem:[%s635_s1 + $0x90] sm:$0xff]  ;;  %v42_v12 = vld [vmem:[%s635_s1 + $0xc8] sm:$0xff] }
   0x4   :  { %172 = vmatprep.subr.bf16.mxu0 %v102_v4  ;;  %v48_v13 = vld [vmem:[%s635_s1 + $0xf8] sm:$0xff]  ;;  %v107_v14 = vpack.c.bf16 %v35_v11, %v29_v10  ;;  %v41_v16 = vld [vmem:[%s635_s1 + $0xc0] sm:$0xff]  ;;  %v47_v17 = vld [vmem:[%s635_s1 + $0xf0] sm:$0xff] }
   0x5   :  { %173 = vmatpush1.bf16.msra.mxu0 %v101_v8  ;;  %v114_v15 = vpack.c.bf16 %v48_v13, %v42_v12  ;;  %v54_v18 = vld [vmem:[%s635_s1 + $0x128] sm:$0xff]  ;;  %v60_v19 = vld [vmem:[%s635_s1 + $0x158] sm:$0xff]  ;;  %v113_v20 = vpack.c.bf16 %v47_v17, %v41_v16  ;;  %v53_v21 = vld [vmem:[%s635_s1 + $0x120] sm:$0xff] }
   0x6   :  { %174 = vmatprep.subr.bf16.mxu0 %v108_v9  ;;  %v59_v22 = vld [vmem:[%s635_s1 + $0x150] sm:$0xff]  ;;  %v120_v23 = vpack.c.bf16 %v60_v19, %v54_v18  ;;  %v66_v24 = vld [vmem:[%s635_s1 + $0x188] sm:$0xff]  ;;  %v20_v25 = vld [vmem:[%s635_s1 + $0x18] sm:$0xff] }
   0x7   :  { %v26_v26 = vld [vmem:[%s635_s1 + $0x48] sm:$0xff]  ;;  %v72_v27 = vld [vmem:[%s635_s1 + $0x1b8] sm:$0xff]  ;;  %v19_v29 = vld [vmem:[%s635_s1 + $0x10] sm:$0xff]  ;;  %v119_v33 = vpack.c.bf16 %v59_v22, %v53_v21 }
   0x8   :  { %v104_v28 = vpack.c.bf16 %v26_v26, %v20_v25  ;;  %v25_v30 = vld [vmem:[%s635_s1 + $0x40] sm:$0xff]  ;;  %v32_v32 = vld [vmem:[%s635_s1 + $0x78] sm:$0xff]  ;;  %v71_v35 = vld [vmem:[%s635_s1 + $0x1b0] sm:$0xff]  ;;  %v126_v37 = vpack.c.bf16 %v72_v27, %v66_v24 }
   0x9   :  { %175 = vmatpush1.bf16.msra.mxu0 %v107_v14  ;;  %v103_v31 = vpack.c.bf16 %v25_v30, %v19_v29  ;;  %v65_v34 = vld [vmem:[%s635_s1 + $0x180] sm:$0xff]  ;;  %v38_v36 = vld [vmem:[%s635_s1 + $0xa8] sm:$0xff]  ;;  %v31_v40 = vld [vmem:[%s635_s1 + $0x70] sm:$0xff] }
   0xa   :  { %176 = vmatprep.subr.bf16.mxu0 %v114_v15  ;;  %213 = vmatprep.subr.bf16.mxu1 %v104_v28  ;;  %v78_v38 = vld [vmem:[%s635_s1 + $0x1e8] sm:$0xff]  ;;  %v110_v39 = vpack.c.bf16 %v38_v36, %v32_v32  ;;  %v37_v41 = vld [vmem:[%s635_s1 + $0xa0] sm:$0xff]  ;;  %v84_v42 = vld [vmem:[%s635_s1 + $0x218] sm:$0xff]  ;;  %v125_v50 = vpack.c.bf16 %v71_v35, %v65_v34 }
   0xb   :  { %214 = vmatpush1.bf16.msra.mxu1 %v103_v31  ;;  %v109_v43 = vpack.c.bf16 %v37_v41, %v31_v40  ;;  %v44_v44 = vld [vmem:[%s635_s1 + $0xd8] sm:$0xff]  ;;  %v50_v45 = vld [vmem:[%s635_s1 + $0x108] sm:$0xff]  ;;  %v77_v46 = vld [vmem:[%s635_s1 + $0x1e0] sm:$0xff]  ;;  %v132_v54 = vpack.c.bf16 %v84_v42, %v78_v38 }
   0xc   :  { %v83_v47 = vld [vmem:[%s635_s1 + $0x210] sm:$0xff]  ;;  %215 = vmatprep.subr.bf16.mxu1 %v110_v39  ;;  %v116_v48 = vpack.c.bf16 %v50_v45, %v44_v44  ;;  %v90_v51 = vld [vmem:[%s635_s1 + $0x248] sm:$0xff]  ;;  %v96_v52 = vld [vmem:[%s635_s1 + $0x278] sm:$0xf] }
   0xd   :  { %177 = vmatpush1.bf16.msra.mxu0 %v113_v20  ;;  %v43_v49 = vld [vmem:[%s635_s1 + $0xd0] sm:$0xff]  ;;  %v49_v53 = vld [vmem:[%s635_s1 + $0x100] sm:$0xff]  ;;  %v56_v57 = vld [vmem:[%s635_s1 + $0x138] sm:$0xff]  ;;  %v131_v0 = vpack.c.bf16 %v83_v47, %v77_v46  ;;  %v138_v2 = vpack.c.bf16 %v96_v52, %v90_v51 }
   0xe   :  { %178 = vmatprep.subr.bf16.mxu0 %v120_v23  ;;  %v89_v55 = vld [vmem:[%s635_s1 + $0x240] sm:$0xff]  ;;  %v115_v56 = vpack.c.bf16 %v49_v53, %v43_v49  ;;  %v62_v58 = vld [vmem:[%s635_s1 + $0x168] sm:$0xff]  ;;  %v95_v59 = vld [vmem:[%s635_s1 + $0x270] sm:$0xf] }
   0xf   :  { %216 = vmatpush1.bf16.msra.mxu1 %v109_v43  ;;  %v122_v60 = vpack.c.bf16 %v62_v58, %v56_v57  ;;  %v55_v61 = vld [vmem:[%s635_s1 + $0x130] sm:$0xff]  ;;  %v61_v62 = vld [vmem:[%s635_s1 + $0x160] sm:$0xff]  ;;  %v68_v63 = vld [vmem:[%s635_s1 + $0x198] sm:$0xff]  ;;  %v137_v4 = vpack.c.bf16 %v95_v59, %v89_v55 }
  0x10   :  { %217 = vmatprep.subr.bf16.mxu1 %v116_v48  ;;  %v74_v1 = vld [vmem:[%s635_s1 + $0x1c8] sm:$0xff]  ;;  %v121_v6 = vpack.c.bf16 %v61_v62, %v55_v61  ;;  %v28_v7 = vld [vmem:[%s635_s1 + $0x58] sm:$0xff]  ;;  %v67_v9 = vld [vmem:[%s635_s1 + $0x190] sm:$0xff] }
  0x11   :  { %179 = vmatpush1.bf16.msra.mxu0 %v119_v33  ;;  %v22_v5 = vld [vmem:[%s635_s1 + $0x28] sm:$0xff]  ;;  %v128_v8 = vpack.c.bf16 %v74_v1, %v68_v63  ;;  %v73_v10 = vld [vmem:[%s635_s1 + $0x1c0] sm:$0xff]  ;;  %v80_v11 = vld [vmem:[%s635_s1 + $0x1f8] sm:$0xff]  ;;  %v155_v15 = vsel %vm153_vm0, %v137_v4, 0 }
  0x12   :  { %180 = vmatprep.subr.bf16.mxu0 %v126_v37  ;;  %v86_v12 = vld [vmem:[%s635_s1 + $0x228] sm:$0xff]  ;;  %v15_v13 = vld [vmem:[%s636_s0] sm:$0x1f]  ;;  %v106_v16 = vpack.c.bf16 %v28_v7, %v22_v5  ;;  %v27_v17 = vld [vmem:[%s635_s1 + $0x50] sm:$0xff]  ;;  %v127_v20 = vpack.c.bf16 %v73_v10, %v67_v9 }
  0x13   :  { %218 = vmatpush1.bf16.msra.mxu1 %v115_v56  ;;  %v21_v14 = vld [vmem:[%s635_s1 + $0x20] sm:$0xff]  ;;  %v34_v18 = vld [vmem:[%s635_s1 + $0x88] sm:$0xff]  ;;  %v40_v19 = vld [vmem:[%s635_s1 + $0xb8] sm:$0xff]  ;;  %v134_v21 = vpack.c.bf16 %v86_v12, %v80_v11  ;;  %v526_v25 = vpack.c.bf16 %v15_v13, %v15_v13 }
  0x14   :  { %219 = vmatprep.subr.bf16.mxu1 %v122_v60  ;;  %v79_v22 = vld [vmem:[%s635_s1 + $0x1f0] sm:$0xff]  ;;  %v85_v23 = vld [vmem:[%s635_s1 + $0x220] sm:$0xff]  ;;  %v92_v24 = vld [vmem:[%s635_s1 + $0x258] sm:$0xff]  ;;  %v105_v29 = vpack.c.bf16 %v27_v17, %v21_v14  ;;  %v112_v31 = vpack.c.bf16 %v40_v19, %v34_v18 }
  0x15   :  { %181 = vmatpush1.bf16.msra.mxu0 %v125_v50  ;;  %v98_v26 = vld [vmem:[%s635_s1 + $0x288] sm:$0xf]  ;;  %v91_v27 = vld [vmem:[%s635_s1 + $0x250] sm:$0xff]  ;;  %v97_v28 = vld [vmem:[%s635_s1 + $0x280] sm:$0xf]  ;;  %v133_v34 = vpack.c.bf16 %v85_v23, %v79_v22 }
  0x16   :  { %182 = vmatprep.subr.bf16.mxu0 %v132_v54  ;;  %v143_v30 = vld [vmem:[%s637_s2] sm:$0x1f]  ;;  %v39_v33 = vld [vmem:[%s635_s1 + $0xb0] sm:$0xff]  ;;  %v46_v35 = vld [vmem:[%s635_s1 + $0xe8] sm:$0xff]  ;;  %v140_v37 = vpack.c.bf16 %v98_v26, %v92_v24  ;;  %v139_v38 = vpack.c.bf16 %v97_v28, %v91_v27 }
  0x17   :  { %220 = vmatpush1.bf16.msra.mxu1 %v121_v6  ;;  %v33_v32 = vld [vmem:[%s635_s1 + $0x80] sm:$0xff]  ;;  %v52_v36 = vld [vmem:[%s635_s1 + $0x118] sm:$0xff]  ;;  %146 = vperm.xlu0 %319, %v143_v30   ;;  %v51_v42 = vld [vmem:[%s635_s1 + $0x110] sm:$0xff] }
  0x18   :  { %221 = vmatprep.subr.bf16.mxu1 %v128_v8  ;;  %v111_v39 = vpack.c.bf16 %v39_v33, %v33_v32  ;;  %v118_v40 = vpack.c.bf16 %v52_v36, %v46_v35  ;;  %v45_v41 = vld [vmem:[%s635_s1 + $0xe0] sm:$0xff]  ;;  %v58_v43 = vld [vmem:[%s635_s1 + $0x148] sm:$0xff]  ;;  %v64_v44 = vld [vmem:[%s635_s1 + $0x178] sm:$0xff] }
  0x19   :  { %183 = vmatpush1.bf16.msra.mxu0 %v131_v0  ;;  %v117_v45 = vpack.c.bf16 %v51_v42, %v45_v41  ;;  %v124_v46 = vpack.c.bf16 %v64_v44, %v58_v43  ;;  %v57_v47 = vld [vmem:[%s635_s1 + $0x140] sm:$0xff]  ;;  %v63_v48 = vld [vmem:[%s635_s1 + $0x170] sm:$0xff]  ;;  %v70_v49 = vld [vmem:[%s635_s1 + $0x1a8] sm:$0xff] }
  0x1a   :  { %312 = vmatprep.subr.msk.bf16.mxu0 %vm153_vm0, %v138_v2  ;;  %v76_v50 = vld [vmem:[%s635_s1 + $0x1d8] sm:$0xff]  ;;  %v123_v51 = vpack.c.bf16 %v63_v48, %v57_v47  ;;  %v69_v53 = vld [vmem:[%s635_s1 + $0x1a0] sm:$0xff]  ;;  %v75_v54 = vld [vmem:[%s635_s1 + $0x1d0] sm:$0xff] }
  0x1b   :  { %222 = vmatpush1.bf16.msra.mxu1 %v127_v20  ;;  %v130_v52 = vpack.c.bf16 %v76_v50, %v70_v49  ;;  %v82_v55 = vld [vmem:[%s635_s1 + $0x208] sm:$0xff]  ;;  %v88_v56 = vld [vmem:[%s635_s1 + $0x238] sm:$0xff]  ;;  %v129_v57 = vpack.c.bf16 %v75_v54, %v69_v53  ;;  %v81_v59 = vld [vmem:[%s635_s1 + $0x200] sm:$0xff] }
  0x1c   :  { %223 = vmatprep.subr.bf16.mxu1 %v134_v21  ;;  %v136_v58 = vpack.c.bf16 %v88_v56, %v82_v55  ;;  %v87_v60 = vld [vmem:[%s635_s1 + $0x230] sm:$0xff]  ;;  %v94_v61 = vld [vmem:[%s635_s1 + $0x268] sm:$0xff]  ;;  %v100_v62 = vld [vmem:[%s635_s1 + $0x298] sm:$0xf] }
  0x1d   :  { %185 = vmatpush1.bf16.msra.mxu0 %v155_v15  ;;  %v93_v63 = vld [vmem:[%s635_s1 + $0x260] sm:$0xff]  ;;  %v99_v0 = vld [vmem:[%s635_s1 + $0x290] sm:$0xf]  ;;  %v135_v1 = vpack.c.bf16 %v87_v60, %v81_v59  ;;  %v142_v2 = vpack.c.bf16 %v100_v62, %v94_v61 }
  0x1e   :  { %254 = vmatprep.subr.bf16.mxu0 %v106_v16  ;;  %v141_v4 = vpack.c.bf16 %v99_v0, %v93_v63 }
  0x1f   :  { %224 = vmatpush1.bf16.msra.mxu1 %v133_v34 }
  0x20   :  { %313 = vmatmul.mubr.msk.bf16.vlgmr.msra.gmra.mrb[0].mxu0 %vm149_vm1, %v526_v25  ;;  %314 = vmatprep.subr.msk.bf16.mxu1 %vm153_vm0, %v140_v37  ;;  %v167_v5 = vsel %vm153_vm0, %v141_v4, 0 }
  0x21   :  { %255 = vmatpush1.bf16.msra.mxu0 %v105_v29  ;;  %286 = vmatprep.mubr.bf16.mxu0 %v320_v3  ;;  %v161_v3 = vsel %vm153_vm0, %v139_v38, 0 }
  0x22   :  { %256 = vmatprep.subr.bf16.mxu0 %v112_v31 }
  0x23   :  { %226 = vmatpush1.bf16.msra.mxu1 %v161_v3 }
  0x25   :  { %257 = vmatpush1.bf16.msra.mxu0 %v111_v39 }
  0x26   :  { %258 = vmatprep.subr.bf16.mxu0 %v118_v40  ;;  %315 = vmatmul.mubr.msk.bf16.vlgmr.msra.gmra.mrb[0].mxu1 %vm149_vm1, %v526_v25 }
  0x29   :  { %259 = vmatpush1.bf16.msra.mxu0 %v117_v45 }
  0x2a   :  { %260 = vmatprep.subr.bf16.mxu0 %v124_v46 }
  0x2d   :  { %261 = vmatpush1.bf16.msra.mxu0 %v123_v51 }
  0x2e   :  { %262 = vmatprep.subr.bf16.mxu0 %v130_v52 }
  0x31   :  { %263 = vmatpush1.bf16.msra.mxu0 %v129_v57 }
  0x32   :  { %264 = vmatprep.subr.bf16.mxu0 %v136_v58 }
  0x35   :  { %265 = vmatpush1.bf16.msra.mxu0 %v135_v1 }
  0x36   :  { %316 = vmatprep.subr.msk.bf16.mxu0 %vm153_vm0, %v142_v2 }
  0x39   :  { %267 = vmatpush1.bf16.msra.mxu0 %v167_v5 }
  0x3c   :  { %317 = vmatmul.mubr.msk.bf16.vlgmr.msra.gmra.mrb[4].mxu0 %vm149_vm1, %v526_v25 }
  0x96   :  { %v147_v6 = vpop.permute.xlu0 %146 }
  0xf3   :  { %v206_v7 = vpop.f32.mrb[0].mxu0 }
  0xf4   :  { %v207_v8 = vadd.f32 %v206_v7, %v147_v6  ;;  %v208_v9 = vpop.f32.mrb[1].mxu0 }
  0xf5   :  { %v209_v10 = vadd.f32 %v208_v9, %v147_v6  ;;  %v210_v11 = vpop.f32.mrb[2].mxu0 }
  0xf6   :  { %v295_v12 = vmax.f32 %v207_v8, 0.0  ;;  %v211_v13 = vpop.f32.mrb[3].mxu0 }
  0xf7   :  { %v296_v14 = vmax.f32 %v209_v10, 0.0 }
  0xf8   :  { %301 = vst [vmem:[%s638_s3] sm:$0x1f] %v295_v12 }
  0xf9   :  { %302 = vst [vmem:[%s638_s3 + $0x8] sm:$0x1f] %v296_v14  ;;  %v247_v15 = vpop.f32.mrb[0].mxu1 }
  0xfa   :  { %v248_v16 = vadd.f32 %v247_v15, %v147_v6  ;;  %v249_v17 = vpop.f32.mrb[1].mxu1 }
  0xfb   :  { %v250_v18 = vadd.f32 %v249_v17, %v147_v6  ;;  %v251_v19 = vpop.f32.mrb[2].mxu1 }
  0xfc   :  { %v297_v20 = vmax.f32 %v248_v16, 0.0  ;;  %v252_v21 = vpop.f32.mrb[3].mxu1 }
  0xfd   :  { %v298_v22 = vmax.f32 %v250_v18, 0.0 }
  0xfe   :  { %303 = vst [vmem:[%s638_s3 + $0x10] sm:$0x1f] %v297_v20 }
  0xff   :  { %304 = vst [vmem:[%s638_s3 + $0x18] sm:$0x1f] %v298_v22 }
 0x10f   :  { %v288_v23 = vpop.f32.mrb[4].mxu0 }
 0x110   :  { %v289_v24 = vadd.f32 %v288_v23, %v147_v6  ;;  %v290_v25 = vpop.f32.mrb[5].mxu0 }
 0x111   :  { %v291_v26 = vadd.f32 %v290_v25, %v147_v6  ;;  %v292_v27 = vpop.f32.mrb[6].mxu0 }
 0x112   :  { %v299_v28 = vmax.f32 %v289_v24, 0.0  ;;  %v293_v29 = vpop.f32.mrb[7].mxu0 }
 0x113   :  { %v300_v30 = vmax.f32 %v291_v26, 0.0 }
 0x114   :  { %305 = vst [vmem:[%s638_s3 + $0x20] sm:$0x1f] %v299_v28 }
 0x115   :  { %307 = vst.msk [vmem:[%s638_s3 + $0x28] sm:$0x1f] %vm306_vm2, %v300_v30 }

// kernel: net_forward.6
= control target key start
LH: loop header
LB: loop body
LE: loop exit
PB: predicated region body
PF: predicated region fallthrough
CT: control target
= control target key end

     0   :  { %v259_v0 = vmov 0   ;;  %vm138_vm0 = vcmask 424960   ;;  %vm142_vm1 = vcmask 1041408   ;;  %vm244_vm2 = vcmask 670720   ;;  %s538_s1 = inlined_call_operand.vmem [shape: f32[180,338], index: 1, kind: input, shape index: {}]   ;;  %s539_s0 = inlined_call_operand.vmem [shape: f32[9,180], index: 0, kind: input, shape index: {}]   ;;  %s540_s2 = inlined_call_operand.vmem [shape: f32[9,1], index: 2, kind: input, shape index: {}]   ;;  %s541_s3 = inlined_call_operand.vmem [shape: f32[9,338], index: 3, kind: output, shape index: {}]  }
   0x1   :  { %195 = vmatprep.subr.bf16.mxu1 %v259_v0  ;;  %v22_v1 = vld [vmem:[%s538_s1 + $0x8] sm:$0xff]  ;;  %v25_v2 = vld [vmem:[%s538_s1 + $0x20] sm:$0xff]  ;;  %v23_v3 = vld [vmem:[%s538_s1 + $0x10] sm:$0xff]  ;;  %258 = vset.pattern.permute.xlu0 %v259_v0  ;;  %vm248_vm3 = vcmask 663552  }
   0x2   :  { %v91_v4 = vpack.c.bf16 %v25_v2, %v22_v1  ;;  %v26_v5 = vld [vmem:[%s538_s1 + $0x28] sm:$0xff]  ;;  %v21_v6 = vld [vmem:[%s538_s1] sm:$0xff]  ;;  %v24_v7 = vld [vmem:[%s538_s1 + $0x18] sm:$0xff] }
   0x3   :  { %v92_v8 = vpack.c.bf16 %v26_v5, %v23_v3  ;;  %v90_v9 = vpack.c.bf16 %v24_v7, %v21_v6  ;;  %v28_v10 = vld [vmem:[%s538_s1 + $0x38] sm:$0xff]  ;;  %v31_v11 = vld [vmem:[%s538_s1 + $0x50] sm:$0xff]  ;;  %v29_v12 = vld [vmem:[%s538_s1 + $0x40] sm:$0xff] }
   0x4   :  { %152 = vmatprep.subr.bf16.mxu0 %v91_v4  ;;  %v94_v13 = vpack.c.bf16 %v31_v11, %v28_v10  ;;  %v32_v14 = vld [vmem:[%s538_s1 + $0x58] sm:$0xff]  ;;  %v27_v15 = vld [vmem:[%s538_s1 + $0x30] sm:$0xff]  ;;  %v30_v16 = vld [vmem:[%s538_s1 + $0x48] sm:$0xff] }
   0x5   :  { %196 = vmatpush1.bf16.msra.mxu1 %v92_v8  ;;  %153 = vmatpush1.bf16.msra.mxu0 %v90_v9  ;;  %v95_v17 = vpack.c.bf16 %v32_v14, %v29_v12  ;;  %v93_v18 = vpack.c.bf16 %v30_v16, %v27_v15  ;;  %v34_v19 = vld [vmem:[%s538_s1 + $0x68] sm:$0xff]  ;;  %v37_v20 = vld [vmem:[%s538_s1 + $0x80] sm:$0xff]  ;;  %v35_v21 = vld [vmem:[%s538_s1 + $0x70] sm:$0xff] }
   0x6   :  { %197 = vmatprep.subr.bf16.mxu1 %v259_v0  ;;  %154 = vmatprep.subr.bf16.mxu0 %v94_v13  ;;  %v97_v22 = vpack.c.bf16 %v37_v20, %v34_v19  ;;  %v38_v23 = vld [vmem:[%s538_s1 + $0x88] sm:$0xff]  ;;  %v33_v24 = vld [vmem:[%s538_s1 + $0x60] sm:$0xff]  ;;  %v36_v25 = vld [vmem:[%s538_s1 + $0x78] sm:$0xff] }
   0x7   :  { %v40_v26 = vld [vmem:[%s538_s1 + $0x98] sm:$0xff]  ;;  %v43_v27 = vld [vmem:[%s538_s1 + $0xb0] sm:$0xff]  ;;  %v98_v28 = vpack.c.bf16 %v38_v23, %v35_v21  ;;  %v96_v29 = vpack.c.bf16 %v36_v25, %v33_v24  ;;  %v41_v30 = vld [vmem:[%s538_s1 + $0xa0] sm:$0xff] }
   0x8   :  { %v100_v31 = vpack.c.bf16 %v43_v27, %v40_v26  ;;  %v44_v32 = vld [vmem:[%s538_s1 + $0xb8] sm:$0xff]  ;;  %v39_v33 = vld [vmem:[%s538_s1 + $0x90] sm:$0xff]  ;;  %v42_v34 = vld [vmem:[%s538_s1 + $0xa8] sm:$0xff] }
   0x9   :  { %198 = vmatpush1.bf16.msra.mxu1 %v95_v17  ;;  %155 = vmatpush1.bf16.msra.mxu0 %v93_v18  ;;  %v46_v35 = vld [vmem:[%s538_s1 + $0xc8] sm:$0xff]  ;;  %v49_v36 = vld [vmem:[%s538_s1 + $0xe0] sm:$0xff]  ;;  %v101_v37 = vpack.c.bf16 %v44_v32, %v41_v30  ;;  %v99_v38 = vpack.c.bf16 %v42_v34, %v39_v33  ;;  %v47_v39 = vld [vmem:[%s538_s1 + $0xd0] sm:$0xff] }
   0xa   :  { %199 = vmatprep.subr.bf16.mxu1 %v259_v0  ;;  %156 = vmatprep.subr.bf16.mxu0 %v97_v22  ;;  %v103_v40 = vpack.c.bf16 %v49_v36, %v46_v35  ;;  %v50_v41 = vld [vmem:[%s538_s1 + $0xe8] sm:$0xff]  ;;  %v45_v42 = vld [vmem:[%s538_s1 + $0xc0] sm:$0xff]  ;;  %v48_v43 = vld [vmem:[%s538_s1 + $0xd8] sm:$0xff] }
   0xb   :  { %v52_v44 = vld [vmem:[%s538_s1 + $0xf8] sm:$0xff]  ;;  %v55_v45 = vld [vmem:[%s538_s1 + $0x110] sm:$0xff]  ;;  %v104_v46 = vpack.c.bf16 %v50_v41, %v47_v39  ;;  %v102_v47 = vpack.c.bf16 %v48_v43, %v45_v42  ;;  %v53_v48 = vld [vmem:[%s538_s1 + $0x100] sm:$0xff] }
   0xc   :  { %v106_v49 = vpack.c.bf16 %v55_v45, %v52_v44  ;;  %v56_v50 = vld [vmem:[%s538_s1 + $0x118] sm:$0xff]  ;;  %v51_v51 = vld [vmem:[%s538_s1 + $0xf0] sm:$0xff]  ;;  %v54_v52 = vld [vmem:[%s538_s1 + $0x108] sm:$0xff] }
   0xd   :  { %200 = vmatpush1.bf16.msra.mxu1 %v98_v28  ;;  %157 = vmatpush1.bf16.msra.mxu0 %v96_v29  ;;  %v58_v53 = vld [vmem:[%s538_s1 + $0x128] sm:$0xff]  ;;  %v61_v54 = vld [vmem:[%s538_s1 + $0x140] sm:$0xff]  ;;  %v107_v55 = vpack.c.bf16 %v56_v50, %v53_v48  ;;  %v105_v56 = vpack.c.bf16 %v54_v52, %v51_v51  ;;  %v59_v57 = vld [vmem:[%s538_s1 + $0x130] sm:$0xff] }
   0xe   :  { %201 = vmatprep.subr.bf16.mxu1 %v259_v0  ;;  %158 = vmatprep.subr.bf16.mxu0 %v100_v31  ;;  %v109_v58 = vpack.c.bf16 %v61_v54, %v58_v53  ;;  %v62_v59 = vld [vmem:[%s538_s1 + $0x148] sm:$0xff]  ;;  %v57_v60 = vld [vmem:[%s538_s1 + $0x120] sm:$0xff]  ;;  %v60_v61 = vld [vmem:[%s538_s1 + $0x138] sm:$0xff] }
   0xf   :  { %v64_v62 = vld [vmem:[%s538_s1 + $0x158] sm:$0xff]  ;;  %v67_v63 = vld [vmem:[%s538_s1 + $0x170] sm:$0xff]  ;;  %v16_v1 = vld [vmem:[%s539_s0 + $0x8] sm:$0xff]  ;;  %v110_v3 = vpack.c.bf16 %v62_v59, %v59_v57  ;;  %v108_v4 = vpack.c.bf16 %v60_v61, %v57_v60 }
  0x10   :  { %v18_v2 = vld [vmem:[%s539_s0 + $0x18] sm:$0x1]  ;;  %v65_v5 = vld [vmem:[%s538_s1 + $0x160] sm:$0xff]  ;;  %v112_v8 = vpack.c.bf16 %v67_v63, %v64_v62  ;;  %v63_v10 = vld [vmem:[%s538_s1 + $0x150] sm:$0xff] }
  0x11   :  { %202 = vmatpush1.bf16.msra.mxu1 %v101_v37  ;;  %159 = vmatpush1.bf16.msra.mxu0 %v99_v38  ;;  %v20_v6 = vpack.c.bf16 %v18_v2, %v16_v1  ;;  %v126_v7 = vld [vmem:[%s540_s2] sm:$0xff]  ;;  %v68_v9 = vld [vmem:[%s538_s1 + $0x178] sm:$0xff]  ;;  %v66_v11 = vld [vmem:[%s538_s1 + $0x168] sm:$0xff] }
  0x12   :  { %203 = vmatprep.subr.bf16.mxu1 %v259_v0  ;;  %160 = vmatprep.subr.bf16.mxu0 %v103_v40  ;;  %v70_v12 = vld [vmem:[%s538_s1 + $0x188] sm:$0xff]  ;;  %v73_v13 = vld [vmem:[%s538_s1 + $0x1a0] sm:$0xff]  ;;  %v113_v14 = vpack.c.bf16 %v68_v9, %v65_v5  ;;  %v111_v15 = vpack.c.bf16 %v66_v11, %v63_v10  ;;  %v71_v16 = vld [vmem:[%s538_s1 + $0x190] sm:$0xff] }
  0x13   :  { %256 = vmatprep.mubr.msk.bf16.mxu1 %vm138_vm0, %v20_v6  ;;  %255 = vmatprep.mubr.msk.bf16.mxu0 %vm138_vm0, %v20_v6  ;;  %v127_v17 = vld [vmem:[%s540_s2 + $0x8] sm:$0x1]  ;;  %v115_v18 = vpack.c.bf16 %v73_v13, %v70_v12  ;;  %v69_v20 = vld [vmem:[%s538_s1 + $0x180] sm:$0xff]  ;;  %v72_v21 = vld [vmem:[%s538_s1 + $0x198] sm:$0xff] }
  0x14   :  { %130 = vperm.xlu0 %258, %v126_v7   ;;  %v74_v19 = vld [vmem:[%s538_s1 + $0x1a8] sm:$0xff]  ;;  %v76_v22 = vld [vmem:[%s538_s1 + $0x1b8] sm:$0xff]  ;;  %v79_v23 = vld [vmem:[%s538_s1 + $0x1d0] sm:$0xff]  ;;  %v114_v25 = vpack.c.bf16 %v72_v21, %v69_v20 }
  0x15   :  { %204 = vmatpush1.bf16.msra.mxu1 %v104_v46  ;;  %161 = vmatpush1.bf16.msra.mxu0 %v102_v47  ;;  %v116_v24 = vpack.c.bf16 %v74_v19, %v71_v16  ;;  %v77_v26 = vld [vmem:[%s538_s1 + $0x1c0] sm:$0xff]  ;;  %v118_v27 = vpack.c.bf16 %v79_v23, %v76_v22  ;;  %v80_v28 = vld [vmem:[%s538_s1 + $0x1d8] sm:$0xff]  ;;  %v75_v29 = vld [vmem:[%s538_s1 + $0x1b0] sm:$0xff] }
  0x16   :  { %205 = vmatprep.subr.bf16.mxu1 %v259_v0  ;;  %162 = vmatprep.subr.bf16.mxu0 %v106_v49  ;;  %v78_v30 = vld [vmem:[%s538_s1 + $0x1c8] sm:$0xff]  ;;  %v85_v32 = vld [vmem:[%s538_s1 + $0x200] sm:$0xff]  ;;  %v119_v33 = vpack.c.bf16 %v80_v28, %v77_v26  ;;  %v83_v35 = vld [vmem:[%s538_s1 + $0x1f0] sm:$0xff] }
  0x17   :  { %v82_v31 = vld [vmem:[%s538_s1 + $0x1e8] sm:$0xff]  ;;  %v117_v34 = vpack.c.bf16 %v78_v30, %v75_v29  ;;  %v81_v38 = vld [vmem:[%s538_s1 + $0x1e0] sm:$0xff]  ;;  %v84_v39 = vld [vmem:[%s538_s1 + $0x1f8] sm:$0xff] }
  0x18   :  { %135 = vperm.xlu0 %258, %v127_v17   ;;  %v121_v36 = vpack.c.bf16 %v85_v32, %v82_v31  ;;  %v86_v37 = vld [vmem:[%s538_s1 + $0x208] sm:$0xff]  ;;  %v88_v40 = vld [vmem:[%s538_s1 + $0x218] sm:$0xf]  ;;  %v89_v41 = vld [vmem:[%s538_s1 + $0x220] sm:$0xf]  ;;  %v120_v44 = vpack.c.bf16 %v84_v39, %v81_v38 }
  0x19   :  { %206 = vmatpush1.bf16.msra.mxu1 %v107_v55  ;;  %163 = vmatpush1.bf16.msra.mxu0 %v105_v56  ;;  %v87_v42 = vld [vmem:[%s538_s1 + $0x210] sm:$0xf]  ;;  %v122_v43 = vpack.c.bf16 %v86_v37, %v83_v35  ;;  %v124_v45 = vpack.c.bf16 %v88_v40, %v88_v40  ;;  %v125_v46 = vpack.c.bf16 %v89_v41, %v89_v41  ;;  %v15_v48 = vld [vmem:[%s539_s0] sm:$0xff] }
  0x1a   :  { %207 = vmatprep.subr.bf16.mxu1 %v259_v0  ;;  %164 = vmatprep.subr.bf16.mxu0 %v109_v58  ;;  %v123_v47 = vpack.c.bf16 %v87_v42, %v87_v42  ;;  %v17_v49 = vld [vmem:[%s539_s0 + $0x10] sm:$0x1] }
  0x1b   :  { %v150_v50 = vsel %vm142_vm1, %v125_v46, 0  ;;  %v19_v52 = vpack.c.bf16 %v17_v49, %v15_v48 }
  0x1c   :  { %v144_v51 = vsel %vm142_vm1, %v123_v47, 0 }
  0x1d   :  { %208 = vmatpush1.bf16.msra.mxu1 %v110_v3  ;;  %165 = vmatpush1.bf16.msra.mxu0 %v108_v4 }
  0x1e   :  { %209 = vmatprep.subr.bf16.mxu1 %v259_v0  ;;  %166 = vmatprep.subr.bf16.mxu0 %v112_v8 }
  0x21   :  { %210 = vmatpush1.bf16.msra.mxu1 %v113_v14  ;;  %167 = vmatpush1.bf16.msra.mxu0 %v111_v15 }
  0x22   :  { %211 = vmatprep.subr.bf16.mxu1 %v259_v0  ;;  %168 = vmatprep.subr.bf16.mxu0 %v115_v18 }
  0x25   :  { %212 = vmatpush1.bf16.msra.mxu1 %v116_v24  ;;  %169 = vmatpush1.bf16.msra.mxu0 %v114_v25 }
  0x26   :  { %213 = vmatprep.subr.bf16.mxu1 %v259_v0  ;;  %170 = vmatprep.subr.bf16.mxu0 %v118_v27 }
  0x29   :  { %214 = vmatpush1.bf16.msra.mxu1 %v119_v33  ;;  %171 = vmatpush1.bf16.msra.mxu0 %v117_v34 }
  0x2a   :  { %215 = vmatprep.subr.bf16.mxu1 %v259_v0  ;;  %172 = vmatprep.subr.bf16.mxu0 %v121_v36 }
  0x2d   :  { %216 = vmatpush1.bf16.msra.mxu1 %v122_v43  ;;  %173 = vmatpush1.bf16.msra.mxu0 %v120_v44 }
  0x2e   :  { %217 = vmatprep.subr.bf16.mxu1 %v259_v0  ;;  %254 = vmatprep.subr.msk.bf16.mxu0 %vm142_vm1, %v124_v45 }
  0x31   :  { %218 = vmatpush1.bf16.msra.mxu1 %v150_v50  ;;  %175 = vmatpush1.bf16.msra.mxu0 %v144_v51 }
  0x34   :  { %228 = vmatmul.mubr.bf16.vlgmr.msra.gmra.mrb[0].mxu1 %v19_v52  ;;  %185 = vmatmul.mubr.bf16.vlgmr.msra.gmra.mrb[0].mxu0 %v19_v52 }
  0x93   :  { %v131_v53 = vpop.permute.xlu0 %130 }
  0x97   :  { %v136_v54 = vpop.permute.xlu0 %135 }
 0x107   :  { %v229_v55 = vpop.f32.mrb[0].mxu1  ;;  %v186_v56 = vpop.f32.mrb[0].mxu0 }
 0x108   :  { %v230_v57 = vadd.f32 %v229_v55, %v131_v53  ;;  %v187_v58 = vadd.f32 %v186_v56, %v131_v53  ;;  %v231_v59 = vpop.f32.mrb[1].mxu1  ;;  %v188_v60 = vpop.f32.mrb[1].mxu0 }
 0x109   :  { %v189_v61 = vadd.f32 %v188_v60, %v131_v53  ;;  %v232_v62 = vpop.f32.mrb[2].mxu1  ;;  %v190_v0 = vpop.f32.mrb[2].mxu0 }
 0x10a   :  { %v238_v63 = vmax.f32 %v230_v57, 0.0  ;;  %v236_v1 = vmax.f32 %v187_v58, 0.0  ;;  %v233_v2 = vadd.f32 %v232_v62, %v136_v54  ;;  %v191_v3 = vadd.f32 %v190_v0, %v136_v54  ;;  %v234_v4 = vpop.f32.mrb[3].mxu1  ;;  %v192_v5 = vpop.f32.mrb[3].mxu0 }
 0x10b   :  { %v237_v6 = vmax.f32 %v189_v61, 0.0  ;;  %v193_v7 = vadd.f32 %v192_v5, %v136_v54 }
 0x10c   :  { %245 = vst.msk [vmem:[%s541_s3 + $0x10] sm:$0xff] %vm244_vm2, %v238_v63  ;;  %242 = vst [vmem:[%s541_s3] sm:$0xff] %v236_v1  ;;  %v241_v8 = vmax.f32 %v233_v2, 0.0  ;;  %v239_v9 = vmax.f32 %v191_v3, 0.0 }
 0x10d   :  { %243 = vst [vmem:[%s541_s3 + $0x8] sm:$0xff] %v237_v6  ;;  %v240_v10 = vmax.f32 %v193_v7, 0.0 }
 0x10e   :  { %249 = vst.msk [vmem:[%s541_s3 + $0x28] sm:$0x1] %vm248_vm3, %v241_v8  ;;  %246 = vst [vmem:[%s541_s3 + $0x18] sm:$0x1] %v239_v9 }
 0x10f   :  { %247 = vst [vmem:[%s541_s3 + $0x20] sm:$0x1] %v240_v10 }

// kernel: net_forward.7
= control target key start
LH: loop header
LB: loop body
LE: loop exit
PB: predicated region body
PF: predicated region fallthrough
CT: control target
= control target key end

     0   :  { %10 = vsyncpa [#allocation4], 0  ;;  %s13686_s18 = smov 0   ;;  %s15375_s0 = inlined_call_operand.vmem [shape: f32[2,1536], index: 0, kind: input, shape index: {}]   ;;  %s15376_s1 = inlined_call_operand.vmem [shape: bf16[3,1536,1536], index: 1, kind: input, shape index: {}]   ;;  %s15377_s2 = inlined_call_operand.vmem [shape: f32[3,1,1536], index: 2, kind: input, shape index: {}]   ;;  %s15378_s3 = inlined_call_operand.vmem [shape: bf16[1536,128], index: 3, kind: input, shape index: {}]   ;;  %s15379_s4 = inlined_call_operand.vmem [shape: f32[1,128], index: 4, kind: input, shape index: {}]   ;;  %s15380_s5 = inlined_call_operand.hbm [shape: f32[2,128], index: 5, kind: output, shape index: {}]  }
   0x1 LB: > { %s13692_s19 = sadd.s32 4294967295, %s13650_s18   ;;  %p10227_p0 = scmp.ge.s32.totalorder %s13650_s18, 1  ;;  %s13650_s18 = sphi %s13686_s18, %s16_s18  }
   0x2   : > { %p192_p1 = scmp.lt.s32.totalorder %s13650_s18, 4 }
   0x4   : > { %p193_p2 = pnand %p10227_p0, %p192_p1 }
   0x5   : > { %p219_p3 = scmp.lt.s32.totalorder (!%p193_p2), %s13692_s19, 2  ;;  %p10229_p4 = scmp.ne.s32.totalorder (!%p193_p2), %s13692_s19, 0 }
   0x6   : > { %196 = sbr.rel (%p193_p2) target bundleno = 1714 (0x6b2), region = 40 }
   0xd   : > { %s220_s20 = scalar_select %p219_p3, %s13692_s19, 2 }
   0xe   : > { %232 = sbr.rel (%p10229_p4) target bundleno = 36 (0x24), region = 44  ;;  %v233_v0 = vld [vmem:[%s15375_s0] sm:$0xff] (!%p10229_p4)  ;;  %v234_v1 = vld [vmem:[%s15375_s0 + $0x8] sm:$0xff] (!%p10229_p4)  ;;  %v243_v2 = vlaneseq (!%p10229_p4)  ;;  %v13652_v3 = vmov (!%p10229_p4), 1983009808   ;;  %v235_v7 = vld [vmem:[%s15375_s0 + $0x10] sm:$0xff] (!%p10229_p4) }
   0xf   : > { %s11764_s21 = smul.u32 9216, %s220_s20  ;;  %v241_v4 = vunpack.c.l.s4 (!%p10229_p4), %v13652_v3  ;;  %v13653_v5 = vmov (!%p10229_p4), 1966171168   ;;  %v239_v9 = vcombine.high (!%p10229_p4), %v233_v0, %v233_v0  ;;  %v256_v11 = vcombine.high (!%p10229_p4), %v234_v1, %v234_v1 }
  0x10   : > { %s11765_s22 = smul.u32 12, %s220_s20  ;;  %v331_v6 = vunpack.c.l.s4 (!%p10229_p4), %v13653_v5  ;;  %v244_v8 = vshrl.u32 (!%p10229_p4), %v243_v2, 7  ;;  %v273_v13 = vcombine.high (!%p10229_p4), %v235_v7, %v235_v7 }
  0x11   : > { %s13701_s25 = scalar_lea.vmem %s15376_s1, %s11764_s21  ;;  %v242_v10 = vunpack.c.0.s8 (!%p10229_p4), %v241_v4 }
  0x12   : > { %s13706_s28 = scalar_lea.vmem %s15377_s2, %s11765_s22  ;;  %v332_v12 = vunpack.c.0.s8 (!%p10229_p4), %v331_v6 }
  0x13   : > { %v245_v14 = vsub.s32 (!%p10229_p4), %v242_v10, %v244_v8 }
  0x14   : > { %v335_v19 = vsub.s32 (!%p10229_p4), %v332_v12, %v244_v8 }
  0x15   : > { %v246_v15 = vrot.slane %v233_v0, %v245_v14  ;;  %v253_v16 = vrot.slane %v239_v9, %v245_v14  ;;  %v263_v17 = vrot.slane %v234_v1, %v245_v14  ;;  %v270_v18 = vrot.slane %v256_v11, %v245_v14 }
  0x16   : > { %v280_v20 = vrot.slane %v235_v7, %v245_v14  ;;  %v287_v21 = vrot.slane %v273_v13, %v245_v14 }
  0x17   : > { %v254_v22 = vcombine.high %v246_v15, %v246_v15  ;;  %v255_v23 = vcombine.high %v253_v16, %v253_v16  ;;  %v271_v24 = vcombine.high %v263_v17, %v263_v17  ;;  %v272_v25 = vcombine.high %v270_v18, %v270_v18 }
  0x18   : > { %v288_v26 = vcombine.high %v280_v20, %v280_v20  ;;  %v289_v27 = vcombine.high %v287_v21, %v287_v21 }
  0x19   : > { %v10230_v28 = vpack.c.bf16 %v254_v22, %v246_v15  ;;  %v10231_v29 = vpack.c.bf16 %v255_v23, %v253_v16  ;;  %v10232_v30 = vpack.c.bf16 %v271_v24, %v263_v17  ;;  %v10233_v31 = vpack.c.bf16 %v272_v25, %v270_v18 }
  0x1a   : > { %v10234_v32 = vpack.c.bf16 %v288_v26, %v280_v20  ;;  %v10235_v33 = vpack.c.bf16 %v289_v27, %v287_v21 }
  0x1b   : > { %v336_v34 = vrot.slane %v10230_v28, %v335_v19  ;;  %v343_v35 = vrot.slane %v10231_v29, %v335_v19  ;;  %v350_v36 = vrot.slane %v10232_v30, %v335_v19  ;;  %v357_v37 = vrot.slane %v10233_v31, %v335_v19 }
  0x1c   : > { %v383_v38 = vrot.slane %v10234_v32, %v335_v19  ;;  %v390_v39 = vrot.slane %v10235_v33, %v335_v19 }
  0x1d   : > { %v358_v40 = vcombine.low %v336_v34, %v343_v35  ;;  %v359_v41 = vcombine.low %v350_v36, %v357_v37 }
  0x1e   : > { %v391_v42 = vcombine.low %v383_v38, %v390_v39 }
  0x1f   : > { %v366_v43 = vrot.slane %v358_v40, %v335_v19  ;;  %v373_v44 = vrot.slane %v359_v41, %v335_v19 }
  0x20   : > { %10236 = vst.sshfl [vmem:[#allocation2 + $0x8] sm:$0x55 pattern:$0x73625140] %v391_v42 }
  0x21   : > { %v374_v45 = vcombine.low %v366_v43, %v373_v44 }
  0x23   : > { %401 = vst [vmem:[#allocation2] sm:$0xff] %v374_v45 }
  0x24 PF: > { %v11787_v46 = vld [vmem:[%s13701_s25 + $0x4] ss:$48 sps:$4 sm:$0xff]   ;;  %v11789_v47 = vld [vmem:[%s13701_s25 + $0xc] ss:$48 sps:$4 sm:$0xff]   ;;  %v11791_v48 = vld [vmem:[%s13701_s25] ss:$48 sps:$4 sm:$0xff]   ;;  %v1561_v18 = vlaneseq }
  0x25   : > { %7468 = vmatprep.subr.bf16.mxu0 %v11787_v46  ;;  %v11792_v49 = vld [vmem:[%s13701_s25 + $0x8] ss:$48 sps:$4 sm:$0xff]   ;;  %7714 = vmatprep.subr.bf16.mxu1 %v11789_v47  ;;  %v11793_v50 = vld [vmem:[%s13701_s25 + $0x64] ss:$48 sps:$4 sm:$0xff]   ;;  %v11795_v51 = vld [vmem:[%s13701_s25 + $0x6c] ss:$48 sps:$4 sm:$0xff]  }
  0x26   : > { %7469 = vmatpush1.bf16.msra.mxu0 %v11791_v48  ;;  %7715 = vmatpush1.bf16.msra.mxu1 %v11792_v49  ;;  %v11797_v52 = vld [vmem:[%s13701_s25 + $0x60] ss:$48 sps:$4 sm:$0xff]   ;;  %v11798_v53 = vld [vmem:[%s13701_s25 + $0x68] ss:$48 sps:$4 sm:$0xff]   ;;  %v11799_v54 = vld [vmem:[%s13701_s25 + $0xc4] ss:$48 sps:$4 sm:$0xff]  }
  0x27   : > { %7470 = vmatprep.subr.bf16.mxu0 %v11793_v50  ;;  %7716 = vmatprep.subr.bf16.mxu1 %v11795_v51  ;;  %v11801_v55 = vld [vmem:[%s13701_s25 + $0xcc] ss:$48 sps:$4 sm:$0xff]   ;;  %v11803_v56 = vld [vmem:[%s13701_s25 + $0xc0] ss:$48 sps:$4 sm:$0xff]   ;;  %v11804_v57 = vld [vmem:[%s13701_s25 + $0xc8] ss:$48 sps:$4 sm:$0xff]  }
  0x28   : > { %v11805_v58 = vld [vmem:[%s13701_s25 + $0x124] ss:$48 sps:$4 sm:$0xff]   ;;  %v11807_v59 = vld [vmem:[%s13701_s25 + $0x12c] ss:$48 sps:$4 sm:$0xff]   ;;  %v11809_v60 = vld [vmem:[%s13701_s25 + $0x120] ss:$48 sps:$4 sm:$0xff]  }
  0x29   : > { %v11810_v61 = vld [vmem:[%s13701_s25 + $0x128] ss:$48 sps:$4 sm:$0xff]   ;;  %v11811_v62 = vld [vmem:[%s13701_s25 + $0x184] ss:$48 sps:$4 sm:$0xff]   ;;  %v11813_v63 = vld [vmem:[%s13701_s25 + $0x18c] ss:$48 sps:$4 sm:$0xff]  }
  0x2a   : > { %7471 = vmatpush1.bf16.msra.mxu0 %v11797_v52  ;;  %7717 = vmatpush1.bf16.msra.mxu1 %v11798_v53  ;;  %v11815_v0 = vld [vmem:[%s13701_s25 + $0x180] ss:$48 sps:$4 sm:$0xff]   ;;  %v11816_v1 = vld [vmem:[%s13701_s25 + $0x188] ss:$48 sps:$4 sm:$0xff]   ;;  %v11817_v2 = vld [vmem:[%s13701_s25 + $0x1e4] ss:$48 sps:$4 sm:$0xff]  }
  0x2b   : > { %7472 = vmatprep.subr.bf16.mxu0 %v11799_v54  ;;  %7718 = vmatprep.subr.bf16.mxu1 %v11801_v55  ;;  %v11819_v3 = vld [vmem:[%s13701_s25 + $0x1ec] ss:$48 sps:$4 sm:$0xff]   ;;  %v11821_v4 = vld [vmem:[%s13701_s25 + $0x1e0] ss:$48 sps:$4 sm:$0xff]   ;;  %v11822_v5 = vld [vmem:[%s13701_s25 + $0x1e8] ss:$48 sps:$4 sm:$0xff]  }
  0x2c   : > { %v11823_v6 = vld [vmem:[%s13701_s25 + $0x244] ss:$48 sps:$4 sm:$0xff]   ;;  %v11825_v7 = vld [vmem:[%s13701_s25 + $0x24c] ss:$48 sps:$4 sm:$0xff]   ;;  %v11827_v8 = vld [vmem:[%s13701_s25 + $0x240] ss:$48 sps:$4 sm:$0xff]  }
  0x2d   : > { %v11828_v9 = vld [vmem:[%s13701_s25 + $0x248] ss:$48 sps:$4 sm:$0xff]   ;;  %v11829_v10 = vld [vmem:[%s13701_s25 + $0x2a4] ss:$48 sps:$4 sm:$0xff]   ;;  %v11831_v11 = vld [vmem:[%s13701_s25 + $0x2ac] ss:$48 sps:$4 sm:$0xff]  }
  0x2e   : > { %7473 = vmatpush1.bf16.msra.mxu0 %v11803_v56  ;;  %7719 = vmatpush1.bf16.msra.mxu1 %v11804_v57  ;;  %v11833_v12 = vld [vmem:[%s13701_s25 + $0x2a0] ss:$48 sps:$4 sm:$0xff]   ;;  %v11834_v13 = vld [vmem:[%s13701_s25 + $0x2a8] ss:$48 sps:$4 sm:$0xff]   ;;  %v11835_v14 = vld [vmem:[%s13701_s25 + $0x304] ss:$48 sps:$4 sm:$0xff]  }
  0x2f   : > { %7474 = vmatprep.subr.bf16.mxu0 %v11805_v58  ;;  %7720 = vmatprep.subr.bf16.mxu1 %v11807_v59  ;;  %v11837_v15 = vld [vmem:[%s13701_s25 + $0x30c] ss:$48 sps:$4 sm:$0xff]   ;;  %v11839_v16 = vld [vmem:[%s13701_s25 + $0x300] ss:$48 sps:$4 sm:$0xff]   ;;  %v11840_v17 = vld [vmem:[%s13701_s25 + $0x308] ss:$48 sps:$4 sm:$0xff]  }
  0x30   : > { %v13654_v19 = vmov 1966171168   ;;  %v11841_v21 = vld [vmem:[%s13701_s25 + $0x364] ss:$48 sps:$4 sm:$0xff]   ;;  %v11843_v22 = vld [vmem:[%s13701_s25 + $0x36c] ss:$48 sps:$4 sm:$0xff]  }
  0x31   : > { %v1625_v20 = vunpack.c.l.s4 %v13654_v19  ;;  %v11845_v23 = vld [vmem:[%s13701_s25 + $0x360] ss:$48 sps:$4 sm:$0xff]   ;;  %v13757_v24 = vshrl.u32 %v1561_v18, 7  ;;  %v11846_v26 = vld [vmem:[%s13701_s25 + $0x368] ss:$48 sps:$4 sm:$0xff]   ;;  %p11397_p5 = scmp.ne.s32.totalorder %s13692_s19, 2 }
  0x32   : > { %7475 = vmatpush1.bf16.msra.mxu0 %v11809_v60  ;;  %7721 = vmatpush1.bf16.msra.mxu1 %v11810_v61  ;;  %v11847_v27 = vld [vmem:[%s13701_s25 + $0x3c4] ss:$48 sps:$4 sm:$0xff]   ;;  %v11849_v28 = vld [vmem:[%s13701_s25 + $0x3cc] ss:$48 sps:$4 sm:$0xff]   ;;  %v11851_v29 = vld [vmem:[%s13701_s25 + $0x3c0] ss:$48 sps:$4 sm:$0xff]  }
  0x33   : > { %7476 = vmatprep.subr.bf16.mxu0 %v11811_v62  ;;  %7722 = vmatprep.subr.bf16.mxu1 %v11813_v63  ;;  %v1626_v25 = vunpack.c.0.s8 %v1625_v20  ;;  %v11852_v30 = vld [vmem:[%s13701_s25 + $0x3c8] ss:$48 sps:$4 sm:$0xff]   ;;  %v11853_v32 = vld [vmem:[%s13701_s25 + $0x424] ss:$48 sps:$4 sm:$0xff]   ;;  %v11855_v33 = vld [vmem:[%s13701_s25 + $0x42c] ss:$48 sps:$4 sm:$0xff]  }
  0x34   : > { %v13769_v34 = vld [vmem:[#allocation2] sm:$0xff]  ;;  %v11858_v37 = vld [vmem:[%s13701_s25 + $0x428] ss:$48 sps:$4 sm:$0xff]   ;;  %v11861_v39 = vld [vmem:[%s13701_s25 + $0x48c] ss:$48 sps:$4 sm:$0xff]  }
  0x35   : > { %v13765_v31 = vsub.s32 %v1626_v25, %v13757_v24  ;;  %v11857_v35 = vld [vmem:[%s13701_s25 + $0x420] ss:$48 sps:$4 sm:$0xff]   ;;  %v11859_v38 = vld [vmem:[%s13701_s25 + $0x484] ss:$48 sps:$4 sm:$0xff]   ;;  %v11864_v43 = vld [vmem:[%s13701_s25 + $0x488] ss:$48 sps:$4 sm:$0xff]  }
  0x36   : > { %7477 = vmatpush1.bf16.msra.mxu0 %v11815_v0  ;;  %7723 = vmatpush1.bf16.msra.mxu1 %v11816_v1  ;;  %v11863_v41 = vld [vmem:[%s13701_s25 + $0x480] ss:$48 sps:$4 sm:$0xff]   ;;  %v11865_v44 = vld [vmem:[%s13701_s25 + $0x4e4] ss:$48 sps:$4 sm:$0xff]   ;;  %v11867_v45 = vld [vmem:[%s13701_s25 + $0x4ec] ss:$48 sps:$4 sm:$0xff]  }
  0x37   : > { %7478 = vmatprep.subr.bf16.mxu0 %v11817_v2  ;;  %7724 = vmatprep.subr.bf16.mxu1 %v11819_v3  ;;  %v1630_v36 = vrot.slane %v13769_v34, %v13765_v31  ;;  %v11869_v46 = vld [vmem:[%s13701_s25 + $0x4e0] ss:$48 sps:$4 sm:$0xff]   ;;  %v11870_v47 = vld [vmem:[%s13701_s25 + $0x4e8] ss:$48 sps:$4 sm:$0xff]   ;;  %v11871_v48 = vld [vmem:[%s13701_s25 + $0x544] ss:$48 sps:$4 sm:$0xff]  }
  0x38   : > { %v11873_v49 = vld [vmem:[%s13701_s25 + $0x54c] ss:$48 sps:$4 sm:$0xff]   ;;  %v11875_v50 = vld [vmem:[%s13701_s25 + $0x540] ss:$48 sps:$4 sm:$0xff]   ;;  %v11876_v51 = vld [vmem:[%s13701_s25 + $0x548] ss:$48 sps:$4 sm:$0xff]  }
  0x39   : > { %v1638_v40 = vcombine.high %v1630_v36, %v1630_v36  ;;  %v11877_v52 = vld [vmem:[%s13701_s25 + $0x5a4] ss:$48 sps:$4 sm:$0xff]   ;;  %v11879_v53 = vld [vmem:[%s13701_s25 + $0x5ac] ss:$48 sps:$4 sm:$0xff]   ;;  %v11881_v54 = vld [vmem:[%s13701_s25 + $0x5a0] ss:$48 sps:$4 sm:$0xff]   ;;  %v13800_v59 = vrot.slane %v1630_v36, %v13765_v31 }
  0x3a   : > { %7479 = vmatpush1.bf16.msra.mxu0 %v11821_v4  ;;  %7725 = vmatpush1.bf16.msra.mxu1 %v11822_v5  ;;  %v11882_v55 = vld [vmem:[%s13701_s25 + $0x5a8] ss:$48 sps:$4 sm:$0xff]   ;;  %v11885_v56 = vld [vmem:[%s13701_s25 + $0x604] ss:$48 sps:$4 sm:$0xff]   ;;  %v11888_v57 = vld [vmem:[%s13701_s25 + $0x60c] ss:$48 sps:$4 sm:$0xff]  }
  0x3b   : > { %7480 = vmatprep.subr.bf16.mxu0 %v11823_v6  ;;  %7726 = vmatprep.subr.bf16.mxu1 %v11825_v7  ;;  %v13779_v42 = vrot.slane %v1638_v40, %v13765_v31  ;;  %v11883_v58 = vld [vmem:[%s13701_s25 + $0x600] ss:$48 sps:$4 sm:$0xff]   ;;  %v11886_v60 = vld [vmem:[%s13701_s25 + $0x608] ss:$48 sps:$4 sm:$0xff]   ;;  %v11891_v61 = vld [vmem:[%s13701_s25 + $0x664] ss:$48 sps:$4 sm:$0xff]  }
  0x3c   : > { %v11894_v62 = vld [vmem:[%s13701_s25 + $0x66c] ss:$48 sps:$4 sm:$0xff]   ;;  %v11889_v0 = vld [vmem:[%s13701_s25 + $0x660] ss:$48 sps:$4 sm:$0xff]   ;;  %v11892_v1 = vld [vmem:[%s13701_s25 + $0x668] ss:$48 sps:$4 sm:$0xff]  }
  0x3d   : > { %7500 = vmatprep.mubr.bf16.mxu0 %v13779_v42  ;;  %7746 = vmatprep.mubr.bf16.mxu1 %v13779_v42  ;;  %v13807_v63 = vcombine.high %v13779_v42, %v13779_v42  ;;  %v11897_v2 = vld [vmem:[%s13701_s25 + $0x6c4] ss:$48 sps:$4 sm:$0xff]   ;;  %v11900_v3 = vld [vmem:[%s13701_s25 + $0x6cc] ss:$48 sps:$4 sm:$0xff]   ;;  %v11895_v4 = vld [vmem:[%s13701_s25 + $0x6c0] ss:$48 sps:$4 sm:$0xff]  }
  0x3e   : > { %7481 = vmatpush1.bf16.msra.mxu0 %v11827_v8  ;;  %7727 = vmatpush1.bf16.msra.mxu1 %v11828_v9  ;;  %v11898_v5 = vld [vmem:[%s13701_s25 + $0x6c8] ss:$48 sps:$4 sm:$0xff]   ;;  %v11903_v6 = vld [vmem:[%s13701_s25 + $0x724] ss:$48 sps:$4 sm:$0xff]   ;;  %v11906_v7 = vld [vmem:[%s13701_s25 + $0x72c] ss:$48 sps:$4 sm:$0xff]  }
  0x3f   : > { %7482 = vmatprep.subr.bf16.mxu0 %v11829_v10  ;;  %7728 = vmatprep.subr.bf16.mxu1 %v11831_v11  ;;  %v11901_v8 = vld [vmem:[%s13701_s25 + $0x720] ss:$48 sps:$4 sm:$0xff]   ;;  %v11904_v9 = vld [vmem:[%s13701_s25 + $0x728] ss:$48 sps:$4 sm:$0xff]   ;;  %v11909_v10 = vld [vmem:[%s13701_s25 + $0x784] ss:$48 sps:$4 sm:$0xff]  }
  0x40   : > { %v11912_v11 = vld [vmem:[%s13701_s25 + $0x78c] ss:$48 sps:$4 sm:$0xff]   ;;  %v11921_v18 = vld [vmem:[%s13701_s25 + $0x844] ss:$48 sps:$4 sm:$0xff]   ;;  %v11919_v20 = vld [vmem:[%s13701_s25 + $0x840] ss:$48 sps:$4 sm:$0xff]  }
  0x41   : > { %v11924_v19 = vld [vmem:[%s13701_s25 + $0x84c] ss:$48 sps:$4 sm:$0xff]   ;;  %v11925_v25 = vld [vmem:[%s13701_s25 + $0x8a0] ss:$48 sps:$4 sm:$0xff]   ;;  %v11940_v36 = vld [vmem:[%s13701_s25 + $0x968] ss:$48 sps:$4 sm:$0xff]  }
  0x42   : > { %7483 = vmatpush1.bf16.msra.mxu0 %v11833_v12  ;;  %7729 = vmatpush1.bf16.msra.mxu1 %v11834_v13  ;;  %v11907_v12 = vld [vmem:[%s13701_s25 + $0x780] ss:$48 sps:$4 sm:$0xff]   ;;  %v11910_v13 = vld [vmem:[%s13701_s25 + $0x788] ss:$48 sps:$4 sm:$0xff]  }
  0x43   : > { %7484 = vmatprep.subr.bf16.mxu0 %v11835_v14  ;;  %7730 = vmatprep.subr.bf16.mxu1 %v11837_v15  ;;  %v11915_v14 = vld [vmem:[%s13701_s25 + $0x7e4] ss:$48 sps:$4 sm:$0xff]   ;;  %v11918_v15 = vld [vmem:[%s13701_s25 + $0x7ec] ss:$48 sps:$4 sm:$0xff]   ;;  %v11946_v40 = vld [vmem:[%s13701_s25 + $0x9c8] ss:$48 sps:$4 sm:$0xff]  }
  0x46   : > { %7485 = vmatpush1.bf16.msra.mxu0 %v11839_v16  ;;  %7731 = vmatpush1.bf16.msra.mxu1 %v11840_v17  ;;  %v11913_v16 = vld [vmem:[%s13701_s25 + $0x7e0] ss:$48 sps:$4 sm:$0xff]   ;;  %v11916_v17 = vld [vmem:[%s13701_s25 + $0x7e8] ss:$48 sps:$4 sm:$0xff]  }
  0x47   : > { %7486 = vmatprep.subr.bf16.mxu0 %v11841_v21  ;;  %7732 = vmatprep.subr.bf16.mxu1 %v11843_v22  ;;  %v11922_v21 = vld [vmem:[%s13701_s25 + $0x848] ss:$48 sps:$4 sm:$0xff]   ;;  %v11927_v22 = vld [vmem:[%s13701_s25 + $0x8a4] ss:$48 sps:$4 sm:$0xff]  }
  0x4a   : > { %7487 = vmatpush1.bf16.msra.mxu0 %v11845_v23  ;;  %7733 = vmatpush1.bf16.msra.mxu1 %v11846_v26  ;;  %v11930_v23 = vld [vmem:[%s13701_s25 + $0x8ac] ss:$48 sps:$4 sm:$0xff]   ;;  %v11928_v26 = vld [vmem:[%s13701_s25 + $0x8a8] ss:$48 sps:$4 sm:$0xff]  }
  0x4b   : > { %7488 = vmatprep.subr.bf16.mxu0 %v11847_v27  ;;  %7734 = vmatprep.subr.bf16.mxu1 %v11849_v28  ;;  %v11933_v27 = vld [vmem:[%s13701_s25 + $0x904] ss:$48 sps:$4 sm:$0xff]   ;;  %v11936_v28 = vld [vmem:[%s13701_s25 + $0x90c] ss:$48 sps:$4 sm:$0xff]  }
  0x4e   : > { %7489 = vmatpush1.bf16.msra.mxu0 %v11851_v29  ;;  %7735 = vmatpush1.bf16.msra.mxu1 %v11852_v30  ;;  %v11931_v29 = vld [vmem:[%s13701_s25 + $0x900] ss:$48 sps:$4 sm:$0xff]   ;;  %v11934_v30 = vld [vmem:[%s13701_s25 + $0x908] ss:$48 sps:$4 sm:$0xff]  }
  0x4f   : > { %7490 = vmatprep.subr.bf16.mxu0 %v11853_v32  ;;  %7736 = vmatprep.subr.bf16.mxu1 %v11855_v33  ;;  %v11939_v32 = vld [vmem:[%s13701_s25 + $0x964] ss:$48 sps:$4 sm:$0xff]   ;;  %v11942_v33 = vld [vmem:[%s13701_s25 + $0x96c] ss:$48 sps:$4 sm:$0xff]  }
  0x52   : > { %7491 = vmatpush1.bf16.msra.mxu0 %v11857_v35  ;;  %7737 = vmatpush1.bf16.msra.mxu1 %v11858_v37  ;;  %v11937_v35 = vld [vmem:[%s13701_s25 + $0x960] ss:$48 sps:$4 sm:$0xff]   ;;  %v11945_v37 = vld [vmem:[%s13701_s25 + $0x9c4] ss:$48 sps:$4 sm:$0xff]  }
  0x53   : > { %7492 = vmatprep.subr.bf16.mxu0 %v11859_v38  ;;  %7738 = vmatprep.subr.bf16.mxu1 %v11861_v39  ;;  %v11948_v38 = vld [vmem:[%s13701_s25 + $0x9cc] ss:$48 sps:$4 sm:$0xff]   ;;  %v11943_v39 = vld [vmem:[%s13701_s25 + $0x9c0] ss:$48 sps:$4 sm:$0xff]  }
  0x56   : > { %7493 = vmatpush1.bf16.msra.mxu0 %v11863_v41  ;;  %7739 = vmatpush1.bf16.msra.mxu1 %v11864_v43  ;;  %v11951_v41 = vld [vmem:[%s13701_s25 + $0xa24] ss:$48 sps:$4 sm:$0xff]   ;;  %v11954_v43 = vld [vmem:[%s13701_s25 + $0xa2c] ss:$48 sps:$4 sm:$0xff]  }
  0x57   : > { %7494 = vmatprep.subr.bf16.mxu0 %v11865_v44  ;;  %7740 = vmatprep.subr.bf16.mxu1 %v11867_v45  ;;  %v11949_v44 = vld [vmem:[%s13701_s25 + $0xa20] ss:$48 sps:$4 sm:$0xff]   ;;  %v11952_v45 = vld [vmem:[%s13701_s25 + $0xa28] ss:$48 sps:$4 sm:$0xff]  }
  0x5a   : > { %7495 = vmatpush1.bf16.msra.mxu0 %v11869_v46  ;;  %7741 = vmatpush1.bf16.msra.mxu1 %v11870_v47  ;;  %v11957_v46 = vld [vmem:[%s13701_s25 + $0xa84] ss:$48 sps:$4 sm:$0xff]   ;;  %v11960_v47 = vld [vmem:[%s13701_s25 + $0xa8c] ss:$48 sps:$4 sm:$0xff]  }
  0x5b   : > { %7496 = vmatprep.subr.bf16.mxu0 %v11871_v48  ;;  %7742 = vmatprep.subr.bf16.mxu1 %v11873_v49  ;;  %v11955_v48 = vld [vmem:[%s13701_s25 + $0xa80] ss:$48 sps:$4 sm:$0xff]   ;;  %v11958_v49 = vld [vmem:[%s13701_s25 + $0xa88] ss:$48 sps:$4 sm:$0xff]  }
  0x5e   : > { %7497 = vmatpush1.bf16.msra.mxu0 %v11875_v50  ;;  %7743 = vmatpush1.bf16.msra.mxu1 %v11876_v51  ;;  %v11963_v50 = vld [vmem:[%s13701_s25 + $0xae4] ss:$48 sps:$4 sm:$0xff]   ;;  %v11966_v51 = vld [vmem:[%s13701_s25 + $0xaec] ss:$48 sps:$4 sm:$0xff]  }
  0x5f   : > { %7498 = vmatprep.subr.bf16.mxu0 %v11877_v52  ;;  %7744 = vmatprep.subr.bf16.mxu1 %v11879_v53  ;;  %v11961_v52 = vld [vmem:[%s13701_s25 + $0xae0] ss:$48 sps:$4 sm:$0xff]   ;;  %v11964_v53 = vld [vmem:[%s13701_s25 + $0xae8] ss:$48 sps:$4 sm:$0xff]  }
  0x62   : > { %7499 = vmatpush1.bf16.msra.mxu0 %v11881_v54  ;;  %7745 = vmatpush1.bf16.msra.mxu1 %v11882_v55  ;;  %v11969_v54 = vld [vmem:[%s13701_s25 + $0xb44] ss:$48 sps:$4 sm:$0xff]   ;;  %v11972_v55 = vld [vmem:[%s13701_s25 + $0xb4c] ss:$48 sps:$4 sm:$0xff]  }
  0x63   : > { %7509 = vmatprep.subr.bf16.mxu0 %v11885_v56  ;;  %7755 = vmatprep.subr.bf16.mxu1 %v11888_v57  ;;  %v1623_v56 = vcombine.high %v13769_v34, %v13769_v34  ;;  %v11967_v57 = vld [vmem:[%s13701_s25 + $0xb40] ss:$48 sps:$4 sm:$0xff]   ;;  %v11976_v34 = vld [vmem:[%s13701_s25 + $0xba8] ss:$48 sps:$4 sm:$0xff]  }
  0x65   : > { %7501 = vmatmul.mubr.bf16.vlgmr.msra.gmra.mrb[0].mxu0 %v13800_v59  ;;  %7747 = vmatmul.mubr.bf16.vlgmr.msra.gmra.mrb[0].mxu1 %v13800_v59 }
  0x66   : > { %7510 = vmatpush1.bf16.msra.mxu0 %v11883_v58  ;;  %7756 = vmatpush1.bf16.msra.mxu1 %v11886_v60  ;;  %v11970_v58 = vld [vmem:[%s13701_s25 + $0xb48] ss:$48 sps:$4 sm:$0xff]   ;;  %v11975_v60 = vld [vmem:[%s13701_s25 + $0xba4] ss:$48 sps:$4 sm:$0xff]  }
  0x67   : > { %7511 = vmatprep.subr.bf16.mxu0 %v11891_v61  ;;  %7757 = vmatprep.subr.bf16.mxu1 %v11894_v62  ;;  %v11978_v61 = vld [vmem:[%s13701_s25 + $0xbac] ss:$48 sps:$4 sm:$0xff]   ;;  %v13872_v62 = vrot.slane %v1623_v56, %v13765_v31  ;;  %v12053_v56 = vld [vmem:[%s13701_s25 + $0x1084] ss:$48 sps:$4 sm:$0xff]  }
  0x68   : > { %7541 = vmatprep.mubr.bf16.mxu0 %v13807_v63  ;;  %7787 = vmatprep.mubr.bf16.mxu1 %v13807_v63 }
  0x6a   : > { %7512 = vmatpush1.bf16.msra.mxu0 %v11889_v0  ;;  %7758 = vmatpush1.bf16.msra.mxu1 %v11892_v1  ;;  %v11973_v0 = vld [vmem:[%s13701_s25 + $0xba0] ss:$48 sps:$4 sm:$0xff]   ;;  %v11981_v1 = vld [vmem:[%s13701_s25 + $0xc04] ss:$48 sps:$4 sm:$0xff]  }
  0x6b   : > { %7513 = vmatprep.subr.bf16.mxu0 %v11897_v2  ;;  %7759 = vmatprep.subr.bf16.mxu1 %v11900_v3  ;;  %v11984_v2 = vld [vmem:[%s13701_s25 + $0xc0c] ss:$48 sps:$4 sm:$0xff]   ;;  %v1639_v3 = vcombine.high %v13872_v62, %v13872_v62 }
  0x6e   : > { %7514 = vmatpush1.bf16.msra.mxu0 %v11895_v4  ;;  %7760 = vmatpush1.bf16.msra.mxu1 %v11898_v5  ;;  %v11979_v4 = vld [vmem:[%s13701_s25 + $0xc00] ss:$48 sps:$4 sm:$0xff]   ;;  %v13883_v5 = vcombine.high %v13800_v59, %v13800_v59 }
  0x6f   : > { %7515 = vmatprep.subr.bf16.mxu0 %v11903_v6  ;;  %7761 = vmatprep.subr.bf16.mxu1 %v11906_v7  ;;  %v11982_v6 = vld [vmem:[%s13701_s25 + $0xc08] ss:$48 sps:$4 sm:$0xff]   ;;  %v11987_v7 = vld [vmem:[%s13701_s25 + $0xc64] ss:$48 sps:$4 sm:$0xff]  }
  0x72   : > { %7516 = vmatpush1.bf16.msra.mxu0 %v11901_v8  ;;  %7762 = vmatpush1.bf16.msra.mxu1 %v11904_v9  ;;  %v11990_v8 = vld [vmem:[%s13701_s25 + $0xc6c] ss:$48 sps:$4 sm:$0xff]   ;;  %v13889_v9 = vrot.slane %v1639_v3, %v13765_v31 }
  0x73   : > { %7517 = vmatprep.subr.bf16.mxu0 %v11909_v10  ;;  %7763 = vmatprep.subr.bf16.mxu1 %v11912_v11  ;;  %v11985_v10 = vld [vmem:[%s13701_s25 + $0xc60] ss:$48 sps:$4 sm:$0xff]   ;;  %v11988_v11 = vld [vmem:[%s13701_s25 + $0xc68] ss:$48 sps:$4 sm:$0xff]   ;;  %v12068_v3 = vld [vmem:[%s13701_s25 + $0x114c] ss:$48 sps:$4 sm:$0xff]  }
  0x76   : > { %7518 = vmatpush1.bf16.msra.mxu0 %v11907_v12  ;;  %7764 = vmatpush1.bf16.msra.mxu1 %v11910_v13  ;;  %v11993_v12 = vld [vmem:[%s13701_s25 + $0xcc4] ss:$48 sps:$4 sm:$0xff]   ;;  %v11996_v13 = vld [vmem:[%s13701_s25 + $0xccc] ss:$48 sps:$4 sm:$0xff]  }
  0x77   : > { %7519 = vmatprep.subr.bf16.mxu0 %v11915_v14  ;;  %7765 = vmatprep.subr.bf16.mxu1 %v11918_v15  ;;  %v11991_v14 = vld [vmem:[%s13701_s25 + $0xcc0] ss:$48 sps:$4 sm:$0xff]   ;;  %v11994_v15 = vld [vmem:[%s13701_s25 + $0xcc8] ss:$48 sps:$4 sm:$0xff]  }
  0x7a   : > { %7520 = vmatpush1.bf16.msra.mxu0 %v11913_v16  ;;  %7766 = vmatpush1.bf16.msra.mxu1 %v11916_v17  ;;  %v11999_v16 = vld [vmem:[%s13701_s25 + $0xd24] ss:$48 sps:$4 sm:$0xff]   ;;  %v12002_v17 = vld [vmem:[%s13701_s25 + $0xd2c] ss:$48 sps:$4 sm:$0xff]  }
  0x7b   : > { %7521 = vmatprep.subr.bf16.mxu0 %v11921_v18  ;;  %7767 = vmatprep.subr.bf16.mxu1 %v11924_v19  ;;  %v11997_v18 = vld [vmem:[%s13701_s25 + $0xd20] ss:$48 sps:$4 sm:$0xff]   ;;  %v12000_v19 = vld [vmem:[%s13701_s25 + $0xd28] ss:$48 sps:$4 sm:$0xff]  }
  0x7e   : > { %7522 = vmatpush1.bf16.msra.mxu0 %v11919_v20  ;;  %7768 = vmatpush1.bf16.msra.mxu1 %v11922_v21  ;;  %v12005_v20 = vld [vmem:[%s13701_s25 + $0xd84] ss:$48 sps:$4 sm:$0xff]   ;;  %v12008_v21 = vld [vmem:[%s13701_s25 + $0xd8c] ss:$48 sps:$4 sm:$0xff]  }
  0x7f   : > { %7523 = vmatprep.subr.bf16.mxu0 %v11927_v22  ;;  %7769 = vmatprep.subr.bf16.mxu1 %v11930_v23  ;;  %v12003_v22 = vld [vmem:[%s13701_s25 + $0xd80] ss:$48 sps:$4 sm:$0xff]   ;;  %v12006_v23 = vld [vmem:[%s13701_s25 + $0xd88] ss:$48 sps:$4 sm:$0xff]  }
  0x82   : > { %7524 = vmatpush1.bf16.msra.mxu0 %v11925_v25  ;;  %7770 = vmatpush1.bf16.msra.mxu1 %v11928_v26  ;;  %v12011_v25 = vld [vmem:[%s13701_s25 + $0xde4] ss:$48 sps:$4 sm:$0xff]   ;;  %v12014_v26 = vld [vmem:[%s13701_s25 + $0xdec] ss:$48 sps:$4 sm:$0xff]  }
  0x83   : > { %7525 = vmatprep.subr.bf16.mxu0 %v11933_v27  ;;  %7771 = vmatprep.subr.bf16.mxu1 %v11936_v28  ;;  %v12009_v27 = vld [vmem:[%s13701_s25 + $0xde0] ss:$48 sps:$4 sm:$0xff]   ;;  %v12012_v28 = vld [vmem:[%s13701_s25 + $0xde8] ss:$48 sps:$4 sm:$0xff]  }
  0x86   : > { %7526 = vmatpush1.bf16.msra.mxu0 %v11931_v29  ;;  %7772 = vmatpush1.bf16.msra.mxu1 %v11934_v30  ;;  %v12017_v29 = vld [vmem:[%s13701_s25 + $0xe44] ss:$48 sps:$4 sm:$0xff]   ;;  %v12020_v30 = vld [vmem:[%s13701_s25 + $0xe4c] ss:$48 sps:$4 sm:$0xff]  }
  0x87   : > { %7527 = vmatprep.subr.bf16.mxu0 %v11939_v32  ;;  %7773 = vmatprep.subr.bf16.mxu1 %v11942_v33  ;;  %v12015_v32 = vld [vmem:[%s13701_s25 + $0xe40] ss:$48 sps:$4 sm:$0xff]   ;;  %v12018_v33 = vld [vmem:[%s13701_s25 + $0xe48] ss:$48 sps:$4 sm:$0xff]  }
  0x8a   : > { %7528 = vmatpush1.bf16.msra.mxu0 %v11937_v35  ;;  %7774 = vmatpush1.bf16.msra.mxu1 %v11940_v36  ;;  %v12023_v35 = vld [vmem:[%s13701_s25 + $0xea4] ss:$48 sps:$4 sm:$0xff]   ;;  %v12026_v36 = vld [vmem:[%s13701_s25 + $0xeac] ss:$48 sps:$4 sm:$0xff]  }
  0x8b   : > { %7529 = vmatprep.subr.bf16.mxu0 %v11945_v37  ;;  %7775 = vmatprep.subr.bf16.mxu1 %v11948_v38  ;;  %v12021_v37 = vld [vmem:[%s13701_s25 + $0xea0] ss:$48 sps:$4 sm:$0xff]   ;;  %v12024_v38 = vld [vmem:[%s13701_s25 + $0xea8] ss:$48 sps:$4 sm:$0xff]  }
  0x8e   : > { %7530 = vmatpush1.bf16.msra.mxu0 %v11943_v39  ;;  %7776 = vmatpush1.bf16.msra.mxu1 %v11946_v40  ;;  %v12029_v39 = vld [vmem:[%s13701_s25 + $0xf04] ss:$48 sps:$4 sm:$0xff]   ;;  %v12032_v40 = vld [vmem:[%s13701_s25 + $0xf0c] ss:$48 sps:$4 sm:$0xff]  }
  0x8f   : > { %7531 = vmatprep.subr.bf16.mxu0 %v11951_v41  ;;  %7777 = vmatprep.subr.bf16.mxu1 %v11954_v43  ;;  %v12027_v41 = vld [vmem:[%s13701_s25 + $0xf00] ss:$48 sps:$4 sm:$0xff]   ;;  %v12030_v43 = vld [vmem:[%s13701_s25 + $0xf08] ss:$48 sps:$4 sm:$0xff]  }
  0x92   : > { %7532 = vmatpush1.bf16.msra.mxu0 %v11949_v44  ;;  %7778 = vmatpush1.bf16.msra.mxu1 %v11952_v45  ;;  %v12035_v44 = vld [vmem:[%s13701_s25 + $0xf64] ss:$48 sps:$4 sm:$0xff]   ;;  %v12038_v45 = vld [vmem:[%s13701_s25 + $0xf6c] ss:$48 sps:$4 sm:$0xff]  }
  0x93   : > { %7533 = vmatprep.subr.bf16.mxu0 %v11957_v46  ;;  %7779 = vmatprep.subr.bf16.mxu1 %v11960_v47  ;;  %v12033_v46 = vld [vmem:[%s13701_s25 + $0xf60] ss:$48 sps:$4 sm:$0xff]   ;;  %v12036_v47 = vld [vmem:[%s13701_s25 + $0xf68] ss:$48 sps:$4 sm:$0xff]  }
  0x96   : > { %7534 = vmatpush1.bf16.msra.mxu0 %v11955_v48  ;;  %7780 = vmatpush1.bf16.msra.mxu1 %v11958_v49  ;;  %v12041_v48 = vld [vmem:[%s13701_s25 + $0xfc4] ss:$48 sps:$4 sm:$0xff]   ;;  %v12044_v49 = vld [vmem:[%s13701_s25 + $0xfcc] ss:$48 sps:$4 sm:$0xff]  }
  0x97   : > { %7535 = vmatprep.subr.bf16.mxu0 %v11963_v50  ;;  %7781 = vmatprep.subr.bf16.mxu1 %v11966_v51  ;;  %v12039_v50 = vld [vmem:[%s13701_s25 + $0xfc0] ss:$48 sps:$4 sm:$0xff]   ;;  %v12042_v51 = vld [vmem:[%s13701_s25 + $0xfc8] ss:$48 sps:$4 sm:$0xff]  }
  0x9a   : > { %7536 = vmatpush1.bf16.msra.mxu0 %v11961_v52  ;;  %7782 = vmatpush1.bf16.msra.mxu1 %v11964_v53  ;;  %v12047_v52 = vld [vmem:[%s13701_s25 + $0x1024] ss:$48 sps:$4 sm:$0xff]   ;;  %v12050_v53 = vld [vmem:[%s13701_s25 + $0x102c] ss:$48 sps:$4 sm:$0xff]  }
  0x9b   : > { %7537 = vmatprep.subr.bf16.mxu0 %v11969_v54  ;;  %7783 = vmatprep.subr.bf16.mxu1 %v11972_v55  ;;  %v12045_v54 = vld [vmem:[%s13701_s25 + $0x1020] ss:$48 sps:$4 sm:$0xff]   ;;  %v12048_v55 = vld [vmem:[%s13701_s25 + $0x1028] ss:$48 sps:$4 sm:$0xff]  }
  0x9e   : > { %7538 = vmatpush1.bf16.msra.mxu0 %v11967_v57  ;;  %7784 = vmatpush1.bf16.msra.mxu1 %v11970_v58  ;;  %v12056_v57 = vld [vmem:[%s13701_s25 + $0x108c] ss:$48 sps:$4 sm:$0xff]   ;;  %v12051_v58 = vld [vmem:[%s13701_s25 + $0x1080] ss:$48 sps:$4 sm:$0xff]  }
  0x9f   : > { %7539 = vmatprep.subr.bf16.mxu0 %v11975_v60  ;;  %7785 = vmatprep.subr.bf16.mxu1 %v11978_v61  ;;  %v12054_v60 = vld [vmem:[%s13701_s25 + $0x1088] ss:$48 sps:$4 sm:$0xff]   ;;  %v12059_v61 = vld [vmem:[%s13701_s25 + $0x10e4] ss:$48 sps:$4 sm:$0xff]  }
  0xa2   : > { %7540 = vmatpush1.bf16.msra.mxu0 %v11973_v0  ;;  %7786 = vmatpush1.bf16.msra.mxu1 %v11976_v34  ;;  %v12062_v0 = vld [vmem:[%s13701_s25 + $0x10ec] ss:$48 sps:$4 sm:$0xff]   ;;  %v12057_v34 = vld [vmem:[%s13701_s25 + $0x10e0] ss:$48 sps:$4 sm:$0xff]  }
  0xa3   : > { %7550 = vmatprep.subr.bf16.mxu0 %v11981_v1  ;;  %7796 = vmatprep.subr.bf16.mxu1 %v11984_v2  ;;  %v12060_v1 = vld [vmem:[%s13701_s25 + $0x10e8] ss:$48 sps:$4 sm:$0xff]   ;;  %v12065_v2 = vld [vmem:[%s13701_s25 + $0x1144] ss:$48 sps:$4 sm:$0xff]  }
  0xa5   : > { %7542 = vmatmul.mubr.bf16.vlgmr.msra.gmra.mrb[0].mxu0 %v13883_v5  ;;  %7788 = vmatmul.mubr.bf16.vlgmr.msra.gmra.mrb[0].mxu1 %v13883_v5 }
  0xa6   : > { %7551 = vmatpush1.bf16.msra.mxu0 %v11979_v4  ;;  %7797 = vmatpush1.bf16.msra.mxu1 %v11982_v6  ;;  %v12063_v4 = vld [vmem:[%s13701_s25 + $0x1140] ss:$48 sps:$4 sm:$0xff]   ;;  %v12066_v6 = vld [vmem:[%s13701_s25 + $0x1148] ss:$48 sps:$4 sm:$0xff]  }
  0xa7   : > { %7552 = vmatprep.subr.bf16.mxu0 %v11987_v7  ;;  %7798 = vmatprep.subr.bf16.mxu1 %v11990_v8  ;;  %v12071_v7 = vld [vmem:[%s13701_s25 + $0x11a4] ss:$48 sps:$4 sm:$0xff]   ;;  %v12074_v8 = vld [vmem:[%s13701_s25 + $0x11ac] ss:$48 sps:$4 sm:$0xff]  }
  0xa8   : > { %7582 = vmatprep.mubr.bf16.mxu0 %v13889_v9  ;;  %7828 = vmatprep.mubr.bf16.mxu1 %v13889_v9 }
  0xaa   : > { %7553 = vmatpush1.bf16.msra.mxu0 %v11985_v10  ;;  %7799 = vmatpush1.bf16.msra.mxu1 %v11988_v11  ;;  %v12069_v10 = vld [vmem:[%s13701_s25 + $0x11a0] ss:$48 sps:$4 sm:$0xff]   ;;  %v12072_v11 = vld [vmem:[%s13701_s25 + $0x11a8] ss:$48 sps:$4 sm:$0xff]  }
  0xab   : > { %7554 = vmatprep.subr.bf16.mxu0 %v11993_v12  ;;  %7800 = vmatprep.subr.bf16.mxu1 %v11996_v13  ;;  %v12078_v12 = vld [vmem:[%s13701_s25 + $0x1204] ss:$48 sps:$4 sm:$0xff]   ;;  %v12081_v13 = vld [vmem:[%s13701_s25 + $0x120c] ss:$48 sps:$4 sm:$0xff]  }
  0xae   : > { %7555 = vmatpush1.bf16.msra.mxu0 %v11991_v14  ;;  %7801 = vmatpush1.bf16.msra.mxu1 %v11994_v15  ;;  %v12076_v14 = vld [vmem:[%s13701_s25 + $0x1200] ss:$48 sps:$4 sm:$0xff]   ;;  %v13958_v15 = vrot.slane %v13872_v62, %v13765_v31 }
  0xaf   : > { %7556 = vmatprep.subr.bf16.mxu0 %v11999_v16  ;;  %7802 = vmatprep.subr.bf16.mxu1 %v12002_v17  ;;  %v12079_v16 = vld [vmem:[%s13701_s25 + $0x1208] ss:$48 sps:$4 sm:$0xff]   ;;  %v12084_v17 = vld [vmem:[%s13701_s25 + $0x1264] ss:$48 sps:$4 sm:$0xff]   ;;  %v12082_v62 = vld [vmem:[%s13701_s25 + $0x1260] ss:$48 sps:$4 sm:$0xff]  }
  0xb2   : > { %7557 = vmatpush1.bf16.msra.mxu0 %v11997_v18  ;;  %7803 = vmatpush1.bf16.msra.mxu1 %v12000_v19  ;;  %v12087_v18 = vld [vmem:[%s13701_s25 + $0x126c] ss:$48 sps:$4 sm:$0xff]   ;;  %v13965_v19 = vcombine.high %v13889_v9, %v13889_v9 }
  0xb3   : > { %7558 = vmatprep.subr.bf16.mxu0 %v12005_v20  ;;  %7804 = vmatprep.subr.bf16.mxu1 %v12008_v21  ;;  %v12085_v20 = vld [vmem:[%s13701_s25 + $0x1268] ss:$48 sps:$4 sm:$0xff]   ;;  %v12090_v21 = vld [vmem:[%s13701_s25 + $0x12c4] ss:$48 sps:$4 sm:$0xff]  }
  0xb6   : > { %7559 = vmatpush1.bf16.msra.mxu0 %v12003_v22  ;;  %7805 = vmatpush1.bf16.msra.mxu1 %v12006_v23  ;;  %v12093_v22 = vld [vmem:[%s13701_s25 + $0x12cc] ss:$48 sps:$4 sm:$0xff]   ;;  %v12088_v23 = vld [vmem:[%s13701_s25 + $0x12c0] ss:$48 sps:$4 sm:$0xff]  }
  0xb7   : > { %7560 = vmatprep.subr.bf16.mxu0 %v12011_v25  ;;  %7806 = vmatprep.subr.bf16.mxu1 %v12014_v26  ;;  %v12091_v25 = vld [vmem:[%s13701_s25 + $0x12c8] ss:$48 sps:$4 sm:$0xff]   ;;  %v12096_v26 = vld [vmem:[%s13701_s25 + $0x1324] ss:$48 sps:$4 sm:$0xff]  }
  0xba   : > { %7561 = vmatpush1.bf16.msra.mxu0 %v12009_v27  ;;  %7807 = vmatpush1.bf16.msra.mxu1 %v12012_v28  ;;  %v12099_v27 = vld [vmem:[%s13701_s25 + $0x132c] ss:$48 sps:$4 sm:$0xff]   ;;  %v12094_v28 = vld [vmem:[%s13701_s25 + $0x1320] ss:$48 sps:$4 sm:$0xff]  }
  0xbb   : > { %7562 = vmatprep.subr.bf16.mxu0 %v12017_v29  ;;  %7808 = vmatprep.subr.bf16.mxu1 %v12020_v30  ;;  %v12097_v29 = vld [vmem:[%s13701_s25 + $0x1328] ss:$48 sps:$4 sm:$0xff]   ;;  %v12102_v30 = vld [vmem:[%s13701_s25 + $0x1384] ss:$48 sps:$4 sm:$0xff]  }
  0xbe   : > { %7563 = vmatpush1.bf16.msra.mxu0 %v12015_v32  ;;  %7809 = vmatpush1.bf16.msra.mxu1 %v12018_v33  ;;  %v12105_v32 = vld [vmem:[%s13701_s25 + $0x138c] ss:$48 sps:$4 sm:$0xff]   ;;  %v12100_v33 = vld [vmem:[%s13701_s25 + $0x1380] ss:$48 sps:$4 sm:$0xff]  }
  0xbf   : > { %7564 = vmatprep.subr.bf16.mxu0 %v12023_v35  ;;  %7810 = vmatprep.subr.bf16.mxu1 %v12026_v36  ;;  %v12103_v35 = vld [vmem:[%s13701_s25 + $0x1388] ss:$48 sps:$4 sm:$0xff]   ;;  %v12108_v36 = vld [vmem:[%s13701_s25 + $0x13e4] ss:$48 sps:$4 sm:$0xff]  }
  0xc2   : > { %7565 = vmatpush1.bf16.msra.mxu0 %v12021_v37  ;;  %7811 = vmatpush1.bf16.msra.mxu1 %v12024_v38  ;;  %v12111_v37 = vld [vmem:[%s13701_s25 + $0x13ec] ss:$48 sps:$4 sm:$0xff]   ;;  %v12106_v38 = vld [vmem:[%s13701_s25 + $0x13e0] ss:$48 sps:$4 sm:$0xff]  }
  0xc3   : > { %7566 = vmatprep.subr.bf16.mxu0 %v12029_v39  ;;  %7812 = vmatprep.subr.bf16.mxu1 %v12032_v40  ;;  %v12109_v39 = vld [vmem:[%s13701_s25 + $0x13e8] ss:$48 sps:$4 sm:$0xff]   ;;  %v12114_v40 = vld [vmem:[%s13701_s25 + $0x1444] ss:$48 sps:$4 sm:$0xff]  }
  0xc6   : > { %7567 = vmatpush1.bf16.msra.mxu0 %v12027_v41  ;;  %7813 = vmatpush1.bf16.msra.mxu1 %v12030_v43  ;;  %v12117_v41 = vld [vmem:[%s13701_s25 + $0x144c] ss:$48 sps:$4 sm:$0xff]   ;;  %v12112_v43 = vld [vmem:[%s13701_s25 + $0x1440] ss:$48 sps:$4 sm:$0xff]  }
  0xc7   : > { %7568 = vmatprep.subr.bf16.mxu0 %v12035_v44  ;;  %7814 = vmatprep.subr.bf16.mxu1 %v12038_v45  ;;  %v12115_v44 = vld [vmem:[%s13701_s25 + $0x1448] ss:$48 sps:$4 sm:$0xff]   ;;  %v12120_v45 = vld [vmem:[%s13701_s25 + $0x14a4] ss:$48 sps:$4 sm:$0xff]  }
  0xca   : > { %7569 = vmatpush1.bf16.msra.mxu0 %v12033_v46  ;;  %7815 = vmatpush1.bf16.msra.mxu1 %v12036_v47  ;;  %v12123_v46 = vld [vmem:[%s13701_s25 + $0x14ac] ss:$48 sps:$4 sm:$0xff]   ;;  %v12118_v47 = vld [vmem:[%s13701_s25 + $0x14a0] ss:$48 sps:$4 sm:$0xff]  }
  0xcb   : > { %7570 = vmatprep.subr.bf16.mxu0 %v12041_v48  ;;  %7816 = vmatprep.subr.bf16.mxu1 %v12044_v49  ;;  %v12121_v48 = vld [vmem:[%s13701_s25 + $0x14a8] ss:$48 sps:$4 sm:$0xff]   ;;  %v12126_v49 = vld [vmem:[%s13701_s25 + $0x1504] ss:$48 sps:$4 sm:$0xff]  }
  0xce   : > { %7571 = vmatpush1.bf16.msra.mxu0 %v12039_v50  ;;  %7817 = vmatpush1.bf16.msra.mxu1 %v12042_v51  ;;  %v12129_v50 = vld [vmem:[%s13701_s25 + $0x150c] ss:$48 sps:$4 sm:$0xff]   ;;  %v12124_v51 = vld [vmem:[%s13701_s25 + $0x1500] ss:$48 sps:$4 sm:$0xff]  }
  0xcf   : > { %7572 = vmatprep.subr.bf16.mxu0 %v12047_v52  ;;  %7818 = vmatprep.subr.bf16.mxu1 %v12050_v53  ;;  %v12127_v52 = vld [vmem:[%s13701_s25 + $0x1508] ss:$48 sps:$4 sm:$0xff]   ;;  %v12132_v53 = vld [vmem:[%s13701_s25 + $0x1564] ss:$48 sps:$4 sm:$0xff]  }
  0xd2   : > { %7573 = vmatpush1.bf16.msra.mxu0 %v12045_v54  ;;  %7819 = vmatpush1.bf16.msra.mxu1 %v12048_v55  ;;  %v12135_v54 = vld [vmem:[%s13701_s25 + $0x156c] ss:$48 sps:$4 sm:$0xff]   ;;  %v12130_v55 = vld [vmem:[%s13701_s25 + $0x1560] ss:$48 sps:$4 sm:$0xff]  }
  0xd3   : > { %7574 = vmatprep.subr.bf16.mxu0 %v12053_v56  ;;  %7820 = vmatprep.subr.bf16.mxu1 %v12056_v57  ;;  %v12133_v56 = vld [vmem:[%s13701_s25 + $0x1568] ss:$48 sps:$4 sm:$0xff]   ;;  %v12138_v57 = vld [vmem:[%s13701_s25 + $0x15c4] ss:$48 sps:$4 sm:$0xff]  }
  0xd6   : > { %7575 = vmatpush1.bf16.msra.mxu0 %v12051_v58  ;;  %7821 = vmatpush1.bf16.msra.mxu1 %v12054_v60  ;;  %v12141_v58 = vld [vmem:[%s13701_s25 + $0x15cc] ss:$48 sps:$4 sm:$0xff]   ;;  %v12136_v60 = vld [vmem:[%s13701_s25 + $0x15c0] ss:$48 sps:$4 sm:$0xff]  }
  0xd7   : > { %7576 = vmatprep.subr.bf16.mxu0 %v12059_v61  ;;  %7822 = vmatprep.subr.bf16.mxu1 %v12062_v0  ;;  %v12139_v61 = vld [vmem:[%s13701_s25 + $0x15c8] ss:$48 sps:$4 sm:$0xff]   ;;  %v12144_v0 = vld [vmem:[%s13701_s25 + $0x1624] ss:$48 sps:$4 sm:$0xff]  }
  0xda   : > { %7577 = vmatpush1.bf16.msra.mxu0 %v12057_v34  ;;  %7823 = vmatpush1.bf16.msra.mxu1 %v12060_v1  ;;  %v12147_v34 = vld [vmem:[%s13701_s25 + $0x162c] ss:$48 sps:$4 sm:$0xff]   ;;  %v12142_v1 = vld [vmem:[%s13701_s25 + $0x1620] ss:$48 sps:$4 sm:$0xff]  }
  0xdb   : > { %7578 = vmatprep.subr.bf16.mxu0 %v12065_v2  ;;  %7824 = vmatprep.subr.bf16.mxu1 %v12068_v3  ;;  %v12145_v2 = vld [vmem:[%s13701_s25 + $0x1628] ss:$48 sps:$4 sm:$0xff]   ;;  %v12150_v3 = vld [vmem:[%s13701_s25 + $0x1684] ss:$48 sps:$4 sm:$0xff]  }
  0xde   : > { %7579 = vmatpush1.bf16.msra.mxu0 %v12063_v4  ;;  %7825 = vmatpush1.bf16.msra.mxu1 %v12066_v6  ;;  %v12153_v4 = vld [vmem:[%s13701_s25 + $0x168c] ss:$48 sps:$4 sm:$0xff]   ;;  %v12148_v6 = vld [vmem:[%s13701_s25 + $0x1680] ss:$48 sps:$4 sm:$0xff]  }
  0xdf   : > { %7580 = vmatprep.subr.bf16.mxu0 %v12071_v7  ;;  %7826 = vmatprep.subr.bf16.mxu1 %v12074_v8  ;;  %v12151_v7 = vld [vmem:[%s13701_s25 + $0x1688] ss:$48 sps:$4 sm:$0xff]   ;;  %v12156_v8 = vld [vmem:[%s13701_s25 + $0x16e4] ss:$48 sps:$4 sm:$0xff]  }
  0xe2   : > { %7581 = vmatpush1.bf16.msra.mxu0 %v12069_v10  ;;  %7827 = vmatpush1.bf16.msra.mxu1 %v12072_v11  ;;  %v12159_v10 = vld [vmem:[%s13701_s25 + $0x16ec] ss:$48 sps:$4 sm:$0xff]   ;;  %v12154_v11 = vld [vmem:[%s13701_s25 + $0x16e0] ss:$48 sps:$4 sm:$0xff]  }
  0xe3   : > { %7591 = vmatprep.subr.bf16.mxu0 %v12078_v12  ;;  %7837 = vmatprep.subr.bf16.mxu1 %v12081_v13  ;;  %v12157_v12 = vld [vmem:[%s13701_s25 + $0x16e8] ss:$48 sps:$4 sm:$0xff]   ;;  %v12162_v13 = vld [vmem:[%s13701_s25 + $0x1744] ss:$48 sps:$4 sm:$0xff]  }
  0xe5   : > { %7583 = vmatmul.mubr.bf16.vlgmr.msra.gmra.mrb[0].mxu0 %v13958_v15  ;;  %7829 = vmatmul.mubr.bf16.vlgmr.msra.gmra.mrb[0].mxu1 %v13958_v15 }
  0xe6   : > { %7592 = vmatpush1.bf16.msra.mxu0 %v12076_v14  ;;  %7838 = vmatpush1.bf16.msra.mxu1 %v12079_v16  ;;  %v12165_v14 = vld [vmem:[%s13701_s25 + $0x174c] ss:$48 sps:$4 sm:$0xff]   ;;  %v12160_v16 = vld [vmem:[%s13701_s25 + $0x1740] ss:$48 sps:$4 sm:$0xff]  }
  0xe7   : > { %7593 = vmatprep.subr.bf16.mxu0 %v12084_v17  ;;  %7839 = vmatprep.subr.bf16.mxu1 %v12087_v18  ;;  %v12163_v17 = vld [vmem:[%s13701_s25 + $0x1748] ss:$48 sps:$4 sm:$0xff]   ;;  %v12168_v18 = vld [vmem:[%s13701_s25 + $0x17a4] ss:$48 sps:$4 sm:$0xff]  }
  0xe8   : > { %7623 = vmatprep.mubr.bf16.mxu0 %v13965_v19  ;;  %7869 = vmatprep.mubr.bf16.mxu1 %v13965_v19 }
  0xea   : > { %7594 = vmatpush1.bf16.msra.mxu0 %v12082_v62  ;;  %7840 = vmatpush1.bf16.msra.mxu1 %v12085_v20  ;;  %v12171_v62 = vld [vmem:[%s13701_s25 + $0x17ac] ss:$48 sps:$4 sm:$0xff]   ;;  %v14027_v20 = vld.sshfl [vmem:[#allocation2 + $0x8] sm:$0x33 pattern:$0x75316420] }
  0xeb   : > { %7595 = vmatprep.subr.bf16.mxu0 %v12090_v21  ;;  %7841 = vmatprep.subr.bf16.mxu1 %v12093_v22  ;;  %v12166_v21 = vld [vmem:[%s13701_s25 + $0x17a0] ss:$48 sps:$4 sm:$0xff]   ;;  %v12169_v22 = vld [vmem:[%s13701_s25 + $0x17a8] ss:$48 sps:$4 sm:$0xff]  }
  0xee   : > { %7596 = vmatpush1.bf16.msra.mxu0 %v12088_v23  ;;  %7842 = vmatpush1.bf16.msra.mxu1 %v12091_v25  ;;  %v12174_v23 = vld [vmem:[%s13701_s25 + $0x1804] ss:$48 sps:$4 sm:$0xff]   ;;  %v12177_v25 = vld [vmem:[%s13701_s25 + $0x180c] ss:$48 sps:$4 sm:$0xff]  }
  0xef   : > { %7597 = vmatprep.subr.bf16.mxu0 %v12096_v26  ;;  %7843 = vmatprep.subr.bf16.mxu1 %v12099_v27  ;;  %v1679_v26 = vcombine.high %v14027_v20, %v14027_v20  ;;  %v12172_v27 = vld [vmem:[%s13701_s25 + $0x1800] ss:$48 sps:$4 sm:$0xff]  }
  0xf2   : > { %7598 = vmatpush1.bf16.msra.mxu0 %v12094_v28  ;;  %7844 = vmatpush1.bf16.msra.mxu1 %v12097_v29  ;;  %v14038_v28 = vcombine.high %v13958_v15, %v13958_v15  ;;  %v12175_v29 = vld [vmem:[%s13701_s25 + $0x1808] ss:$48 sps:$4 sm:$0xff]  }
  0xf3   : > { %7599 = vmatprep.subr.bf16.mxu0 %v12102_v30  ;;  %7845 = vmatprep.subr.bf16.mxu1 %v12105_v32  ;;  %v12180_v30 = vld [vmem:[%s13701_s25 + $0x1864] ss:$48 sps:$4 sm:$0xff]   ;;  %v12183_v32 = vld [vmem:[%s13701_s25 + $0x186c] ss:$48 sps:$4 sm:$0xff]  }
  0xf6   : > { %7600 = vmatpush1.bf16.msra.mxu0 %v12100_v33  ;;  %7846 = vmatpush1.bf16.msra.mxu1 %v12103_v35  ;;  %v14044_v33 = vrot.slane %v1679_v26, %v13765_v31  ;;  %v12178_v35 = vld [vmem:[%s13701_s25 + $0x1860] ss:$48 sps:$4 sm:$0xff]   ;;  %v12255_v26 = vld [vmem:[%s13701_s25 + $0x1cec] ss:$48 sps:$4 sm:$0xff]  }
  0xf7   : > { %7601 = vmatprep.subr.bf16.mxu0 %v12108_v36  ;;  %7847 = vmatprep.subr.bf16.mxu1 %v12111_v37  ;;  %v12181_v36 = vld [vmem:[%s13701_s25 + $0x1868] ss:$48 sps:$4 sm:$0xff]   ;;  %v12186_v37 = vld [vmem:[%s13701_s25 + $0x18c4] ss:$48 sps:$4 sm:$0xff]  }
  0xfa   : > { %7602 = vmatpush1.bf16.msra.mxu0 %v12106_v38  ;;  %7848 = vmatpush1.bf16.msra.mxu1 %v12109_v39  ;;  %v12189_v38 = vld [vmem:[%s13701_s25 + $0x18cc] ss:$48 sps:$4 sm:$0xff]   ;;  %v12184_v39 = vld [vmem:[%s13701_s25 + $0x18c0] ss:$48 sps:$4 sm:$0xff]  }
  0xfb   : > { %7603 = vmatprep.subr.bf16.mxu0 %v12114_v40  ;;  %7849 = vmatprep.subr.bf16.mxu1 %v12117_v41  ;;  %v12187_v40 = vld [vmem:[%s13701_s25 + $0x18c8] ss:$48 sps:$4 sm:$0xff]   ;;  %v12192_v41 = vld [vmem:[%s13701_s25 + $0x1924] ss:$48 sps:$4 sm:$0xff]  }
  0xfe   : > { %7604 = vmatpush1.bf16.msra.mxu0 %v12112_v43  ;;  %7850 = vmatpush1.bf16.msra.mxu1 %v12115_v44  ;;  %v12195_v43 = vld [vmem:[%s13701_s25 + $0x192c] ss:$48 sps:$4 sm:$0xff]   ;;  %v12190_v44 = vld [vmem:[%s13701_s25 + $0x1920] ss:$48 sps:$4 sm:$0xff]  }
  0xff   : > { %7605 = vmatprep.subr.bf16.mxu0 %v12120_v45  ;;  %7851 = vmatprep.subr.bf16.mxu1 %v12123_v46  ;;  %v12193_v45 = vld [vmem:[%s13701_s25 + $0x1928] ss:$48 sps:$4 sm:$0xff]   ;;  %v12198_v46 = vld [vmem:[%s13701_s25 + $0x1984] ss:$48 sps:$4 sm:$0xff]  }
 0x102   : > { %7606 = vmatpush1.bf16.msra.mxu0 %v12118_v47  ;;  %7852 = vmatpush1.bf16.msra.mxu1 %v12121_v48  ;;  %v12201_v47 = vld [vmem:[%s13701_s25 + $0x198c] ss:$48 sps:$4 sm:$0xff]   ;;  %v12196_v48 = vld [vmem:[%s13701_s25 + $0x1980] ss:$48 sps:$4 sm:$0xff]  }
 0x103   : > { %7607 = vmatprep.subr.bf16.mxu0 %v12126_v49  ;;  %7853 = vmatprep.subr.bf16.mxu1 %v12129_v50  ;;  %v12199_v49 = vld [vmem:[%s13701_s25 + $0x1988] ss:$48 sps:$4 sm:$0xff]   ;;  %v12204_v50 = vld [vmem:[%s13701_s25 + $0x19e4] ss:$48 sps:$4 sm:$0xff]  }
 0x106   : > { %7608 = vmatpush1.bf16.msra.mxu0 %v12124_v51  ;;  %7854 = vmatpush1.bf16.msra.mxu1 %v12127_v52  ;;  %v12207_v51 = vld [vmem:[%s13701_s25 + $0x19ec] ss:$48 sps:$4 sm:$0xff]   ;;  %v12202_v52 = vld [vmem:[%s13701_s25 + $0x19e0] ss:$48 sps:$4 sm:$0xff]  }
 0x107   : > { %7609 = vmatprep.subr.bf16.mxu0 %v12132_v53  ;;  %7855 = vmatprep.subr.bf16.mxu1 %v12135_v54  ;;  %v12205_v53 = vld [vmem:[%s13701_s25 + $0x19e8] ss:$48 sps:$4 sm:$0xff]   ;;  %v12210_v54 = vld [vmem:[%s13701_s25 + $0x1a44] ss:$48 sps:$4 sm:$0xff]  }
 0x10a   : > { %7610 = vmatpush1.bf16.msra.mxu0 %v12130_v55  ;;  %7856 = vmatpush1.bf16.msra.mxu1 %v12133_v56  ;;  %v12213_v55 = vld [vmem:[%s13701_s25 + $0x1a4c] ss:$48 sps:$4 sm:$0xff]   ;;  %v12208_v56 = vld [vmem:[%s13701_s25 + $0x1a40] ss:$48 sps:$4 sm:$0xff]  }
 0x10b   : > { %7611 = vmatprep.subr.bf16.mxu0 %v12138_v57  ;;  %7857 = vmatprep.subr.bf16.mxu1 %v12141_v58  ;;  %v12211_v57 = vld [vmem:[%s13701_s25 + $0x1a48] ss:$48 sps:$4 sm:$0xff]   ;;  %v12216_v58 = vld [vmem:[%s13701_s25 + $0x1aa4] ss:$48 sps:$4 sm:$0xff]  }
 0x10e   : > { %7612 = vmatpush1.bf16.msra.mxu0 %v12136_v60  ;;  %7858 = vmatpush1.bf16.msra.mxu1 %v12139_v61  ;;  %v12219_v60 = vld [vmem:[%s13701_s25 + $0x1aac] ss:$48 sps:$4 sm:$0xff]   ;;  %v12214_v61 = vld [vmem:[%s13701_s25 + $0x1aa0] ss:$48 sps:$4 sm:$0xff]  }
 0x10f   : > { %7613 = vmatprep.subr.bf16.mxu0 %v12144_v0  ;;  %7859 = vmatprep.subr.bf16.mxu1 %v12147_v34  ;;  %v12217_v0 = vld [vmem:[%s13701_s25 + $0x1aa8] ss:$48 sps:$4 sm:$0xff]   ;;  %v12222_v34 = vld [vmem:[%s13701_s25 + $0x1b04] ss:$48 sps:$4 sm:$0xff]  }
 0x112   : > { %7614 = vmatpush1.bf16.msra.mxu0 %v12142_v1  ;;  %7860 = vmatpush1.bf16.msra.mxu1 %v12145_v2  ;;  %v12225_v1 = vld [vmem:[%s13701_s25 + $0x1b0c] ss:$48 sps:$4 sm:$0xff]   ;;  %v12220_v2 = vld [vmem:[%s13701_s25 + $0x1b00] ss:$48 sps:$4 sm:$0xff]  }
 0x113   : > { %7615 = vmatprep.subr.bf16.mxu0 %v12150_v3  ;;  %7861 = vmatprep.subr.bf16.mxu1 %v12153_v4  ;;  %v12223_v3 = vld [vmem:[%s13701_s25 + $0x1b08] ss:$48 sps:$4 sm:$0xff]   ;;  %v12228_v4 = vld [vmem:[%s13701_s25 + $0x1b64] ss:$48 sps:$4 sm:$0xff]  }
 0x116   : > { %7616 = vmatpush1.bf16.msra.mxu0 %v12148_v6  ;;  %7862 = vmatpush1.bf16.msra.mxu1 %v12151_v7  ;;  %v12231_v6 = vld [vmem:[%s13701_s25 + $0x1b6c] ss:$48 sps:$4 sm:$0xff]   ;;  %v12226_v7 = vld [vmem:[%s13701_s25 + $0x1b60] ss:$48 sps:$4 sm:$0xff]  }
 0x117   : > { %7617 = vmatprep.subr.bf16.mxu0 %v12156_v8  ;;  %7863 = vmatprep.subr.bf16.mxu1 %v12159_v10  ;;  %v12229_v8 = vld [vmem:[%s13701_s25 + $0x1b68] ss:$48 sps:$4 sm:$0xff]   ;;  %v12234_v10 = vld [vmem:[%s13701_s25 + $0x1bc4] ss:$48 sps:$4 sm:$0xff]  }
 0x11a   : > { %7618 = vmatpush1.bf16.msra.mxu0 %v12154_v11  ;;  %7864 = vmatpush1.bf16.msra.mxu1 %v12157_v12  ;;  %v12237_v11 = vld [vmem:[%s13701_s25 + $0x1bcc] ss:$48 sps:$4 sm:$0xff]   ;;  %v12232_v12 = vld [vmem:[%s13701_s25 + $0x1bc0] ss:$48 sps:$4 sm:$0xff]  }
 0x11b   : > { %7619 = vmatprep.subr.bf16.mxu0 %v12162_v13  ;;  %7865 = vmatprep.subr.bf16.mxu1 %v12165_v14  ;;  %v12235_v13 = vld [vmem:[%s13701_s25 + $0x1bc8] ss:$48 sps:$4 sm:$0xff]   ;;  %v12240_v14 = vld [vmem:[%s13701_s25 + $0x1c24] ss:$48 sps:$4 sm:$0xff]  }
 0x11e   : > { %7620 = vmatpush1.bf16.msra.mxu0 %v12160_v16  ;;  %7866 = vmatpush1.bf16.msra.mxu1 %v12163_v17  ;;  %v12243_v16 = vld [vmem:[%s13701_s25 + $0x1c2c] ss:$48 sps:$4 sm:$0xff]   ;;  %v12238_v17 = vld [vmem:[%s13701_s25 + $0x1c20] ss:$48 sps:$4 sm:$0xff]  }
 0x11f   : > { %7621 = vmatprep.subr.bf16.mxu0 %v12168_v18  ;;  %7867 = vmatprep.subr.bf16.mxu1 %v12171_v62  ;;  %v12241_v18 = vld [vmem:[%s13701_s25 + $0x1c28] ss:$48 sps:$4 sm:$0xff]   ;;  %v12246_v62 = vld [vmem:[%s13701_s25 + $0x1c84] ss:$48 sps:$4 sm:$0xff]  }
 0x122   : > { %7622 = vmatpush1.bf16.msra.mxu0 %v12166_v21  ;;  %7868 = vmatpush1.bf16.msra.mxu1 %v12169_v22  ;;  %v12249_v21 = vld [vmem:[%s13701_s25 + $0x1c8c] ss:$48 sps:$4 sm:$0xff]   ;;  %v12244_v22 = vld [vmem:[%s13701_s25 + $0x1c80] ss:$48 sps:$4 sm:$0xff]  }
 0x123   : > { %7632 = vmatprep.subr.bf16.mxu0 %v12174_v23  ;;  %7878 = vmatprep.subr.bf16.mxu1 %v12177_v25  ;;  %v12247_v23 = vld [vmem:[%s13701_s25 + $0x1c88] ss:$48 sps:$4 sm:$0xff]   ;;  %v12252_v25 = vld [vmem:[%s13701_s25 + $0x1ce4] ss:$48 sps:$4 sm:$0xff]  }
 0x125   : > { %7624 = vmatmul.mubr.bf16.vlgmr.msra.gmra.mrb[0].mxu0 %v14038_v28  ;;  %7870 = vmatmul.mubr.bf16.vlgmr.msra.gmra.mrb[0].mxu1 %v14038_v28 }
 0x126   : > { %7633 = vmatpush1.bf16.msra.mxu0 %v12172_v27  ;;  %7879 = vmatpush1.bf16.msra.mxu1 %v12175_v29  ;;  %v12250_v27 = vld [vmem:[%s13701_s25 + $0x1ce0] ss:$48 sps:$4 sm:$0xff]   ;;  %v12253_v29 = vld [vmem:[%s13701_s25 + $0x1ce8] ss:$48 sps:$4 sm:$0xff]  }
 0x127   : > { %7634 = vmatprep.subr.bf16.mxu0 %v12180_v30  ;;  %7880 = vmatprep.subr.bf16.mxu1 %v12183_v32  ;;  %v12258_v30 = vld [vmem:[%s13701_s25 + $0x1d44] ss:$48 sps:$4 sm:$0xff]   ;;  %v12261_v32 = vld [vmem:[%s13701_s25 + $0x1d4c] ss:$48 sps:$4 sm:$0xff]  }
 0x128   : > { %7664 = vmatprep.mubr.bf16.mxu0 %v14044_v33  ;;  %7910 = vmatprep.mubr.bf16.mxu1 %v14044_v33 }
 0x12a   : > { %7635 = vmatpush1.bf16.msra.mxu0 %v12178_v35  ;;  %7881 = vmatpush1.bf16.msra.mxu1 %v12181_v36  ;;  %v12256_v35 = vld [vmem:[%s13701_s25 + $0x1d40] ss:$48 sps:$4 sm:$0xff]   ;;  %v12259_v36 = vld [vmem:[%s13701_s25 + $0x1d48] ss:$48 sps:$4 sm:$0xff]  }
 0x12b   : > { %7636 = vmatprep.subr.bf16.mxu0 %v12186_v37  ;;  %7882 = vmatprep.subr.bf16.mxu1 %v12189_v38  ;;  %v12264_v37 = vld [vmem:[%s13701_s25 + $0x1da4] ss:$48 sps:$4 sm:$0xff]   ;;  %v12267_v38 = vld [vmem:[%s13701_s25 + $0x1dac] ss:$48 sps:$4 sm:$0xff]  }
 0x12e   : > { %7637 = vmatpush1.bf16.msra.mxu0 %v12184_v39  ;;  %7883 = vmatpush1.bf16.msra.mxu1 %v12187_v40  ;;  %v12262_v39 = vld [vmem:[%s13701_s25 + $0x1da0] ss:$48 sps:$4 sm:$0xff]   ;;  %v12265_v40 = vld [vmem:[%s13701_s25 + $0x1da8] ss:$48 sps:$4 sm:$0xff]  }
 0x12f   : > { %7638 = vmatprep.subr.bf16.mxu0 %v12192_v41  ;;  %7884 = vmatprep.subr.bf16.mxu1 %v12195_v43  ;;  %v12270_v41 = vld [vmem:[%s13701_s25 + $0x1e04] ss:$48 sps:$4 sm:$0xff]   ;;  %v12273_v43 = vld [vmem:[%s13701_s25 + $0x1e0c] ss:$48 sps:$4 sm:$0xff]  }
 0x132   : > { %7639 = vmatpush1.bf16.msra.mxu0 %v12190_v44  ;;  %7885 = vmatpush1.bf16.msra.mxu1 %v12193_v45  ;;  %v14112_v44 = vrot.slane %v14027_v20, %v13765_v31  ;;  %v12268_v45 = vld [vmem:[%s13701_s25 + $0x1e00] ss:$48 sps:$4 sm:$0xff]  }
 0x133   : > { %7640 = vmatprep.subr.bf16.mxu0 %v12198_v46  ;;  %7886 = vmatprep.subr.bf16.mxu1 %v12201_v47  ;;  %v12271_v46 = vld [vmem:[%s13701_s25 + $0x1e08] ss:$48 sps:$4 sm:$0xff]   ;;  %v12276_v47 = vld [vmem:[%s13701_s25 + $0x1e64] ss:$48 sps:$4 sm:$0xff]   ;;  %v12274_v20 = vld [vmem:[%s13701_s25 + $0x1e60] ss:$48 sps:$4 sm:$0xff]  }
 0x136   : > { %7641 = vmatpush1.bf16.msra.mxu0 %v12196_v48  ;;  %7887 = vmatpush1.bf16.msra.mxu1 %v12199_v49  ;;  %v12279_v48 = vld [vmem:[%s13701_s25 + $0x1e6c] ss:$48 sps:$4 sm:$0xff]   ;;  %v14120_v49 = vcombine.high %v14044_v33, %v14044_v33 }
 0x137   : > { %7642 = vmatprep.subr.bf16.mxu0 %v12204_v50  ;;  %7888 = vmatprep.subr.bf16.mxu1 %v12207_v51  ;;  %v12277_v50 = vld [vmem:[%s13701_s25 + $0x1e68] ss:$48 sps:$4 sm:$0xff]   ;;  %v12282_v51 = vld [vmem:[%s13701_s25 + $0x1ec4] ss:$48 sps:$4 sm:$0xff]  }
 0x13a   : > { %7643 = vmatpush1.bf16.msra.mxu0 %v12202_v52  ;;  %7889 = vmatpush1.bf16.msra.mxu1 %v12205_v53  ;;  %v12285_v52 = vld [vmem:[%s13701_s25 + $0x1ecc] ss:$48 sps:$4 sm:$0xff]   ;;  %v12280_v53 = vld [vmem:[%s13701_s25 + $0x1ec0] ss:$48 sps:$4 sm:$0xff]  }
 0x13b   : > { %7644 = vmatprep.subr.bf16.mxu0 %v12210_v54  ;;  %7890 = vmatprep.subr.bf16.mxu1 %v12213_v55  ;;  %v12283_v54 = vld [vmem:[%s13701_s25 + $0x1ec8] ss:$48 sps:$4 sm:$0xff]   ;;  %v12288_v55 = vld [vmem:[%s13701_s25 + $0x1f24] ss:$48 sps:$4 sm:$0xff]  }
 0x13e   : > { %7645 = vmatpush1.bf16.msra.mxu0 %v12208_v56  ;;  %7891 = vmatpush1.bf16.msra.mxu1 %v12211_v57  ;;  %v12291_v56 = vld [vmem:[%s13701_s25 + $0x1f2c] ss:$48 sps:$4 sm:$0xff]   ;;  %v12286_v57 = vld [vmem:[%s13701_s25 + $0x1f20] ss:$48 sps:$4 sm:$0xff]  }
 0x13f   : > { %7646 = vmatprep.subr.bf16.mxu0 %v12216_v58  ;;  %7892 = vmatprep.subr.bf16.mxu1 %v12219_v60  ;;  %v12289_v58 = vld [vmem:[%s13701_s25 + $0x1f28] ss:$48 sps:$4 sm:$0xff]   ;;  %v12294_v60 = vld [vmem:[%s13701_s25 + $0x1f84] ss:$48 sps:$4 sm:$0xff]  }
 0x142   : > { %7647 = vmatpush1.bf16.msra.mxu0 %v12214_v61  ;;  %7893 = vmatpush1.bf16.msra.mxu1 %v12217_v0  ;;  %v12297_v61 = vld [vmem:[%s13701_s25 + $0x1f8c] ss:$48 sps:$4 sm:$0xff]   ;;  %v12292_v0 = vld [vmem:[%s13701_s25 + $0x1f80] ss:$48 sps:$4 sm:$0xff]  }
 0x143   : > { %7648 = vmatprep.subr.bf16.mxu0 %v12222_v34  ;;  %7894 = vmatprep.subr.bf16.mxu1 %v12225_v1  ;;  %v12295_v34 = vld [vmem:[%s13701_s25 + $0x1f88] ss:$48 sps:$4 sm:$0xff]   ;;  %v12300_v1 = vld [vmem:[%s13701_s25 + $0x1fe4] ss:$48 sps:$4 sm:$0xff]  }
 0x146   : > { %7649 = vmatpush1.bf16.msra.mxu0 %v12220_v2  ;;  %7895 = vmatpush1.bf16.msra.mxu1 %v12223_v3  ;;  %v12303_v2 = vld [vmem:[%s13701_s25 + $0x1fec] ss:$48 sps:$4 sm:$0xff]   ;;  %v12298_v3 = vld [vmem:[%s13701_s25 + $0x1fe0] ss:$48 sps:$4 sm:$0xff]  }
 0x147   : > { %7650 = vmatprep.subr.bf16.mxu0 %v12228_v4  ;;  %7896 = vmatprep.subr.bf16.mxu1 %v12231_v6  ;;  %v12301_v4 = vld [vmem:[%s13701_s25 + $0x1fe8] ss:$48 sps:$4 sm:$0xff]   ;;  %v12306_v6 = vld [vmem:[%s13701_s25 + $0x2044] ss:$48 sps:$4 sm:$0xff]  }
 0x14a   : > { %7651 = vmatpush1.bf16.msra.mxu0 %v12226_v7  ;;  %7897 = vmatpush1.bf16.msra.mxu1 %v12229_v8  ;;  %v12309_v7 = vld [vmem:[%s13701_s25 + $0x204c] ss:$48 sps:$4 sm:$0xff]   ;;  %v12304_v8 = vld [vmem:[%s13701_s25 + $0x2040] ss:$48 sps:$4 sm:$0xff]  }
 0x14b   : > { %7652 = vmatprep.subr.bf16.mxu0 %v12234_v10  ;;  %7898 = vmatprep.subr.bf16.mxu1 %v12237_v11  ;;  %v12307_v10 = vld [vmem:[%s13701_s25 + $0x2048] ss:$48 sps:$4 sm:$0xff]   ;;  %v12312_v11 = vld [vmem:[%s13701_s25 + $0x20a4] ss:$48 sps:$4 sm:$0xff]  }
 0x14e   : > { %7653 = vmatpush1.bf16.msra.mxu0 %v12232_v12  ;;  %7899 = vmatpush1.bf16.msra.mxu1 %v12235_v13  ;;  %v12315_v12 = vld [vmem:[%s13701_s25 + $0x20ac] ss:$48 sps:$4 sm:$0xff]   ;;  %v12310_v13 = vld [vmem:[%s13701_s25 + $0x20a0] ss:$48 sps:$4 sm:$0xff]  }
 0x14f   : > { %7654 = vmatprep.subr.bf16.mxu0 %v12240_v14  ;;  %7900 = vmatprep.subr.bf16.mxu1 %v12243_v16  ;;  %v12313_v14 = vld [vmem:[%s13701_s25 + $0x20a8] ss:$48 sps:$4 sm:$0xff]   ;;  %v12318_v16 = vld [vmem:[%s13701_s25 + $0x2104] ss:$48 sps:$4 sm:$0xff]  }
 0x152   : > { %7655 = vmatpush1.bf16.msra.mxu0 %v12238_v17  ;;  %7901 = vmatpush1.bf16.msra.mxu1 %v12241_v18  ;;  %v12321_v17 = vld [vmem:[%s13701_s25 + $0x210c] ss:$48 sps:$4 sm:$0xff]   ;;  %v12316_v18 = vld [vmem:[%s13701_s25 + $0x2100] ss:$48 sps:$4 sm:$0xff]  }
 0x153   : > { %7656 = vmatprep.subr.bf16.mxu0 %v12246_v62  ;;  %7902 = vmatprep.subr.bf16.mxu1 %v12249_v21  ;;  %v12319_v62 = vld [vmem:[%s13701_s25 + $0x2108] ss:$48 sps:$4 sm:$0xff]   ;;  %v12324_v21 = vld [vmem:[%s13701_s25 + $0x2164] ss:$48 sps:$4 sm:$0xff]  }
 0x156   : > { %7657 = vmatpush1.bf16.msra.mxu0 %v12244_v22  ;;  %7903 = vmatpush1.bf16.msra.mxu1 %v12247_v23  ;;  %v12327_v22 = vld [vmem:[%s13701_s25 + $0x216c] ss:$48 sps:$4 sm:$0xff]   ;;  %v12322_v23 = vld [vmem:[%s13701_s25 + $0x2160] ss:$48 sps:$4 sm:$0xff]  }
 0x157   : > { %7658 = vmatprep.subr.bf16.mxu0 %v12252_v25  ;;  %7904 = vmatprep.subr.bf16.mxu1 %v12255_v26  ;;  %v12325_v25 = vld [vmem:[%s13701_s25 + $0x2168] ss:$48 sps:$4 sm:$0xff]   ;;  %v12330_v26 = vld [vmem:[%s13701_s25 + $0x21c4] ss:$48 sps:$4 sm:$0xff]  }
 0x15a   : > { %7659 = vmatpush1.bf16.msra.mxu0 %v12250_v27  ;;  %7905 = vmatpush1.bf16.msra.mxu1 %v12253_v29  ;;  %v12333_v27 = vld [vmem:[%s13701_s25 + $0x21cc] ss:$48 sps:$4 sm:$0xff]   ;;  %v12328_v29 = vld [vmem:[%s13701_s25 + $0x21c0] ss:$48 sps:$4 sm:$0xff]  }
 0x15b   : > { %7660 = vmatprep.subr.bf16.mxu0 %v12258_v30  ;;  %7906 = vmatprep.subr.bf16.mxu1 %v12261_v32  ;;  %v12331_v30 = vld [vmem:[%s13701_s25 + $0x21c8] ss:$48 sps:$4 sm:$0xff]   ;;  %v12336_v32 = vld [vmem:[%s13701_s25 + $0x2224] ss:$48 sps:$4 sm:$0xff]  }
 0x15e   : > { %7661 = vmatpush1.bf16.msra.mxu0 %v12256_v35  ;;  %7907 = vmatpush1.bf16.msra.mxu1 %v12259_v36  ;;  %v12339_v35 = vld [vmem:[%s13701_s25 + $0x222c] ss:$48 sps:$4 sm:$0xff]   ;;  %v12334_v36 = vld [vmem:[%s13701_s25 + $0x2220] ss:$48 sps:$4 sm:$0xff]  }
 0x15f   : > { %7662 = vmatprep.subr.bf16.mxu0 %v12264_v37  ;;  %7908 = vmatprep.subr.bf16.mxu1 %v12267_v38  ;;  %v12337_v37 = vld [vmem:[%s13701_s25 + $0x2228] ss:$48 sps:$4 sm:$0xff]   ;;  %v12342_v38 = vld [vmem:[%s13701_s25 + $0x2284] ss:$48 sps:$4 sm:$0xff]  }
 0x162   : > { %7663 = vmatpush1.bf16.msra.mxu0 %v12262_v39  ;;  %7909 = vmatpush1.bf16.msra.mxu1 %v12265_v40  ;;  %v12345_v39 = vld [vmem:[%s13701_s25 + $0x228c] ss:$48 sps:$4 sm:$0xff]   ;;  %v12340_v40 = vld [vmem:[%s13701_s25 + $0x2280] ss:$48 sps:$4 sm:$0xff]  }
 0x163   : > { %7673 = vmatprep.subr.bf16.mxu0 %v12270_v41  ;;  %7919 = vmatprep.subr.bf16.mxu1 %v12273_v43  ;;  %v12343_v41 = vld [vmem:[%s13701_s25 + $0x2288] ss:$48 sps:$4 sm:$0xff]   ;;  %v12348_v43 = vld [vmem:[%s13701_s25 + $0x22e4] ss:$48 sps:$4 sm:$0xff]  }
 0x165   : > { %7665 = vmatmul.mubr.bf16.vlgmr.msra.gmra.mrb[0].mxu0 %v14112_v44  ;;  %7911 = vmatmul.mubr.bf16.vlgmr.msra.gmra.mrb[0].mxu1 %v14112_v44 }
 0x166   : > { %7674 = vmatpush1.bf16.msra.mxu0 %v12268_v45  ;;  %7920 = vmatpush1.bf16.msra.mxu1 %v12271_v46  ;;  %v12351_v45 = vld [vmem:[%s13701_s25 + $0x22ec] ss:$48 sps:$4 sm:$0xff]   ;;  %v12346_v46 = vld [vmem:[%s13701_s25 + $0x22e0] ss:$48 sps:$4 sm:$0xff]  }
 0x167   : > { %7675 = vmatprep.subr.bf16.mxu0 %v12276_v47  ;;  %7921 = vmatprep.subr.bf16.mxu1 %v12279_v48  ;;  %v12349_v47 = vld [vmem:[%s13701_s25 + $0x22e8] ss:$48 sps:$4 sm:$0xff]   ;;  %v12354_v48 = vld [vmem:[%s13701_s25 + $0x2344] ss:$48 sps:$4 sm:$0xff]  }
 0x168   : > { %7705 = vmatprep.mubr.bf16.mxu0 %v14120_v49  ;;  %7951 = vmatprep.mubr.bf16.mxu1 %v14120_v49 }
 0x16a   : > { %7676 = vmatpush1.bf16.msra.mxu0 %v12274_v20  ;;  %7922 = vmatpush1.bf16.msra.mxu1 %v12277_v50  ;;  %v12357_v20 = vld [vmem:[%s13701_s25 + $0x234c] ss:$48 sps:$4 sm:$0xff]   ;;  %v12352_v50 = vld [vmem:[%s13701_s25 + $0x2340] ss:$48 sps:$4 sm:$0xff]  }
 0x16b   : > { %7677 = vmatprep.subr.bf16.mxu0 %v12282_v51  ;;  %7923 = vmatprep.subr.bf16.mxu1 %v12285_v52  ;;  %v12355_v51 = vld [vmem:[%s13701_s25 + $0x2348] ss:$48 sps:$4 sm:$0xff]   ;;  %v12360_v52 = vld [vmem:[%s13701_s25 + $0x23a4] ss:$48 sps:$4 sm:$0xff]  }
 0x16e   : > { %7678 = vmatpush1.bf16.msra.mxu0 %v12280_v53  ;;  %7924 = vmatpush1.bf16.msra.mxu1 %v12283_v54  ;;  %v12363_v53 = vld [vmem:[%s13701_s25 + $0x23ac] ss:$48 sps:$4 sm:$0xff]   ;;  %v12358_v54 = vld [vmem:[%s13701_s25 + $0x23a0] ss:$48 sps:$4 sm:$0xff]  }
 0x16f   : > { %7679 = vmatprep.subr.bf16.mxu0 %v12288_v55  ;;  %7925 = vmatprep.subr.bf16.mxu1 %v12291_v56  ;;  %v12361_v55 = vld [vmem:[%s13701_s25 + $0x23a8] ss:$48 sps:$4 sm:$0xff]   ;;  %v12366_v56 = vld [vmem:[%s13701_s25 + $0x14] ss:$48 sps:$4 sm:$0xff]  }
 0x172   : > { %7680 = vmatpush1.bf16.msra.mxu0 %v12286_v57  ;;  %7926 = vmatpush1.bf16.msra.mxu1 %v12289_v58  ;;  %v12369_v57 = vld [vmem:[%s13701_s25 + $0x1c] ss:$48 sps:$4 sm:$0xff]   ;;  %v14188_v58 = vcombine.high %v14112_v44, %v14112_v44 }
 0x173   : > { %7681 = vmatprep.subr.bf16.mxu0 %v12294_v60  ;;  %7927 = vmatprep.subr.bf16.mxu1 %v12297_v61  ;;  %v12364_v60 = vld [vmem:[%s13701_s25 + $0x10] ss:$48 sps:$4 sm:$0xff]   ;;  %v12367_v61 = vld [vmem:[%s13701_s25 + $0x18] ss:$48 sps:$4 sm:$0xff]  }
 0x176   : > { %7682 = vmatpush1.bf16.msra.mxu0 %v12292_v0  ;;  %7928 = vmatpush1.bf16.msra.mxu1 %v12295_v34  ;;  %v12372_v0 = vld [vmem:[%s13701_s25 + $0x74] ss:$48 sps:$4 sm:$0xff]   ;;  %v12375_v34 = vld [vmem:[%s13701_s25 + $0x7c] ss:$48 sps:$4 sm:$0xff]  }
 0x177   : > { %7683 = vmatprep.subr.bf16.mxu0 %v12300_v1  ;;  %7929 = vmatprep.subr.bf16.mxu1 %v12303_v2  ;;  %v12370_v1 = vld [vmem:[%s13701_s25 + $0x70] ss:$48 sps:$4 sm:$0xff]   ;;  %v12373_v2 = vld [vmem:[%s13701_s25 + $0x78] ss:$48 sps:$4 sm:$0xff]  }
 0x17a   : > { %7684 = vmatpush1.bf16.msra.mxu0 %v12298_v3  ;;  %7930 = vmatpush1.bf16.msra.mxu1 %v12301_v4  ;;  %v12378_v3 = vld [vmem:[%s13701_s25 + $0xd4] ss:$48 sps:$4 sm:$0xff]   ;;  %v12381_v4 = vld [vmem:[%s13701_s25 + $0xdc] ss:$48 sps:$4 sm:$0xff]  }
 0x17b   : > { %7685 = vmatprep.subr.bf16.mxu0 %v12306_v6  ;;  %7931 = vmatprep.subr.bf16.mxu1 %v12309_v7  ;;  %v12376_v6 = vld [vmem:[%s13701_s25 + $0xd0] ss:$48 sps:$4 sm:$0xff]   ;;  %v12379_v7 = vld [vmem:[%s13701_s25 + $0xd8] ss:$48 sps:$4 sm:$0xff]  }
 0x17e   : > { %7686 = vmatpush1.bf16.msra.mxu0 %v12304_v8  ;;  %7932 = vmatpush1.bf16.msra.mxu1 %v12307_v10  ;;  %v12384_v8 = vld [vmem:[%s13701_s25 + $0x134] ss:$48 sps:$4 sm:$0xff]   ;;  %v12387_v10 = vld [vmem:[%s13701_s25 + $0x13c] ss:$48 sps:$4 sm:$0xff]  }
 0x17f   : > { %7687 = vmatprep.subr.bf16.mxu0 %v12312_v11  ;;  %7933 = vmatprep.subr.bf16.mxu1 %v12315_v12  ;;  %v12382_v11 = vld [vmem:[%s13701_s25 + $0x130] ss:$48 sps:$4 sm:$0xff]   ;;  %v12385_v12 = vld [vmem:[%s13701_s25 + $0x138] ss:$48 sps:$4 sm:$0xff]  }
 0x182   : > { %7688 = vmatpush1.bf16.msra.mxu0 %v12310_v13  ;;  %7934 = vmatpush1.bf16.msra.mxu1 %v12313_v14  ;;  %v12390_v13 = vld [vmem:[%s13701_s25 + $0x194] ss:$48 sps:$4 sm:$0xff]   ;;  %v12393_v14 = vld [vmem:[%s13701_s25 + $0x19c] ss:$48 sps:$4 sm:$0xff]  }
 0x183   : > { %7689 = vmatprep.subr.bf16.mxu0 %v12318_v16  ;;  %7935 = vmatprep.subr.bf16.mxu1 %v12321_v17  ;;  %v12388_v16 = vld [vmem:[%s13701_s25 + $0x190] ss:$48 sps:$4 sm:$0xff]   ;;  %v12391_v17 = vld [vmem:[%s13701_s25 + $0x198] ss:$48 sps:$4 sm:$0xff]  }
 0x186   : > { %7690 = vmatpush1.bf16.msra.mxu0 %v12316_v18  ;;  %7936 = vmatpush1.bf16.msra.mxu1 %v12319_v62  ;;  %v12396_v18 = vld [vmem:[%s13701_s25 + $0x1f4] ss:$48 sps:$4 sm:$0xff]   ;;  %v12399_v62 = vld [vmem:[%s13701_s25 + $0x1fc] ss:$48 sps:$4 sm:$0xff]  }
 0x187   : > { %7691 = vmatprep.subr.bf16.mxu0 %v12324_v21  ;;  %7937 = vmatprep.subr.bf16.mxu1 %v12327_v22  ;;  %v12394_v21 = vld [vmem:[%s13701_s25 + $0x1f0] ss:$48 sps:$4 sm:$0xff]   ;;  %v12397_v22 = vld [vmem:[%s13701_s25 + $0x1f8] ss:$48 sps:$4 sm:$0xff]  }
 0x18a   : > { %7692 = vmatpush1.bf16.msra.mxu0 %v12322_v23  ;;  %7938 = vmatpush1.bf16.msra.mxu1 %v12325_v25  ;;  %v12402_v23 = vld [vmem:[%s13701_s25 + $0x254] ss:$48 sps:$4 sm:$0xff]   ;;  %v12405_v25 = vld [vmem:[%s13701_s25 + $0x25c] ss:$48 sps:$4 sm:$0xff]  }
 0x18b   : > { %7693 = vmatprep.subr.bf16.mxu0 %v12330_v26  ;;  %7939 = vmatprep.subr.bf16.mxu1 %v12333_v27  ;;  %v12400_v26 = vld [vmem:[%s13701_s25 + $0x250] ss:$48 sps:$4 sm:$0xff]   ;;  %v12403_v27 = vld [vmem:[%s13701_s25 + $0x258] ss:$48 sps:$4 sm:$0xff]  }
 0x18e   : > { %7694 = vmatpush1.bf16.msra.mxu0 %v12328_v29  ;;  %7940 = vmatpush1.bf16.msra.mxu1 %v12331_v30  ;;  %v12408_v29 = vld [vmem:[%s13701_s25 + $0x2b4] ss:$48 sps:$4 sm:$0xff]   ;;  %v12411_v30 = vld [vmem:[%s13701_s25 + $0x2bc] ss:$48 sps:$4 sm:$0xff]  }
 0x18f   : > { %7695 = vmatprep.subr.bf16.mxu0 %v12336_v32  ;;  %7941 = vmatprep.subr.bf16.mxu1 %v12339_v35  ;;  %v12406_v32 = vld [vmem:[%s13701_s25 + $0x2b0] ss:$48 sps:$4 sm:$0xff]   ;;  %v12409_v35 = vld [vmem:[%s13701_s25 + $0x2b8] ss:$48 sps:$4 sm:$0xff]  }
 0x192   : > { %7696 = vmatpush1.bf16.msra.mxu0 %v12334_v36  ;;  %7942 = vmatpush1.bf16.msra.mxu1 %v12337_v37  ;;  %v12414_v36 = vld [vmem:[%s13701_s25 + $0x314] ss:$48 sps:$4 sm:$0xff]   ;;  %v12417_v37 = vld [vmem:[%s13701_s25 + $0x31c] ss:$48 sps:$4 sm:$0xff]  }
 0x193   : > { %7697 = vmatprep.subr.bf16.mxu0 %v12342_v38  ;;  %7943 = vmatprep.subr.bf16.mxu1 %v12345_v39  ;;  %v12412_v38 = vld [vmem:[%s13701_s25 + $0x310] ss:$48 sps:$4 sm:$0xff]   ;;  %v12415_v39 = vld [vmem:[%s13701_s25 + $0x318] ss:$48 sps:$4 sm:$0xff]  }
 0x196   : > { %7698 = vmatpush1.bf16.msra.mxu0 %v12340_v40  ;;  %7944 = vmatpush1.bf16.msra.mxu1 %v12343_v41  ;;  %v12420_v40 = vld [vmem:[%s13701_s25 + $0x374] ss:$48 sps:$4 sm:$0xff]   ;;  %v12423_v41 = vld [vmem:[%s13701_s25 + $0x37c] ss:$48 sps:$4 sm:$0xff]  }
 0x197   : > { %7699 = vmatprep.subr.bf16.mxu0 %v12348_v43  ;;  %7945 = vmatprep.subr.bf16.mxu1 %v12351_v45  ;;  %v12418_v43 = vld [vmem:[%s13701_s25 + $0x370] ss:$48 sps:$4 sm:$0xff]   ;;  %v12421_v45 = vld [vmem:[%s13701_s25 + $0x378] ss:$48 sps:$4 sm:$0xff]  }
 0x19a   : > { %7700 = vmatpush1.bf16.msra.mxu0 %v12346_v46  ;;  %7946 = vmatpush1.bf16.msra.mxu1 %v12349_v47  ;;  %v12426_v46 = vld [vmem:[%s13701_s25 + $0x3d4] ss:$48 sps:$4 sm:$0xff]   ;;  %v12429_v47 = vld [vmem:[%s13701_s25 + $0x3dc] ss:$48 sps:$4 sm:$0xff]  }
 0x19b   : > { %7701 = vmatprep.subr.bf16.mxu0 %v12354_v48  ;;  %7947 = vmatprep.subr.bf16.mxu1 %v12357_v20  ;;  %v12424_v48 = vld [vmem:[%s13701_s25 + $0x3d0] ss:$48 sps:$4 sm:$0xff]   ;;  %v12427_v20 = vld [vmem:[%s13701_s25 + $0x3d8] ss:$48 sps:$4 sm:$0xff]  }
 0x19e   : > { %7702 = vmatpush1.bf16.msra.mxu0 %v12352_v50  ;;  %7948 = vmatpush1.bf16.msra.mxu1 %v12355_v51  ;;  %v12432_v50 = vld [vmem:[%s13701_s25 + $0x434] ss:$48 sps:$4 sm:$0xff]   ;;  %v12435_v51 = vld [vmem:[%s13701_s25 + $0x43c] ss:$48 sps:$4 sm:$0xff]  }
 0x19f   : > { %7703 = vmatprep.subr.bf16.mxu0 %v12360_v52  ;;  %7949 = vmatprep.subr.bf16.mxu1 %v12363_v53  ;;  %v12430_v52 = vld [vmem:[%s13701_s25 + $0x430] ss:$48 sps:$4 sm:$0xff]   ;;  %v12433_v53 = vld [vmem:[%s13701_s25 + $0x438] ss:$48 sps:$4 sm:$0xff]  }
 0x1a2   : > { %7704 = vmatpush1.bf16.msra.mxu0 %v12358_v54  ;;  %7950 = vmatpush1.bf16.msra.mxu1 %v12361_v55  ;;  %v12438_v54 = vld [vmem:[%s13701_s25 + $0x494] ss:$48 sps:$4 sm:$0xff]   ;;  %v12441_v55 = vld [vmem:[%s13701_s25 + $0x49c] ss:$48 sps:$4 sm:$0xff]  }
 0x1a3   : > { %7960 = vmatprep.subr.bf16.mxu0 %v12366_v56  ;;  %8206 = vmatprep.subr.bf16.mxu1 %v12369_v57  ;;  %v12436_v56 = vld [vmem:[%s13701_s25 + $0x490] ss:$48 sps:$4 sm:$0xff]   ;;  %v12439_v57 = vld [vmem:[%s13701_s25 + $0x498] ss:$48 sps:$4 sm:$0xff]  }
 0x1a5   : > { %7706 = vmatmul.mubr.bf16.vlgmr.msra.gmra.mrb[0].mxu0 %v14188_v58  ;;  %7952 = vmatmul.mubr.bf16.vlgmr.msra.gmra.mrb[0].mxu1 %v14188_v58 }
 0x1a6   : > { %7961 = vmatpush1.bf16.msra.mxu0 %v12364_v60  ;;  %8207 = vmatpush1.bf16.msra.mxu1 %v12367_v61  ;;  %v12444_v60 = vld [vmem:[%s13701_s25 + $0x4f4] ss:$48 sps:$4 sm:$0xff]   ;;  %v12447_v61 = vld [vmem:[%s13701_s25 + $0x4fc] ss:$48 sps:$4 sm:$0xff]  }
 0x1a7   : > { %7962 = vmatprep.subr.bf16.mxu0 %v12372_v0  ;;  %8208 = vmatprep.subr.bf16.mxu1 %v12375_v34  ;;  %v12442_v0 = vld [vmem:[%s13701_s25 + $0x4f0] ss:$48 sps:$4 sm:$0xff]   ;;  %v12445_v34 = vld [vmem:[%s13701_s25 + $0x4f8] ss:$48 sps:$4 sm:$0xff]  }
 0x1a8   : > { %7992 = vmatprep.mubr.bf16.mxu0 %v13779_v42  ;;  %8238 = vmatprep.mubr.bf16.mxu1 %v13779_v42 }
 0x1aa   : > { %7963 = vmatpush1.bf16.msra.mxu0 %v12370_v1  ;;  %8209 = vmatpush1.bf16.msra.mxu1 %v12373_v2  ;;  %v12450_v1 = vld [vmem:[%s13701_s25 + $0x554] ss:$48 sps:$4 sm:$0xff]   ;;  %v12453_v2 = vld [vmem:[%s13701_s25 + $0x55c] ss:$48 sps:$4 sm:$0xff]  }
 0x1ab   : > { %7964 = vmatprep.subr.bf16.mxu0 %v12378_v3  ;;  %8210 = vmatprep.subr.bf16.mxu1 %v12381_v4  ;;  %v12448_v3 = vld [vmem:[%s13701_s25 + $0x550] ss:$48 sps:$4 sm:$0xff]   ;;  %v12451_v4 = vld [vmem:[%s13701_s25 + $0x558] ss:$48 sps:$4 sm:$0xff]  }
 0x1ae   : > { %7965 = vmatpush1.bf16.msra.mxu0 %v12376_v6  ;;  %8211 = vmatpush1.bf16.msra.mxu1 %v12379_v7  ;;  %v12456_v6 = vld [vmem:[%s13701_s25 + $0x5b4] ss:$48 sps:$4 sm:$0xff]   ;;  %v12459_v7 = vld [vmem:[%s13701_s25 + $0x5bc] ss:$48 sps:$4 sm:$0xff]  }
 0x1af   : > { %7966 = vmatprep.subr.bf16.mxu0 %v12384_v8  ;;  %8212 = vmatprep.subr.bf16.mxu1 %v12387_v10  ;;  %v12454_v8 = vld [vmem:[%s13701_s25 + $0x5b0] ss:$48 sps:$4 sm:$0xff]   ;;  %v12457_v10 = vld [vmem:[%s13701_s25 + $0x5b8] ss:$48 sps:$4 sm:$0xff]  }
 0x1b2   : > { %7967 = vmatpush1.bf16.msra.mxu0 %v12382_v11  ;;  %8213 = vmatpush1.bf16.msra.mxu1 %v12385_v12  ;;  %v12462_v11 = vld [vmem:[%s13701_s25 + $0x614] ss:$48 sps:$4 sm:$0xff]   ;;  %v12465_v12 = vld [vmem:[%s13701_s25 + $0x61c] ss:$48 sps:$4 sm:$0xff]  }
 0x1b3   : > { %7968 = vmatprep.subr.bf16.mxu0 %v12390_v13  ;;  %8214 = vmatprep.subr.bf16.mxu1 %v12393_v14  ;;  %v12460_v13 = vld [vmem:[%s13701_s25 + $0x610] ss:$48 sps:$4 sm:$0xff]   ;;  %v12463_v14 = vld [vmem:[%s13701_s25 + $0x618] ss:$48 sps:$4 sm:$0xff]  }
 0x1b6   : > { %7969 = vmatpush1.bf16.msra.mxu0 %v12388_v16  ;;  %8215 = vmatpush1.bf16.msra.mxu1 %v12391_v17  ;;  %v12468_v16 = vld [vmem:[%s13701_s25 + $0x674] ss:$48 sps:$4 sm:$0xff]   ;;  %v12471_v17 = vld [vmem:[%s13701_s25 + $0x67c] ss:$48 sps:$4 sm:$0xff]  }
 0x1b7   : > { %7970 = vmatprep.subr.bf16.mxu0 %v12396_v18  ;;  %8216 = vmatprep.subr.bf16.mxu1 %v12399_v62  ;;  %v12466_v18 = vld [vmem:[%s13701_s25 + $0x670] ss:$48 sps:$4 sm:$0xff]   ;;  %v12469_v62 = vld [vmem:[%s13701_s25 + $0x678] ss:$48 sps:$4 sm:$0xff]  }
 0x1ba   : > { %7971 = vmatpush1.bf16.msra.mxu0 %v12394_v21  ;;  %8217 = vmatpush1.bf16.msra.mxu1 %v12397_v22  ;;  %v12474_v21 = vld [vmem:[%s13701_s25 + $0x6d4] ss:$48 sps:$4 sm:$0xff]   ;;  %v12477_v22 = vld [vmem:[%s13701_s25 + $0x6dc] ss:$48 sps:$4 sm:$0xff]  }
 0x1bb   : > { %7972 = vmatprep.subr.bf16.mxu0 %v12402_v23  ;;  %8218 = vmatprep.subr.bf16.mxu1 %v12405_v25  ;;  %v12472_v23 = vld [vmem:[%s13701_s25 + $0x6d0] ss:$48 sps:$4 sm:$0xff]   ;;  %v12475_v25 = vld [vmem:[%s13701_s25 + $0x6d8] ss:$48 sps:$4 sm:$0xff]  }
 0x1be   : > { %7973 = vmatpush1.bf16.msra.mxu0 %v12400_v26  ;;  %8219 = vmatpush1.bf16.msra.mxu1 %v12403_v27  ;;  %v12480_v26 = vld [vmem:[%s13701_s25 + $0x734] ss:$48 sps:$4 sm:$0xff]   ;;  %v12483_v27 = vld [vmem:[%s13701_s25 + $0x73c] ss:$48 sps:$4 sm:$0xff]  }
 0x1bf   : > { %7974 = vmatprep.subr.bf16.mxu0 %v12408_v29  ;;  %8220 = vmatprep.subr.bf16.mxu1 %v12411_v30  ;;  %v12478_v29 = vld [vmem:[%s13701_s25 + $0x730] ss:$48 sps:$4 sm:$0xff]   ;;  %v12481_v30 = vld [vmem:[%s13701_s25 + $0x738] ss:$48 sps:$4 sm:$0xff]  }
 0x1c2   : > { %7975 = vmatpush1.bf16.msra.mxu0 %v12406_v32  ;;  %8221 = vmatpush1.bf16.msra.mxu1 %v12409_v35  ;;  %v12486_v32 = vld [vmem:[%s13701_s25 + $0x794] ss:$48 sps:$4 sm:$0xff]   ;;  %v12489_v35 = vld [vmem:[%s13701_s25 + $0x79c] ss:$48 sps:$4 sm:$0xff]  }
 0x1c3   : > { %7976 = vmatprep.subr.bf16.mxu0 %v12414_v36  ;;  %8222 = vmatprep.subr.bf16.mxu1 %v12417_v37  ;;  %v12484_v36 = vld [vmem:[%s13701_s25 + $0x790] ss:$48 sps:$4 sm:$0xff]   ;;  %v12487_v37 = vld [vmem:[%s13701_s25 + $0x798] ss:$48 sps:$4 sm:$0xff]  }
 0x1c6   : > { %7977 = vmatpush1.bf16.msra.mxu0 %v12412_v38  ;;  %8223 = vmatpush1.bf16.msra.mxu1 %v12415_v39  ;;  %v12492_v38 = vld [vmem:[%s13701_s25 + $0x7f4] ss:$48 sps:$4 sm:$0xff]   ;;  %v12495_v39 = vld [vmem:[%s13701_s25 + $0x7fc] ss:$48 sps:$4 sm:$0xff]  }
 0x1c7   : > { %7978 = vmatprep.subr.bf16.mxu0 %v12420_v40  ;;  %8224 = vmatprep.subr.bf16.mxu1 %v12423_v41  ;;  %v12490_v40 = vld [vmem:[%s13701_s25 + $0x7f0] ss:$48 sps:$4 sm:$0xff]   ;;  %v12493_v41 = vld [vmem:[%s13701_s25 + $0x7f8] ss:$48 sps:$4 sm:$0xff]  }
 0x1ca   : > { %7979 = vmatpush1.bf16.msra.mxu0 %v12418_v43  ;;  %8225 = vmatpush1.bf16.msra.mxu1 %v12421_v45  ;;  %v12498_v43 = vld [vmem:[%s13701_s25 + $0x854] ss:$48 sps:$4 sm:$0xff]   ;;  %v12501_v45 = vld [vmem:[%s13701_s25 + $0x85c] ss:$48 sps:$4 sm:$0xff]  }
 0x1cb   : > { %7980 = vmatprep.subr.bf16.mxu0 %v12426_v46  ;;  %8226 = vmatprep.subr.bf16.mxu1 %v12429_v47  ;;  %v12496_v46 = vld [vmem:[%s13701_s25 + $0x850] ss:$48 sps:$4 sm:$0xff]   ;;  %v12499_v47 = vld [vmem:[%s13701_s25 + $0x858] ss:$48 sps:$4 sm:$0xff]  }
 0x1ce   : > { %7981 = vmatpush1.bf16.msra.mxu0 %v12424_v48  ;;  %8227 = vmatpush1.bf16.msra.mxu1 %v12427_v20  ;;  %v12504_v48 = vld [vmem:[%s13701_s25 + $0x8b4] ss:$48 sps:$4 sm:$0xff]   ;;  %v12507_v20 = vld [vmem:[%s13701_s25 + $0x8bc] ss:$48 sps:$4 sm:$0xff]  }
 0x1cf   : > { %7982 = vmatprep.subr.bf16.mxu0 %v12432_v50  ;;  %8228 = vmatprep.subr.bf16.mxu1 %v12435_v51  ;;  %v12502_v50 = vld [vmem:[%s13701_s25 + $0x8b0] ss:$48 sps:$4 sm:$0xff]   ;;  %v12505_v51 = vld [vmem:[%s13701_s25 + $0x8b8] ss:$48 sps:$4 sm:$0xff]  }
 0x1d2   : > { %7983 = vmatpush1.bf16.msra.mxu0 %v12430_v52  ;;  %8229 = vmatpush1.bf16.msra.mxu1 %v12433_v53  ;;  %v12510_v52 = vld [vmem:[%s13701_s25 + $0x914] ss:$48 sps:$4 sm:$0xff]   ;;  %v12513_v53 = vld [vmem:[%s13701_s25 + $0x91c] ss:$48 sps:$4 sm:$0xff]  }
 0x1d3   : > { %7984 = vmatprep.subr.bf16.mxu0 %v12438_v54  ;;  %8230 = vmatprep.subr.bf16.mxu1 %v12441_v55  ;;  %v12508_v54 = vld [vmem:[%s13701_s25 + $0x910] ss:$48 sps:$4 sm:$0xff]   ;;  %v12511_v55 = vld [vmem:[%s13701_s25 + $0x918] ss:$48 sps:$4 sm:$0xff]  }
 0x1d6   : > { %7985 = vmatpush1.bf16.msra.mxu0 %v12436_v56  ;;  %8231 = vmatpush1.bf16.msra.mxu1 %v12439_v57  ;;  %v12516_v56 = vld [vmem:[%s13701_s25 + $0x974] ss:$48 sps:$4 sm:$0xff]   ;;  %v12519_v57 = vld [vmem:[%s13701_s25 + $0x97c] ss:$48 sps:$4 sm:$0xff]  }
 0x1d7   : > { %7986 = vmatprep.subr.bf16.mxu0 %v12444_v60  ;;  %8232 = vmatprep.subr.bf16.mxu1 %v12447_v61  ;;  %v12514_v60 = vld [vmem:[%s13701_s25 + $0x970] ss:$48 sps:$4 sm:$0xff]   ;;  %v12517_v61 = vld [vmem:[%s13701_s25 + $0x978] ss:$48 sps:$4 sm:$0xff]  }
 0x1da   : > { %7987 = vmatpush1.bf16.msra.mxu0 %v12442_v0  ;;  %8233 = vmatpush1.bf16.msra.mxu1 %v12445_v34  ;;  %v12522_v0 = vld [vmem:[%s13701_s25 + $0x9d4] ss:$48 sps:$4 sm:$0xff]   ;;  %v12525_v34 = vld [vmem:[%s13701_s25 + $0x9dc] ss:$48 sps:$4 sm:$0xff]  }
 0x1db   : > { %7988 = vmatprep.subr.bf16.mxu0 %v12450_v1  ;;  %8234 = vmatprep.subr.bf16.mxu1 %v12453_v2  ;;  %v12520_v1 = vld [vmem:[%s13701_s25 + $0x9d0] ss:$48 sps:$4 sm:$0xff]   ;;  %v12523_v2 = vld [vmem:[%s13701_s25 + $0x9d8] ss:$48 sps:$4 sm:$0xff]  }
 0x1de   : > { %7989 = vmatpush1.bf16.msra.mxu0 %v12448_v3  ;;  %8235 = vmatpush1.bf16.msra.mxu1 %v12451_v4  ;;  %v12528_v3 = vld [vmem:[%s13701_s25 + $0xa34] ss:$48 sps:$4 sm:$0xff]   ;;  %v12531_v4 = vld [vmem:[%s13701_s25 + $0xa3c] ss:$48 sps:$4 sm:$0xff]  }
 0x1df   : > { %7990 = vmatprep.subr.bf16.mxu0 %v12456_v6  ;;  %8236 = vmatprep.subr.bf16.mxu1 %v12459_v7  ;;  %v12526_v6 = vld [vmem:[%s13701_s25 + $0xa30] ss:$48 sps:$4 sm:$0xff]   ;;  %v12529_v7 = vld [vmem:[%s13701_s25 + $0xa38] ss:$48 sps:$4 sm:$0xff]  }
 0x1e2   : > { %7991 = vmatpush1.bf16.msra.mxu0 %v12454_v8  ;;  %8237 = vmatpush1.bf16.msra.mxu1 %v12457_v10  ;;  %v12534_v8 = vld [vmem:[%s13701_s25 + $0xa94] ss:$48 sps:$4 sm:$0xff]   ;;  %v12537_v10 = vld [vmem:[%s13701_s25 + $0xa9c] ss:$48 sps:$4 sm:$0xff]  }
 0x1e3   : > { %8001 = vmatprep.subr.bf16.mxu0 %v12462_v11  ;;  %8247 = vmatprep.subr.bf16.mxu1 %v12465_v12  ;;  %v12532_v11 = vld [vmem:[%s13701_s25 + $0xa90] ss:$48 sps:$4 sm:$0xff]   ;;  %v12535_v12 = vld [vmem:[%s13701_s25 + $0xa98] ss:$48 sps:$4 sm:$0xff]  }
 0x1e5   : > { %7993 = vmatmul.mubr.bf16.vlgmr.msra.gmra.mrb[4].mxu0 %v13800_v59  ;;  %8239 = vmatmul.mubr.bf16.vlgmr.msra.gmra.mrb[4].mxu1 %v13800_v59 }
 0x1e6   : > { %8002 = vmatpush1.bf16.msra.mxu0 %v12460_v13  ;;  %8248 = vmatpush1.bf16.msra.mxu1 %v12463_v14  ;;  %v12540_v13 = vld [vmem:[%s13701_s25 + $0xaf4] ss:$48 sps:$4 sm:$0xff]   ;;  %v12543_v14 = vld [vmem:[%s13701_s25 + $0xafc] ss:$48 sps:$4 sm:$0xff]  }
 0x1e7   : > { %8003 = vmatprep.subr.bf16.mxu0 %v12468_v16  ;;  %8249 = vmatprep.subr.bf16.mxu1 %v12471_v17  ;;  %v12538_v16 = vld [vmem:[%s13701_s25 + $0xaf0] ss:$48 sps:$4 sm:$0xff]   ;;  %v12541_v17 = vld [vmem:[%s13701_s25 + $0xaf8] ss:$48 sps:$4 sm:$0xff]  }
 0x1e8   : > { %8033 = vmatprep.mubr.bf16.mxu0 %v13807_v63  ;;  %8279 = vmatprep.mubr.bf16.mxu1 %v13807_v63 }
 0x1ea   : > { %8004 = vmatpush1.bf16.msra.mxu0 %v12466_v18  ;;  %8250 = vmatpush1.bf16.msra.mxu1 %v12469_v62  ;;  %v12546_v18 = vld [vmem:[%s13701_s25 + $0xb54] ss:$48 sps:$4 sm:$0xff]   ;;  %v12549_v62 = vld [vmem:[%s13701_s25 + $0xb5c] ss:$48 sps:$4 sm:$0xff]  }
 0x1eb   : > { %8005 = vmatprep.subr.bf16.mxu0 %v12474_v21  ;;  %8251 = vmatprep.subr.bf16.mxu1 %v12477_v22  ;;  %v12544_v21 = vld [vmem:[%s13701_s25 + $0xb50] ss:$48 sps:$4 sm:$0xff]   ;;  %v12547_v22 = vld [vmem:[%s13701_s25 + $0xb58] ss:$48 sps:$4 sm:$0xff]  }
 0x1ee   : > { %8006 = vmatpush1.bf16.msra.mxu0 %v12472_v23  ;;  %8252 = vmatpush1.bf16.msra.mxu1 %v12475_v25  ;;  %v12552_v23 = vld [vmem:[%s13701_s25 + $0xbb4] ss:$48 sps:$4 sm:$0xff]   ;;  %v12555_v25 = vld [vmem:[%s13701_s25 + $0xbbc] ss:$48 sps:$4 sm:$0xff]  }
 0x1ef   : > { %8007 = vmatprep.subr.bf16.mxu0 %v12480_v26  ;;  %8253 = vmatprep.subr.bf16.mxu1 %v12483_v27  ;;  %v12550_v26 = vld [vmem:[%s13701_s25 + $0xbb0] ss:$48 sps:$4 sm:$0xff]   ;;  %v12553_v27 = vld [vmem:[%s13701_s25 + $0xbb8] ss:$48 sps:$4 sm:$0xff]  }
 0x1f2   : > { %8008 = vmatpush1.bf16.msra.mxu0 %v12478_v29  ;;  %8254 = vmatpush1.bf16.msra.mxu1 %v12481_v30  ;;  %v12558_v29 = vld [vmem:[%s13701_s25 + $0xc14] ss:$48 sps:$4 sm:$0xff]   ;;  %v12561_v30 = vld [vmem:[%s13701_s25 + $0xc1c] ss:$48 sps:$4 sm:$0xff]  }
 0x1f3   : > { %8009 = vmatprep.subr.bf16.mxu0 %v12486_v32  ;;  %8255 = vmatprep.subr.bf16.mxu1 %v12489_v35  ;;  %v12556_v32 = vld [vmem:[%s13701_s25 + $0xc10] ss:$48 sps:$4 sm:$0xff]   ;;  %v12559_v35 = vld [vmem:[%s13701_s25 + $0xc18] ss:$48 sps:$4 sm:$0xff]  }
 0x1f6   : > { %8010 = vmatpush1.bf16.msra.mxu0 %v12484_v36  ;;  %8256 = vmatpush1.bf16.msra.mxu1 %v12487_v37  ;;  %v12564_v36 = vld [vmem:[%s13701_s25 + $0xc74] ss:$48 sps:$4 sm:$0xff]   ;;  %v12567_v37 = vld [vmem:[%s13701_s25 + $0xc7c] ss:$48 sps:$4 sm:$0xff]  }
 0x1f7   : > { %8011 = vmatprep.subr.bf16.mxu0 %v12492_v38  ;;  %8257 = vmatprep.subr.bf16.mxu1 %v12495_v39  ;;  %v12562_v38 = vld [vmem:[%s13701_s25 + $0xc70] ss:$48 sps:$4 sm:$0xff]   ;;  %v12565_v39 = vld [vmem:[%s13701_s25 + $0xc78] ss:$48 sps:$4 sm:$0xff]  }
 0x1fa   : > { %8012 = vmatpush1.bf16.msra.mxu0 %v12490_v40  ;;  %8258 = vmatpush1.bf16.msra.mxu1 %v12493_v41  ;;  %v12570_v40 = vld [vmem:[%s13701_s25 + $0xcd4] ss:$48 sps:$4 sm:$0xff]   ;;  %v12573_v41 = vld [vmem:[%s13701_s25 + $0xcdc] ss:$48 sps:$4 sm:$0xff]  }
 0x1fb   : > { %8013 = vmatprep.subr.bf16.mxu0 %v12498_v43  ;;  %8259 = vmatprep.subr.bf16.mxu1 %v12501_v45  ;;  %v12568_v43 = vld [vmem:[%s13701_s25 + $0xcd0] ss:$48 sps:$4 sm:$0xff]   ;;  %v12571_v45 = vld [vmem:[%s13701_s25 + $0xcd8] ss:$48 sps:$4 sm:$0xff]  }
 0x1fe   : > { %8014 = vmatpush1.bf16.msra.mxu0 %v12496_v46  ;;  %8260 = vmatpush1.bf16.msra.mxu1 %v12499_v47  ;;  %v12576_v46 = vld [vmem:[%s13701_s25 + $0xd34] ss:$48 sps:$4 sm:$0xff]   ;;  %v12579_v47 = vld [vmem:[%s13701_s25 + $0xd3c] ss:$48 sps:$4 sm:$0xff]  }
 0x1ff   : > { %8015 = vmatprep.subr.bf16.mxu0 %v12504_v48  ;;  %8261 = vmatprep.subr.bf16.mxu1 %v12507_v20  ;;  %v12574_v48 = vld [vmem:[%s13701_s25 + $0xd30] ss:$48 sps:$4 sm:$0xff]   ;;  %v12577_v20 = vld [vmem:[%s13701_s25 + $0xd38] ss:$48 sps:$4 sm:$0xff]  }
 0x202   : > { %8016 = vmatpush1.bf16.msra.mxu0 %v12502_v50  ;;  %8262 = vmatpush1.bf16.msra.mxu1 %v12505_v51  ;;  %v12582_v50 = vld [vmem:[%s13701_s25 + $0xd94] ss:$48 sps:$4 sm:$0xff]   ;;  %v12585_v51 = vld [vmem:[%s13701_s25 + $0xd9c] ss:$48 sps:$4 sm:$0xff]  }
 0x203   : > { %8017 = vmatprep.subr.bf16.mxu0 %v12510_v52  ;;  %8263 = vmatprep.subr.bf16.mxu1 %v12513_v53  ;;  %v12580_v52 = vld [vmem:[%s13701_s25 + $0xd90] ss:$48 sps:$4 sm:$0xff]   ;;  %v12583_v53 = vld [vmem:[%s13701_s25 + $0xd98] ss:$48 sps:$4 sm:$0xff]  }
 0x206   : > { %8018 = vmatpush1.bf16.msra.mxu0 %v12508_v54  ;;  %8264 = vmatpush1.bf16.msra.mxu1 %v12511_v55  ;;  %v12588_v54 = vld [vmem:[%s13701_s25 + $0xdf4] ss:$48 sps:$4 sm:$0xff]   ;;  %v12591_v55 = vld [vmem:[%s13701_s25 + $0xdfc] ss:$48 sps:$4 sm:$0xff]  }
 0x207   : > { %8019 = vmatprep.subr.bf16.mxu0 %v12516_v56  ;;  %8265 = vmatprep.subr.bf16.mxu1 %v12519_v57  ;;  %v12586_v56 = vld [vmem:[%s13701_s25 + $0xdf0] ss:$48 sps:$4 sm:$0xff]   ;;  %v12589_v57 = vld [vmem:[%s13701_s25 + $0xdf8] ss:$48 sps:$4 sm:$0xff]  }
 0x20a   : > { %8020 = vmatpush1.bf16.msra.mxu0 %v12514_v60  ;;  %8266 = vmatpush1.bf16.msra.mxu1 %v12517_v61  ;;  %v12594_v60 = vld [vmem:[%s13701_s25 + $0xe54] ss:$48 sps:$4 sm:$0xff]   ;;  %v12597_v61 = vld [vmem:[%s13701_s25 + $0xe5c] ss:$48 sps:$4 sm:$0xff]  }
 0x20b   : > { %8021 = vmatprep.subr.bf16.mxu0 %v12522_v0  ;;  %8267 = vmatprep.subr.bf16.mxu1 %v12525_v34  ;;  %v12592_v0 = vld [vmem:[%s13701_s25 + $0xe50] ss:$48 sps:$4 sm:$0xff]   ;;  %v12595_v34 = vld [vmem:[%s13701_s25 + $0xe58] ss:$48 sps:$4 sm:$0xff]  }
 0x20e   : > { %8022 = vmatpush1.bf16.msra.mxu0 %v12520_v1  ;;  %8268 = vmatpush1.bf16.msra.mxu1 %v12523_v2  ;;  %v12600_v1 = vld [vmem:[%s13701_s25 + $0xeb4] ss:$48 sps:$4 sm:$0xff]   ;;  %v12603_v2 = vld [vmem:[%s13701_s25 + $0xebc] ss:$48 sps:$4 sm:$0xff]  }
 0x20f   : > { %8023 = vmatprep.subr.bf16.mxu0 %v12528_v3  ;;  %8269 = vmatprep.subr.bf16.mxu1 %v12531_v4  ;;  %v12598_v3 = vld [vmem:[%s13701_s25 + $0xeb0] ss:$48 sps:$4 sm:$0xff]   ;;  %v12601_v4 = vld [vmem:[%s13701_s25 + $0xeb8] ss:$48 sps:$4 sm:$0xff]  }
 0x212   : > { %8024 = vmatpush1.bf16.msra.mxu0 %v12526_v6  ;;  %8270 = vmatpush1.bf16.msra.mxu1 %v12529_v7  ;;  %v12606_v6 = vld [vmem:[%s13701_s25 + $0xf14] ss:$48 sps:$4 sm:$0xff]   ;;  %v12609_v7 = vld [vmem:[%s13701_s25 + $0xf1c] ss:$48 sps:$4 sm:$0xff]  }
 0x213   : > { %8025 = vmatprep.subr.bf16.mxu0 %v12534_v8  ;;  %8271 = vmatprep.subr.bf16.mxu1 %v12537_v10  ;;  %v12604_v8 = vld [vmem:[%s13701_s25 + $0xf10] ss:$48 sps:$4 sm:$0xff]   ;;  %v12607_v10 = vld [vmem:[%s13701_s25 + $0xf18] ss:$48 sps:$4 sm:$0xff]  }
 0x216   : > { %8026 = vmatpush1.bf16.msra.mxu0 %v12532_v11  ;;  %8272 = vmatpush1.bf16.msra.mxu1 %v12535_v12  ;;  %v12612_v11 = vld [vmem:[%s13701_s25 + $0xf74] ss:$48 sps:$4 sm:$0xff]   ;;  %v12615_v12 = vld [vmem:[%s13701_s25 + $0xf7c] ss:$48 sps:$4 sm:$0xff]  }
 0x217   : > { %8027 = vmatprep.subr.bf16.mxu0 %v12540_v13  ;;  %8273 = vmatprep.subr.bf16.mxu1 %v12543_v14  ;;  %v12610_v13 = vld [vmem:[%s13701_s25 + $0xf70] ss:$48 sps:$4 sm:$0xff]   ;;  %v12613_v14 = vld [vmem:[%s13701_s25 + $0xf78] ss:$48 sps:$4 sm:$0xff]  }
 0x21a   : > { %8028 = vmatpush1.bf16.msra.mxu0 %v12538_v16  ;;  %8274 = vmatpush1.bf16.msra.mxu1 %v12541_v17  ;;  %v12618_v16 = vld [vmem:[%s13701_s25 + $0xfd4] ss:$48 sps:$4 sm:$0xff]   ;;  %v12621_v17 = vld [vmem:[%s13701_s25 + $0xfdc] ss:$48 sps:$4 sm:$0xff]  }
 0x21b   : > { %8029 = vmatprep.subr.bf16.mxu0 %v12546_v18  ;;  %8275 = vmatprep.subr.bf16.mxu1 %v12549_v62  ;;  %v12616_v18 = vld [vmem:[%s13701_s25 + $0xfd0] ss:$48 sps:$4 sm:$0xff]   ;;  %v12619_v62 = vld [vmem:[%s13701_s25 + $0xfd8] ss:$48 sps:$4 sm:$0xff]  }
 0x21e   : > { %8030 = vmatpush1.bf16.msra.mxu0 %v12544_v21  ;;  %8276 = vmatpush1.bf16.msra.mxu1 %v12547_v22  ;;  %v12624_v21 = vld [vmem:[%s13701_s25 + $0x1034] ss:$48 sps:$4 sm:$0xff]   ;;  %v12627_v22 = vld [vmem:[%s13701_s25 + $0x103c] ss:$48 sps:$4 sm:$0xff]  }
 0x21f   : > { %8031 = vmatprep.subr.bf16.mxu0 %v12552_v23  ;;  %8277 = vmatprep.subr.bf16.mxu1 %v12555_v25  ;;  %v12622_v23 = vld [vmem:[%s13701_s25 + $0x1030] ss:$48 sps:$4 sm:$0xff]   ;;  %v12625_v25 = vld [vmem:[%s13701_s25 + $0x1038] ss:$48 sps:$4 sm:$0xff]  }
 0x222   : > { %8032 = vmatpush1.bf16.msra.mxu0 %v12550_v26  ;;  %8278 = vmatpush1.bf16.msra.mxu1 %v12553_v27  ;;  %v12630_v26 = vld [vmem:[%s13701_s25 + $0x1094] ss:$48 sps:$4 sm:$0xff]   ;;  %v12633_v27 = vld [vmem:[%s13701_s25 + $0x109c] ss:$48 sps:$4 sm:$0xff]  }
 0x223   : > { %8042 = vmatprep.subr.bf16.mxu0 %v12558_v29  ;;  %8288 = vmatprep.subr.bf16.mxu1 %v12561_v30  ;;  %v12628_v29 = vld [vmem:[%s13701_s25 + $0x1090] ss:$48 sps:$4 sm:$0xff]   ;;  %v12631_v30 = vld [vmem:[%s13701_s25 + $0x1098] ss:$48 sps:$4 sm:$0xff]  }
 0x225   : > { %8034 = vmatmul.mubr.bf16.vlgmr.msra.gmra.mrb[4].mxu0 %v13883_v5  ;;  %8280 = vmatmul.mubr.bf16.vlgmr.msra.gmra.mrb[4].mxu1 %v13883_v5 }
 0x226   : > { %8043 = vmatpush1.bf16.msra.mxu0 %v12556_v32  ;;  %8289 = vmatpush1.bf16.msra.mxu1 %v12559_v35  ;;  %v12636_v32 = vld [vmem:[%s13701_s25 + $0x10f4] ss:$48 sps:$4 sm:$0xff]   ;;  %v12639_v35 = vld [vmem:[%s13701_s25 + $0x10fc] ss:$48 sps:$4 sm:$0xff]  }
 0x227   : > { %8044 = vmatprep.subr.bf16.mxu0 %v12564_v36  ;;  %8290 = vmatprep.subr.bf16.mxu1 %v12567_v37  ;;  %v12634_v36 = vld [vmem:[%s13701_s25 + $0x10f0] ss:$48 sps:$4 sm:$0xff]   ;;  %v12637_v37 = vld [vmem:[%s13701_s25 + $0x10f8] ss:$48 sps:$4 sm:$0xff]  }
 0x228   : > { %8074 = vmatprep.mubr.bf16.mxu0 %v13889_v9  ;;  %8320 = vmatprep.mubr.bf16.mxu1 %v13889_v9 }
 0x22a   : > { %8045 = vmatpush1.bf16.msra.mxu0 %v12562_v38  ;;  %8291 = vmatpush1.bf16.msra.mxu1 %v12565_v39  ;;  %v12642_v38 = vld [vmem:[%s13701_s25 + $0x1154] ss:$48 sps:$4 sm:$0xff]   ;;  %v12645_v39 = vld [vmem:[%s13701_s25 + $0x115c] ss:$48 sps:$4 sm:$0xff]  }
 0x22b   : > { %8046 = vmatprep.subr.bf16.mxu0 %v12570_v40  ;;  %8292 = vmatprep.subr.bf16.mxu1 %v12573_v41  ;;  %v12640_v40 = vld [vmem:[%s13701_s25 + $0x1150] ss:$48 sps:$4 sm:$0xff]   ;;  %v12643_v41 = vld [vmem:[%s13701_s25 + $0x1158] ss:$48 sps:$4 sm:$0xff]  }
 0x22e   : > { %8047 = vmatpush1.bf16.msra.mxu0 %v12568_v43  ;;  %8293 = vmatpush1.bf16.msra.mxu1 %v12571_v45  ;;  %v12648_v43 = vld [vmem:[%s13701_s25 + $0x11b4] ss:$48 sps:$4 sm:$0xff]   ;;  %v12651_v45 = vld [vmem:[%s13701_s25 + $0x11bc] ss:$48 sps:$4 sm:$0xff]  }
 0x22f   : > { %8048 = vmatprep.subr.bf16.mxu0 %v12576_v46  ;;  %8294 = vmatprep.subr.bf16.mxu1 %v12579_v47  ;;  %v12646_v46 = vld [vmem:[%s13701_s25 + $0x11b0] ss:$48 sps:$4 sm:$0xff]   ;;  %v12649_v47 = vld [vmem:[%s13701_s25 + $0x11b8] ss:$48 sps:$4 sm:$0xff]  }
 0x232   : > { %8049 = vmatpush1.bf16.msra.mxu0 %v12574_v48  ;;  %8295 = vmatpush1.bf16.msra.mxu1 %v12577_v20  ;;  %v12654_v48 = vld [vmem:[%s13701_s25 + $0x1214] ss:$48 sps:$4 sm:$0xff]   ;;  %v12657_v20 = vld [vmem:[%s13701_s25 + $0x121c] ss:$48 sps:$4 sm:$0xff]  }
 0x233   : > { %8050 = vmatprep.subr.bf16.mxu0 %v12582_v50  ;;  %8296 = vmatprep.subr.bf16.mxu1 %v12585_v51  ;;  %v12652_v50 = vld [vmem:[%s13701_s25 + $0x1210] ss:$48 sps:$4 sm:$0xff]   ;;  %v12655_v51 = vld [vmem:[%s13701_s25 + $0x1218] ss:$48 sps:$4 sm:$0xff]  }
 0x236   : > { %8051 = vmatpush1.bf16.msra.mxu0 %v12580_v52  ;;  %8297 = vmatpush1.bf16.msra.mxu1 %v12583_v53  ;;  %v12660_v52 = vld [vmem:[%s13701_s25 + $0x1274] ss:$48 sps:$4 sm:$0xff]   ;;  %v12663_v53 = vld [vmem:[%s13701_s25 + $0x127c] ss:$48 sps:$4 sm:$0xff]  }
 0x237   : > { %8052 = vmatprep.subr.bf16.mxu0 %v12588_v54  ;;  %8298 = vmatprep.subr.bf16.mxu1 %v12591_v55  ;;  %v12658_v54 = vld [vmem:[%s13701_s25 + $0x1270] ss:$48 sps:$4 sm:$0xff]   ;;  %v12661_v55 = vld [vmem:[%s13701_s25 + $0x1278] ss:$48 sps:$4 sm:$0xff]  }
 0x23a   : > { %8053 = vmatpush1.bf16.msra.mxu0 %v12586_v56  ;;  %8299 = vmatpush1.bf16.msra.mxu1 %v12589_v57  ;;  %v12666_v56 = vld [vmem:[%s13701_s25 + $0x12d4] ss:$48 sps:$4 sm:$0xff]   ;;  %v12669_v57 = vld [vmem:[%s13701_s25 + $0x12dc] ss:$48 sps:$4 sm:$0xff]  }
 0x23b   : > { %8054 = vmatprep.subr.bf16.mxu0 %v12594_v60  ;;  %8300 = vmatprep.subr.bf16.mxu1 %v12597_v61  ;;  %v12664_v60 = vld [vmem:[%s13701_s25 + $0x12d0] ss:$48 sps:$4 sm:$0xff]   ;;  %v12667_v61 = vld [vmem:[%s13701_s25 + $0x12d8] ss:$48 sps:$4 sm:$0xff]  }
 0x23e   : > { %8055 = vmatpush1.bf16.msra.mxu0 %v12592_v0  ;;  %8301 = vmatpush1.bf16.msra.mxu1 %v12595_v34  ;;  %v12672_v0 = vld [vmem:[%s13701_s25 + $0x1334] ss:$48 sps:$4 sm:$0xff]   ;;  %v12675_v34 = vld [vmem:[%s13701_s25 + $0x133c] ss:$48 sps:$4 sm:$0xff]  }
 0x23f   : > { %8056 = vmatprep.subr.bf16.mxu0 %v12600_v1  ;;  %8302 = vmatprep.subr.bf16.mxu1 %v12603_v2  ;;  %v12670_v1 = vld [vmem:[%s13701_s25 + $0x1330] ss:$48 sps:$4 sm:$0xff]   ;;  %v12673_v2 = vld [vmem:[%s13701_s25 + $0x1338] ss:$48 sps:$4 sm:$0xff]  }
 0x242   : > { %8057 = vmatpush1.bf16.msra.mxu0 %v12598_v3  ;;  %8303 = vmatpush1.bf16.msra.mxu1 %v12601_v4  ;;  %v12678_v3 = vld [vmem:[%s13701_s25 + $0x1394] ss:$48 sps:$4 sm:$0xff]   ;;  %v12681_v4 = vld [vmem:[%s13701_s25 + $0x139c] ss:$48 sps:$4 sm:$0xff]  }
 0x243   : > { %8058 = vmatprep.subr.bf16.mxu0 %v12606_v6  ;;  %8304 = vmatprep.subr.bf16.mxu1 %v12609_v7  ;;  %v12676_v6 = vld [vmem:[%s13701_s25 + $0x1390] ss:$48 sps:$4 sm:$0xff]   ;;  %v1563_v7 = vsub.s32 0, %v13757_v24 }
 0x246   : > { %8059 = vmatpush1.bf16.msra.mxu0 %v12604_v8  ;;  %8305 = vmatpush1.bf16.msra.mxu1 %v12607_v10  ;;  %v1571_v8 = vsub.s32 2, %v13757_v24  ;;  %v12679_v10 = vld [vmem:[%s13701_s25 + $0x1398] ss:$48 sps:$4 sm:$0xff]  }
 0x247   : > { %8060 = vmatprep.subr.bf16.mxu0 %v12612_v11  ;;  %8306 = vmatprep.subr.bf16.mxu1 %v12615_v12  ;;  %v1557_v11 = vld [vmem:[%s13706_s28] sm:$0xff]  ;;  %v1567_v12 = vsub.s32 1, %v13757_v24 }
 0x24a   : > { %8061 = vmatpush1.bf16.msra.mxu0 %v12610_v13  ;;  %8307 = vmatpush1.bf16.msra.mxu1 %v12613_v14  ;;  %v1575_v13 = vsub.s32 3, %v13757_v24  ;;  %v12684_v14 = vld [vmem:[%s13701_s25 + $0x13f4] ss:$48 sps:$4 sm:$0xff]  }
 0x24b   : > { %8062 = vmatprep.subr.bf16.mxu0 %v12618_v16  ;;  %8308 = vmatprep.subr.bf16.mxu1 %v12621_v17  ;;  %v12687_v16 = vld [vmem:[%s13701_s25 + $0x13fc] ss:$48 sps:$4 sm:$0xff]   ;;  %v1564_v17 = vrot.slane %v1557_v11, %v1563_v7 }
 0x24e   : > { %8063 = vmatpush1.bf16.msra.mxu0 %v12616_v18  ;;  %8309 = vmatpush1.bf16.msra.mxu1 %v12619_v62  ;;  %v1572_v18 = vrot.slane %v1557_v11, %v1571_v8  ;;  %v1568_v62 = vrot.slane %v1557_v11, %v1567_v12 }
 0x24f   : > { %8064 = vmatprep.subr.bf16.mxu0 %v12624_v21  ;;  %8310 = vmatprep.subr.bf16.mxu1 %v12627_v22  ;;  %v1576_v21 = vrot.slane %v1557_v11, %v1575_v13  ;;  %v12682_v22 = vld [vmem:[%s13701_s25 + $0x13f0] ss:$48 sps:$4 sm:$0xff]   ;;  %v12714_v11 = vld [vmem:[%s13701_s25 + $0x15d4] ss:$48 sps:$4 sm:$0xff]  }
 0x252   : > { %8065 = vmatpush1.bf16.msra.mxu0 %v12622_v23  ;;  %8311 = vmatpush1.bf16.msra.mxu1 %v12625_v25  ;;  %v12685_v23 = vld [vmem:[%s13701_s25 + $0x13f8] ss:$48 sps:$4 sm:$0xff]   ;;  %v12690_v25 = vld [vmem:[%s13701_s25 + $0x1454] ss:$48 sps:$4 sm:$0xff]  }
 0x253   : > { %8066 = vmatprep.subr.bf16.mxu0 %v12630_v26  ;;  %8312 = vmatprep.subr.bf16.mxu1 %v12633_v27  ;;  %v12693_v26 = vld [vmem:[%s13701_s25 + $0x145c] ss:$48 sps:$4 sm:$0xff]  }
 0x256   : > { %8067 = vmatpush1.bf16.msra.mxu0 %v12628_v29  ;;  %8313 = vmatpush1.bf16.msra.mxu1 %v12631_v30  ;;  %v12688_v30 = vld [vmem:[%s13701_s25 + $0x1450] ss:$48 sps:$4 sm:$0xff]  }
 0x257   : > { %8068 = vmatprep.subr.bf16.mxu0 %v12636_v32  ;;  %8314 = vmatprep.subr.bf16.mxu1 %v12639_v35 }
 0x25a   : > { %8069 = vmatpush1.bf16.msra.mxu0 %v12634_v36  ;;  %8315 = vmatpush1.bf16.msra.mxu1 %v12637_v37 }
 0x25b   : > { %8070 = vmatprep.subr.bf16.mxu0 %v12642_v38  ;;  %8316 = vmatprep.subr.bf16.mxu1 %v12645_v39 }
 0x25e   : > { %8071 = vmatpush1.bf16.msra.mxu0 %v12640_v40  ;;  %8317 = vmatpush1.bf16.msra.mxu1 %v12643_v41 }
 0x25f   : > { %8072 = vmatprep.subr.bf16.mxu0 %v12648_v43  ;;  %8318 = vmatprep.subr.bf16.mxu1 %v12651_v45  ;;  %v12691_v43 = vld [vmem:[%s13701_s25 + $0x1458] ss:$48 sps:$4 sm:$0xff]   ;;  %v12696_v45 = vld [vmem:[%s13701_s25 + $0x14b4] ss:$48 sps:$4 sm:$0xff]  }
 0x262   : > { %8073 = vmatpush1.bf16.msra.mxu0 %v12646_v46  ;;  %8319 = vmatpush1.bf16.msra.mxu1 %v12649_v47 }
 0x263   : > { %8083 = vmatprep.subr.bf16.mxu0 %v12654_v48  ;;  %8329 = vmatprep.subr.bf16.mxu1 %v12657_v20 }
 0x265   : > { %8075 = vmatmul.mubr.bf16.vlgmr.msra.gmra.mrb[4].mxu0 %v13958_v15  ;;  %8321 = vmatmul.mubr.bf16.vlgmr.msra.gmra.mrb[4].mxu1 %v13958_v15 }
 0x266   : > { %8084 = vmatpush1.bf16.msra.mxu0 %v12652_v50  ;;  %8330 = vmatpush1.bf16.msra.mxu1 %v12655_v51  ;;  %v12699_v50 = vld [vmem:[%s13701_s25 + $0x14bc] ss:$48 sps:$4 sm:$0xff]  }
 0x267   : > { %8085 = vmatprep.subr.bf16.mxu0 %v12660_v52  ;;  %8331 = vmatprep.subr.bf16.mxu1 %v12663_v53 }
 0x268   : > { %8115 = vmatprep.mubr.bf16.mxu0 %v13965_v19  ;;  %8361 = vmatprep.mubr.bf16.mxu1 %v13965_v19 }
 0x26a   : > { %8086 = vmatpush1.bf16.msra.mxu0 %v12658_v54  ;;  %8332 = vmatpush1.bf16.msra.mxu1 %v12661_v55  ;;  %v12694_v55 = vld [vmem:[%s13701_s25 + $0x14b0] ss:$48 sps:$4 sm:$0xff]  }
 0x26b   : > { %8087 = vmatprep.subr.bf16.mxu0 %v12666_v56  ;;  %8333 = vmatprep.subr.bf16.mxu1 %v12669_v57  ;;  %v12697_v56 = vld [vmem:[%s13701_s25 + $0x14b8] ss:$48 sps:$4 sm:$0xff]   ;;  %v12702_v57 = vld [vmem:[%s13701_s25 + $0x1514] ss:$48 sps:$4 sm:$0xff]  }
 0x26e   : > { %8088 = vmatpush1.bf16.msra.mxu0 %v12664_v60  ;;  %8334 = vmatpush1.bf16.msra.mxu1 %v12667_v61  ;;  %v12705_v60 = vld [vmem:[%s13701_s25 + $0x151c] ss:$48 sps:$4 sm:$0xff]  }
 0x26f   : > { %8089 = vmatprep.subr.bf16.mxu0 %v12672_v0  ;;  %8335 = vmatprep.subr.bf16.mxu1 %v12675_v34 }
 0x272   : > { %8090 = vmatpush1.bf16.msra.mxu0 %v12670_v1  ;;  %8336 = vmatpush1.bf16.msra.mxu1 %v12673_v2  ;;  %v12700_v1 = vld [vmem:[%s13701_s25 + $0x1510] ss:$48 sps:$4 sm:$0xff]   ;;  %v12703_v2 = vld [vmem:[%s13701_s25 + $0x1518] ss:$48 sps:$4 sm:$0xff]  }
 0x273   : > { %8091 = vmatprep.subr.bf16.mxu0 %v12678_v3  ;;  %8337 = vmatprep.subr.bf16.mxu1 %v12681_v4  ;;  %v12708_v3 = vld [vmem:[%s13701_s25 + $0x1574] ss:$48 sps:$4 sm:$0xff]   ;;  %v12711_v4 = vld [vmem:[%s13701_s25 + $0x157c] ss:$48 sps:$4 sm:$0xff]  }
 0x276   : > { %8092 = vmatpush1.bf16.msra.mxu0 %v12676_v6  ;;  %8338 = vmatpush1.bf16.msra.mxu1 %v12679_v10  ;;  %v12706_v6 = vld [vmem:[%s13701_s25 + $0x1570] ss:$48 sps:$4 sm:$0xff]   ;;  %v12709_v10 = vld [vmem:[%s13701_s25 + $0x1578] ss:$48 sps:$4 sm:$0xff]  }
 0x277   : > { %8093 = vmatprep.subr.bf16.mxu0 %v12684_v14  ;;  %8339 = vmatprep.subr.bf16.mxu1 %v12687_v16  ;;  %v12717_v14 = vld [vmem:[%s13701_s25 + $0x15dc] ss:$48 sps:$4 sm:$0xff]   ;;  %v12712_v16 = vld [vmem:[%s13701_s25 + $0x15d0] ss:$48 sps:$4 sm:$0xff]  }
 0x278   : > { %v7707_v27 = vpop.f32.mrb[0].mxu0  ;;  %v7953_v29 = vpop.f32.mrb[0].mxu1 }
 0x279   : > { %v11632_v32 = vadd.f32 %v7707_v27, %v1564_v17  ;;  %v11634_v35 = vadd.f32 %v7953_v29, %v1572_v18  ;;  %v7709_v36 = vpop.f32.mrb[1].mxu0  ;;  %v7955_v37 = vpop.f32.mrb[1].mxu1  ;;  %v12715_v17 = vld [vmem:[%s13701_s25 + $0x15d8] ss:$48 sps:$4 sm:$0xff]   ;;  %v12720_v18 = vld [vmem:[%s13701_s25 + $0x1634] ss:$48 sps:$4 sm:$0xff]  }
 0x27a   : > { %v11633_v38 = vadd.f32 %v7709_v36, %v1568_v62  ;;  %v11635_v39 = vadd.f32 %v7955_v37, %v1576_v21  ;;  %v7711_v40 = vpop.f32.mrb[2].mxu0  ;;  %v7957_v41 = vpop.f32.mrb[2].mxu1  ;;  %8094 = vmatpush1.bf16.msra.mxu0 %v12682_v22  ;;  %8340 = vmatpush1.bf16.msra.mxu1 %v12685_v23  ;;  %v12723_v62 = vld [vmem:[%s13701_s25 + $0x163c] ss:$48 sps:$4 sm:$0xff]   ;;  %v12718_v21 = vld [vmem:[%s13701_s25 + $0x1630] ss:$48 sps:$4 sm:$0xff]  }
 0x27b   : > { %v8944_v46 = vmax.f32 %v11632_v32, 0.0  ;;  %v8946_v47 = vmax.f32 %v11634_v35, 0.0  ;;  %v7712_v48 = vpop.f32.mrb[3].mxu0  ;;  %v7958_v20 = vpop.f32.mrb[3].mxu1  ;;  %8095 = vmatprep.subr.bf16.mxu0 %v12690_v25  ;;  %8341 = vmatprep.subr.bf16.mxu1 %v12693_v26  ;;  %v12721_v22 = vld [vmem:[%s13701_s25 + $0x1638] ss:$48 sps:$4 sm:$0xff]  }
 0x27c   : > { %v8945_v51 = vmax.f32 %v11633_v38, 0.0  ;;  %v8947_v52 = vmax.f32 %v11635_v39, 0.0  ;;  %v12726_v23 = vld [vmem:[%s13701_s25 + $0x1694] ss:$48 sps:$4 sm:$0xff]   ;;  %v12729_v25 = vld [vmem:[%s13701_s25 + $0x169c] ss:$48 sps:$4 sm:$0xff]  }
 0x27d   : > { %v12724_v26 = vld [vmem:[%s13701_s25 + $0x1690] ss:$48 sps:$4 sm:$0xff]   ;;  %v12727_v27 = vld [vmem:[%s13701_s25 + $0x1698] ss:$48 sps:$4 sm:$0xff]   ;;  %v12732_v29 = vld [vmem:[%s13701_s25 + $0x16f4] ss:$48 sps:$4 sm:$0xff]  }
 0x27e   : > { %v11390_v53 = vpack.c.bf16 %v8945_v51, %v8944_v46  ;;  %v11391_v54 = vpack.c.bf16 %v8947_v52, %v8946_v47  ;;  %8096 = vmatpush1.bf16.msra.mxu0 %v12688_v30  ;;  %8342 = vmatpush1.bf16.msra.mxu1 %v12691_v43  ;;  %v12735_v30 = vld [vmem:[%s13701_s25 + $0x16fc] ss:$48 sps:$4 sm:$0xff]   ;;  %v12730_v32 = vld [vmem:[%s13701_s25 + $0x16f0] ss:$48 sps:$4 sm:$0xff]   ;;  %v12733_v35 = vld [vmem:[%s13701_s25 + $0x16f8] ss:$48 sps:$4 sm:$0xff]  }
 0x27f   : > { %8097 = vmatprep.subr.bf16.mxu0 %v12696_v45  ;;  %8343 = vmatprep.subr.bf16.mxu1 %v12699_v50  ;;  %v12738_v36 = vld [vmem:[%s13701_s25 + $0x1754] ss:$48 sps:$4 sm:$0xff]   ;;  %v12741_v37 = vld [vmem:[%s13701_s25 + $0x175c] ss:$48 sps:$4 sm:$0xff]   ;;  %v12736_v38 = vld [vmem:[%s13701_s25 + $0x1750] ss:$48 sps:$4 sm:$0xff]  }
 0x280   : > { %v8990_v61 = vrot.slane %v11390_v53, %v13765_v31  ;;  %v8997_v0 = vrot.slane %v11391_v54, %v13765_v31  ;;  %v12739_v39 = vld [vmem:[%s13701_s25 + $0x1758] ss:$48 sps:$4 sm:$0xff]   ;;  %v12744_v40 = vld [vmem:[%s13701_s25 + $0x17b4] ss:$48 sps:$4 sm:$0xff]   ;;  %v12747_v41 = vld [vmem:[%s13701_s25 + $0x17bc] ss:$48 sps:$4 sm:$0xff]  }
 0x281   : > { %v12742_v43 = vld [vmem:[%s13701_s25 + $0x17b0] ss:$48 sps:$4 sm:$0xff]   ;;  %v12745_v45 = vld [vmem:[%s13701_s25 + $0x17b8] ss:$48 sps:$4 sm:$0xff]   ;;  %v12750_v46 = vld [vmem:[%s13701_s25 + $0x1814] ss:$48 sps:$4 sm:$0xff]  }
 0x282   : > { %v14445_v34 = vcombine.low %v8990_v61, %v8997_v0  ;;  %8098 = vmatpush1.bf16.msra.mxu0 %v12694_v55  ;;  %8344 = vmatpush1.bf16.msra.mxu1 %v12697_v56  ;;  %v12753_v47 = vld [vmem:[%s13701_s25 + $0x181c] ss:$48 sps:$4 sm:$0xff]   ;;  %v12748_v48 = vld [vmem:[%s13701_s25 + $0x1810] ss:$48 sps:$4 sm:$0xff]   ;;  %v12751_v20 = vld [vmem:[%s13701_s25 + $0x1818] ss:$48 sps:$4 sm:$0xff]  }
 0x283   : > { %8099 = vmatprep.subr.bf16.mxu0 %v12702_v57  ;;  %8345 = vmatprep.subr.bf16.mxu1 %v12705_v60  ;;  %v12756_v50 = vld [vmem:[%s13701_s25 + $0x1874] ss:$48 sps:$4 sm:$0xff]   ;;  %v12759_v51 = vld [vmem:[%s13701_s25 + $0x187c] ss:$48 sps:$4 sm:$0xff]   ;;  %v12754_v52 = vld [vmem:[%s13701_s25 + $0x1870] ss:$48 sps:$4 sm:$0xff]  }
 0x284   : > { %v12757_v53 = vld [vmem:[%s13701_s25 + $0x1878] ss:$48 sps:$4 sm:$0xff]   ;;  %v12762_v54 = vld [vmem:[%s13701_s25 + $0x18d4] ss:$48 sps:$4 sm:$0xff]   ;;  %v12765_v55 = vld [vmem:[%s13701_s25 + $0x18dc] ss:$48 sps:$4 sm:$0xff]  }
 0x285   : > { %v12760_v56 = vld [vmem:[%s13701_s25 + $0x18d0] ss:$48 sps:$4 sm:$0xff]   ;;  %v12763_v57 = vld [vmem:[%s13701_s25 + $0x18d8] ss:$48 sps:$4 sm:$0xff]   ;;  %v12768_v60 = vld [vmem:[%s13701_s25 + $0x1934] ss:$48 sps:$4 sm:$0xff]  }
 0x286   : > { %8100 = vmatpush1.bf16.msra.mxu0 %v12700_v1  ;;  %8346 = vmatpush1.bf16.msra.mxu1 %v12703_v2  ;;  %v12771_v61 = vld [vmem:[%s13701_s25 + $0x193c] ss:$48 sps:$4 sm:$0xff]   ;;  %v12766_v0 = vld [vmem:[%s13701_s25 + $0x1930] ss:$48 sps:$4 sm:$0xff]   ;;  %v12769_v1 = vld [vmem:[%s13701_s25 + $0x1938] ss:$48 sps:$4 sm:$0xff]  }
 0x287   : > { %8101 = vmatprep.subr.bf16.mxu0 %v12708_v3  ;;  %8347 = vmatprep.subr.bf16.mxu1 %v12711_v4  ;;  %v12774_v2 = vld [vmem:[%s13701_s25 + $0x1994] ss:$48 sps:$4 sm:$0xff]   ;;  %v12777_v3 = vld [vmem:[%s13701_s25 + $0x199c] ss:$48 sps:$4 sm:$0xff]   ;;  %v12772_v4 = vld [vmem:[%s13701_s25 + $0x1990] ss:$48 sps:$4 sm:$0xff]  }
 0x28a   : > { %8102 = vmatpush1.bf16.msra.mxu0 %v12706_v6  ;;  %8348 = vmatpush1.bf16.msra.mxu1 %v12709_v10  ;;  %v12775_v6 = vld [vmem:[%s13701_s25 + $0x1998] ss:$48 sps:$4 sm:$0xff]   ;;  %v12780_v10 = vld [vmem:[%s13701_s25 + $0x19f4] ss:$48 sps:$4 sm:$0xff]  }
 0x28b   : > { %8103 = vmatprep.subr.bf16.mxu0 %v12714_v11  ;;  %8349 = vmatprep.subr.bf16.mxu1 %v12717_v14  ;;  %v12783_v11 = vld [vmem:[%s13701_s25 + $0x19fc] ss:$48 sps:$4 sm:$0xff]   ;;  %v12778_v14 = vld [vmem:[%s13701_s25 + $0x19f0] ss:$48 sps:$4 sm:$0xff]  }
 0x28e   : > { %8104 = vmatpush1.bf16.msra.mxu0 %v12712_v16  ;;  %8350 = vmatpush1.bf16.msra.mxu1 %v12715_v17  ;;  %v12781_v16 = vld [vmem:[%s13701_s25 + $0x19f8] ss:$48 sps:$4 sm:$0xff]   ;;  %v12786_v17 = vld [vmem:[%s13701_s25 + $0x1a54] ss:$48 sps:$4 sm:$0xff]  }
 0x28f   : > { %8105 = vmatprep.subr.bf16.mxu0 %v12720_v18  ;;  %8351 = vmatprep.subr.bf16.mxu1 %v12723_v62  ;;  %v12789_v18 = vld [vmem:[%s13701_s25 + $0x1a5c] ss:$48 sps:$4 sm:$0xff]   ;;  %v12784_v62 = vld [vmem:[%s13701_s25 + $0x1a50] ss:$48 sps:$4 sm:$0xff]  }
 0x292   : > { %8106 = vmatpush1.bf16.msra.mxu0 %v12718_v21  ;;  %8352 = vmatpush1.bf16.msra.mxu1 %v12721_v22  ;;  %v12787_v21 = vld [vmem:[%s13701_s25 + $0x1a58] ss:$48 sps:$4 sm:$0xff]   ;;  %v12792_v22 = vld [vmem:[%s13701_s25 + $0x1ab4] ss:$48 sps:$4 sm:$0xff]  }
 0x293   : > { %8107 = vmatprep.subr.bf16.mxu0 %v12726_v23  ;;  %8353 = vmatprep.subr.bf16.mxu1 %v12729_v25  ;;  %v12795_v23 = vld [vmem:[%s13701_s25 + $0x1abc] ss:$48 sps:$4 sm:$0xff]   ;;  %v12790_v25 = vld [vmem:[%s13701_s25 + $0x1ab0] ss:$48 sps:$4 sm:$0xff]  }
 0x296   : > { %8108 = vmatpush1.bf16.msra.mxu0 %v12724_v26  ;;  %8354 = vmatpush1.bf16.msra.mxu1 %v12727_v27  ;;  %v12793_v26 = vld [vmem:[%s13701_s25 + $0x1ab8] ss:$48 sps:$4 sm:$0xff]   ;;  %v12798_v27 = vld [vmem:[%s13701_s25 + $0x1b14] ss:$48 sps:$4 sm:$0xff]  }
 0x297   : > { %8109 = vmatprep.subr.bf16.mxu0 %v12732_v29  ;;  %8355 = vmatprep.subr.bf16.mxu1 %v12735_v30  ;;  %v12801_v29 = vld [vmem:[%s13701_s25 + $0x1b1c] ss:$48 sps:$4 sm:$0xff]   ;;  %v12796_v30 = vld [vmem:[%s13701_s25 + $0x1b10] ss:$48 sps:$4 sm:$0xff]  }
 0x29a   : > { %8110 = vmatpush1.bf16.msra.mxu0 %v12730_v32  ;;  %8356 = vmatpush1.bf16.msra.mxu1 %v12733_v35  ;;  %v12799_v32 = vld [vmem:[%s13701_s25 + $0x1b18] ss:$48 sps:$4 sm:$0xff]   ;;  %v12804_v35 = vld [vmem:[%s13701_s25 + $0x1b74] ss:$48 sps:$4 sm:$0xff]  }
 0x29b   : > { %8111 = vmatprep.subr.bf16.mxu0 %v12738_v36  ;;  %8357 = vmatprep.subr.bf16.mxu1 %v12741_v37  ;;  %v12807_v36 = vld [vmem:[%s13701_s25 + $0x1b7c] ss:$48 sps:$4 sm:$0xff]   ;;  %v12802_v37 = vld [vmem:[%s13701_s25 + $0x1b70] ss:$48 sps:$4 sm:$0xff]  }
 0x29e   : > { %8112 = vmatpush1.bf16.msra.mxu0 %v12736_v38  ;;  %8358 = vmatpush1.bf16.msra.mxu1 %v12739_v39  ;;  %v12805_v38 = vld [vmem:[%s13701_s25 + $0x1b78] ss:$48 sps:$4 sm:$0xff]   ;;  %v12810_v39 = vld [vmem:[%s13701_s25 + $0x1bd4] ss:$48 sps:$4 sm:$0xff]  }
 0x29f   : > { %8113 = vmatprep.subr.bf16.mxu0 %v12744_v40  ;;  %8359 = vmatprep.subr.bf16.mxu1 %v12747_v41  ;;  %v12813_v40 = vld [vmem:[%s13701_s25 + $0x1bdc] ss:$48 sps:$4 sm:$0xff]   ;;  %v12808_v41 = vld [vmem:[%s13701_s25 + $0x1bd0] ss:$48 sps:$4 sm:$0xff]  }
 0x2a2   : > { %8114 = vmatpush1.bf16.msra.mxu0 %v12742_v43  ;;  %8360 = vmatpush1.bf16.msra.mxu1 %v12745_v45  ;;  %v12811_v43 = vld [vmem:[%s13701_s25 + $0x1bd8] ss:$48 sps:$4 sm:$0xff]   ;;  %v12816_v45 = vld [vmem:[%s13701_s25 + $0x1c34] ss:$48 sps:$4 sm:$0xff]  }
 0x2a3   : > { %8124 = vmatprep.subr.bf16.mxu0 %v12750_v46  ;;  %8370 = vmatprep.subr.bf16.mxu1 %v12753_v47  ;;  %v12819_v46 = vld [vmem:[%s13701_s25 + $0x1c3c] ss:$48 sps:$4 sm:$0xff]   ;;  %v12814_v47 = vld [vmem:[%s13701_s25 + $0x1c30] ss:$48 sps:$4 sm:$0xff]  }
 0x2a5   : > { %8116 = vmatmul.mubr.bf16.vlgmr.msra.gmra.mrb[4].mxu0 %v14038_v28  ;;  %8362 = vmatmul.mubr.bf16.vlgmr.msra.gmra.mrb[4].mxu1 %v14038_v28 }
 0x2a6   : > { %8125 = vmatpush1.bf16.msra.mxu0 %v12748_v48  ;;  %8371 = vmatpush1.bf16.msra.mxu1 %v12751_v20  ;;  %v12817_v48 = vld [vmem:[%s13701_s25 + $0x1c38] ss:$48 sps:$4 sm:$0xff]   ;;  %v12822_v20 = vld [vmem:[%s13701_s25 + $0x1c94] ss:$48 sps:$4 sm:$0xff]  }
 0x2a7   : > { %8126 = vmatprep.subr.bf16.mxu0 %v12756_v50  ;;  %8372 = vmatprep.subr.bf16.mxu1 %v12759_v51  ;;  %v12825_v50 = vld [vmem:[%s13701_s25 + $0x1c9c] ss:$48 sps:$4 sm:$0xff]   ;;  %v12820_v51 = vld [vmem:[%s13701_s25 + $0x1c90] ss:$48 sps:$4 sm:$0xff]  }
 0x2a8   : > { %8156 = vmatprep.mubr.bf16.mxu0 %v14044_v33  ;;  %8402 = vmatprep.mubr.bf16.mxu1 %v14044_v33 }
 0x2aa   : > { %8127 = vmatpush1.bf16.msra.mxu0 %v12754_v52  ;;  %8373 = vmatpush1.bf16.msra.mxu1 %v12757_v53  ;;  %v12823_v52 = vld [vmem:[%s13701_s25 + $0x1c98] ss:$48 sps:$4 sm:$0xff]   ;;  %v12828_v53 = vld [vmem:[%s13701_s25 + $0x1cf4] ss:$48 sps:$4 sm:$0xff]  }
 0x2ab   : > { %8128 = vmatprep.subr.bf16.mxu0 %v12762_v54  ;;  %8374 = vmatprep.subr.bf16.mxu1 %v12765_v55  ;;  %v12831_v54 = vld [vmem:[%s13701_s25 + $0x1cfc] ss:$48 sps:$4 sm:$0xff]   ;;  %v12826_v55 = vld [vmem:[%s13701_s25 + $0x1cf0] ss:$48 sps:$4 sm:$0xff]  }
 0x2ae   : > { %8129 = vmatpush1.bf16.msra.mxu0 %v12760_v56  ;;  %8375 = vmatpush1.bf16.msra.mxu1 %v12763_v57  ;;  %v12829_v56 = vld [vmem:[%s13701_s25 + $0x1cf8] ss:$48 sps:$4 sm:$0xff]   ;;  %v12834_v57 = vld [vmem:[%s13701_s25 + $0x1d54] ss:$48 sps:$4 sm:$0xff]  }
 0x2af   : > { %8130 = vmatprep.subr.bf16.mxu0 %v12768_v60  ;;  %8376 = vmatprep.subr.bf16.mxu1 %v12771_v61  ;;  %v12837_v60 = vld [vmem:[%s13701_s25 + $0x1d5c] ss:$48 sps:$4 sm:$0xff]   ;;  %v12832_v61 = vld [vmem:[%s13701_s25 + $0x1d50] ss:$48 sps:$4 sm:$0xff]  }
 0x2b2   : > { %8131 = vmatpush1.bf16.msra.mxu0 %v12766_v0  ;;  %8377 = vmatpush1.bf16.msra.mxu1 %v12769_v1  ;;  %v12835_v0 = vld [vmem:[%s13701_s25 + $0x1d58] ss:$48 sps:$4 sm:$0xff]   ;;  %v12840_v1 = vld [vmem:[%s13701_s25 + $0x1db4] ss:$48 sps:$4 sm:$0xff]  }
 0x2b3   : > { %8132 = vmatprep.subr.bf16.mxu0 %v12774_v2  ;;  %8378 = vmatprep.subr.bf16.mxu1 %v12777_v3  ;;  %v12843_v2 = vld [vmem:[%s13701_s25 + $0x1dbc] ss:$48 sps:$4 sm:$0xff]   ;;  %v12838_v3 = vld [vmem:[%s13701_s25 + $0x1db0] ss:$48 sps:$4 sm:$0xff]  }
 0x2b6   : > { %8133 = vmatpush1.bf16.msra.mxu0 %v12772_v4  ;;  %8379 = vmatpush1.bf16.msra.mxu1 %v12775_v6  ;;  %v12841_v4 = vld [vmem:[%s13701_s25 + $0x1db8] ss:$48 sps:$4 sm:$0xff]   ;;  %v12846_v6 = vld [vmem:[%s13701_s25 + $0x1e14] ss:$48 sps:$4 sm:$0xff]  }
 0x2b7   : > { %8134 = vmatprep.subr.bf16.mxu0 %v12780_v10  ;;  %8380 = vmatprep.subr.bf16.mxu1 %v12783_v11  ;;  %v12849_v10 = vld [vmem:[%s13701_s25 + $0x1e1c] ss:$48 sps:$4 sm:$0xff]   ;;  %v12844_v11 = vld [vmem:[%s13701_s25 + $0x1e10] ss:$48 sps:$4 sm:$0xff]  }
 0x2ba   : > { %8135 = vmatpush1.bf16.msra.mxu0 %v12778_v14  ;;  %8381 = vmatpush1.bf16.msra.mxu1 %v12781_v16  ;;  %v12847_v14 = vld [vmem:[%s13701_s25 + $0x1e18] ss:$48 sps:$4 sm:$0xff]   ;;  %v12852_v16 = vld [vmem:[%s13701_s25 + $0x1e74] ss:$48 sps:$4 sm:$0xff]  }
 0x2bb   : > { %8136 = vmatprep.subr.bf16.mxu0 %v12786_v17  ;;  %8382 = vmatprep.subr.bf16.mxu1 %v12789_v18  ;;  %v12855_v17 = vld [vmem:[%s13701_s25 + $0x1e7c] ss:$48 sps:$4 sm:$0xff]   ;;  %v12850_v18 = vld [vmem:[%s13701_s25 + $0x1e70] ss:$48 sps:$4 sm:$0xff]  }
 0x2be   : > { %8137 = vmatpush1.bf16.msra.mxu0 %v12784_v62  ;;  %8383 = vmatpush1.bf16.msra.mxu1 %v12787_v21  ;;  %v12853_v62 = vld [vmem:[%s13701_s25 + $0x1e78] ss:$48 sps:$4 sm:$0xff]   ;;  %v12858_v21 = vld [vmem:[%s13701_s25 + $0x1ed4] ss:$48 sps:$4 sm:$0xff]  }
 0x2bf   : > { %8138 = vmatprep.subr.bf16.mxu0 %v12792_v22  ;;  %8384 = vmatprep.subr.bf16.mxu1 %v12795_v23  ;;  %v12861_v22 = vld [vmem:[%s13701_s25 + $0x1edc] ss:$48 sps:$4 sm:$0xff]   ;;  %v12856_v23 = vld [vmem:[%s13701_s25 + $0x1ed0] ss:$48 sps:$4 sm:$0xff]  }
 0x2c2   : > { %8139 = vmatpush1.bf16.msra.mxu0 %v12790_v25  ;;  %8385 = vmatpush1.bf16.msra.mxu1 %v12793_v26  ;;  %v12859_v25 = vld [vmem:[%s13701_s25 + $0x1ed8] ss:$48 sps:$4 sm:$0xff]   ;;  %v12864_v26 = vld [vmem:[%s13701_s25 + $0x1f34] ss:$48 sps:$4 sm:$0xff]  }
 0x2c3   : > { %8140 = vmatprep.subr.bf16.mxu0 %v12798_v27  ;;  %8386 = vmatprep.subr.bf16.mxu1 %v12801_v29  ;;  %v12867_v27 = vld [vmem:[%s13701_s25 + $0x1f3c] ss:$48 sps:$4 sm:$0xff]   ;;  %v12862_v29 = vld [vmem:[%s13701_s25 + $0x1f30] ss:$48 sps:$4 sm:$0xff]  }
 0x2c6   : > { %8141 = vmatpush1.bf16.msra.mxu0 %v12796_v30  ;;  %8387 = vmatpush1.bf16.msra.mxu1 %v12799_v32  ;;  %v12865_v30 = vld [vmem:[%s13701_s25 + $0x1f38] ss:$48 sps:$4 sm:$0xff]   ;;  %v12870_v32 = vld [vmem:[%s13701_s25 + $0x1f94] ss:$48 sps:$4 sm:$0xff]  }
 0x2c7   : > { %8142 = vmatprep.subr.bf16.mxu0 %v12804_v35  ;;  %8388 = vmatprep.subr.bf16.mxu1 %v12807_v36  ;;  %v12873_v35 = vld [vmem:[%s13701_s25 + $0x1f9c] ss:$48 sps:$4 sm:$0xff]   ;;  %v12868_v36 = vld [vmem:[%s13701_s25 + $0x1f90] ss:$48 sps:$4 sm:$0xff]  }
 0x2ca   : > { %8143 = vmatpush1.bf16.msra.mxu0 %v12802_v37  ;;  %8389 = vmatpush1.bf16.msra.mxu1 %v12805_v38  ;;  %v12871_v37 = vld [vmem:[%s13701_s25 + $0x1f98] ss:$48 sps:$4 sm:$0xff]   ;;  %v12876_v38 = vld [vmem:[%s13701_s25 + $0x1ff4] ss:$48 sps:$4 sm:$0xff]  }
 0x2cb   : > { %8144 = vmatprep.subr.bf16.mxu0 %v12810_v39  ;;  %8390 = vmatprep.subr.bf16.mxu1 %v12813_v40  ;;  %v12879_v39 = vld [vmem:[%s13701_s25 + $0x1ffc] ss:$48 sps:$4 sm:$0xff]   ;;  %v12874_v40 = vld [vmem:[%s13701_s25 + $0x1ff0] ss:$48 sps:$4 sm:$0xff]  }
 0x2ce   : > { %8145 = vmatpush1.bf16.msra.mxu0 %v12808_v41  ;;  %8391 = vmatpush1.bf16.msra.mxu1 %v12811_v43  ;;  %v12877_v41 = vld [vmem:[%s13701_s25 + $0x1ff8] ss:$48 sps:$4 sm:$0xff]   ;;  %v12882_v43 = vld [vmem:[%s13701_s25 + $0x2054] ss:$48 sps:$4 sm:$0xff]  }
 0x2cf   : > { %8146 = vmatprep.subr.bf16.mxu0 %v12816_v45  ;;  %8392 = vmatprep.subr.bf16.mxu1 %v12819_v46  ;;  %v12885_v45 = vld [vmem:[%s13701_s25 + $0x205c] ss:$48 sps:$4 sm:$0xff]   ;;  %v12880_v46 = vld [vmem:[%s13701_s25 + $0x2050] ss:$48 sps:$4 sm:$0xff]  }
 0x2d2   : > { %8147 = vmatpush1.bf16.msra.mxu0 %v12814_v47  ;;  %8393 = vmatpush1.bf16.msra.mxu1 %v12817_v48  ;;  %v12883_v47 = vld [vmem:[%s13701_s25 + $0x2058] ss:$48 sps:$4 sm:$0xff]   ;;  %v12888_v48 = vld [vmem:[%s13701_s25 + $0x20b4] ss:$48 sps:$4 sm:$0xff]  }
 0x2d3   : > { %8148 = vmatprep.subr.bf16.mxu0 %v12822_v20  ;;  %8394 = vmatprep.subr.bf16.mxu1 %v12825_v50  ;;  %v12891_v20 = vld [vmem:[%s13701_s25 + $0x20bc] ss:$48 sps:$4 sm:$0xff]   ;;  %v12886_v50 = vld [vmem:[%s13701_s25 + $0x20b0] ss:$48 sps:$4 sm:$0xff]  }
 0x2d6   : > { %8149 = vmatpush1.bf16.msra.mxu0 %v12820_v51  ;;  %8395 = vmatpush1.bf16.msra.mxu1 %v12823_v52  ;;  %v12889_v51 = vld [vmem:[%s13701_s25 + $0x20b8] ss:$48 sps:$4 sm:$0xff]   ;;  %v12894_v52 = vld [vmem:[%s13701_s25 + $0x2114] ss:$48 sps:$4 sm:$0xff]  }
 0x2d7   : > { %8150 = vmatprep.subr.bf16.mxu0 %v12828_v53  ;;  %8396 = vmatprep.subr.bf16.mxu1 %v12831_v54  ;;  %v12897_v53 = vld [vmem:[%s13701_s25 + $0x211c] ss:$48 sps:$4 sm:$0xff]   ;;  %v12892_v54 = vld [vmem:[%s13701_s25 + $0x2110] ss:$48 sps:$4 sm:$0xff]  }
 0x2da   : > { %8151 = vmatpush1.bf16.msra.mxu0 %v12826_v55  ;;  %8397 = vmatpush1.bf16.msra.mxu1 %v12829_v56  ;;  %v12895_v55 = vld [vmem:[%s13701_s25 + $0x2118] ss:$48 sps:$4 sm:$0xff]   ;;  %v12900_v56 = vld [vmem:[%s13701_s25 + $0x2174] ss:$48 sps:$4 sm:$0xff]  }
 0x2db   : > { %8152 = vmatprep.subr.bf16.mxu0 %v12834_v57  ;;  %8398 = vmatprep.subr.bf16.mxu1 %v12837_v60  ;;  %v12903_v57 = vld [vmem:[%s13701_s25 + $0x217c] ss:$48 sps:$4 sm:$0xff]   ;;  %v12898_v60 = vld [vmem:[%s13701_s25 + $0x2170] ss:$48 sps:$4 sm:$0xff]  }
 0x2de   : > { %8153 = vmatpush1.bf16.msra.mxu0 %v12832_v61  ;;  %8399 = vmatpush1.bf16.msra.mxu1 %v12835_v0  ;;  %v12901_v61 = vld [vmem:[%s13701_s25 + $0x2178] ss:$48 sps:$4 sm:$0xff]   ;;  %v12906_v0 = vld [vmem:[%s13701_s25 + $0x21d4] ss:$48 sps:$4 sm:$0xff]  }
 0x2df   : > { %8154 = vmatprep.subr.bf16.mxu0 %v12840_v1  ;;  %8400 = vmatprep.subr.bf16.mxu1 %v12843_v2  ;;  %v12909_v1 = vld [vmem:[%s13701_s25 + $0x21dc] ss:$48 sps:$4 sm:$0xff]   ;;  %v12904_v2 = vld [vmem:[%s13701_s25 + $0x21d0] ss:$48 sps:$4 sm:$0xff]  }
 0x2e2   : > { %8155 = vmatpush1.bf16.msra.mxu0 %v12838_v3  ;;  %8401 = vmatpush1.bf16.msra.mxu1 %v12841_v4  ;;  %v12907_v3 = vld [vmem:[%s13701_s25 + $0x21d8] ss:$48 sps:$4 sm:$0xff]   ;;  %v12912_v4 = vld [vmem:[%s13701_s25 + $0x2234] ss:$48 sps:$4 sm:$0xff]  }
 0x2e3   : > { %8165 = vmatprep.subr.bf16.mxu0 %v12846_v6  ;;  %8411 = vmatprep.subr.bf16.mxu1 %v12849_v10  ;;  %v12915_v6 = vld [vmem:[%s13701_s25 + $0x223c] ss:$48 sps:$4 sm:$0xff]   ;;  %v12910_v10 = vld [vmem:[%s13701_s25 + $0x2230] ss:$48 sps:$4 sm:$0xff]  }
 0x2e5   : > { %8157 = vmatmul.mubr.bf16.vlgmr.msra.gmra.mrb[4].mxu0 %v14112_v44  ;;  %8403 = vmatmul.mubr.bf16.vlgmr.msra.gmra.mrb[4].mxu1 %v14112_v44 }
 0x2e6   : > { %8166 = vmatpush1.bf16.msra.mxu0 %v12844_v11  ;;  %8412 = vmatpush1.bf16.msra.mxu1 %v12847_v14  ;;  %v12913_v11 = vld [vmem:[%s13701_s25 + $0x2238] ss:$48 sps:$4 sm:$0xff]   ;;  %v12918_v14 = vld [vmem:[%s13701_s25 + $0x2294] ss:$48 sps:$4 sm:$0xff]  }
 0x2e7   : > { %8167 = vmatprep.subr.bf16.mxu0 %v12852_v16  ;;  %8413 = vmatprep.subr.bf16.mxu1 %v12855_v17  ;;  %v12921_v16 = vld [vmem:[%s13701_s25 + $0x229c] ss:$48 sps:$4 sm:$0xff]   ;;  %v12916_v17 = vld [vmem:[%s13701_s25 + $0x2290] ss:$48 sps:$4 sm:$0xff]  }
 0x2e8   : > { %8197 = vmatprep.mubr.bf16.mxu0 %v14120_v49  ;;  %8443 = vmatprep.mubr.bf16.mxu1 %v14120_v49 }
 0x2ea   : > { %8168 = vmatpush1.bf16.msra.mxu0 %v12850_v18  ;;  %8414 = vmatpush1.bf16.msra.mxu1 %v12853_v62  ;;  %v12919_v18 = vld [vmem:[%s13701_s25 + $0x2298] ss:$48 sps:$4 sm:$0xff]   ;;  %v12924_v62 = vld [vmem:[%s13701_s25 + $0x22f4] ss:$48 sps:$4 sm:$0xff]  }
 0x2eb   : > { %8169 = vmatprep.subr.bf16.mxu0 %v12858_v21  ;;  %8415 = vmatprep.subr.bf16.mxu1 %v12861_v22  ;;  %v12927_v21 = vld [vmem:[%s13701_s25 + $0x22fc] ss:$48 sps:$4 sm:$0xff]   ;;  %v12922_v22 = vld [vmem:[%s13701_s25 + $0x22f0] ss:$48 sps:$4 sm:$0xff]  }
 0x2ee   : > { %8170 = vmatpush1.bf16.msra.mxu0 %v12856_v23  ;;  %8416 = vmatpush1.bf16.msra.mxu1 %v12859_v25  ;;  %v12925_v23 = vld [vmem:[%s13701_s25 + $0x22f8] ss:$48 sps:$4 sm:$0xff]   ;;  %v12930_v25 = vld [vmem:[%s13701_s25 + $0x2354] ss:$48 sps:$4 sm:$0xff]  }
 0x2ef   : > { %8171 = vmatprep.subr.bf16.mxu0 %v12864_v26  ;;  %8417 = vmatprep.subr.bf16.mxu1 %v12867_v27  ;;  %v12933_v26 = vld [vmem:[%s13701_s25 + $0x235c] ss:$48 sps:$4 sm:$0xff]   ;;  %v12928_v27 = vld [vmem:[%s13701_s25 + $0x2350] ss:$48 sps:$4 sm:$0xff]  }
 0x2f2   : > { %8172 = vmatpush1.bf16.msra.mxu0 %v12862_v29  ;;  %8418 = vmatpush1.bf16.msra.mxu1 %v12865_v30  ;;  %v12931_v29 = vld [vmem:[%s13701_s25 + $0x2358] ss:$48 sps:$4 sm:$0xff]   ;;  %v12936_v30 = vld [vmem:[%s13701_s25 + $0x23b4] ss:$48 sps:$4 sm:$0xff]  }
 0x2f3   : > { %8173 = vmatprep.subr.bf16.mxu0 %v12870_v32  ;;  %8419 = vmatprep.subr.bf16.mxu1 %v12873_v35  ;;  %v12939_v32 = vld [vmem:[%s13701_s25 + $0x23bc] ss:$48 sps:$4 sm:$0xff]   ;;  %v12934_v35 = vld [vmem:[%s13701_s25 + $0x23b0] ss:$48 sps:$4 sm:$0xff]  }
 0x2f6   : > { %8174 = vmatpush1.bf16.msra.mxu0 %v12868_v36  ;;  %8420 = vmatpush1.bf16.msra.mxu1 %v12871_v37  ;;  %v12937_v36 = vld [vmem:[%s13701_s25 + $0x23b8] ss:$48 sps:$4 sm:$0xff]   ;;  %v12942_v37 = vld [vmem:[%s13701_s25 + $0x24] ss:$48 sps:$4 sm:$0xff]  }
 0x2f7   : > { %8175 = vmatprep.subr.bf16.mxu0 %v12876_v38  ;;  %8421 = vmatprep.subr.bf16.mxu1 %v12879_v39  ;;  %v12945_v38 = vld [vmem:[%s13701_s25 + $0x2c] ss:$48 sps:$4 sm:$0xff]   ;;  %v12940_v39 = vld [vmem:[%s13701_s25 + $0x20] ss:$48 sps:$4 sm:$0xff]  }
 0x2fa   : > { %8176 = vmatpush1.bf16.msra.mxu0 %v12874_v40  ;;  %8422 = vmatpush1.bf16.msra.mxu1 %v12877_v41  ;;  %v12943_v40 = vld [vmem:[%s13701_s25 + $0x28] ss:$48 sps:$4 sm:$0xff]   ;;  %v12948_v41 = vld [vmem:[%s13701_s25 + $0x84] ss:$48 sps:$4 sm:$0xff]  }
 0x2fb   : > { %8177 = vmatprep.subr.bf16.mxu0 %v12882_v43  ;;  %8423 = vmatprep.subr.bf16.mxu1 %v12885_v45  ;;  %v12951_v43 = vld [vmem:[%s13701_s25 + $0x8c] ss:$48 sps:$4 sm:$0xff]   ;;  %v12946_v45 = vld [vmem:[%s13701_s25 + $0x80] ss:$48 sps:$4 sm:$0xff]  }
 0x2fe   : > { %8178 = vmatpush1.bf16.msra.mxu0 %v12880_v46  ;;  %8424 = vmatpush1.bf16.msra.mxu1 %v12883_v47  ;;  %v12949_v46 = vld [vmem:[%s13701_s25 + $0x88] ss:$48 sps:$4 sm:$0xff]   ;;  %v12954_v47 = vld [vmem:[%s13701_s25 + $0xe4] ss:$48 sps:$4 sm:$0xff]  }
 0x2ff   : > { %8179 = vmatprep.subr.bf16.mxu0 %v12888_v48  ;;  %8425 = vmatprep.subr.bf16.mxu1 %v12891_v20  ;;  %v12957_v48 = vld [vmem:[%s13701_s25 + $0xec] ss:$48 sps:$4 sm:$0xff]   ;;  %v12952_v20 = vld [vmem:[%s13701_s25 + $0xe0] ss:$48 sps:$4 sm:$0xff]  }
 0x302   : > { %8180 = vmatpush1.bf16.msra.mxu0 %v12886_v50  ;;  %8426 = vmatpush1.bf16.msra.mxu1 %v12889_v51  ;;  %v12955_v50 = vld [vmem:[%s13701_s25 + $0xe8] ss:$48 sps:$4 sm:$0xff]   ;;  %v12960_v51 = vld [vmem:[%s13701_s25 + $0x144] ss:$48 sps:$4 sm:$0xff]  }
 0x303   : > { %8181 = vmatprep.subr.bf16.mxu0 %v12894_v52  ;;  %8427 = vmatprep.subr.bf16.mxu1 %v12897_v53  ;;  %v12963_v52 = vld [vmem:[%s13701_s25 + $0x14c] ss:$48 sps:$4 sm:$0xff]   ;;  %v12958_v53 = vld [vmem:[%s13701_s25 + $0x140] ss:$48 sps:$4 sm:$0xff]  }
 0x306   : > { %8182 = vmatpush1.bf16.msra.mxu0 %v12892_v54  ;;  %8428 = vmatpush1.bf16.msra.mxu1 %v12895_v55  ;;  %v12961_v54 = vld [vmem:[%s13701_s25 + $0x148] ss:$48 sps:$4 sm:$0xff]   ;;  %v12969_v55 = vld [vmem:[%s13701_s25 + $0x1ac] ss:$48 sps:$4 sm:$0xff]  }
 0x307   : > { %8183 = vmatprep.subr.bf16.mxu0 %v12900_v56  ;;  %8429 = vmatprep.subr.bf16.mxu1 %v12903_v57  ;;  %v12964_v56 = vld [vmem:[%s13701_s25 + $0x1a0] ss:$48 sps:$4 sm:$0xff]   ;;  %v12967_v57 = vld [vmem:[%s13701_s25 + $0x1a8] ss:$48 sps:$4 sm:$0xff]  }
 0x30a   : > { %8184 = vmatpush1.bf16.msra.mxu0 %v12898_v60  ;;  %8430 = vmatpush1.bf16.msra.mxu1 %v12901_v61  ;;  %v12972_v60 = vld [vmem:[%s13701_s25 + $0x204] ss:$48 sps:$4 sm:$0xff]   ;;  %v12975_v61 = vld [vmem:[%s13701_s25 + $0x20c] ss:$48 sps:$4 sm:$0xff]  }
 0x30b   : > { %8185 = vmatprep.subr.bf16.mxu0 %v12906_v0  ;;  %8431 = vmatprep.subr.bf16.mxu1 %v12909_v1  ;;  %v12970_v0 = vld [vmem:[%s13701_s25 + $0x200] ss:$48 sps:$4 sm:$0xff]   ;;  %v12973_v1 = vld [vmem:[%s13701_s25 + $0x208] ss:$48 sps:$4 sm:$0xff]  }
 0x30e   : > { %8186 = vmatpush1.bf16.msra.mxu0 %v12904_v2  ;;  %8432 = vmatpush1.bf16.msra.mxu1 %v12907_v3  ;;  %v12978_v2 = vld [vmem:[%s13701_s25 + $0x264] ss:$48 sps:$4 sm:$0xff]   ;;  %v12981_v3 = vld [vmem:[%s13701_s25 + $0x26c] ss:$48 sps:$4 sm:$0xff]  }
 0x30f   : > { %8187 = vmatprep.subr.bf16.mxu0 %v12912_v4  ;;  %8433 = vmatprep.subr.bf16.mxu1 %v12915_v6  ;;  %v12976_v4 = vld [vmem:[%s13701_s25 + $0x260] ss:$48 sps:$4 sm:$0xff]   ;;  %v12979_v6 = vld [vmem:[%s13701_s25 + $0x268] ss:$48 sps:$4 sm:$0xff]  }
 0x312   : > { %8188 = vmatpush1.bf16.msra.mxu0 %v12910_v10  ;;  %8434 = vmatpush1.bf16.msra.mxu1 %v12913_v11  ;;  %v12984_v10 = vld [vmem:[%s13701_s25 + $0x2c4] ss:$48 sps:$4 sm:$0xff]   ;;  %v12987_v11 = vld [vmem:[%s13701_s25 + $0x2cc] ss:$48 sps:$4 sm:$0xff]  }
 0x313   : > { %8189 = vmatprep.subr.bf16.mxu0 %v12918_v14  ;;  %8435 = vmatprep.subr.bf16.mxu1 %v12921_v16  ;;  %v12982_v14 = vld [vmem:[%s13701_s25 + $0x2c0] ss:$48 sps:$4 sm:$0xff]   ;;  %v12985_v16 = vld [vmem:[%s13701_s25 + $0x2c8] ss:$48 sps:$4 sm:$0xff]  }
 0x316   : > { %8190 = vmatpush1.bf16.msra.mxu0 %v12916_v17  ;;  %8436 = vmatpush1.bf16.msra.mxu1 %v12919_v18  ;;  %v12990_v17 = vld [vmem:[%s13701_s25 + $0x324] ss:$48 sps:$4 sm:$0xff]   ;;  %v12993_v18 = vld [vmem:[%s13701_s25 + $0x32c] ss:$48 sps:$4 sm:$0xff]  }
 0x317   : > { %8191 = vmatprep.subr.bf16.mxu0 %v12924_v62  ;;  %8437 = vmatprep.subr.bf16.mxu1 %v12927_v21  ;;  %v12988_v62 = vld [vmem:[%s13701_s25 + $0x320] ss:$48 sps:$4 sm:$0xff]   ;;  %v12991_v21 = vld [vmem:[%s13701_s25 + $0x328] ss:$48 sps:$4 sm:$0xff]  }
 0x31a   : > { %8192 = vmatpush1.bf16.msra.mxu0 %v12922_v22  ;;  %8438 = vmatpush1.bf16.msra.mxu1 %v12925_v23  ;;  %v12996_v22 = vld [vmem:[%s13701_s25 + $0x384] ss:$48 sps:$4 sm:$0xff]   ;;  %v12999_v23 = vld [vmem:[%s13701_s25 + $0x38c] ss:$48 sps:$4 sm:$0xff]  }
 0x31b   : > { %8193 = vmatprep.subr.bf16.mxu0 %v12930_v25  ;;  %8439 = vmatprep.subr.bf16.mxu1 %v12933_v26  ;;  %v12994_v25 = vld [vmem:[%s13701_s25 + $0x380] ss:$48 sps:$4 sm:$0xff]   ;;  %v12997_v26 = vld [vmem:[%s13701_s25 + $0x388] ss:$48 sps:$4 sm:$0xff]  }
 0x31e   : > { %8194 = vmatpush1.bf16.msra.mxu0 %v12928_v27  ;;  %8440 = vmatpush1.bf16.msra.mxu1 %v12931_v29  ;;  %v13002_v27 = vld [vmem:[%s13701_s25 + $0x3e4] ss:$48 sps:$4 sm:$0xff]   ;;  %v13005_v29 = vld [vmem:[%s13701_s25 + $0x3ec] ss:$48 sps:$4 sm:$0xff]  }
 0x31f   : > { %8195 = vmatprep.subr.bf16.mxu0 %v12936_v30  ;;  %8441 = vmatprep.subr.bf16.mxu1 %v12939_v32  ;;  %v13000_v30 = vld [vmem:[%s13701_s25 + $0x3e0] ss:$48 sps:$4 sm:$0xff]   ;;  %v13003_v32 = vld [vmem:[%s13701_s25 + $0x3e8] ss:$48 sps:$4 sm:$0xff]  }
 0x322   : > { %8196 = vmatpush1.bf16.msra.mxu0 %v12934_v35  ;;  %8442 = vmatpush1.bf16.msra.mxu1 %v12937_v36  ;;  %v13008_v35 = vld [vmem:[%s13701_s25 + $0x444] ss:$48 sps:$4 sm:$0xff]   ;;  %v13011_v36 = vld [vmem:[%s13701_s25 + $0x44c] ss:$48 sps:$4 sm:$0xff]  }
 0x323   : > { %8452 = vmatprep.subr.bf16.mxu0 %v12942_v37  ;;  %8698 = vmatprep.subr.bf16.mxu1 %v12945_v38  ;;  %v13006_v37 = vld [vmem:[%s13701_s25 + $0x440] ss:$48 sps:$4 sm:$0xff]   ;;  %v13009_v38 = vld [vmem:[%s13701_s25 + $0x448] ss:$48 sps:$4 sm:$0xff]  }
 0x325   : > { %8198 = vmatmul.mubr.bf16.vlgmr.msra.gmra.mrb[4].mxu0 %v14188_v58  ;;  %8444 = vmatmul.mubr.bf16.vlgmr.msra.gmra.mrb[4].mxu1 %v14188_v58 }
 0x326   : > { %8453 = vmatpush1.bf16.msra.mxu0 %v12940_v39  ;;  %8699 = vmatpush1.bf16.msra.mxu1 %v12943_v40  ;;  %v13014_v39 = vld [vmem:[%s13701_s25 + $0x4a4] ss:$48 sps:$4 sm:$0xff]   ;;  %v13017_v40 = vld [vmem:[%s13701_s25 + $0x4ac] ss:$48 sps:$4 sm:$0xff]  }
 0x327   : > { %8454 = vmatprep.subr.bf16.mxu0 %v12948_v41  ;;  %8700 = vmatprep.subr.bf16.mxu1 %v12951_v43  ;;  %v13012_v41 = vld [vmem:[%s13701_s25 + $0x4a0] ss:$48 sps:$4 sm:$0xff]   ;;  %v13015_v43 = vld [vmem:[%s13701_s25 + $0x4a8] ss:$48 sps:$4 sm:$0xff]  }
 0x328   : > { %8484 = vmatprep.mubr.bf16.mxu0 %v13779_v42  ;;  %8730 = vmatprep.mubr.bf16.mxu1 %v13779_v42  ;;  %v12966_v42 = vld [vmem:[%s13701_s25 + $0x1a4] ss:$48 sps:$4 sm:$0xff]  }
 0x32a   : > { %8455 = vmatpush1.bf16.msra.mxu0 %v12946_v45  ;;  %8701 = vmatpush1.bf16.msra.mxu1 %v12949_v46  ;;  %v13020_v45 = vld [vmem:[%s13701_s25 + $0x504] ss:$48 sps:$4 sm:$0xff]   ;;  %v13023_v46 = vld [vmem:[%s13701_s25 + $0x50c] ss:$48 sps:$4 sm:$0xff]  }
 0x32b   : > { %8456 = vmatprep.subr.bf16.mxu0 %v12954_v47  ;;  %8702 = vmatprep.subr.bf16.mxu1 %v12957_v48  ;;  %v13018_v47 = vld [vmem:[%s13701_s25 + $0x500] ss:$48 sps:$4 sm:$0xff]   ;;  %v13021_v48 = vld [vmem:[%s13701_s25 + $0x508] ss:$48 sps:$4 sm:$0xff]  }
 0x32e   : > { %8457 = vmatpush1.bf16.msra.mxu0 %v12952_v20  ;;  %8703 = vmatpush1.bf16.msra.mxu1 %v12955_v50  ;;  %v13026_v20 = vld [vmem:[%s13701_s25 + $0x564] ss:$48 sps:$4 sm:$0xff]   ;;  %v13029_v50 = vld [vmem:[%s13701_s25 + $0x56c] ss:$48 sps:$4 sm:$0xff]  }
 0x32f   : > { %8458 = vmatprep.subr.bf16.mxu0 %v12960_v51  ;;  %8704 = vmatprep.subr.bf16.mxu1 %v12963_v52  ;;  %v13024_v51 = vld [vmem:[%s13701_s25 + $0x560] ss:$48 sps:$4 sm:$0xff]   ;;  %v13027_v52 = vld [vmem:[%s13701_s25 + $0x568] ss:$48 sps:$4 sm:$0xff]  }
 0x332   : > { %8459 = vmatpush1.bf16.msra.mxu0 %v12958_v53  ;;  %8705 = vmatpush1.bf16.msra.mxu1 %v12961_v54  ;;  %v13032_v53 = vld [vmem:[%s13701_s25 + $0x5c4] ss:$48 sps:$4 sm:$0xff]   ;;  %v13035_v54 = vld [vmem:[%s13701_s25 + $0x5cc] ss:$48 sps:$4 sm:$0xff]  }
 0x333   : > { %8460 = vmatprep.subr.bf16.mxu0 %v12966_v42  ;;  %8706 = vmatprep.subr.bf16.mxu1 %v12969_v55  ;;  %v13030_v42 = vld [vmem:[%s13701_s25 + $0x5c0] ss:$48 sps:$4 sm:$0xff]   ;;  %v13033_v55 = vld [vmem:[%s13701_s25 + $0x5c8] ss:$48 sps:$4 sm:$0xff]  }
 0x336   : > { %8461 = vmatpush1.bf16.msra.mxu0 %v12964_v56  ;;  %8707 = vmatpush1.bf16.msra.mxu1 %v12967_v57  ;;  %v13038_v56 = vld [vmem:[%s13701_s25 + $0x624] ss:$48 sps:$4 sm:$0xff]   ;;  %v13041_v57 = vld [vmem:[%s13701_s25 + $0x62c] ss:$48 sps:$4 sm:$0xff]  }
 0x337   : > { %8462 = vmatprep.subr.bf16.mxu0 %v12972_v60  ;;  %8708 = vmatprep.subr.bf16.mxu1 %v12975_v61  ;;  %v13036_v60 = vld [vmem:[%s13701_s25 + $0x620] ss:$48 sps:$4 sm:$0xff]   ;;  %v13039_v61 = vld [vmem:[%s13701_s25 + $0x628] ss:$48 sps:$4 sm:$0xff]  }
 0x33a   : > { %8463 = vmatpush1.bf16.msra.mxu0 %v12970_v0  ;;  %8709 = vmatpush1.bf16.msra.mxu1 %v12973_v1  ;;  %v13044_v0 = vld [vmem:[%s13701_s25 + $0x684] ss:$48 sps:$4 sm:$0xff]   ;;  %v13047_v1 = vld [vmem:[%s13701_s25 + $0x68c] ss:$48 sps:$4 sm:$0xff]  }
 0x33b   : > { %8464 = vmatprep.subr.bf16.mxu0 %v12978_v2  ;;  %8710 = vmatprep.subr.bf16.mxu1 %v12981_v3  ;;  %v13042_v2 = vld [vmem:[%s13701_s25 + $0x680] ss:$48 sps:$4 sm:$0xff]   ;;  %v13045_v3 = vld [vmem:[%s13701_s25 + $0x688] ss:$48 sps:$4 sm:$0xff]  }
 0x33e   : > { %8465 = vmatpush1.bf16.msra.mxu0 %v12976_v4  ;;  %8711 = vmatpush1.bf16.msra.mxu1 %v12979_v6  ;;  %v13050_v4 = vld [vmem:[%s13701_s25 + $0x6e4] ss:$48 sps:$4 sm:$0xff]   ;;  %v13053_v6 = vld [vmem:[%s13701_s25 + $0x6ec] ss:$48 sps:$4 sm:$0xff]  }
 0x33f   : > { %8466 = vmatprep.subr.bf16.mxu0 %v12984_v10  ;;  %8712 = vmatprep.subr.bf16.mxu1 %v12987_v11  ;;  %v13051_v10 = vld [vmem:[%s13701_s25 + $0x6e8] ss:$48 sps:$4 sm:$0xff]   ;;  %v13056_v11 = vld [vmem:[%s13701_s25 + $0x744] ss:$48 sps:$4 sm:$0xff]  }
 0x342   : > { %8467 = vmatpush1.bf16.msra.mxu0 %v12982_v14  ;;  %8713 = vmatpush1.bf16.msra.mxu1 %v12985_v16  ;;  %v13059_v14 = vld [vmem:[%s13701_s25 + $0x74c] ss:$48 sps:$4 sm:$0xff]   ;;  %v13054_v16 = vld [vmem:[%s13701_s25 + $0x740] ss:$48 sps:$4 sm:$0xff]  }
 0x343   : > { %8468 = vmatprep.subr.bf16.mxu0 %v12990_v17  ;;  %8714 = vmatprep.subr.bf16.mxu1 %v12993_v18  ;;  %v13057_v17 = vld [vmem:[%s13701_s25 + $0x748] ss:$48 sps:$4 sm:$0xff]   ;;  %v13065_v18 = vld [vmem:[%s13701_s25 + $0x7ac] ss:$48 sps:$4 sm:$0xff]  }
 0x346   : > { %8469 = vmatpush1.bf16.msra.mxu0 %v12988_v62  ;;  %8715 = vmatpush1.bf16.msra.mxu1 %v12991_v21  ;;  %v13060_v62 = vld [vmem:[%s13701_s25 + $0x7a0] ss:$48 sps:$4 sm:$0xff]   ;;  %v13063_v21 = vld [vmem:[%s13701_s25 + $0x7a8] ss:$48 sps:$4 sm:$0xff]  }
 0x347   : > { %8470 = vmatprep.subr.bf16.mxu0 %v12996_v22  ;;  %8716 = vmatprep.subr.bf16.mxu1 %v12999_v23  ;;  %v13068_v22 = vld [vmem:[%s13701_s25 + $0x804] ss:$48 sps:$4 sm:$0xff]   ;;  %v13071_v23 = vld [vmem:[%s13701_s25 + $0x80c] ss:$48 sps:$4 sm:$0xff]  }
 0x34a   : > { %8471 = vmatpush1.bf16.msra.mxu0 %v12994_v25  ;;  %8717 = vmatpush1.bf16.msra.mxu1 %v12997_v26  ;;  %v13066_v25 = vld [vmem:[%s13701_s25 + $0x800] ss:$48 sps:$4 sm:$0xff]   ;;  %v13069_v26 = vld [vmem:[%s13701_s25 + $0x808] ss:$48 sps:$4 sm:$0xff]  }
 0x34b   : > { %8472 = vmatprep.subr.bf16.mxu0 %v13002_v27  ;;  %8718 = vmatprep.subr.bf16.mxu1 %v13005_v29  ;;  %v13074_v27 = vld [vmem:[%s13701_s25 + $0x864] ss:$48 sps:$4 sm:$0xff]   ;;  %v13077_v29 = vld [vmem:[%s13701_s25 + $0x86c] ss:$48 sps:$4 sm:$0xff]  }
 0x34e   : > { %8473 = vmatpush1.bf16.msra.mxu0 %v13000_v30  ;;  %8719 = vmatpush1.bf16.msra.mxu1 %v13003_v32  ;;  %v13072_v30 = vld [vmem:[%s13701_s25 + $0x860] ss:$48 sps:$4 sm:$0xff]   ;;  %v13075_v32 = vld [vmem:[%s13701_s25 + $0x868] ss:$48 sps:$4 sm:$0xff]  }
 0x34f   : > { %8474 = vmatprep.subr.bf16.mxu0 %v13008_v35  ;;  %8720 = vmatprep.subr.bf16.mxu1 %v13011_v36  ;;  %v13080_v35 = vld [vmem:[%s13701_s25 + $0x8c4] ss:$48 sps:$4 sm:$0xff]   ;;  %v13083_v36 = vld [vmem:[%s13701_s25 + $0x8cc] ss:$48 sps:$4 sm:$0xff]  }
 0x352   : > { %8475 = vmatpush1.bf16.msra.mxu0 %v13006_v37  ;;  %8721 = vmatpush1.bf16.msra.mxu1 %v13009_v38  ;;  %v13078_v37 = vld [vmem:[%s13701_s25 + $0x8c0] ss:$48 sps:$4 sm:$0xff]   ;;  %v13081_v38 = vld [vmem:[%s13701_s25 + $0x8c8] ss:$48 sps:$4 sm:$0xff]  }
 0x353   : > { %8476 = vmatprep.subr.bf16.mxu0 %v13014_v39  ;;  %8722 = vmatprep.subr.bf16.mxu1 %v13017_v40  ;;  %v13086_v39 = vld [vmem:[%s13701_s25 + $0x924] ss:$48 sps:$4 sm:$0xff]   ;;  %v13089_v40 = vld [vmem:[%s13701_s25 + $0x92c] ss:$48 sps:$4 sm:$0xff]  }
 0x356   : > { %8477 = vmatpush1.bf16.msra.mxu0 %v13012_v41  ;;  %8723 = vmatpush1.bf16.msra.mxu1 %v13015_v43  ;;  %v13084_v41 = vld [vmem:[%s13701_s25 + $0x920] ss:$48 sps:$4 sm:$0xff]   ;;  %v13087_v43 = vld [vmem:[%s13701_s25 + $0x928] ss:$48 sps:$4 sm:$0xff]  }
 0x357   : > { %8478 = vmatprep.subr.bf16.mxu0 %v13020_v45  ;;  %8724 = vmatprep.subr.bf16.mxu1 %v13023_v46  ;;  %v13092_v45 = vld [vmem:[%s13701_s25 + $0x984] ss:$48 sps:$4 sm:$0xff]   ;;  %v13095_v46 = vld [vmem:[%s13701_s25 + $0x98c] ss:$48 sps:$4 sm:$0xff]  }
 0x35a   : > { %8479 = vmatpush1.bf16.msra.mxu0 %v13018_v47  ;;  %8725 = vmatpush1.bf16.msra.mxu1 %v13021_v48  ;;  %v13090_v47 = vld [vmem:[%s13701_s25 + $0x980] ss:$48 sps:$4 sm:$0xff]   ;;  %v13093_v48 = vld [vmem:[%s13701_s25 + $0x988] ss:$48 sps:$4 sm:$0xff]  }
 0x35b   : > { %8480 = vmatprep.subr.bf16.mxu0 %v13026_v20  ;;  %8726 = vmatprep.subr.bf16.mxu1 %v13029_v50  ;;  %v13098_v20 = vld [vmem:[%s13701_s25 + $0x9e4] ss:$48 sps:$4 sm:$0xff]   ;;  %v13101_v50 = vld [vmem:[%s13701_s25 + $0x9ec] ss:$48 sps:$4 sm:$0xff]  }
 0x35e   : > { %8481 = vmatpush1.bf16.msra.mxu0 %v13024_v51  ;;  %8727 = vmatpush1.bf16.msra.mxu1 %v13027_v52  ;;  %v13096_v51 = vld [vmem:[%s13701_s25 + $0x9e0] ss:$48 sps:$4 sm:$0xff]   ;;  %v13099_v52 = vld [vmem:[%s13701_s25 + $0x9e8] ss:$48 sps:$4 sm:$0xff]  }
 0x35f   : > { %8482 = vmatprep.subr.bf16.mxu0 %v13032_v53  ;;  %8728 = vmatprep.subr.bf16.mxu1 %v13035_v54  ;;  %v13104_v53 = vld [vmem:[%s13701_s25 + $0xa44] ss:$48 sps:$4 sm:$0xff]   ;;  %v13107_v54 = vld [vmem:[%s13701_s25 + $0xa4c] ss:$48 sps:$4 sm:$0xff]  }
 0x362   : > { %8483 = vmatpush1.bf16.msra.mxu0 %v13030_v42  ;;  %8729 = vmatpush1.bf16.msra.mxu1 %v13033_v55  ;;  %v13102_v42 = vld [vmem:[%s13701_s25 + $0xa40] ss:$48 sps:$4 sm:$0xff]   ;;  %v13105_v55 = vld [vmem:[%s13701_s25 + $0xa48] ss:$48 sps:$4 sm:$0xff]  }
 0x363   : > { %8493 = vmatprep.subr.bf16.mxu0 %v13038_v56  ;;  %8739 = vmatprep.subr.bf16.mxu1 %v13041_v57  ;;  %v13110_v56 = vld [vmem:[%s13701_s25 + $0xaa4] ss:$48 sps:$4 sm:$0xff]   ;;  %v13113_v57 = vld [vmem:[%s13701_s25 + $0xaac] ss:$48 sps:$4 sm:$0xff]  }
 0x365   : > { %8485 = vmatmul.mubr.bf16.vlgmr.msra.gmra.mrb[8].mxu0 %v13800_v59  ;;  %8731 = vmatmul.mubr.bf16.vlgmr.msra.gmra.mrb[8].mxu1 %v13800_v59  ;;  %v13048_v59 = vld [vmem:[%s13701_s25 + $0x6e0] ss:$48 sps:$4 sm:$0xff]  }
 0x366   : > { %8494 = vmatpush1.bf16.msra.mxu0 %v13036_v60  ;;  %8740 = vmatpush1.bf16.msra.mxu1 %v13039_v61  ;;  %v13108_v60 = vld [vmem:[%s13701_s25 + $0xaa0] ss:$48 sps:$4 sm:$0xff]   ;;  %v13111_v61 = vld [vmem:[%s13701_s25 + $0xaa8] ss:$48 sps:$4 sm:$0xff]  }
 0x367   : > { %8495 = vmatprep.subr.bf16.mxu0 %v13044_v0  ;;  %8741 = vmatprep.subr.bf16.mxu1 %v13047_v1  ;;  %v13116_v0 = vld [vmem:[%s13701_s25 + $0xb04] ss:$48 sps:$4 sm:$0xff]   ;;  %v13119_v1 = vld [vmem:[%s13701_s25 + $0xb0c] ss:$48 sps:$4 sm:$0xff]  }
 0x368   : > { %8525 = vmatprep.mubr.bf16.mxu0 %v13807_v63  ;;  %8771 = vmatprep.mubr.bf16.mxu1 %v13807_v63  ;;  %v13062_v63 = vld [vmem:[%s13701_s25 + $0x7a4] ss:$48 sps:$4 sm:$0xff]  }
 0x36a   : > { %8496 = vmatpush1.bf16.msra.mxu0 %v13042_v2  ;;  %8742 = vmatpush1.bf16.msra.mxu1 %v13045_v3  ;;  %v13114_v2 = vld [vmem:[%s13701_s25 + $0xb00] ss:$48 sps:$4 sm:$0xff]   ;;  %v13117_v3 = vld [vmem:[%s13701_s25 + $0xb08] ss:$48 sps:$4 sm:$0xff]  }
 0x36b   : > { %8497 = vmatprep.subr.bf16.mxu0 %v13050_v4  ;;  %8743 = vmatprep.subr.bf16.mxu1 %v13053_v6  ;;  %v13122_v4 = vld [vmem:[%s13701_s25 + $0xb64] ss:$48 sps:$4 sm:$0xff]   ;;  %v13125_v6 = vld [vmem:[%s13701_s25 + $0xb6c] ss:$48 sps:$4 sm:$0xff]  }
 0x36e   : > { %8498 = vmatpush1.bf16.msra.mxu0 %v13048_v59  ;;  %8744 = vmatpush1.bf16.msra.mxu1 %v13051_v10  ;;  %v13120_v59 = vld [vmem:[%s13701_s25 + $0xb60] ss:$48 sps:$4 sm:$0xff]   ;;  %v13123_v10 = vld [vmem:[%s13701_s25 + $0xb68] ss:$48 sps:$4 sm:$0xff]  }
 0x36f   : > { %8499 = vmatprep.subr.bf16.mxu0 %v13056_v11  ;;  %8745 = vmatprep.subr.bf16.mxu1 %v13059_v14  ;;  %v13128_v11 = vld [vmem:[%s13701_s25 + $0xbc4] ss:$48 sps:$4 sm:$0xff]   ;;  %v13131_v14 = vld [vmem:[%s13701_s25 + $0xbcc] ss:$48 sps:$4 sm:$0xff]  }
 0x372   : > { %8500 = vmatpush1.bf16.msra.mxu0 %v13054_v16  ;;  %8746 = vmatpush1.bf16.msra.mxu1 %v13057_v17  ;;  %v13126_v16 = vld [vmem:[%s13701_s25 + $0xbc0] ss:$48 sps:$4 sm:$0xff]   ;;  %v13129_v17 = vld [vmem:[%s13701_s25 + $0xbc8] ss:$48 sps:$4 sm:$0xff]  }
 0x373   : > { %8501 = vmatprep.subr.bf16.mxu0 %v13062_v63  ;;  %8747 = vmatprep.subr.bf16.mxu1 %v13065_v18  ;;  %v13134_v63 = vld [vmem:[%s13701_s25 + $0xc24] ss:$48 sps:$4 sm:$0xff]   ;;  %v13137_v18 = vld [vmem:[%s13701_s25 + $0xc2c] ss:$48 sps:$4 sm:$0xff]  }
 0x376   : > { %8502 = vmatpush1.bf16.msra.mxu0 %v13060_v62  ;;  %8748 = vmatpush1.bf16.msra.mxu1 %v13063_v21  ;;  %v13132_v62 = vld [vmem:[%s13701_s25 + $0xc20] ss:$48 sps:$4 sm:$0xff]   ;;  %v13135_v21 = vld [vmem:[%s13701_s25 + $0xc28] ss:$48 sps:$4 sm:$0xff]  }
 0x377   : > { %8503 = vmatprep.subr.bf16.mxu0 %v13068_v22  ;;  %8749 = vmatprep.subr.bf16.mxu1 %v13071_v23  ;;  %v13140_v22 = vld [vmem:[%s13701_s25 + $0xc84] ss:$48 sps:$4 sm:$0xff]   ;;  %v13143_v23 = vld [vmem:[%s13701_s25 + $0xc8c] ss:$48 sps:$4 sm:$0xff]  }
 0x37a   : > { %8504 = vmatpush1.bf16.msra.mxu0 %v13066_v25  ;;  %8750 = vmatpush1.bf16.msra.mxu1 %v13069_v26  ;;  %v13138_v25 = vld [vmem:[%s13701_s25 + $0xc80] ss:$48 sps:$4 sm:$0xff]   ;;  %v13141_v26 = vld [vmem:[%s13701_s25 + $0xc88] ss:$48 sps:$4 sm:$0xff]  }
 0x37b   : > { %8505 = vmatprep.subr.bf16.mxu0 %v13074_v27  ;;  %8751 = vmatprep.subr.bf16.mxu1 %v13077_v29  ;;  %v13146_v27 = vld [vmem:[%s13701_s25 + $0xce4] ss:$48 sps:$4 sm:$0xff]   ;;  %v13149_v29 = vld [vmem:[%s13701_s25 + $0xcec] ss:$48 sps:$4 sm:$0xff]  }
 0x37e   : > { %8506 = vmatpush1.bf16.msra.mxu0 %v13072_v30  ;;  %8752 = vmatpush1.bf16.msra.mxu1 %v13075_v32  ;;  %v13147_v30 = vld [vmem:[%s13701_s25 + $0xce8] ss:$48 sps:$4 sm:$0xff]   ;;  %v13152_v32 = vld [vmem:[%s13701_s25 + $0xd44] ss:$48 sps:$4 sm:$0xff]  }
 0x37f   : > { %8507 = vmatprep.subr.bf16.mxu0 %v13080_v35  ;;  %8753 = vmatprep.subr.bf16.mxu1 %v13083_v36  ;;  %v13155_v35 = vld [vmem:[%s13701_s25 + $0xd4c] ss:$48 sps:$4 sm:$0xff]   ;;  %v13150_v36 = vld [vmem:[%s13701_s25 + $0xd40] ss:$48 sps:$4 sm:$0xff]  }
 0x382   : > { %8508 = vmatpush1.bf16.msra.mxu0 %v13078_v37  ;;  %8754 = vmatpush1.bf16.msra.mxu1 %v13081_v38  ;;  %v13153_v37 = vld [vmem:[%s13701_s25 + $0xd48] ss:$48 sps:$4 sm:$0xff]   ;;  %v13161_v38 = vld [vmem:[%s13701_s25 + $0xdac] ss:$48 sps:$4 sm:$0xff]  }
 0x383   : > { %8509 = vmatprep.subr.bf16.mxu0 %v13086_v39  ;;  %8755 = vmatprep.subr.bf16.mxu1 %v13089_v40  ;;  %v13156_v39 = vld [vmem:[%s13701_s25 + $0xda0] ss:$48 sps:$4 sm:$0xff]   ;;  %v13159_v40 = vld [vmem:[%s13701_s25 + $0xda8] ss:$48 sps:$4 sm:$0xff]  }
 0x386   : > { %8510 = vmatpush1.bf16.msra.mxu0 %v13084_v41  ;;  %8756 = vmatpush1.bf16.msra.mxu1 %v13087_v43  ;;  %v13164_v41 = vld [vmem:[%s13701_s25 + $0xe04] ss:$48 sps:$4 sm:$0xff]   ;;  %v13167_v43 = vld [vmem:[%s13701_s25 + $0xe0c] ss:$48 sps:$4 sm:$0xff]  }
 0x387   : > { %8511 = vmatprep.subr.bf16.mxu0 %v13092_v45  ;;  %8757 = vmatprep.subr.bf16.mxu1 %v13095_v46  ;;  %v13162_v45 = vld [vmem:[%s13701_s25 + $0xe00] ss:$48 sps:$4 sm:$0xff]   ;;  %v13165_v46 = vld [vmem:[%s13701_s25 + $0xe08] ss:$48 sps:$4 sm:$0xff]  }
 0x38a   : > { %8512 = vmatpush1.bf16.msra.mxu0 %v13090_v47  ;;  %8758 = vmatpush1.bf16.msra.mxu1 %v13093_v48  ;;  %v13170_v47 = vld [vmem:[%s13701_s25 + $0xe64] ss:$48 sps:$4 sm:$0xff]   ;;  %v13173_v48 = vld [vmem:[%s13701_s25 + $0xe6c] ss:$48 sps:$4 sm:$0xff]  }
 0x38b   : > { %8513 = vmatprep.subr.bf16.mxu0 %v13098_v20  ;;  %8759 = vmatprep.subr.bf16.mxu1 %v13101_v50  ;;  %v13168_v20 = vld [vmem:[%s13701_s25 + $0xe60] ss:$48 sps:$4 sm:$0xff]   ;;  %v13171_v50 = vld [vmem:[%s13701_s25 + $0xe68] ss:$48 sps:$4 sm:$0xff]  }
 0x38e   : > { %8514 = vmatpush1.bf16.msra.mxu0 %v13096_v51  ;;  %8760 = vmatpush1.bf16.msra.mxu1 %v13099_v52  ;;  %v13176_v51 = vld [vmem:[%s13701_s25 + $0xec4] ss:$48 sps:$4 sm:$0xff]   ;;  %v13179_v52 = vld [vmem:[%s13701_s25 + $0xecc] ss:$48 sps:$4 sm:$0xff]  }
 0x38f   : > { %8515 = vmatprep.subr.bf16.mxu0 %v13104_v53  ;;  %8761 = vmatprep.subr.bf16.mxu1 %v13107_v54  ;;  %v13174_v53 = vld [vmem:[%s13701_s25 + $0xec0] ss:$48 sps:$4 sm:$0xff]   ;;  %v13177_v54 = vld [vmem:[%s13701_s25 + $0xec8] ss:$48 sps:$4 sm:$0xff]  }
 0x392   : > { %8516 = vmatpush1.bf16.msra.mxu0 %v13102_v42  ;;  %8762 = vmatpush1.bf16.msra.mxu1 %v13105_v55  ;;  %v13182_v42 = vld [vmem:[%s13701_s25 + $0xf24] ss:$48 sps:$4 sm:$0xff]   ;;  %v13185_v55 = vld [vmem:[%s13701_s25 + $0xf2c] ss:$48 sps:$4 sm:$0xff]  }
 0x393   : > { %8517 = vmatprep.subr.bf16.mxu0 %v13110_v56  ;;  %8763 = vmatprep.subr.bf16.mxu1 %v13113_v57  ;;  %v13180_v56 = vld [vmem:[%s13701_s25 + $0xf20] ss:$48 sps:$4 sm:$0xff]   ;;  %v13183_v57 = vld [vmem:[%s13701_s25 + $0xf28] ss:$48 sps:$4 sm:$0xff]  }
 0x396   : > { %8518 = vmatpush1.bf16.msra.mxu0 %v13108_v60  ;;  %8764 = vmatpush1.bf16.msra.mxu1 %v13111_v61  ;;  %v13188_v60 = vld [vmem:[%s13701_s25 + $0xf84] ss:$48 sps:$4 sm:$0xff]   ;;  %v13191_v61 = vld [vmem:[%s13701_s25 + $0xf8c] ss:$48 sps:$4 sm:$0xff]  }
 0x397   : > { %8519 = vmatprep.subr.bf16.mxu0 %v13116_v0  ;;  %8765 = vmatprep.subr.bf16.mxu1 %v13119_v1  ;;  %v13186_v0 = vld [vmem:[%s13701_s25 + $0xf80] ss:$48 sps:$4 sm:$0xff]   ;;  %v13189_v1 = vld [vmem:[%s13701_s25 + $0xf88] ss:$48 sps:$4 sm:$0xff]  }
 0x39a   : > { %8520 = vmatpush1.bf16.msra.mxu0 %v13114_v2  ;;  %8766 = vmatpush1.bf16.msra.mxu1 %v13117_v3  ;;  %v13194_v2 = vld [vmem:[%s13701_s25 + $0xfe4] ss:$48 sps:$4 sm:$0xff]   ;;  %v13197_v3 = vld [vmem:[%s13701_s25 + $0xfec] ss:$48 sps:$4 sm:$0xff]  }
 0x39b   : > { %8521 = vmatprep.subr.bf16.mxu0 %v13122_v4  ;;  %8767 = vmatprep.subr.bf16.mxu1 %v13125_v6  ;;  %v13192_v4 = vld [vmem:[%s13701_s25 + $0xfe0] ss:$48 sps:$4 sm:$0xff]   ;;  %v13195_v6 = vld [vmem:[%s13701_s25 + $0xfe8] ss:$48 sps:$4 sm:$0xff]  }
 0x39e   : > { %8522 = vmatpush1.bf16.msra.mxu0 %v13120_v59  ;;  %8768 = vmatpush1.bf16.msra.mxu1 %v13123_v10  ;;  %v13200_v59 = vld [vmem:[%s13701_s25 + $0x1044] ss:$48 sps:$4 sm:$0xff]   ;;  %v13203_v10 = vld [vmem:[%s13701_s25 + $0x104c] ss:$48 sps:$4 sm:$0xff]  }
 0x39f   : > { %8523 = vmatprep.subr.bf16.mxu0 %v13128_v11  ;;  %8769 = vmatprep.subr.bf16.mxu1 %v13131_v14  ;;  %v13198_v11 = vld [vmem:[%s13701_s25 + $0x1040] ss:$48 sps:$4 sm:$0xff]   ;;  %v13201_v14 = vld [vmem:[%s13701_s25 + $0x1048] ss:$48 sps:$4 sm:$0xff]  }
 0x3a2   : > { %8524 = vmatpush1.bf16.msra.mxu0 %v13126_v16  ;;  %8770 = vmatpush1.bf16.msra.mxu1 %v13129_v17  ;;  %v13206_v16 = vld [vmem:[%s13701_s25 + $0x10a4] ss:$48 sps:$4 sm:$0xff]   ;;  %v13209_v17 = vld [vmem:[%s13701_s25 + $0x10ac] ss:$48 sps:$4 sm:$0xff]  }
 0x3a3   : > { %8534 = vmatprep.subr.bf16.mxu0 %v13134_v63  ;;  %8780 = vmatprep.subr.bf16.mxu1 %v13137_v18  ;;  %v13204_v63 = vld [vmem:[%s13701_s25 + $0x10a0] ss:$48 sps:$4 sm:$0xff]   ;;  %v13207_v18 = vld [vmem:[%s13701_s25 + $0x10a8] ss:$48 sps:$4 sm:$0xff]  }
 0x3a5   : > { %8526 = vmatmul.mubr.bf16.vlgmr.msra.gmra.mrb[8].mxu0 %v13883_v5  ;;  %8772 = vmatmul.mubr.bf16.vlgmr.msra.gmra.mrb[8].mxu1 %v13883_v5  ;;  %v13144_v5 = vld [vmem:[%s13701_s25 + $0xce0] ss:$48 sps:$4 sm:$0xff]  }
 0x3a6   : > { %8535 = vmatpush1.bf16.msra.mxu0 %v13132_v62  ;;  %8781 = vmatpush1.bf16.msra.mxu1 %v13135_v21  ;;  %v13212_v62 = vld [vmem:[%s13701_s25 + $0x1104] ss:$48 sps:$4 sm:$0xff]   ;;  %v13215_v21 = vld [vmem:[%s13701_s25 + $0x110c] ss:$48 sps:$4 sm:$0xff]  }
 0x3a7   : > { %8536 = vmatprep.subr.bf16.mxu0 %v13140_v22  ;;  %8782 = vmatprep.subr.bf16.mxu1 %v13143_v23  ;;  %v13210_v22 = vld [vmem:[%s13701_s25 + $0x1100] ss:$48 sps:$4 sm:$0xff]   ;;  %v13213_v23 = vld [vmem:[%s13701_s25 + $0x1108] ss:$48 sps:$4 sm:$0xff]  }
 0x3a8   : > { %8566 = vmatprep.mubr.bf16.mxu0 %v13889_v9  ;;  %8812 = vmatprep.mubr.bf16.mxu1 %v13889_v9  ;;  %v13158_v9 = vld [vmem:[%s13701_s25 + $0xda4] ss:$48 sps:$4 sm:$0xff]  }
 0x3aa   : > { %8537 = vmatpush1.bf16.msra.mxu0 %v13138_v25  ;;  %8783 = vmatpush1.bf16.msra.mxu1 %v13141_v26  ;;  %v13218_v25 = vld [vmem:[%s13701_s25 + $0x1164] ss:$48 sps:$4 sm:$0xff]   ;;  %v13221_v26 = vld [vmem:[%s13701_s25 + $0x116c] ss:$48 sps:$4 sm:$0xff]  }
 0x3ab   : > { %8538 = vmatprep.subr.bf16.mxu0 %v13146_v27  ;;  %8784 = vmatprep.subr.bf16.mxu1 %v13149_v29  ;;  %v13216_v27 = vld [vmem:[%s13701_s25 + $0x1160] ss:$48 sps:$4 sm:$0xff]   ;;  %v13219_v29 = vld [vmem:[%s13701_s25 + $0x1168] ss:$48 sps:$4 sm:$0xff]  }
 0x3ae   : > { %8539 = vmatpush1.bf16.msra.mxu0 %v13144_v5  ;;  %8785 = vmatpush1.bf16.msra.mxu1 %v13147_v30  ;;  %v13224_v5 = vld [vmem:[%s13701_s25 + $0x11c4] ss:$48 sps:$4 sm:$0xff]   ;;  %v13227_v30 = vld [vmem:[%s13701_s25 + $0x11cc] ss:$48 sps:$4 sm:$0xff]  }
 0x3af   : > { %8540 = vmatprep.subr.bf16.mxu0 %v13152_v32  ;;  %8786 = vmatprep.subr.bf16.mxu1 %v13155_v35  ;;  %v13222_v32 = vld [vmem:[%s13701_s25 + $0x11c0] ss:$48 sps:$4 sm:$0xff]   ;;  %v13225_v35 = vld [vmem:[%s13701_s25 + $0x11c8] ss:$48 sps:$4 sm:$0xff]  }
 0x3b2   : > { %8541 = vmatpush1.bf16.msra.mxu0 %v13150_v36  ;;  %8787 = vmatpush1.bf16.msra.mxu1 %v13153_v37  ;;  %v13230_v36 = vld [vmem:[%s13701_s25 + $0x1224] ss:$48 sps:$4 sm:$0xff]   ;;  %v13233_v37 = vld [vmem:[%s13701_s25 + $0x122c] ss:$48 sps:$4 sm:$0xff]  }
 0x3b3   : > { %8542 = vmatprep.subr.bf16.mxu0 %v13158_v9  ;;  %8788 = vmatprep.subr.bf16.mxu1 %v13161_v38  ;;  %v13228_v9 = vld [vmem:[%s13701_s25 + $0x1220] ss:$48 sps:$4 sm:$0xff]   ;;  %v13231_v38 = vld [vmem:[%s13701_s25 + $0x1228] ss:$48 sps:$4 sm:$0xff]  }
 0x3b6   : > { %8543 = vmatpush1.bf16.msra.mxu0 %v13156_v39  ;;  %8789 = vmatpush1.bf16.msra.mxu1 %v13159_v40  ;;  %v13236_v39 = vld [vmem:[%s13701_s25 + $0x1284] ss:$48 sps:$4 sm:$0xff]   ;;  %v13239_v40 = vld [vmem:[%s13701_s25 + $0x128c] ss:$48 sps:$4 sm:$0xff]  }
 0x3b7   : > { %8544 = vmatprep.subr.bf16.mxu0 %v13164_v41  ;;  %8790 = vmatprep.subr.bf16.mxu1 %v13167_v43  ;;  %v13234_v41 = vld [vmem:[%s13701_s25 + $0x1280] ss:$48 sps:$4 sm:$0xff]   ;;  %v13237_v43 = vld [vmem:[%s13701_s25 + $0x1288] ss:$48 sps:$4 sm:$0xff]  }
 0x3ba   : > { %8545 = vmatpush1.bf16.msra.mxu0 %v13162_v45  ;;  %8791 = vmatpush1.bf16.msra.mxu1 %v13165_v46  ;;  %v13242_v45 = vld [vmem:[%s13701_s25 + $0x12e4] ss:$48 sps:$4 sm:$0xff]   ;;  %v13245_v46 = vld [vmem:[%s13701_s25 + $0x12ec] ss:$48 sps:$4 sm:$0xff]  }
 0x3bb   : > { %8546 = vmatprep.subr.bf16.mxu0 %v13170_v47  ;;  %8792 = vmatprep.subr.bf16.mxu1 %v13173_v48  ;;  %v13243_v47 = vld [vmem:[%s13701_s25 + $0x12e8] ss:$48 sps:$4 sm:$0xff]   ;;  %v13248_v48 = vld [vmem:[%s13701_s25 + $0x1344] ss:$48 sps:$4 sm:$0xff]  }
 0x3be   : > { %8547 = vmatpush1.bf16.msra.mxu0 %v13168_v20  ;;  %8793 = vmatpush1.bf16.msra.mxu1 %v13171_v50  ;;  %v13251_v20 = vld [vmem:[%s13701_s25 + $0x134c] ss:$48 sps:$4 sm:$0xff]   ;;  %v13246_v50 = vld [vmem:[%s13701_s25 + $0x1340] ss:$48 sps:$4 sm:$0xff]  }
 0x3bf   : > { %8548 = vmatprep.subr.bf16.mxu0 %v13176_v51  ;;  %8794 = vmatprep.subr.bf16.mxu1 %v13179_v52  ;;  %v13249_v51 = vld [vmem:[%s13701_s25 + $0x1348] ss:$48 sps:$4 sm:$0xff]   ;;  %v13257_v52 = vld [vmem:[%s13701_s25 + $0x13ac] ss:$48 sps:$4 sm:$0xff]  }
 0x3c2   : > { %8549 = vmatpush1.bf16.msra.mxu0 %v13174_v53  ;;  %8795 = vmatpush1.bf16.msra.mxu1 %v13177_v54  ;;  %v1579_v53 = vsub.s32 4, %v13757_v24  ;;  %v1587_v54 = vsub.s32 6, %v13757_v24 }
 0x3c3   : > { %8550 = vmatprep.subr.bf16.mxu0 %v13182_v42  ;;  %8796 = vmatprep.subr.bf16.mxu1 %v13185_v55  ;;  %v13252_v42 = vld [vmem:[%s13701_s25 + $0x13a0] ss:$48 sps:$4 sm:$0xff]   ;;  %v13255_v55 = vld [vmem:[%s13701_s25 + $0x13a8] ss:$48 sps:$4 sm:$0xff]  }
 0x3c6   : > { %8551 = vmatpush1.bf16.msra.mxu0 %v13180_v56  ;;  %8797 = vmatpush1.bf16.msra.mxu1 %v13183_v57  ;;  %v1583_v56 = vsub.s32 5, %v13757_v24  ;;  %v1591_v57 = vsub.s32 7, %v13757_v24 }
 0x3c7   : > { %8552 = vmatprep.subr.bf16.mxu0 %v13188_v60  ;;  %8798 = vmatprep.subr.bf16.mxu1 %v13191_v61  ;;  %v13260_v60 = vld [vmem:[%s13701_s25 + $0x1404] ss:$48 sps:$4 sm:$0xff]   ;;  %v13263_v61 = vld [vmem:[%s13701_s25 + $0x140c] ss:$48 sps:$4 sm:$0xff]  }
 0x3ca   : > { %8553 = vmatpush1.bf16.msra.mxu0 %v13186_v0  ;;  %8799 = vmatpush1.bf16.msra.mxu1 %v13189_v1  ;;  %v13516_v0 = vld [vmem:[%s13706_s28] sm:$0xff] }
 0x3cb   : > { %8554 = vmatprep.subr.bf16.mxu0 %v13194_v2  ;;  %8800 = vmatprep.subr.bf16.mxu1 %v13197_v3  ;;  %v1580_v1 = vrot.slane %v13516_v0, %v1579_v53  ;;  %v1588_v2 = vrot.slane %v13516_v0, %v1587_v54  ;;  %v1584_v3 = vrot.slane %v13516_v0, %v1583_v56  ;;  %v13282_v54 = vld [vmem:[%s13701_s25 + $0x1580] ss:$48 sps:$4 sm:$0xff]   ;;  %v13293_v56 = vld [vmem:[%s13701_s25 + $0x15ec] ss:$48 sps:$4 sm:$0xff]  }
 0x3ce   : > { %8555 = vmatpush1.bf16.msra.mxu0 %v13192_v4  ;;  %8801 = vmatpush1.bf16.msra.mxu1 %v13195_v6  ;;  %v1592_v4 = vrot.slane %v13516_v0, %v1591_v57  ;;  %v13258_v6 = vld [vmem:[%s13701_s25 + $0x1400] ss:$48 sps:$4 sm:$0xff]   ;;  %v13291_v57 = vld [vmem:[%s13701_s25 + $0x15e8] ss:$48 sps:$4 sm:$0xff]  }
 0x3cf   : > { %8556 = vmatprep.subr.bf16.mxu0 %v13200_v59  ;;  %8802 = vmatprep.subr.bf16.mxu1 %v13203_v10  ;;  %v13261_v59 = vld [vmem:[%s13701_s25 + $0x1408] ss:$48 sps:$4 sm:$0xff]   ;;  %v13266_v10 = vld [vmem:[%s13701_s25 + $0x1464] ss:$48 sps:$4 sm:$0xff]   ;;  %v13294_v0 = vld [vmem:[%s13701_s25 + $0x1640] ss:$48 sps:$4 sm:$0xff]  }
 0x3d2   : > { %8557 = vmatpush1.bf16.msra.mxu0 %v13198_v11  ;;  %8803 = vmatpush1.bf16.msra.mxu1 %v13201_v14  ;;  %v13269_v11 = vld [vmem:[%s13701_s25 + $0x146c] ss:$48 sps:$4 sm:$0xff]  }
 0x3d3   : > { %8558 = vmatprep.subr.bf16.mxu0 %v13206_v16  ;;  %8804 = vmatprep.subr.bf16.mxu1 %v13209_v17 }
 0x3d6   : > { %8559 = vmatpush1.bf16.msra.mxu0 %v13204_v63  ;;  %8805 = vmatpush1.bf16.msra.mxu1 %v13207_v18 }
 0x3d7   : > { %8560 = vmatprep.subr.bf16.mxu0 %v13212_v62  ;;  %8806 = vmatprep.subr.bf16.mxu1 %v13215_v21  ;;  %v13264_v21 = vld [vmem:[%s13701_s25 + $0x1460] ss:$48 sps:$4 sm:$0xff]  }
 0x3da   : > { %8561 = vmatpush1.bf16.msra.mxu0 %v13210_v22  ;;  %8807 = vmatpush1.bf16.msra.mxu1 %v13213_v23 }
 0x3db   : > { %8562 = vmatprep.subr.bf16.mxu0 %v13218_v25  ;;  %8808 = vmatprep.subr.bf16.mxu1 %v13221_v26 }
 0x3de   : > { %8563 = vmatpush1.bf16.msra.mxu0 %v13216_v27  ;;  %8809 = vmatpush1.bf16.msra.mxu1 %v13219_v29  ;;  %v13267_v27 = vld [vmem:[%s13701_s25 + $0x1468] ss:$48 sps:$4 sm:$0xff]   ;;  %v13272_v29 = vld [vmem:[%s13701_s25 + $0x14c4] ss:$48 sps:$4 sm:$0xff]  }
 0x3df   : > { %8564 = vmatprep.subr.bf16.mxu0 %v13224_v5  ;;  %8810 = vmatprep.subr.bf16.mxu1 %v13227_v30 }
 0x3e2   : > { %8565 = vmatpush1.bf16.msra.mxu0 %v13222_v32  ;;  %8811 = vmatpush1.bf16.msra.mxu1 %v13225_v35 }
 0x3e3   : > { %8575 = vmatprep.subr.bf16.mxu0 %v13230_v36  ;;  %8821 = vmatprep.subr.bf16.mxu1 %v13233_v37  ;;  %v13275_v36 = vld [vmem:[%s13701_s25 + $0x14cc] ss:$48 sps:$4 sm:$0xff]  }
 0x3e5   : > { %8567 = vmatmul.mubr.bf16.vlgmr.msra.gmra.mrb[8].mxu0 %v13958_v15  ;;  %8813 = vmatmul.mubr.bf16.vlgmr.msra.gmra.mrb[8].mxu1 %v13958_v15  ;;  %v13240_v15 = vld [vmem:[%s13701_s25 + $0x12e0] ss:$48 sps:$4 sm:$0xff]  }
 0x3e6   : > { %8576 = vmatpush1.bf16.msra.mxu0 %v13228_v9  ;;  %8822 = vmatpush1.bf16.msra.mxu1 %v13231_v38 }
 0x3e7   : > { %8577 = vmatprep.subr.bf16.mxu0 %v13236_v39  ;;  %8823 = vmatprep.subr.bf16.mxu1 %v13239_v40  ;;  %v13270_v40 = vld [vmem:[%s13701_s25 + $0x14c0] ss:$48 sps:$4 sm:$0xff]  }
 0x3e8   : > { %8607 = vmatprep.mubr.bf16.mxu0 %v13965_v19  ;;  %8853 = vmatprep.mubr.bf16.mxu1 %v13965_v19  ;;  %v13254_v19 = vld [vmem:[%s13701_s25 + $0x13a4] ss:$48 sps:$4 sm:$0xff]  }
 0x3ea   : > { %8578 = vmatpush1.bf16.msra.mxu0 %v13234_v41  ;;  %8824 = vmatpush1.bf16.msra.mxu1 %v13237_v43  ;;  %v13273_v41 = vld [vmem:[%s13701_s25 + $0x14c8] ss:$48 sps:$4 sm:$0xff]   ;;  %v13278_v43 = vld [vmem:[%s13701_s25 + $0x1524] ss:$48 sps:$4 sm:$0xff]  }
 0x3eb   : > { %8579 = vmatprep.subr.bf16.mxu0 %v13242_v45  ;;  %8825 = vmatprep.subr.bf16.mxu1 %v13245_v46  ;;  %v13281_v45 = vld [vmem:[%s13701_s25 + $0x152c] ss:$48 sps:$4 sm:$0xff]  }
 0x3ee   : > { %8580 = vmatpush1.bf16.msra.mxu0 %v13240_v15  ;;  %8826 = vmatpush1.bf16.msra.mxu1 %v13243_v47 }
 0x3ef   : > { %8581 = vmatprep.subr.bf16.mxu0 %v13248_v48  ;;  %8827 = vmatprep.subr.bf16.mxu1 %v13251_v20  ;;  %v13276_v48 = vld [vmem:[%s13701_s25 + $0x1520] ss:$48 sps:$4 sm:$0xff]   ;;  %v13279_v20 = vld [vmem:[%s13701_s25 + $0x1528] ss:$48 sps:$4 sm:$0xff]  }
 0x3f2   : > { %8582 = vmatpush1.bf16.msra.mxu0 %v13246_v50  ;;  %8828 = vmatpush1.bf16.msra.mxu1 %v13249_v51  ;;  %v13284_v50 = vld [vmem:[%s13701_s25 + $0x1584] ss:$48 sps:$4 sm:$0xff]   ;;  %v13287_v51 = vld [vmem:[%s13701_s25 + $0x158c] ss:$48 sps:$4 sm:$0xff]  }
 0x3f3   : > { %8583 = vmatprep.subr.bf16.mxu0 %v13254_v19  ;;  %8829 = vmatprep.subr.bf16.mxu1 %v13257_v52  ;;  %v9020_v19 = vrot.slane %v14445_v34, %v13765_v31  ;;  %v13288_v34 = vld [vmem:[%s13701_s25 + $0x15e0] ss:$48 sps:$4 sm:$0xff]  }
 0x3f6   : > { %8584 = vmatpush1.bf16.msra.mxu0 %v13252_v42  ;;  %8830 = vmatpush1.bf16.msra.mxu1 %v13255_v55  ;;  %v13285_v42 = vld [vmem:[%s13701_s25 + $0x1588] ss:$48 sps:$4 sm:$0xff]   ;;  %v13290_v55 = vld [vmem:[%s13701_s25 + $0x15e4] ss:$48 sps:$4 sm:$0xff]  }
 0x3f7   : > { %8585 = vmatprep.subr.bf16.mxu0 %v13260_v60  ;;  %8831 = vmatprep.subr.bf16.mxu1 %v13263_v61  ;;  %v13296_v60 = vld [vmem:[%s13701_s25 + $0x1644] ss:$48 sps:$4 sm:$0xff]   ;;  %v13299_v61 = vld [vmem:[%s13701_s25 + $0x164c] ss:$48 sps:$4 sm:$0xff]  }
 0x3f8   : > { %v8199_v14 = vpop.f32.mrb[4].mxu0  ;;  %v8445_v16 = vpop.f32.mrb[4].mxu1 }
 0x3f9   : > { %v11636_v17 = vadd.f32 %v8199_v14, %v1580_v1  ;;  %v11638_v63 = vadd.f32 %v8445_v16, %v1588_v2  ;;  %v8201_v18 = vpop.f32.mrb[5].mxu0  ;;  %v8447_v62 = vpop.f32.mrb[5].mxu1  ;;  %v13297_v1 = vld [vmem:[%s13701_s25 + $0x1648] ss:$48 sps:$4 sm:$0xff]   ;;  %v13302_v2 = vld [vmem:[%s13701_s25 + $0x16a4] ss:$48 sps:$4 sm:$0xff]  }
 0x3fa   : > { %v11637_v22 = vadd.f32 %v8201_v18, %v1584_v3  ;;  %v11639_v23 = vadd.f32 %v8447_v62, %v1592_v4  ;;  %v8203_v25 = vpop.f32.mrb[6].mxu0  ;;  %v8449_v26 = vpop.f32.mrb[6].mxu1  ;;  %8586 = vmatpush1.bf16.msra.mxu0 %v13258_v6  ;;  %8832 = vmatpush1.bf16.msra.mxu1 %v13261_v59  ;;  %v13305_v3 = vld [vmem:[%s13701_s25 + $0x16ac] ss:$48 sps:$4 sm:$0xff]   ;;  %v13300_v4 = vld [vmem:[%s13701_s25 + $0x16a0] ss:$48 sps:$4 sm:$0xff]  }
 0x3fb   : > { %v8948_v5 = vmax.f32 %v11636_v17, 0.0  ;;  %v8950_v30 = vmax.f32 %v11638_v63, 0.0  ;;  %v8204_v32 = vpop.f32.mrb[7].mxu0  ;;  %v8450_v35 = vpop.f32.mrb[7].mxu1  ;;  %8587 = vmatprep.subr.bf16.mxu0 %v13266_v10  ;;  %8833 = vmatprep.subr.bf16.mxu1 %v13269_v11  ;;  %v13303_v6 = vld [vmem:[%s13701_s25 + $0x16a8] ss:$48 sps:$4 sm:$0xff]  }
 0x3fc   : > { %v8949_v37 = vmax.f32 %v11637_v22, 0.0  ;;  %v8951_v9 = vmax.f32 %v11639_v23, 0.0  ;;  %v13308_v59 = vld [vmem:[%s13701_s25 + $0x1704] ss:$48 sps:$4 sm:$0xff]   ;;  %v13311_v10 = vld [vmem:[%s13701_s25 + $0x170c] ss:$48 sps:$4 sm:$0xff]  }
 0x3fd   : > { %v13306_v11 = vld [vmem:[%s13701_s25 + $0x1700] ss:$48 sps:$4 sm:$0xff]   ;;  %v13309_v14 = vld [vmem:[%s13701_s25 + $0x1708] ss:$48 sps:$4 sm:$0xff]   ;;  %v13314_v16 = vld [vmem:[%s13701_s25 + $0x1764] ss:$48 sps:$4 sm:$0xff]  }
 0x3fe   : > { %v11392_v38 = vpack.c.bf16 %v8949_v37, %v8948_v5  ;;  %v11393_v39 = vpack.c.bf16 %v8951_v9, %v8950_v30  ;;  %8588 = vmatpush1.bf16.msra.mxu0 %v13264_v21  ;;  %8834 = vmatpush1.bf16.msra.mxu1 %v13267_v27  ;;  %v13317_v17 = vld [vmem:[%s13701_s25 + $0x176c] ss:$48 sps:$4 sm:$0xff]   ;;  %v13312_v63 = vld [vmem:[%s13701_s25 + $0x1760] ss:$48 sps:$4 sm:$0xff]   ;;  %v13315_v18 = vld [vmem:[%s13701_s25 + $0x1768] ss:$48 sps:$4 sm:$0xff]  }
 0x3ff   : > { %8589 = vmatprep.subr.bf16.mxu0 %v13272_v29  ;;  %8835 = vmatprep.subr.bf16.mxu1 %v13275_v36  ;;  %v13320_v62 = vld [vmem:[%s13701_s25 + $0x17c4] ss:$48 sps:$4 sm:$0xff]   ;;  %v13323_v21 = vld [vmem:[%s13701_s25 + $0x17cc] ss:$48 sps:$4 sm:$0xff]   ;;  %v13318_v22 = vld [vmem:[%s13701_s25 + $0x17c0] ss:$48 sps:$4 sm:$0xff]  }
 0x400   : > { %v9004_v46 = vrot.slane %v11392_v38, %v13765_v31  ;;  %v9011_v15 = vrot.slane %v11393_v39, %v13765_v31  ;;  %v13321_v23 = vld [vmem:[%s13701_s25 + $0x17c8] ss:$48 sps:$4 sm:$0xff]   ;;  %v13326_v25 = vld [vmem:[%s13701_s25 + $0x1824] ss:$48 sps:$4 sm:$0xff]   ;;  %v13329_v26 = vld [vmem:[%s13701_s25 + $0x182c] ss:$48 sps:$4 sm:$0xff]  }
 0x401   : > { %v13324_v27 = vld [vmem:[%s13701_s25 + $0x1820] ss:$48 sps:$4 sm:$0xff]   ;;  %v13327_v29 = vld [vmem:[%s13701_s25 + $0x1828] ss:$48 sps:$4 sm:$0xff]   ;;  %v13332_v5 = vld [vmem:[%s13701_s25 + $0x1884] ss:$48 sps:$4 sm:$0xff]  }
 0x402   : > { %v9013_v47 = vcombine.low %v9004_v46, %v9011_v15  ;;  %8590 = vmatpush1.bf16.msra.mxu0 %v13270_v40  ;;  %8836 = vmatpush1.bf16.msra.mxu1 %v13273_v41  ;;  %v13335_v30 = vld [vmem:[%s13701_s25 + $0x188c] ss:$48 sps:$4 sm:$0xff]   ;;  %v13330_v32 = vld [vmem:[%s13701_s25 + $0x1880] ss:$48 sps:$4 sm:$0xff]   ;;  %v13333_v35 = vld [vmem:[%s13701_s25 + $0x1888] ss:$48 sps:$4 sm:$0xff]  }
 0x403   : > { %8591 = vmatprep.subr.bf16.mxu0 %v13278_v43  ;;  %8837 = vmatprep.subr.bf16.mxu1 %v13281_v45  ;;  %v13338_v36 = vld [vmem:[%s13701_s25 + $0x18e4] ss:$48 sps:$4 sm:$0xff]   ;;  %v13341_v37 = vld [vmem:[%s13701_s25 + $0x18ec] ss:$48 sps:$4 sm:$0xff]   ;;  %v13339_v9 = vld [vmem:[%s13701_s25 + $0x18e8] ss:$48 sps:$4 sm:$0xff]  }
 0x404   : > { %v9027_v52 = vrot.slane %v9013_v47, %v13765_v31  ;;  %v13344_v38 = vld [vmem:[%s13701_s25 + $0x1944] ss:$48 sps:$4 sm:$0xff]   ;;  %v13347_v39 = vld [vmem:[%s13701_s25 + $0x194c] ss:$48 sps:$4 sm:$0xff]   ;;  %v13342_v40 = vld [vmem:[%s13701_s25 + $0x1940] ss:$48 sps:$4 sm:$0xff]  }
 0x405   : > { %v13345_v41 = vld [vmem:[%s13701_s25 + $0x1948] ss:$48 sps:$4 sm:$0xff]   ;;  %v13353_v43 = vld [vmem:[%s13701_s25 + $0x19ac] ss:$48 sps:$4 sm:$0xff]   ;;  %v13348_v45 = vld [vmem:[%s13701_s25 + $0x19a0] ss:$48 sps:$4 sm:$0xff]  }
 0x406   : > { %v9028_v53 = vcombine.low %v9020_v19, %v9027_v52  ;;  %8592 = vmatpush1.bf16.msra.mxu0 %v13276_v48  ;;  %8838 = vmatpush1.bf16.msra.mxu1 %v13279_v20  ;;  %v13351_v46 = vld [vmem:[%s13701_s25 + $0x19a8] ss:$48 sps:$4 sm:$0xff]   ;;  %v13356_v15 = vld [vmem:[%s13701_s25 + $0x1a04] ss:$48 sps:$4 sm:$0xff]   ;;  %v13359_v47 = vld [vmem:[%s13701_s25 + $0x1a0c] ss:$48 sps:$4 sm:$0xff]  }
 0x407   : > { %8593 = vmatprep.subr.bf16.mxu0 %v13284_v50  ;;  %8839 = vmatprep.subr.bf16.mxu1 %v13287_v51  ;;  %v13354_v48 = vld [vmem:[%s13701_s25 + $0x1a00] ss:$48 sps:$4 sm:$0xff]   ;;  %v13357_v20 = vld [vmem:[%s13701_s25 + $0x1a08] ss:$48 sps:$4 sm:$0xff]   ;;  %v13362_v50 = vld [vmem:[%s13701_s25 + $0x1a64] ss:$48 sps:$4 sm:$0xff]  }
 0x408   : > { %9055 = vst [vmem:[#allocation2] sm:$0xff] %v9028_v53  ;;  %v13365_v51 = vld [vmem:[%s13701_s25 + $0x1a6c] ss:$48 sps:$4 sm:$0xff]   ;;  %v13360_v19 = vld [vmem:[%s13701_s25 + $0x1a60] ss:$48 sps:$4 sm:$0xff]  }
 0x409   : > { %v13363_v52 = vld [vmem:[%s13701_s25 + $0x1a68] ss:$48 sps:$4 sm:$0xff]   ;;  %v13368_v53 = vld [vmem:[%s13701_s25 + $0x1ac4] ss:$48 sps:$4 sm:$0xff]  }
 0x40a   : > { %8594 = vmatpush1.bf16.msra.mxu0 %v13282_v54  ;;  %8840 = vmatpush1.bf16.msra.mxu1 %v13285_v42  ;;  %v13371_v54 = vld [vmem:[%s13701_s25 + $0x1acc] ss:$48 sps:$4 sm:$0xff]   ;;  %v13366_v42 = vld [vmem:[%s13701_s25 + $0x1ac0] ss:$48 sps:$4 sm:$0xff]  }
 0x40b   : > { %8595 = vmatprep.subr.bf16.mxu0 %v13290_v55  ;;  %8841 = vmatprep.subr.bf16.mxu1 %v13293_v56  ;;  %v13369_v55 = vld [vmem:[%s13701_s25 + $0x1ac8] ss:$48 sps:$4 sm:$0xff]   ;;  %v13374_v56 = vld [vmem:[%s13701_s25 + $0x1b24] ss:$48 sps:$4 sm:$0xff]  }
 0x40e   : > { %8596 = vmatpush1.bf16.msra.mxu0 %v13288_v34  ;;  %8842 = vmatpush1.bf16.msra.mxu1 %v13291_v57  ;;  %v13377_v34 = vld [vmem:[%s13701_s25 + $0x1b2c] ss:$48 sps:$4 sm:$0xff]   ;;  %v13372_v57 = vld [vmem:[%s13701_s25 + $0x1b20] ss:$48 sps:$4 sm:$0xff]  }
 0x40f   : > { %8597 = vmatprep.subr.bf16.mxu0 %v13296_v60  ;;  %8843 = vmatprep.subr.bf16.mxu1 %v13299_v61  ;;  %v13375_v60 = vld [vmem:[%s13701_s25 + $0x1b28] ss:$48 sps:$4 sm:$0xff]   ;;  %v13380_v61 = vld [vmem:[%s13701_s25 + $0x1b84] ss:$48 sps:$4 sm:$0xff]  }
 0x412   : > { %8598 = vmatpush1.bf16.msra.mxu0 %v13294_v0  ;;  %8844 = vmatpush1.bf16.msra.mxu1 %v13297_v1  ;;  %v13383_v0 = vld [vmem:[%s13701_s25 + $0x1b8c] ss:$48 sps:$4 sm:$0xff]   ;;  %v13378_v1 = vld [vmem:[%s13701_s25 + $0x1b80] ss:$48 sps:$4 sm:$0xff]  }
 0x413   : > { %8599 = vmatprep.subr.bf16.mxu0 %v13302_v2  ;;  %8845 = vmatprep.subr.bf16.mxu1 %v13305_v3  ;;  %v13381_v2 = vld [vmem:[%s13701_s25 + $0x1b88] ss:$48 sps:$4 sm:$0xff]   ;;  %v13386_v3 = vld [vmem:[%s13701_s25 + $0x1be4] ss:$48 sps:$4 sm:$0xff]  }
 0x416   : > { %8600 = vmatpush1.bf16.msra.mxu0 %v13300_v4  ;;  %8846 = vmatpush1.bf16.msra.mxu1 %v13303_v6  ;;  %v13389_v4 = vld [vmem:[%s13701_s25 + $0x1bec] ss:$48 sps:$4 sm:$0xff]   ;;  %v13384_v6 = vld [vmem:[%s13701_s25 + $0x1be0] ss:$48 sps:$4 sm:$0xff]  }
 0x417   : > { %8601 = vmatprep.subr.bf16.mxu0 %v13308_v59  ;;  %8847 = vmatprep.subr.bf16.mxu1 %v13311_v10  ;;  %v13387_v59 = vld [vmem:[%s13701_s25 + $0x1be8] ss:$48 sps:$4 sm:$0xff]   ;;  %v13392_v10 = vld [vmem:[%s13701_s25 + $0x1c44] ss:$48 sps:$4 sm:$0xff]  }
 0x41a   : > { %8602 = vmatpush1.bf16.msra.mxu0 %v13306_v11  ;;  %8848 = vmatpush1.bf16.msra.mxu1 %v13309_v14  ;;  %v13395_v11 = vld [vmem:[%s13701_s25 + $0x1c4c] ss:$48 sps:$4 sm:$0xff]   ;;  %v13390_v14 = vld [vmem:[%s13701_s25 + $0x1c40] ss:$48 sps:$4 sm:$0xff]  }
 0x41b   : > { %8603 = vmatprep.subr.bf16.mxu0 %v13314_v16  ;;  %8849 = vmatprep.subr.bf16.mxu1 %v13317_v17  ;;  %v13393_v16 = vld [vmem:[%s13701_s25 + $0x1c48] ss:$48 sps:$4 sm:$0xff]   ;;  %v13398_v17 = vld [vmem:[%s13701_s25 + $0x1ca4] ss:$48 sps:$4 sm:$0xff]  }
 0x41e   : > { %8604 = vmatpush1.bf16.msra.mxu0 %v13312_v63  ;;  %8850 = vmatpush1.bf16.msra.mxu1 %v13315_v18  ;;  %v13401_v63 = vld [vmem:[%s13701_s25 + $0x1cac] ss:$48 sps:$4 sm:$0xff]   ;;  %v13396_v18 = vld [vmem:[%s13701_s25 + $0x1ca0] ss:$48 sps:$4 sm:$0xff]  }
 0x41f   : > { %8605 = vmatprep.subr.bf16.mxu0 %v13320_v62  ;;  %8851 = vmatprep.subr.bf16.mxu1 %v13323_v21  ;;  %v13399_v62 = vld [vmem:[%s13701_s25 + $0x1ca8] ss:$48 sps:$4 sm:$0xff]   ;;  %v13404_v21 = vld [vmem:[%s13701_s25 + $0x1d04] ss:$48 sps:$4 sm:$0xff]  }
 0x422   : > { %8606 = vmatpush1.bf16.msra.mxu0 %v13318_v22  ;;  %8852 = vmatpush1.bf16.msra.mxu1 %v13321_v23  ;;  %v13407_v22 = vld [vmem:[%s13701_s25 + $0x1d0c] ss:$48 sps:$4 sm:$0xff]   ;;  %v13402_v23 = vld [vmem:[%s13701_s25 + $0x1d00] ss:$48 sps:$4 sm:$0xff]  }
 0x423   : > { %8616 = vmatprep.subr.bf16.mxu0 %v13326_v25  ;;  %8862 = vmatprep.subr.bf16.mxu1 %v13329_v26  ;;  %v13405_v25 = vld [vmem:[%s13701_s25 + $0x1d08] ss:$48 sps:$4 sm:$0xff]   ;;  %v13410_v26 = vld [vmem:[%s13701_s25 + $0x1d64] ss:$48 sps:$4 sm:$0xff]  }
 0x425   : > { %8608 = vmatmul.mubr.bf16.vlgmr.msra.gmra.mrb[8].mxu0 %v14038_v28  ;;  %8854 = vmatmul.mubr.bf16.vlgmr.msra.gmra.mrb[8].mxu1 %v14038_v28  ;;  %v13336_v28 = vld [vmem:[%s13701_s25 + $0x18e0] ss:$48 sps:$4 sm:$0xff]  }
 0x426   : > { %8617 = vmatpush1.bf16.msra.mxu0 %v13324_v27  ;;  %8863 = vmatpush1.bf16.msra.mxu1 %v13327_v29  ;;  %v13413_v27 = vld [vmem:[%s13701_s25 + $0x1d6c] ss:$48 sps:$4 sm:$0xff]   ;;  %v13408_v29 = vld [vmem:[%s13701_s25 + $0x1d60] ss:$48 sps:$4 sm:$0xff]  }
 0x427   : > { %8618 = vmatprep.subr.bf16.mxu0 %v13332_v5  ;;  %8864 = vmatprep.subr.bf16.mxu1 %v13335_v30  ;;  %v13411_v5 = vld [vmem:[%s13701_s25 + $0x1d68] ss:$48 sps:$4 sm:$0xff]   ;;  %v13416_v30 = vld [vmem:[%s13701_s25 + $0x1dc4] ss:$48 sps:$4 sm:$0xff]  }
 0x428   : > { %8648 = vmatprep.mubr.bf16.mxu0 %v14044_v33  ;;  %8894 = vmatprep.mubr.bf16.mxu1 %v14044_v33  ;;  %v13350_v33 = vld [vmem:[%s13701_s25 + $0x19a4] ss:$48 sps:$4 sm:$0xff]  }
 0x42a   : > { %8619 = vmatpush1.bf16.msra.mxu0 %v13330_v32  ;;  %8865 = vmatpush1.bf16.msra.mxu1 %v13333_v35  ;;  %v13419_v32 = vld [vmem:[%s13701_s25 + $0x1dcc] ss:$48 sps:$4 sm:$0xff]   ;;  %v13414_v35 = vld [vmem:[%s13701_s25 + $0x1dc0] ss:$48 sps:$4 sm:$0xff]  }
 0x42b   : > { %8620 = vmatprep.subr.bf16.mxu0 %v13338_v36  ;;  %8866 = vmatprep.subr.bf16.mxu1 %v13341_v37  ;;  %v13417_v36 = vld [vmem:[%s13701_s25 + $0x1dc8] ss:$48 sps:$4 sm:$0xff]   ;;  %v13422_v37 = vld [vmem:[%s13701_s25 + $0x1e24] ss:$48 sps:$4 sm:$0xff]  }
 0x42e   : > { %8621 = vmatpush1.bf16.msra.mxu0 %v13336_v28  ;;  %8867 = vmatpush1.bf16.msra.mxu1 %v13339_v9  ;;  %v13425_v28 = vld [vmem:[%s13701_s25 + $0x1e2c] ss:$48 sps:$4 sm:$0xff]   ;;  %v13420_v9 = vld [vmem:[%s13701_s25 + $0x1e20] ss:$48 sps:$4 sm:$0xff]  }
 0x42f   : > { %8622 = vmatprep.subr.bf16.mxu0 %v13344_v38  ;;  %8868 = vmatprep.subr.bf16.mxu1 %v13347_v39  ;;  %v13423_v38 = vld [vmem:[%s13701_s25 + $0x1e28] ss:$48 sps:$4 sm:$0xff]   ;;  %v13428_v39 = vld [vmem:[%s13701_s25 + $0x1e84] ss:$48 sps:$4 sm:$0xff]  }
 0x432   : > { %8623 = vmatpush1.bf16.msra.mxu0 %v13342_v40  ;;  %8869 = vmatpush1.bf16.msra.mxu1 %v13345_v41  ;;  %v13431_v40 = vld [vmem:[%s13701_s25 + $0x1e8c] ss:$48 sps:$4 sm:$0xff]   ;;  %v13426_v41 = vld [vmem:[%s13701_s25 + $0x1e80] ss:$48 sps:$4 sm:$0xff]  }
 0x433   : > { %8624 = vmatprep.subr.bf16.mxu0 %v13350_v33  ;;  %8870 = vmatprep.subr.bf16.mxu1 %v13353_v43  ;;  %v13429_v33 = vld [vmem:[%s13701_s25 + $0x1e88] ss:$48 sps:$4 sm:$0xff]   ;;  %v13434_v43 = vld [vmem:[%s13701_s25 + $0x1ee4] ss:$48 sps:$4 sm:$0xff]  }
 0x436   : > { %8625 = vmatpush1.bf16.msra.mxu0 %v13348_v45  ;;  %8871 = vmatpush1.bf16.msra.mxu1 %v13351_v46  ;;  %v13437_v45 = vld [vmem:[%s13701_s25 + $0x1eec] ss:$48 sps:$4 sm:$0xff]   ;;  %v13435_v46 = vld [vmem:[%s13701_s25 + $0x1ee8] ss:$48 sps:$4 sm:$0xff]  }
 0x437   : > { %8626 = vmatprep.subr.bf16.mxu0 %v13356_v15  ;;  %8872 = vmatprep.subr.bf16.mxu1 %v13359_v47  ;;  %v13440_v15 = vld [vmem:[%s13701_s25 + $0x1f44] ss:$48 sps:$4 sm:$0xff]   ;;  %v13443_v47 = vld [vmem:[%s13701_s25 + $0x1f4c] ss:$48 sps:$4 sm:$0xff]  }
 0x43a   : > { %8627 = vmatpush1.bf16.msra.mxu0 %v13354_v48  ;;  %8873 = vmatpush1.bf16.msra.mxu1 %v13357_v20  ;;  %v13438_v48 = vld [vmem:[%s13701_s25 + $0x1f40] ss:$48 sps:$4 sm:$0xff]   ;;  %v13441_v20 = vld [vmem:[%s13701_s25 + $0x1f48] ss:$48 sps:$4 sm:$0xff]  }
 0x43b   : > { %8628 = vmatprep.subr.bf16.mxu0 %v13362_v50  ;;  %8874 = vmatprep.subr.bf16.mxu1 %v13365_v51  ;;  %v13449_v50 = vld [vmem:[%s13701_s25 + $0x1fac] ss:$48 sps:$4 sm:$0xff]   ;;  %v13444_v51 = vld [vmem:[%s13701_s25 + $0x1fa0] ss:$48 sps:$4 sm:$0xff]  }
 0x43e   : > { %8629 = vmatpush1.bf16.msra.mxu0 %v13360_v19  ;;  %8875 = vmatpush1.bf16.msra.mxu1 %v13363_v52  ;;  %v13447_v19 = vld [vmem:[%s13701_s25 + $0x1fa8] ss:$48 sps:$4 sm:$0xff]   ;;  %v13452_v52 = vld [vmem:[%s13701_s25 + $0x2004] ss:$48 sps:$4 sm:$0xff]  }
 0x43f   : > { %8630 = vmatprep.subr.bf16.mxu0 %v13368_v53  ;;  %8876 = vmatprep.subr.bf16.mxu1 %v13371_v54  ;;  %v13455_v53 = vld [vmem:[%s13701_s25 + $0x200c] ss:$48 sps:$4 sm:$0xff]   ;;  %v13450_v54 = vld [vmem:[%s13701_s25 + $0x2000] ss:$48 sps:$4 sm:$0xff]  }
 0x442   : > { %8631 = vmatpush1.bf16.msra.mxu0 %v13366_v42  ;;  %8877 = vmatpush1.bf16.msra.mxu1 %v13369_v55  ;;  %v13453_v42 = vld [vmem:[%s13701_s25 + $0x2008] ss:$48 sps:$4 sm:$0xff]   ;;  %v13458_v55 = vld [vmem:[%s13701_s25 + $0x2064] ss:$48 sps:$4 sm:$0xff]  }
 0x443   : > { %8632 = vmatprep.subr.bf16.mxu0 %v13374_v56  ;;  %8878 = vmatprep.subr.bf16.mxu1 %v13377_v34  ;;  %v13461_v56 = vld [vmem:[%s13701_s25 + $0x206c] ss:$48 sps:$4 sm:$0xff]   ;;  %v13456_v34 = vld [vmem:[%s13701_s25 + $0x2060] ss:$48 sps:$4 sm:$0xff]  }
 0x446   : > { %8633 = vmatpush1.bf16.msra.mxu0 %v13372_v57  ;;  %8879 = vmatpush1.bf16.msra.mxu1 %v13375_v60  ;;  %v13459_v57 = vld [vmem:[%s13701_s25 + $0x2068] ss:$48 sps:$4 sm:$0xff]   ;;  %v13464_v60 = vld [vmem:[%s13701_s25 + $0x20c4] ss:$48 sps:$4 sm:$0xff]  }
 0x447   : > { %8634 = vmatprep.subr.bf16.mxu0 %v13380_v61  ;;  %8880 = vmatprep.subr.bf16.mxu1 %v13383_v0  ;;  %v13467_v61 = vld [vmem:[%s13701_s25 + $0x20cc] ss:$48 sps:$4 sm:$0xff]   ;;  %v13462_v0 = vld [vmem:[%s13701_s25 + $0x20c0] ss:$48 sps:$4 sm:$0xff]  }
 0x44a   : > { %8635 = vmatpush1.bf16.msra.mxu0 %v13378_v1  ;;  %8881 = vmatpush1.bf16.msra.mxu1 %v13381_v2  ;;  %v13465_v1 = vld [vmem:[%s13701_s25 + $0x20c8] ss:$48 sps:$4 sm:$0xff]   ;;  %v13470_v2 = vld [vmem:[%s13701_s25 + $0x2124] ss:$48 sps:$4 sm:$0xff]  }
 0x44b   : > { %8636 = vmatprep.subr.bf16.mxu0 %v13386_v3  ;;  %8882 = vmatprep.subr.bf16.mxu1 %v13389_v4  ;;  %v13473_v3 = vld [vmem:[%s13701_s25 + $0x212c] ss:$48 sps:$4 sm:$0xff]   ;;  %v13468_v4 = vld [vmem:[%s13701_s25 + $0x2120] ss:$48 sps:$4 sm:$0xff]  }
 0x44e   : > { %8637 = vmatpush1.bf16.msra.mxu0 %v13384_v6  ;;  %8883 = vmatpush1.bf16.msra.mxu1 %v13387_v59  ;;  %v13471_v6 = vld [vmem:[%s13701_s25 + $0x2128] ss:$48 sps:$4 sm:$0xff]   ;;  %v13476_v59 = vld [vmem:[%s13701_s25 + $0x2184] ss:$48 sps:$4 sm:$0xff]  }
 0x44f   : > { %8638 = vmatprep.subr.bf16.mxu0 %v13392_v10  ;;  %8884 = vmatprep.subr.bf16.mxu1 %v13395_v11  ;;  %v13479_v10 = vld [vmem:[%s13701_s25 + $0x218c] ss:$48 sps:$4 sm:$0xff]   ;;  %v13474_v11 = vld [vmem:[%s13701_s25 + $0x2180] ss:$48 sps:$4 sm:$0xff]  }
 0x452   : > { %8639 = vmatpush1.bf16.msra.mxu0 %v13390_v14  ;;  %8885 = vmatpush1.bf16.msra.mxu1 %v13393_v16  ;;  %v13477_v14 = vld [vmem:[%s13701_s25 + $0x2188] ss:$48 sps:$4 sm:$0xff]   ;;  %v13482_v16 = vld [vmem:[%s13701_s25 + $0x21e4] ss:$48 sps:$4 sm:$0xff]  }
 0x453   : > { %8640 = vmatprep.subr.bf16.mxu0 %v13398_v17  ;;  %8886 = vmatprep.subr.bf16.mxu1 %v13401_v63  ;;  %v13485_v17 = vld [vmem:[%s13701_s25 + $0x21ec] ss:$48 sps:$4 sm:$0xff]   ;;  %v13480_v63 = vld [vmem:[%s13701_s25 + $0x21e0] ss:$48 sps:$4 sm:$0xff]  }
 0x456   : > { %8641 = vmatpush1.bf16.msra.mxu0 %v13396_v18  ;;  %8887 = vmatpush1.bf16.msra.mxu1 %v13399_v62  ;;  %v13483_v18 = vld [vmem:[%s13701_s25 + $0x21e8] ss:$48 sps:$4 sm:$0xff]   ;;  %v13488_v62 = vld [vmem:[%s13701_s25 + $0x2244] ss:$48 sps:$4 sm:$0xff]  }
 0x457   : > { %8642 = vmatprep.subr.bf16.mxu0 %v13404_v21  ;;  %8888 = vmatprep.subr.bf16.mxu1 %v13407_v22  ;;  %v13491_v21 = vld [vmem:[%s13701_s25 + $0x224c] ss:$48 sps:$4 sm:$0xff]   ;;  %v13486_v22 = vld [vmem:[%s13701_s25 + $0x2240] ss:$48 sps:$4 sm:$0xff]  }
 0x45a   : > { %8643 = vmatpush1.bf16.msra.mxu0 %v13402_v23  ;;  %8889 = vmatpush1.bf16.msra.mxu1 %v13405_v25  ;;  %v13489_v23 = vld [vmem:[%s13701_s25 + $0x2248] ss:$48 sps:$4 sm:$0xff]   ;;  %v13494_v25 = vld [vmem:[%s13701_s25 + $0x22a4] ss:$48 sps:$4 sm:$0xff]  }
 0x45b   : > { %8644 = vmatprep.subr.bf16.mxu0 %v13410_v26  ;;  %8890 = vmatprep.subr.bf16.mxu1 %v13413_v27  ;;  %v13497_v26 = vld [vmem:[%s13701_s25 + $0x22ac] ss:$48 sps:$4 sm:$0xff]   ;;  %v13492_v27 = vld [vmem:[%s13701_s25 + $0x22a0] ss:$48 sps:$4 sm:$0xff]  }
 0x45e   : > { %8645 = vmatpush1.bf16.msra.mxu0 %v13408_v29  ;;  %8891 = vmatpush1.bf16.msra.mxu1 %v13411_v5  ;;  %v13495_v29 = vld [vmem:[%s13701_s25 + $0x22a8] ss:$48 sps:$4 sm:$0xff]   ;;  %v13500_v5 = vld [vmem:[%s13701_s25 + $0x2304] ss:$48 sps:$4 sm:$0xff]  }
 0x45f   : > { %8646 = vmatprep.subr.bf16.mxu0 %v13416_v30  ;;  %8892 = vmatprep.subr.bf16.mxu1 %v13419_v32  ;;  %v13503_v30 = vld [vmem:[%s13701_s25 + $0x230c] ss:$48 sps:$4 sm:$0xff]   ;;  %v13498_v32 = vld [vmem:[%s13701_s25 + $0x2300] ss:$48 sps:$4 sm:$0xff]  }
 0x462   : > { %8647 = vmatpush1.bf16.msra.mxu0 %v13414_v35  ;;  %8893 = vmatpush1.bf16.msra.mxu1 %v13417_v36  ;;  %v13501_v35 = vld [vmem:[%s13701_s25 + $0x2308] ss:$48 sps:$4 sm:$0xff]   ;;  %v13506_v36 = vld [vmem:[%s13701_s25 + $0x2364] ss:$48 sps:$4 sm:$0xff]  }
 0x463   : > { %8657 = vmatprep.subr.bf16.mxu0 %v13422_v37  ;;  %8903 = vmatprep.subr.bf16.mxu1 %v13425_v28  ;;  %v13509_v37 = vld [vmem:[%s13701_s25 + $0x236c] ss:$48 sps:$4 sm:$0xff]   ;;  %v13504_v28 = vld [vmem:[%s13701_s25 + $0x2360] ss:$48 sps:$4 sm:$0xff]  }
 0x465   : > { %8649 = vmatmul.mubr.bf16.vlgmr.msra.gmra.mrb[8].mxu0 %v14112_v44  ;;  %8895 = vmatmul.mubr.bf16.vlgmr.msra.gmra.mrb[8].mxu1 %v14112_v44  ;;  %v13432_v44 = vld [vmem:[%s13701_s25 + $0x1ee0] ss:$48 sps:$4 sm:$0xff]  }
 0x466   : > { %8658 = vmatpush1.bf16.msra.mxu0 %v13420_v9  ;;  %8904 = vmatpush1.bf16.msra.mxu1 %v13423_v38  ;;  %v13507_v9 = vld [vmem:[%s13701_s25 + $0x2368] ss:$48 sps:$4 sm:$0xff]   ;;  %v13512_v38 = vld [vmem:[%s13701_s25 + $0x23c4] ss:$48 sps:$4 sm:$0xff]  }
 0x467   : > { %8659 = vmatprep.subr.bf16.mxu0 %v13428_v39  ;;  %8905 = vmatprep.subr.bf16.mxu1 %v13431_v40  ;;  %v13515_v39 = vld [vmem:[%s13701_s25 + $0x23cc] ss:$48 sps:$4 sm:$0xff]   ;;  %v13510_v40 = vld [vmem:[%s13701_s25 + $0x23c0] ss:$48 sps:$4 sm:$0xff]  }
 0x468   : > { %8689 = vmatprep.mubr.bf16.mxu0 %v14120_v49  ;;  %8935 = vmatprep.mubr.bf16.mxu1 %v14120_v49  ;;  %v13446_v49 = vld [vmem:[%s13701_s25 + $0x1fa4] ss:$48 sps:$4 sm:$0xff]  }
 0x46a   : > { %8660 = vmatpush1.bf16.msra.mxu0 %v13426_v41  ;;  %8906 = vmatpush1.bf16.msra.mxu1 %v13429_v33  ;;  %v13513_v41 = vld [vmem:[%s13701_s25 + $0x23c8] ss:$48 sps:$4 sm:$0xff]  }
 0x46b   : > { %8661 = vmatprep.subr.bf16.mxu0 %v13434_v43  ;;  %8907 = vmatprep.subr.bf16.mxu1 %v13437_v45  ;;  %v1558_v33 = vld [vmem:[%s13706_s28 + $0x8] sm:$0xf] }
 0x46c   : > { %v1596_v43 = vrot.slane %v1558_v33, %v1563_v7  ;;  %v1604_v45 = vrot.slane %v1558_v33, %v1571_v8 }
 0x46e   : > { %8662 = vmatpush1.bf16.msra.mxu0 %v13432_v44  ;;  %8908 = vmatpush1.bf16.msra.mxu1 %v13435_v46  ;;  %v1600_v44 = vrot.slane %v1558_v33, %v1567_v12  ;;  %v1608_v46 = vrot.slane %v1558_v33, %v1575_v13 }
 0x46f   : > { %8663 = vmatprep.subr.bf16.mxu0 %v13440_v15  ;;  %8909 = vmatprep.subr.bf16.mxu1 %v13443_v47 }
 0x472   : > { %8664 = vmatpush1.bf16.msra.mxu0 %v13438_v48  ;;  %8910 = vmatpush1.bf16.msra.mxu1 %v13441_v20 }
 0x473   : > { %8665 = vmatprep.subr.bf16.mxu0 %v13446_v49  ;;  %8911 = vmatprep.subr.bf16.mxu1 %v13449_v50 }
 0x476   : > { %8666 = vmatpush1.bf16.msra.mxu0 %v13444_v51  ;;  %8912 = vmatpush1.bf16.msra.mxu1 %v13447_v19 }
 0x477   : > { %8667 = vmatprep.subr.bf16.mxu0 %v13452_v52  ;;  %8913 = vmatprep.subr.bf16.mxu1 %v13455_v53 }
 0x47a   : > { %8668 = vmatpush1.bf16.msra.mxu0 %v13450_v54  ;;  %8914 = vmatpush1.bf16.msra.mxu1 %v13453_v42 }
 0x47b   : > { %8669 = vmatprep.subr.bf16.mxu0 %v13458_v55  ;;  %8915 = vmatprep.subr.bf16.mxu1 %v13461_v56 }
 0x47e   : > { %8670 = vmatpush1.bf16.msra.mxu0 %v13456_v34  ;;  %8916 = vmatpush1.bf16.msra.mxu1 %v13459_v57  ;;  %v13517_v57 = vld [vmem:[%s15378_s3 + $0x40] sm:$0xff] (!%p11397_p5)  }
 0x47f   : > { %8671 = vmatprep.subr.bf16.mxu0 %v13464_v60  ;;  %8917 = vmatprep.subr.bf16.mxu1 %v13467_v61  ;;  %v13518_v60 = vld [vmem:[%s15378_s3 + $0xc0] sm:$0xff] (!%p11397_p5)  }
 0x480   : > { %v13519_v61 = vld [vmem:[%s15378_s3] sm:$0xff] (!%p11397_p5)  }
 0x482   : > { %8672 = vmatpush1.bf16.msra.mxu0 %v13462_v0  ;;  %8918 = vmatpush1.bf16.msra.mxu1 %v13465_v1  ;;  %v13520_v0 = vld [vmem:[%s15378_s3 + $0x80] sm:$0xff] (!%p11397_p5)   ;;  %v13521_v1 = vld [vmem:[%s15378_s3 + $0x48] sm:$0xff] (!%p11397_p5)  }
 0x483   : > { %8673 = vmatprep.subr.bf16.mxu0 %v13470_v2  ;;  %8919 = vmatprep.subr.bf16.mxu1 %v13473_v3  ;;  %v13522_v2 = vld [vmem:[%s15378_s3 + $0xc8] sm:$0xff] (!%p11397_p5)  }
 0x484   : > { %v13523_v3 = vld [vmem:[%s15378_s3 + $0x8] sm:$0xff] (!%p11397_p5)  }
 0x486   : > { %8674 = vmatpush1.bf16.msra.mxu0 %v13468_v4  ;;  %8920 = vmatpush1.bf16.msra.mxu1 %v13471_v6  ;;  %v13524_v4 = vld [vmem:[%s15378_s3 + $0x88] sm:$0xff] (!%p11397_p5)   ;;  %v13525_v6 = vld [vmem:[%s15378_s3 + $0x50] sm:$0xff] (!%p11397_p5)  }
 0x487   : > { %8675 = vmatprep.subr.bf16.mxu0 %v13476_v59  ;;  %8921 = vmatprep.subr.bf16.mxu1 %v13479_v10  ;;  %v13526_v59 = vld [vmem:[%s15378_s3 + $0xd0] sm:$0xff] (!%p11397_p5)  }
 0x488   : > { %v13527_v10 = vld [vmem:[%s15378_s3 + $0x10] sm:$0xff] (!%p11397_p5)  }
 0x48a   : > { %8676 = vmatpush1.bf16.msra.mxu0 %v13474_v11  ;;  %8922 = vmatpush1.bf16.msra.mxu1 %v13477_v14  ;;  %v13528_v11 = vld [vmem:[%s15378_s3 + $0x90] sm:$0xff] (!%p11397_p5)   ;;  %v13529_v14 = vld [vmem:[%s15378_s3 + $0x58] sm:$0xff] (!%p11397_p5)  }
 0x48b   : > { %8677 = vmatprep.subr.bf16.mxu0 %v13482_v16  ;;  %8923 = vmatprep.subr.bf16.mxu1 %v13485_v17  ;;  %v13530_v16 = vld [vmem:[%s15378_s3 + $0xd8] sm:$0xff] (!%p11397_p5)  }
 0x48c   : > { %v13531_v17 = vld [vmem:[%s15378_s3 + $0x18] sm:$0xff] (!%p11397_p5)  }
 0x48e   : > { %8678 = vmatpush1.bf16.msra.mxu0 %v13480_v63  ;;  %8924 = vmatpush1.bf16.msra.mxu1 %v13483_v18  ;;  %v13532_v63 = vld [vmem:[%s15378_s3 + $0x98] sm:$0xff] (!%p11397_p5)   ;;  %v13533_v18 = vld [vmem:[%s15378_s3 + $0x60] sm:$0xff] (!%p11397_p5)  }
 0x48f   : > { %8679 = vmatprep.subr.bf16.mxu0 %v13488_v62  ;;  %8925 = vmatprep.subr.bf16.mxu1 %v13491_v21  ;;  %v13534_v62 = vld [vmem:[%s15378_s3 + $0xe0] sm:$0xff] (!%p11397_p5)  }
 0x490   : > { %v13535_v21 = vld [vmem:[%s15378_s3 + $0x20] sm:$0xff] (!%p11397_p5)  }
 0x492   : > { %8680 = vmatpush1.bf16.msra.mxu0 %v13486_v22  ;;  %8926 = vmatpush1.bf16.msra.mxu1 %v13489_v23  ;;  %v13536_v22 = vld [vmem:[%s15378_s3 + $0xa0] sm:$0xff] (!%p11397_p5)   ;;  %v13537_v23 = vld [vmem:[%s15378_s3 + $0x68] sm:$0xff] (!%p11397_p5)  }
 0x493   : > { %8681 = vmatprep.subr.bf16.mxu0 %v13494_v25  ;;  %8927 = vmatprep.subr.bf16.mxu1 %v13497_v26  ;;  %v13538_v25 = vld [vmem:[%s15378_s3 + $0xe8] sm:$0xff] (!%p11397_p5)  }
 0x494   : > { %v13539_v26 = vld [vmem:[%s15378_s3 + $0x28] sm:$0xff] (!%p11397_p5)  }
 0x496   : > { %8682 = vmatpush1.bf16.msra.mxu0 %v13492_v27  ;;  %8928 = vmatpush1.bf16.msra.mxu1 %v13495_v29  ;;  %v13540_v27 = vld [vmem:[%s15378_s3 + $0xa8] sm:$0xff] (!%p11397_p5)   ;;  %v13541_v29 = vld [vmem:[%s15378_s3 + $0x70] sm:$0xff] (!%p11397_p5)  }
 0x497   : > { %8683 = vmatprep.subr.bf16.mxu0 %v13500_v5  ;;  %8929 = vmatprep.subr.bf16.mxu1 %v13503_v30  ;;  %v13542_v5 = vld [vmem:[%s15378_s3 + $0xf0] sm:$0xff] (!%p11397_p5)  }
 0x498   : > { %v13543_v30 = vld [vmem:[%s15378_s3 + $0x30] sm:$0xff] (!%p11397_p5)  }
 0x49a   : > { %8684 = vmatpush1.bf16.msra.mxu0 %v13498_v32  ;;  %8930 = vmatpush1.bf16.msra.mxu1 %v13501_v35  ;;  %v13544_v32 = vld [vmem:[%s15378_s3 + $0xb0] sm:$0xff] (!%p11397_p5)   ;;  %v13545_v35 = vld [vmem:[%s15378_s3 + $0x78] sm:$0xff] (!%p11397_p5)  }
 0x49b   : > { %8685 = vmatprep.subr.bf16.mxu0 %v13506_v36  ;;  %8931 = vmatprep.subr.bf16.mxu1 %v13509_v37  ;;  %v13546_v36 = vld [vmem:[%s15378_s3 + $0xf8] sm:$0xff] (!%p11397_p5)  }
 0x49c   : > { %v13547_v37 = vld [vmem:[%s15378_s3 + $0x38] sm:$0xff] (!%p11397_p5)  }
 0x49e   : > { %8686 = vmatpush1.bf16.msra.mxu0 %v13504_v28  ;;  %8932 = vmatpush1.bf16.msra.mxu1 %v13507_v9  ;;  %v13548_v28 = vld [vmem:[%s15378_s3 + $0xb8] sm:$0xff] (!%p11397_p5)   ;;  %v9061_v9 = vld [vmem:[#allocation2] sm:$0xff] (!%p11397_p5) }
 0x49f   : > { %8687 = vmatprep.subr.bf16.mxu0 %v13512_v38  ;;  %8933 = vmatprep.subr.bf16.mxu1 %v13515_v39  ;;  %v9264_v38 = vcombine.high (!%p11397_p5), %v9061_v9, %v9061_v9  ;;  %v9271_v39 = vrot.slane (!%p11397_p5), %v9061_v9, %v13765_v31  ;;  %v13599_v9 = vld [vmem:[%s15378_s3 + $0x2e0] sm:$0xff] (!%p11397_p5)  }
 0x4a1   : > { %v9279_v33 = vcombine.high (!%p11397_p5), %v9271_v39, %v9271_v39 }
 0x4a2   : > { %8688 = vmatpush1.bf16.msra.mxu0 %v13510_v40  ;;  %8934 = vmatpush1.bf16.msra.mxu1 %v13513_v41  ;;  %v13550_v40 = vld [vmem:[%s15378_s3 + $0x140] sm:$0xff] (!%p11397_p5)  }
 0x4a3   : > { %11500 = vmatprep.subr.bf16.mxu0 (!%p11397_p5), %v13517_v57  ;;  %11522 = vmatprep.subr.bf16.mxu1 (!%p11397_p5), %v13518_v60  ;;  %v13551_v41 = vld [vmem:[%s15378_s3 + $0x1c0] sm:$0xff] (!%p11397_p5)   ;;  %v13570_v57 = vld [vmem:[%s15378_s3 + $0x168] sm:$0xff] (!%p11397_p5)  }
 0x4a4   : > { %v13569_v60 = vld [vmem:[%s15378_s3 + $0x1a0] sm:$0xff] (!%p11397_p5)  }
 0x4a5   : > { %8690 = vmatmul.mubr.bf16.vlgmr.msra.gmra.mrb[8].mxu0 %v14188_v58  ;;  %8936 = vmatmul.mubr.bf16.vlgmr.msra.gmra.mrb[8].mxu1 %v14188_v58 }
 0x4a6   : > { %11501 = vmatpush3.bf16.msra.mxu0 (!%p11397_p5), %v13519_v61  ;;  %11523 = vmatpush3.bf16.msra.mxu1 (!%p11397_p5), %v13520_v0  ;;  %v13571_v61 = vld [vmem:[%s15378_s3 + $0x1e8] sm:$0xff] (!%p11397_p5)  }
 0x4a7   : > { %11502 = vmatprep.subr.bf16.mxu0 (!%p11397_p5), %v13521_v1  ;;  %11524 = vmatprep.subr.bf16.mxu1 (!%p11397_p5), %v13522_v2  ;;  %v13572_v0 = vld [vmem:[%s15378_s3 + $0x128] sm:$0xff] (!%p11397_p5)   ;;  %v13574_v1 = vld [vmem:[%s15378_s3 + $0x170] sm:$0xff] (!%p11397_p5)  }
 0x4a8   : > { %v13573_v2 = vld [vmem:[%s15378_s3 + $0x1a8] sm:$0xff] (!%p11397_p5)  }
 0x4aa   : > { %11503 = vmatpush3.bf16.msra.mxu0 (!%p11397_p5), %v13523_v3  ;;  %11525 = vmatpush3.bf16.msra.mxu1 (!%p11397_p5), %v13524_v4  ;;  %v13575_v3 = vld [vmem:[%s15378_s3 + $0x1f0] sm:$0xff] (!%p11397_p5)  }
 0x4ab   : > { %11504 = vmatprep.subr.bf16.mxu0 (!%p11397_p5), %v13525_v6  ;;  %11526 = vmatprep.subr.bf16.mxu1 (!%p11397_p5), %v13526_v59  ;;  %v13576_v4 = vld [vmem:[%s15378_s3 + $0x130] sm:$0xff] (!%p11397_p5)   ;;  %v13578_v6 = vld [vmem:[%s15378_s3 + $0x178] sm:$0xff] (!%p11397_p5)  }
 0x4ac   : > { %v13577_v59 = vld [vmem:[%s15378_s3 + $0x1b0] sm:$0xff] (!%p11397_p5)  }
 0x4ae   : > { %11505 = vmatpush3.bf16.msra.mxu0 (!%p11397_p5), %v13527_v10  ;;  %11527 = vmatpush3.bf16.msra.mxu1 (!%p11397_p5), %v13528_v11  ;;  %v13579_v10 = vld [vmem:[%s15378_s3 + $0x1f8] sm:$0xff] (!%p11397_p5)  }
 0x4af   : > { %11506 = vmatprep.subr.bf16.mxu0 (!%p11397_p5), %v13529_v14  ;;  %11528 = vmatprep.subr.bf16.mxu1 (!%p11397_p5), %v13530_v16  ;;  %v13580_v11 = vld [vmem:[%s15378_s3 + $0x138] sm:$0xff] (!%p11397_p5)   ;;  %v13582_v16 = vld [vmem:[%s15378_s3 + $0x240] sm:$0xff] (!%p11397_p5)  }
 0x4b2   : > { %11507 = vmatpush3.bf16.msra.mxu0 (!%p11397_p5), %v13531_v17  ;;  %11529 = vmatpush3.bf16.msra.mxu1 (!%p11397_p5), %v13532_v63  ;;  %v13581_v17 = vld [vmem:[%s15378_s3 + $0x1b8] sm:$0xff] (!%p11397_p5)   ;;  %v13583_v63 = vld [vmem:[%s15378_s3 + $0x2c0] sm:$0xff] (!%p11397_p5)  }
 0x4b3   : > { %11508 = vmatprep.subr.bf16.mxu0 (!%p11397_p5), %v13533_v18  ;;  %11530 = vmatprep.subr.bf16.mxu1 (!%p11397_p5), %v13534_v62  ;;  %v13584_v18 = vld [vmem:[%s15378_s3 + $0x200] sm:$0xff] (!%p11397_p5)  }
 0x4b6   : > { %11509 = vmatpush3.bf16.msra.mxu0 (!%p11397_p5), %v13535_v21  ;;  %11531 = vmatpush3.bf16.msra.mxu1 (!%p11397_p5), %v13536_v22  ;;  %v13586_v21 = vld [vmem:[%s15378_s3 + $0x248] sm:$0xff] (!%p11397_p5)   ;;  %v13585_v22 = vld [vmem:[%s15378_s3 + $0x280] sm:$0xff] (!%p11397_p5)  }
 0x4b7   : > { %11510 = vmatprep.subr.bf16.mxu0 (!%p11397_p5), %v13537_v23  ;;  %11532 = vmatprep.subr.bf16.mxu1 (!%p11397_p5), %v13538_v25  ;;  %v13587_v23 = vld [vmem:[%s15378_s3 + $0x2c8] sm:$0xff] (!%p11397_p5)  }
 0x4b8   : > { %v13588_v25 = vld [vmem:[%s15378_s3 + $0x208] sm:$0xff] (!%p11397_p5)  }
 0x4ba   : > { %11511 = vmatpush3.bf16.msra.mxu0 (!%p11397_p5), %v13539_v26  ;;  %11533 = vmatpush3.bf16.msra.mxu1 (!%p11397_p5), %v13540_v27  ;;  %v13590_v26 = vld [vmem:[%s15378_s3 + $0x250] sm:$0xff] (!%p11397_p5)   ;;  %v13589_v27 = vld [vmem:[%s15378_s3 + $0x288] sm:$0xff] (!%p11397_p5)  }
 0x4bb   : > { %11512 = vmatprep.subr.bf16.mxu0 (!%p11397_p5), %v13541_v29  ;;  %11534 = vmatprep.subr.bf16.mxu1 (!%p11397_p5), %v13542_v5  ;;  %v13591_v29 = vld [vmem:[%s15378_s3 + $0x2d0] sm:$0xff] (!%p11397_p5)  }
 0x4bc   : > { %v13592_v5 = vld [vmem:[%s15378_s3 + $0x210] sm:$0xff] (!%p11397_p5)  }
 0x4be   : > { %11513 = vmatpush3.bf16.msra.mxu0 (!%p11397_p5), %v13543_v30  ;;  %11535 = vmatpush3.bf16.msra.mxu1 (!%p11397_p5), %v13544_v32  ;;  %v13594_v30 = vld [vmem:[%s15378_s3 + $0x258] sm:$0xff] (!%p11397_p5)   ;;  %v13593_v32 = vld [vmem:[%s15378_s3 + $0x290] sm:$0xff] (!%p11397_p5)  }
 0x4bf   : > { %11514 = vmatprep.subr.bf16.mxu0 (!%p11397_p5), %v13545_v35  ;;  %11536 = vmatprep.subr.bf16.mxu1 (!%p11397_p5), %v13546_v36  ;;  %v13595_v35 = vld [vmem:[%s15378_s3 + $0x2d8] sm:$0xff] (!%p11397_p5)  }
 0x4c0   : > { %v13596_v36 = vld [vmem:[%s15378_s3 + $0x218] sm:$0xff] (!%p11397_p5)  }
 0x4c2   : > { %11515 = vmatpush3.bf16.msra.mxu0 (!%p11397_p5), %v13547_v37  ;;  %11537 = vmatpush3.bf16.msra.mxu1 (!%p11397_p5), %v13548_v28  ;;  %v13598_v37 = vld [vmem:[%s15378_s3 + $0x260] sm:$0xff] (!%p11397_p5)   ;;  %v13597_v28 = vld [vmem:[%s15378_s3 + $0x298] sm:$0xff] (!%p11397_p5)  }
 0x4c3   : > { %11544 = vmatprep.subr.bf16.mxu0 (!%p11397_p5), %v13550_v40  ;;  %11566 = vmatprep.subr.bf16.mxu1 (!%p11397_p5), %v13551_v41  ;;  %v13601_v40 = vld [vmem:[%s15378_s3 + $0x2a0] sm:$0xff] (!%p11397_p5)   ;;  %v13603_v41 = vld [vmem:[%s15378_s3 + $0x2e8] sm:$0xff] (!%p11397_p5)  }
 0x578   : > { %v8691_v15 = vpop.f32.mrb[8].mxu0  ;;  %v8937_v47 = vpop.f32.mrb[8].mxu1 }
 0x579   : > { %v11640_v48 = vadd.f32 %v8691_v15, %v1596_v43  ;;  %v11642_v20 = vadd.f32 %v8937_v47, %v1604_v45  ;;  %v8693_v49 = vpop.f32.mrb[9].mxu0  ;;  %v8939_v50 = vpop.f32.mrb[9].mxu1  ;;  %v9287_v43 = vrot.slane (!%p11397_p5), %v9271_v39, %v13765_v31  ;;  %v15150_v45 = vrot.slane (!%p11397_p5), %v9264_v38, %v13765_v31  ;;  %v13600_v38 = vld [vmem:[%s15378_s3 + $0x220] sm:$0xff] (!%p11397_p5)   ;;  %v13602_v39 = vld [vmem:[%s15378_s3 + $0x268] sm:$0xff] (!%p11397_p5)  }
 0x57a   : > { %v11641_v58 = vadd.f32 %v8693_v49, %v1600_v44  ;;  %v11643_v51 = vadd.f32 %v8939_v50, %v1608_v46  ;;  %v8695_v19 = vpop.f32.mrb[10].mxu0  ;;  %v8941_v52 = vpop.f32.mrb[10].mxu1  ;;  %v9301_v44 = vrot.slane (!%p11397_p5), %v9279_v33, %v13765_v31  ;;  %v13552_v46 = vld [vmem:[%s15378_s3 + $0x100] sm:$0xff] (!%p11397_p5)   ;;  %v13604_v33 = vld [vmem:[%s15378_s3 + $0x228] sm:$0xff] (!%p11397_p5)  }
 0x57b   : > { %v8952_v7 = vmax.f32 %v11640_v48, 0.0  ;;  %v8954_v53 = vmax.f32 %v11642_v20, 0.0  ;;  %v8696_v54 = vpop.f32.mrb[11].mxu0  ;;  %v8942_v8 = vpop.f32.mrb[11].mxu1  ;;  %v9280_v15 = vcombine.high (!%p11397_p5), %v15150_v45, %v15150_v45  ;;  %v9309_v47 = vcombine.high (!%p11397_p5), %v9287_v43, %v9287_v43  ;;  %v13554_v48 = vld [vmem:[%s15378_s3 + $0x148] sm:$0xff] (!%p11397_p5)   ;;  %v13553_v49 = vld [vmem:[%s15378_s3 + $0x180] sm:$0xff] (!%p11397_p5)  }
 0x57c   : > { %v8953_v42 = vmax.f32 %v11641_v58, 0.0  ;;  %v8955_v55 = vmax.f32 %v11643_v51, 0.0  ;;  %9957 = vmatprep.mubr.bf16.mxu0 (!%p11397_p5), %v9301_v44  ;;  %v9311_v20 = vcombine.high (!%p11397_p5), %v9301_v44, %v9301_v44  ;;  %v13555_v58 = vld [vmem:[%s15378_s3 + $0x1c8] sm:$0xff] (!%p11397_p5)   ;;  %v13558_v52 = vld [vmem:[%s15378_s3 + $0x150] sm:$0xff] (!%p11397_p5)   ;;  %v13562_v8 = vld [vmem:[%s15378_s3 + $0x158] sm:$0xff] (!%p11397_p5)   ;;  %v9294_v14 = vrot.slane (!%p11397_p5), %v15150_v45, %v13765_v31 }
 0x57d   : > { %v9308_v50 = vrot.slane (!%p11397_p5), %v9280_v15, %v13765_v31  ;;  %9958 = vmatmul.mubr.bf16.vlgmr.msra.gmra.mrb[0].mxu0 (!%p11397_p5), %v9287_v43  ;;  %v13556_v51 = vld [vmem:[%s15378_s3 + $0x108] sm:$0xff] (!%p11397_p5)   ;;  %v13560_v54 = vld [vmem:[%s15378_s3 + $0x110] sm:$0xff] (!%p11397_p5)   ;;  %v13610_v15 = vld [vmem:[%s15378_s3 + $0x278] sm:$0xff] (!%p11397_p5)  }
 0x57e   : > { %v11394_v12 = vpack.c.bf16 %v8953_v42, %v8952_v7  ;;  %v11395_v56 = vpack.c.bf16 %v8955_v55, %v8954_v53  ;;  %9060 = sbr.rel (%p11397_p5) target bundleno = 1689 (0x699), region = 48  ;;  %9997 = vmatprep.mubr.bf16.mxu1 (!%p11397_p5), %v9311_v20  ;;  %11545 = vmatpush3.bf16.msra.mxu0 (!%p11397_p5), %v13552_v46  ;;  %v13557_v7 = vld [vmem:[%s15378_s3 + $0x188] sm:$0xff] (!%p11397_p5)   ;;  %v13559_v53 = vld [vmem:[%s15378_s3 + $0x1d0] sm:$0xff] (!%p11397_p5)   ;;  %v13563_v55 = vld [vmem:[%s15378_s3 + $0x1d8] sm:$0xff] (!%p11397_p5)   ;;  %v9310_v62 = vcombine.high (!%p11397_p5), %v9294_v14, %v9294_v14 }
 0x57f   : > { %v9312_v19 = vcombine.high (!%p11397_p5), %v9308_v50, %v9308_v50  ;;  %9998 = vmatmul.mubr.bf16.vlgmr.msra.gmra.mrb[0].mxu1 (!%p11397_p5), %v9309_v47  ;;  %11546 = vmatprep.subr.bf16.mxu0 (!%p11397_p5), %v13554_v48  ;;  %v13561_v42 = vld [vmem:[%s15378_s3 + $0x190] sm:$0xff] (!%p11397_p5)   ;;  %v13605_v45 = vld [vmem:[%s15378_s3 + $0x2a8] sm:$0xff] (!%p11397_p5)   ;;  %v13611_v48 = vld [vmem:[%s15378_s3 + $0x2f8] sm:$0xff] (!%p11397_p5)  }
 0x580   : > { %v9037_v24 = vrot.slane %v11394_v12, %v13765_v31  ;;  %v9044_v13 = vrot.slane %v11395_v56, %v13765_v31  ;;  %11567 = vmatpush3.bf16.msra.mxu1 (!%p11397_p5), %v13553_v49  ;;  %10037 = vmatprep.mubr.bf16.mxu0 (!%p11397_p5), %v9308_v50  ;;  %v13564_v12 = vld [vmem:[%s15378_s3 + $0x118] sm:$0xff] (!%p11397_p5)   ;;  %v13566_v56 = vld [vmem:[%s15378_s3 + $0x160] sm:$0xff] (!%p11397_p5)   ;;  %v13606_v43 = vld [vmem:[%s15378_s3 + $0x270] sm:$0xff] (!%p11397_p5)  }
 0x581   : > { %11568 = vmatprep.subr.bf16.mxu1 (!%p11397_p5), %v13555_v58  ;;  %10077 = vmatprep.mubr.bf16.mxu1 (!%p11397_p5), %v9312_v19  ;;  %v13607_v44 = vld [vmem:[%s15378_s3 + $0x2f0] sm:$0xff] (!%p11397_p5)   ;;  %v13612_v49 = vld [vmem:[%s15378_s3 + $0x238] sm:$0xff] (!%p11397_p5)  }
 0x582   : > { %v9045_v34 = vcombine.low %v9037_v24, %v9044_v13  ;;  %11547 = vmatpush3.bf16.msra.mxu0 (!%p11397_p5), %v13556_v51  ;;  %v13565_v24 = vld [vmem:[%s15378_s3 + $0x198] sm:$0xff] (!%p11397_p5)   ;;  %v13567_v13 = vld [vmem:[%s15378_s3 + $0x1e0] sm:$0xff] (!%p11397_p5)   ;;  %v13608_v46 = vld [vmem:[%s15378_s3 + $0x230] sm:$0xff] (!%p11397_p5)  }
 0x583   : > { %11548 = vmatprep.subr.bf16.mxu0 (!%p11397_p5), %v13558_v52  ;;  %v13609_v47 = vld [vmem:[%s15378_s3 + $0x2b0] sm:$0xff] (!%p11397_p5)   ;;  %v13613_v51 = vld [vmem:[%s15378_s3 + $0x2b8] sm:$0xff] (!%p11397_p5)  }
 0x584   : > { %11396 = vst.sshfl [vmem:[#allocation2 + $0x8] sm:$0x55 pattern:$0x73625140] %v9045_v34  ;;  %11569 = vmatpush3.bf16.msra.mxu1 (!%p11397_p5), %v13557_v7  ;;  %v13568_v34 = vld [vmem:[%s15378_s3 + $0x120] sm:$0xff] (!%p11397_p5)  }
 0x585   : > { %11570 = vmatprep.subr.bf16.mxu1 %v13559_v53 }
 0x586   : > { %11549 = vmatpush3.bf16.msra.mxu0 %v13560_v54  ;;  %v11398_v54 = vld [vmem:[%s15379_s4] ss:$0 sm:$0xff] }
 0x587   : > { %11550 = vmatprep.subr.bf16.mxu0 %v13562_v8 }
 0x588   : > { %11571 = vmatpush3.bf16.msra.mxu1 %v13561_v42 }
 0x589   : > { %11572 = vmatprep.subr.bf16.mxu1 %v13563_v55 }
 0x58a   : > { %11551 = vmatpush3.bf16.msra.mxu0 %v13564_v12 }
 0x58b   : > { %11552 = vmatprep.subr.bf16.mxu0 %v13566_v56  ;;  %v11399_v20 = vld.sshfl [vmem:[#allocation2 + $0x8] sm:$0x33 pattern:$0x75316420] }
 0x58c   : > { %11573 = vmatpush3.bf16.msra.mxu1 %v13565_v24  ;;  %v9320_v50 = vcombine.high %v11399_v20, %v11399_v20  ;;  %v9327_v58 = vrot.slane %v11399_v20, %v13765_v31 }
 0x58d   : > { %11574 = vmatprep.subr.bf16.mxu1 %v13567_v13 }
 0x58e   : > { %11553 = vmatpush3.bf16.msra.mxu0 %v13568_v34  ;;  %v9334_v19 = vrot.slane %v9320_v50, %v13765_v31  ;;  %v9335_v7 = vcombine.high %v9327_v58, %v9327_v58 }
 0x58f   : > { %11554 = vmatprep.subr.bf16.mxu0 %v13570_v57 }
 0x590   : > { %11575 = vmatpush3.bf16.msra.mxu1 %v13569_v60  ;;  %v9336_v52 = vcombine.high %v9334_v19, %v9334_v19 }
 0x591   : > { %11576 = vmatprep.subr.bf16.mxu1 %v13571_v61 }
 0x592   : > { %11555 = vmatpush3.bf16.msra.mxu0 %v13572_v0 }
 0x593   : > { %11556 = vmatprep.subr.bf16.mxu0 %v13574_v1 }
 0x594   : > { %11577 = vmatpush3.bf16.msra.mxu1 %v13573_v2 }
 0x595   : > { %11578 = vmatprep.subr.bf16.mxu1 %v13575_v3 }
 0x596   : > { %11557 = vmatpush3.bf16.msra.mxu0 %v13576_v4 }
 0x597   : > { %11558 = vmatprep.subr.bf16.mxu0 %v13578_v6 }
 0x598   : > { %11579 = vmatpush3.bf16.msra.mxu1 %v13577_v59 }
 0x599   : > { %11580 = vmatprep.subr.bf16.mxu1 %v13579_v10 }
 0x59a   : > { %11559 = vmatpush3.bf16.msra.mxu0 %v13580_v11 }
 0x59b   : > { %11588 = vmatprep.subr.bf16.mxu0 %v13582_v16 }
 0x59c   : > { %11581 = vmatpush3.bf16.msra.mxu1 %v13581_v17 }
 0x59d   : > { %10038 = vmatmul.mubr.bf16.vlgmr.msra.gmra.mrb[4].mxu0 %v9294_v14  ;;  %11610 = vmatprep.subr.bf16.mxu1 %v13583_v63 }
 0x59e   : > { %11589 = vmatpush3.bf16.msra.mxu0 %v13584_v18  ;;  %10117 = vmatprep.mubr.bf16.mxu0 %v9334_v19 }
 0x59f   : > { %10078 = vmatmul.mubr.bf16.vlgmr.msra.gmra.mrb[4].mxu1 %v9310_v62  ;;  %11590 = vmatprep.subr.bf16.mxu0 %v13586_v21 }
 0x5a0   : > { %11611 = vmatpush3.bf16.msra.mxu1 %v13585_v22  ;;  %10157 = vmatprep.mubr.bf16.mxu1 %v9336_v52 }
 0x5a1   : > { %11612 = vmatprep.subr.bf16.mxu1 %v13587_v23 }
 0x5a2   : > { %11591 = vmatpush3.bf16.msra.mxu0 %v13588_v25 }
 0x5a3   : > { %11592 = vmatprep.subr.bf16.mxu0 %v13590_v26 }
 0x5a4   : > { %11613 = vmatpush3.bf16.msra.mxu1 %v13589_v27 }
 0x5a5   : > { %11614 = vmatprep.subr.bf16.mxu1 %v13591_v29 }
 0x5a6   : > { %11593 = vmatpush3.bf16.msra.mxu0 %v13592_v5 }
 0x5a7   : > { %11594 = vmatprep.subr.bf16.mxu0 %v13594_v30 }
 0x5a8   : > { %11615 = vmatpush3.bf16.msra.mxu1 %v13593_v32 }
 0x5a9   : > { %11616 = vmatprep.subr.bf16.mxu1 %v13595_v35 }
 0x5aa   : > { %11595 = vmatpush3.bf16.msra.mxu0 %v13596_v36 }
 0x5ab   : > { %11596 = vmatprep.subr.bf16.mxu0 %v13598_v37 }
 0x5ac   : > { %11617 = vmatpush3.bf16.msra.mxu1 %v13597_v28 }
 0x5ad   : > { %11618 = vmatprep.subr.bf16.mxu1 %v13599_v9 }
 0x5ae   : > { %11597 = vmatpush3.bf16.msra.mxu0 %v13600_v38 }
 0x5af   : > { %11598 = vmatprep.subr.bf16.mxu0 %v13602_v39 }
 0x5b0   : > { %11619 = vmatpush3.bf16.msra.mxu1 %v13601_v40 }
 0x5b1   : > { %11620 = vmatprep.subr.bf16.mxu1 %v13603_v41 }
 0x5b2   : > { %11599 = vmatpush3.bf16.msra.mxu0 %v13604_v33 }
 0x5b3   : > { %11600 = vmatprep.subr.bf16.mxu0 %v13606_v43 }
 0x5b4   : > { %11621 = vmatpush3.bf16.msra.mxu1 %v13605_v45 }
 0x5b5   : > { %11622 = vmatprep.subr.bf16.mxu1 %v13607_v44 }
 0x5b6   : > { %11601 = vmatpush3.bf16.msra.mxu0 %v13608_v46 }
 0x5b7   : > { %11602 = vmatprep.subr.bf16.mxu0 %v13610_v15 }
 0x5b8   : > { %11623 = vmatpush3.bf16.msra.mxu1 %v13609_v47 }
 0x5b9   : > { %11624 = vmatprep.subr.bf16.mxu1 %v13611_v48 }
 0x5ba   : > { %11603 = vmatpush3.bf16.msra.mxu0 %v13612_v49 }
 0x5bc   : > { %11625 = vmatpush3.bf16.msra.mxu1 %v13613_v51 }
 0x5bd   : > { %10118 = vmatmul.mubr.bf16.vlgmr.msra.gmra.mrb[8].mxu0 %v9327_v58 }
 0x5bf   : > { %10158 = vmatmul.mubr.bf16.vlgmr.msra.gmra.mrb[8].mxu1 %v9335_v7 }
 0x650   : > { %v11516_v53 = vpop.f32.mrb[0].mxu0 }
 0x651   : > { %v11517_v8 = vpop.f32.mrb[1].mxu0 }
 0x652   : > { %v11538_v42 = vpop.f32.mrb[0].mxu1  ;;  %v11518_v55 = vadd.f32 %v11517_v8, %v11516_v53  ;;  %v11519_v12 = vpop.f32.mrb[2].mxu0 }
 0x653   : > { %v11539_v56 = vpop.f32.mrb[1].mxu1  ;;  %v11520_v31 = vpop.f32.mrb[3].mxu0 }
 0x654   : > { %v9960_v24 = vadd.f32 %v11518_v55, %v11398_v54  ;;  %v11540_v13 = vadd.f32 %v11539_v56, %v11538_v42  ;;  %v11541_v34 = vpop.f32.mrb[2].mxu1 }
 0x655   : > { %v11542_v57 = vpop.f32.mrb[3].mxu1 }
 0x656   : > { %v10000_v60 = vadd.f32 %v11540_v13, %v9960_v24 }
 0x670   : > { %v11560_v61 = vpop.f32.mrb[4].mxu0 }
 0x671   : > { %v11561_v0 = vpop.f32.mrb[5].mxu0 }
 0x672   : > { %v11582_v1 = vpop.f32.mrb[4].mxu1  ;;  %v11562_v2 = vadd.f32 %v11561_v0, %v11560_v61  ;;  %v11563_v3 = vpop.f32.mrb[6].mxu0 }
 0x673   : > { %v11583_v4 = vpop.f32.mrb[5].mxu1  ;;  %v11564_v6 = vpop.f32.mrb[7].mxu0 }
 0x674   : > { %v10040_v59 = vadd.f32 %v11562_v2, %v10000_v60  ;;  %v11584_v10 = vadd.f32 %v11583_v4, %v11582_v1  ;;  %v11585_v11 = vpop.f32.mrb[6].mxu1 }
 0x675   : > { %v11586_v14 = vpop.f32.mrb[7].mxu1 }
 0x676   : > { %v10080_v16 = vadd.f32 %v11584_v10, %v10040_v59 }
 0x690   : > { %v11604_v17 = vpop.f32.mrb[8].mxu0 }
 0x691   : > { %v11605_v63 = vpop.f32.mrb[9].mxu0 }
 0x692   : > { %v11626_v18 = vpop.f32.mrb[8].mxu1  ;;  %v11606_v62 = vadd.f32 %v11605_v63, %v11604_v17  ;;  %v11607_v21 = vpop.f32.mrb[10].mxu0 }
 0x693   : > { %v11627_v22 = vpop.f32.mrb[9].mxu1  ;;  %v11608_v23 = vpop.f32.mrb[11].mxu0 }
 0x694   : > { %v10120_v25 = vadd.f32 %v11606_v62, %v10080_v16  ;;  %v11628_v26 = vadd.f32 %v11627_v22, %v11626_v18  ;;  %v11629_v27 = vpop.f32.mrb[10].mxu1 }
 0x695   : > { %v11630_v29 = vpop.f32.mrb[11].mxu1 }
 0x696   : > { %v10160_v5 = vadd.f32 %v11628_v26, %v10120_v25 }
 0x698   : > { %10165 = vst [vmem:[#allocation3] sm:$0x3] %v10160_v5 }
 0x699 PF: > { %p11770_p6 = scmp.eq.s32.totalorder %s13692_s19, 2  ;;  %s13655_s22 = smov [#allocation3]  }
 0x69a   : > { %s10173_s23 = sshll.u32 %s13655_s22, 4  ;;  %s10174_s23 = int_to_ptr.vmem [resolvable:$true] %s10173_s23 }
 0x69b   : > { %s13614_s24 = scalar_lea.vmem %s10174_s23, 32  ;;  %p13621_p10 = scmp.lt.s32.totalorder %s10174_s23, %s10174_s23 }
 0x69c   : > { %p13615_p7 = scmp.ne.s32.totalorder %s10174_s23, %s13614_s24  ;;  %p13622_p11 = scmp.lt.s32.totalorder %s13614_s24, %s13614_s24 }
 0x69e   : > { %p13616_p8 = pnand %p13615_p7, %p11770_p6  ;;  %p13623_p12 = por %p13622_p11, %p13621_p10 }
 0x6a0   : > { %p13617_p9 = pneg %p13616_p8 }
 0x6a2   : > { %p13624_p13 = pnand %p13623_p12, %p13617_p9 }
 0x6a4   : > { %13627 = shalt.err (!%p13624_p13)
}
 0x6a5   : > { %s13628_s27 = scalar_lea.hbm %s15380_s5, 32 }
 0x6a6   : > { %p13629_p0 = scmp.ne.s32.totalorder %s15380_s5, %s13628_s27  ;;  %p13634_p3 = scmp.lt.u32.totalorder %s13628_s27, %s15380_s5 }
 0x6a8   : > { %p13630_p1 = pnand %p13629_p0, %p11770_p6 }
 0x6aa   : > { %p13631_p2 = pneg %p13630_p1 }
 0x6ac   : > { %p13636_p4 = pnand %p13634_p3, %p13631_p2 }
 0x6ae   : > { %13639 = shalt.err (!%p13636_p4)
}
 0x6af   : > { %11767 = dma.vmem_to_hbm [thread:$0]  (%p11770_p6), %s10174_s23, 32, %s15380_s5, [#allocation4]  }
 0x6b0   : > { %13645 = dma.done.wait (%p11770_p6), [#allocation4], 32  }
 0x6b1   : > { %13647 = vsyncadd (%p11770_p6), [#allocation4], 4294967264 }
 0x6b2 PF: > { %s16_s18 = sadd.s32 1, %s13650_s18  }
 0x6b3   : > { %p13_p5 = scmp.ge.s32.totalorder %s16_s18, 5  }
 0x6b5   :  { %15 = sbr.rel (!%p13_p5) target bundleno = 1 (0x1), region = 78 }
 0x6bc   :  { %10186 = vsyncpa [#allocation4], 1 }
 0x6bd   :  { %10188 = vsyncpa [#allocation4 + $0x1], 1 }

</bundles_post_ra>
